<compile_context>
chip_gen: v7x
topology: tpu7x:2x2x1
jax: 0.10.0
libtpu: 0.0.40
codegen_flags: <defaults>
</compile_context>

<pallas_src>
import functools
from typing import NamedTuple, Optional

import numpy as np
import jax
import jax.numpy as jnp
from jax import lax
from jax.experimental import pallas as pl
from jax.experimental.pallas import tpu as pltpu

EPS = 1e-5      # nn.BatchNorm2d default eps
CPAD = 128      # every channel axis padded to one 128-lane register width

# "jnp": pltpu.roll(x, s, 0)[i] == x[i - s];  "rev": == x[i + s];  None: no roll.
_ROLL_MODE = None


# ------------------------- host-side tap metadata -------------------------

def _tap_offsets(ksize):
    pad = (ksize - 1) // 2
    return tuple((ki - pad, kj - pad) for ki in range(ksize) for kj in range(ksize))


def _build_tap_matrices(H, W, ksize, stride):
    """0/1 gather matrices A_t (HWout, HWin) selecting, per output pixel, the
    input pixel of tap t of a 'same'-padded ksize x ksize conv with the given
    stride (zero rows where the tap is out of bounds)."""
    pad = (ksize - 1) // 2
    Ho, Wo = H // stride, W // stride
    mats = []
    for ki in range(ksize):
        for kj in range(ksize):
            di, dj = ki - pad, kj - pad
            a = np.zeros((Ho * Wo, H * W), np.float32)
            for oh in range(Ho):
                for ow in range(Wo):
                    h, w = oh * stride + di, ow * stride + dj
                    if 0 <= h < H and 0 <= w < W:
                        a[oh * Wo + ow, h * W + w] = 1.0
            mats.append(a)
    return np.stack(mats, axis=0)


@functools.lru_cache(maxsize=None)
def _tap_matrices(H, W, ksize, stride):
    return jnp.asarray(_build_tap_matrices(H, W, ksize, stride), jnp.bfloat16)


# ------------------------------ kernel config ------------------------------

class ConvCfg(NamedTuple):
    gather: str                 # "roll" | "mat"
    H: int
    W: int
    taps: tuple                 # ((di, dj), ...)
    relu: bool
    has_res: bool
    has_down: bool
    has_head: bool
    roll_mode: Optional[str]
    hw_out: int                 # output pixels per sample
    groups: int                 # samples per split group (G)


# ------------------------------ Pallas kernel ------------------------------

def _bn_train(y, gamma, beta):
    """Training-mode BatchNorm over all leading axes (biased var), f32 in/out."""
    red = tuple(range(y.ndim - 1))
    mean = jnp.mean(y, axis=red, keepdims=True)
    var = jnp.mean(jnp.square(y - mean), axis=red, keepdims=True)  # two-pass
    shape = (1,) * (y.ndim - 1) + (gamma.shape[-1],)
    scale = gamma.reshape(shape) * lax.rsqrt(var + EPS)
    return (y - mean) * scale + beta.reshape(shape)


def _fused_conv_kernel(*refs, cfg: ConvCfg):
    """One SplitBN group: conv (roll- or matrix-gathered im2col, single matmul)
    -> SplitBN(train) -> [+residual] -> [ReLU] -> [fused 1x1 downsample branch]
    -> [fused GAP + FC head]."""
    i = 0

    def nxt():
        nonlocal i
        r = refs[i]
        i += 1
        return r

    x_ref = nxt()
    a_ref = nxt() if cfg.gather == "mat" else None
    w_ref = nxt()
    g_ref = nxt()
    b_ref = nxt()
    res_ref = nxt() if cfg.has_res else None
    wd_ref = gd_ref = bd_ref = None
    if cfg.has_down:
        wd_ref, gd_ref, bd_ref = nxt(), nxt(), nxt()
    fw_ref = fb_ref = None
    if cfg.has_head:
        fw_ref, fb_ref = nxt(), nxt()
    o_ref = nxt()
    od_ref = nxt() if cfg.has_down else None

    T = len(cfg.taps)
    w = w_ref[...]                                           # (T*C, Cout) bf16
    yd = None

    if cfg.gather == "roll":
        # stride-1: taps are shifts of the flattened (G*H*W) axis.  Rolls that
        # cross row / group boundaries land exactly on masked positions.
        M = x_ref.shape[0]
        x_bf = x_ref[...]                                    # (M, C) bf16
        x32 = x_bf.astype(jnp.float32)
        rr = lax.broadcasted_iota(jnp.int32, (M, 1), 0)
        oh = (rr // cfg.W) % cfg.H
        ow = rr % cfg.W
        cols = []
        for (di, dj) in cfg.taps:
            off = di * cfg.W + dj
            if off == 0:
                cols.append(x_bf)                            # centre tap
                continue
            shift = (-off) % M if cfg.roll_mode == "jnp" else off % M
            rolled = pltpu.roll(x32, shift, axis=0)          # XLU, no MXU work
            valid = ((oh + di >= 0) & (oh + di < cfg.H) &
                     (ow + dj >= 0) & (ow + dj < cfg.W))
            cols.append(jnp.where(valid, rolled, 0.0).astype(jnp.bfloat16))
        slab = cols[0] if T == 1 else jnp.concatenate(cols, axis=1)  # (M, T*C)
        y = jnp.dot(slab, w, preferred_element_type=jnp.float32)     # (M, Cout)
    else:
        # stride-2 (or roll fallback): small 0/1 gather matrices per tap.
        G = x_ref.shape[0]
        a_all = a_ref[...]                                   # (T, HWo, HWin)
        wd = wd_ref[...] if cfg.has_down else None
        ys, yds = [], []
        for g in range(G):
            xg = x_ref[g]                                    # (HWin, C) bf16
            cols = []
            cen = None
            for t, (di, dj) in enumerate(cfg.taps):
                tap = jnp.dot(a_all[t], xg,
                              preferred_element_type=jnp.float32
                              ).astype(jnp.bfloat16)
                cols.append(tap)
                if (di, dj) == (0, 0):
                    cen = tap
            slab = cols[0] if T == 1 else jnp.concatenate(cols, axis=1)
            ys.append(jnp.dot(slab, w, preferred_element_type=jnp.float32))
            if cfg.has_down:
                yds.append(jnp.dot(cen, wd,
                                   preferred_element_type=jnp.float32))
        y = jnp.stack(ys, axis=0)                            # (G, HWo, Cout)
        if cfg.has_down:
            yd = jnp.stack(yds, axis=0)

    out = _bn_train(y, g_ref[...], b_ref[...])
    if cfg.has_res:
        out = out + res_ref[...].astype(jnp.float32)
    if cfg.relu:
        out = jnp.maximum(out, 0.0)

    if cfg.has_head:
        # fused AdaptiveAvgPool2d(1) + Flatten + Linear
        if out.ndim == 3:
            pooled = jnp.mean(out, axis=1)                   # (G, Cout)
        else:
            M = out.shape[0]
            gi = lax.broadcasted_iota(jnp.int32, (cfg.groups, M), 0)
            ri = lax.broadcasted_iota(jnp.int32, (cfg.groups, M), 1)
            pool = jnp.where(ri // cfg.hw_out == gi, 1.0 / cfg.hw_out, 0.0)
            pooled = jnp.dot(pool, out, preferred_element_type=jnp.float32)
        feat = jnp.dot(pooled.astype(jnp.bfloat16), fw_ref[...],
                       preferred_element_type=jnp.float32) + fb_ref[...]
        o_ref[...] = feat[None]                              # (1, G, F) f32
    else:
        o_ref[...] = out.astype(o_ref.dtype)                 # bf16 store

    if cfg.has_down:
        outd = _bn_train(yd, gd_ref[...], bd_ref[...])       # no ReLU
        od_ref[...] = outd.astype(od_ref.dtype)


# ------------------------------ call wrapper ------------------------------

def conv_call(x2d, p, *, H, W, ksize, stride, num_splits, relu=True,
              residual2d=None, down_p=None, fc=None, gather_override=None):
    """x2d: (N*H*W, CPAD) bf16 (rows: permuted-sample-major, split groups are
    contiguous).  Returns bf16 (N*Ho*Wo, Cout), or (main, downsample) pair, or
    (N, F) f32 when the GAP+FC head is fused in."""
    HW = H * W
    NHW, C = x2d.shape
    N = NHW // HW
    G = N // num_splits
    Ho, Wo = H // stride, W // stride
    HWo = Ho * Wo
    Cout = p["w"].shape[-1]
    taps = _tap_offsets(ksize)

    if gather_override is not None:
        gather = gather_override
    else:
        gather = "roll" if (stride == 1 and _ROLL_MODE is not None) else "mat"
    assert down_p is None or gather == "mat"

    cfg = ConvCfg(gather=gather, H=H, W=W, taps=taps, relu=relu,
                  has_res=residual2d is not None, has_down=down_p is not None,
                  has_head=fc is not None, roll_mode=_ROLL_MODE,
                  hw_out=HWo, groups=G)

    args, in_specs = [], []
    if gather == "roll":
        args.append(x2d)
        in_specs.append(pl.BlockSpec((G * HW, C), lambda s: (s, 0)))
    else:
        args.append(x2d.reshape(N, HW, C))
        in_specs.append(pl.BlockSpec((G, HW, C), lambda s: (s, 0, 0)))
        amats = _tap_matrices(H, W, ksize, stride)
        args.append(amats)
        in_specs.append(pl.BlockSpec(tuple(amats.shape), lambda s: (0, 0, 0)))

    args += [p["w"], p["g"], p["b"]]
    in_specs += [pl.BlockSpec(tuple(p["w"].shape), lambda s: (0, 0)),
                 pl.BlockSpec((1, Cout), lambda s: (0, 0)),
                 pl.BlockSpec((1, Cout), lambda s: (0, 0))]

    if residual2d is not None:
        if gather == "roll":
            args.append(residual2d)
            in_specs.append(pl.BlockSpec((G * HWo, Cout), lambda s: (s, 0)))
        else:
            args.append(residual2d.reshape(N, HWo, Cout))
            in_specs.append(pl.BlockSpec((G, HWo, Cout), lambda s: (s, 0, 0)))

    if down_p is not None:
        args += [down_p["w"], down_p["g"], down_p["b"]]
        in_specs += [pl.BlockSpec(tuple(down_p["w"].shape), lambda s: (0, 0)),
                     pl.BlockSpec((1, Cout), lambda s: (0, 0)),
                     pl.BlockSpec((1, Cout), lambda s: (0, 0))]

    if fc is not None:
        fw, fb = fc
        F = fw.shape[-1]
        args += [fw, fb]
        in_specs += [pl.BlockSpec(tuple(fw.shape), lambda s: (0, 0)),
                     pl.BlockSpec((1, F), lambda s: (0, 0))]
        out_shape = jax.ShapeDtypeStruct((num_splits, G, F), jnp.float32)
        out_specs = pl.BlockSpec((1, G, F), lambda s: (s, 0, 0))
    elif gather == "roll":
        out_shape = jax.ShapeDtypeStruct((N * HWo, Cout), jnp.bfloat16)
        out_specs = pl.BlockSpec((G * HWo, Cout), lambda s: (s, 0))
    else:
        out_shape = jax.ShapeDtypeStruct((N, HWo, Cout), jnp.bfloat16)
        out_specs = pl.BlockSpec((G, HWo, Cout), lambda s: (s, 0, 0))

    if down_p is not None:
        out_shape = (out_shape,
                     jax.ShapeDtypeStruct((N, HWo, Cout), jnp.bfloat16))
        out_specs = (out_specs,
                     pl.BlockSpec((G, HWo, Cout), lambda s: (s, 0, 0)))

    res = pl.pallas_call(
        functools.partial(_fused_conv_kernel, cfg=cfg),
        out_shape=out_shape,
        grid=(num_splits,),
        in_specs=in_specs,
        out_specs=out_specs,
        compiler_params=pltpu.CompilerParams(
            dimension_semantics=("parallel",)),
    )(*args)

    if fc is not None:
        return res.reshape(N, F)
    if down_p is not None:
        y, yd = res
        return y.reshape(N * HWo, Cout), yd.reshape(N * HWo, Cout)
    if gather == "roll":
        return res
    return res.reshape(N * HWo, Cout)


# -------------------- roll support / convention validation --------------------

def _select_roll_mode():
    """Validate the roll-gather conv against the matrix-gather conv (bitwise-
    comparable); pick the roll convention that matches, else fall back."""
    global _ROLL_MODE
    key = jax.random.PRNGKey(42)
    k1, k2 = jax.random.split(key)
    H = W = 16
    N, S = 4, 2
    x = (0.5 * jax.random.normal(k1, (N * H * W, CPAD), jnp.float32)
         ).astype(jnp.bfloat16)
    p = {"w": (0.1 * jax.random.normal(k2, (9 * CPAD, CPAD), jnp.float32)
               ).astype(jnp.bfloat16),
         "g": jnp.ones((1, CPAD), jnp.float32),
         "b": jnp.zeros((1, CPAD), jnp.float32)}
    ref = np.array(conv_call(x, p, H=H, W=W, ksize=3, stride=1, num_splits=S,
                             gather_override="mat").astype(jnp.float32))
    for mode in ("jnp", "rev"):
        _ROLL_MODE = mode
        try:
            got = np.array(conv_call(x, p, H=H, W=W, ksize=3, stride=1,
                                     num_splits=S, gather_override="roll"
                                     ).astype(jnp.float32))
            if np.allclose(got, ref, rtol=5e-2, atol=5e-2):
                return
        except Exception:
            pass
    _ROLL_MODE = None   # roll unsupported -> gather matrices everywhere


# ------------------------------ ResNet structure ------------------------------

def basic_block(x2d, H, W, blk, stride, num_splits, fc=None):
    if "down" in blk:
        # conv1 + 1x1 downsample fused: x is read from HBM once.
        out1, identity = conv_call(x2d, blk["conv1"], H=H, W=W, ksize=3,
                                   stride=stride, num_splits=num_splits,
                                   relu=True, down_p=blk["down"])
    else:
        out1 = conv_call(x2d, blk["conv1"], H=H, W=W, ksize=3, stride=stride,
                         num_splits=num_splits, relu=True)
        identity = x2d
    Ho, Wo = H // stride, W // stride
    # conv2 + BN + residual add + ReLU (+ fused GAP/FC head on the last block)
    out2 = conv_call(out1, blk["conv2"], H=Ho, W=Wo, ksize=3, stride=1,
                     num_splits=num_splits, relu=True, residual2d=identity,
                     fc=fc)
    return out2, Ho, Wo


def model_forward(params, x_nchw, num_splits):
    N, Cin, H, W = x_nchw.shape
    assert N % num_splits == 0
    G = N // num_splits
    # torch's SplitBatchNorm groups samples by (n % num_splits); permute the
    # batch so each split group is a contiguous block of rows, undo at the end.
    perm = np.arange(N).reshape(G, num_splits).T.reshape(-1)
    inv_perm = np.argsort(perm)

    x = jnp.transpose(x_nchw[perm], (0, 2, 3, 1))                     # NHWC
    x = jnp.pad(x, ((0, 0), (0, 0), (0, 0), (0, CPAD - Cin)))         # lane pad
    x = x.reshape(N * H * W, CPAD).astype(jnp.bfloat16)               # bf16 acts

    # stem: conv3x3 s1 p1 -> SplitBN -> ReLU  (maxpool removed per ModelBase)
    x = conv_call(x, params["stem"], H=H, W=W, ksize=3, stride=1,
                  num_splits=num_splits, relu=True)
    nlayers = len(params["layers"])
    for li, layer in enumerate(params["layers"]):
        for bi, blk in enumerate(layer):
            stride = (1 if li == 0 else 2) if bi == 0 else 1
            is_last = (li == nlayers - 1) and (bi == len(layer) - 1)
            fc = (params["fc_w"], params["fc_b"]) if is_last else None
            x, H, W = basic_block(x, H, W, blk, stride, num_splits, fc=fc)
    return x[inv_perm]                                                # (N, F) f32


# ------------------------------ parameter init ------------------------------

def init_params(key, base=8, layers=(2, 2, 2, 2), feature_dim=128, in_ch=3):
    widths = [base, base * 2, base * 4, base * 8]
    keys = iter(jax.random.split(key, 256))

    def conv(ksize, cin, cout):
        t = ksize * ksize
        w = 0.1 * jax.random.normal(next(keys), (t, cin, cout), jnp.float32)
        wp = jnp.zeros((t, CPAD, CPAD), jnp.float32).at[:, :cin, :cout].set(w)
        return {"w": wp.reshape(t * CPAD, CPAD).astype(jnp.bfloat16),
                "g": jnp.ones((1, CPAD), jnp.float32),
                "b": jnp.zeros((1, CPAD), jnp.float32)}

    params = {"stem": conv(3, in_ch, widths[0])}
    layer_params = []
    inplanes = widths[0]
    for li, (planes, nblocks) in enumerate(zip(widths, layers)):
        blocks = []
        for bi in range(nblocks):
            stride = (1 if li == 0 else 2) if bi == 0 else 1
            blk = {"conv1": conv(3, inplanes, planes),
                   "conv2": conv(3, planes, planes)}
            if stride != 1 or inplanes != planes:
                blk["down"] = conv(1, inplanes, planes)
            blocks.append(blk)
            inplanes = planes
        layer_params.append(blocks)
    params["layers"] = layer_params

    fcw = 0.1 * jax.random.normal(next(keys), (inplanes, feature_dim),
                                  jnp.float32)
    fc_w = jnp.zeros((CPAD, feature_dim), jnp.float32).at[:inplanes, :].set(fcw)
    params["fc_w"] = fc_w.astype(jnp.bfloat16)
    params["fc_b"] = jnp.zeros((1, feature_dim), jnp.float32)
    return params


if __name__ == "__main__":
    # Pick the in-VMEM roll gather if it lowers (validated numerically against
    # the matrix-gather path); otherwise gather matrices are used everywhere.
    _select_roll_mode()

    # Small deterministic config: ResNet18-style [2,2,2,2] BasicBlocks, base
    # width 8 (padded to 128 lanes), bn_splits=2, feature_dim=128, NCHW input.
    num_splits = 2
    feature_dim = 128
    key = jax.random.PRNGKey(0)
    pkey, xkey = jax.random.split(key)
    params = init_params(pkey, base=8, layers=(2, 2, 2, 2),
                         feature_dim=feature_dim, in_ch=3)
    x = jax.random.normal(xkey, (4, 3, 16, 16), jnp.float32)  # NCHW like torch

    fwd = jax.jit(functools.partial(model_forward, num_splits=num_splits))
    out = jax.block_until_ready(fwd(params, x))
    assert out.shape == (4, feature_dim)
    assert out.dtype == jnp.float32
    assert bool(jnp.all(jnp.isfinite(out)))
    print("KERNEL_OK")
</pallas_src>

<mosaic_0001>
module attributes {stable_mosaic.version = 11 : i64} {
  func.func @_fused_conv_kernel(%arg0: i32, %arg1: memref<2x256x128xbf16, #tpu.memory_space<vmem>>, %arg2: memref<9x256x256xbf16, #tpu.memory_space<vmem>>, %arg3: memref<1152x128xbf16, #tpu.memory_space<vmem>>, %arg4: memref<1x128xf32, #tpu.memory_space<vmem>>, %arg5: memref<1x128xf32, #tpu.memory_space<vmem>>, %arg6: memref<2x256x128xbf16, #tpu.memory_space<vmem>>) attributes {dimension_semantics = [#tpu.dimension_semantics<parallel>], iteration_bounds = array<i64: 2>, scalar_prefetch = 0 : i64, scratch_operands = 0 : i64, tpu.core_type = #tpu.core_type<tc>, window_params = [{transform_indices = @transform_0, window_bounds = array<i64: 2, 256, 128>}, {pipeline_mode = #tpu.pipeline_mode<synchronous>, transform_indices = @transform_1, window_bounds = array<i64: 9, 256, 256>}, {pipeline_mode = #tpu.pipeline_mode<synchronous>, transform_indices = @transform_2, window_bounds = array<i64: 1152, 128>}, {pipeline_mode = #tpu.pipeline_mode<synchronous>, transform_indices = @transform_3, window_bounds = array<i64: 1, 128>}, {pipeline_mode = #tpu.pipeline_mode<synchronous>, transform_indices = @transform_4, window_bounds = array<i64: 1, 128>}, {transform_indices = @transform_5, window_bounds = array<i64: 2, 256, 128>}]} {
    %c0 = arith.constant 0 : index
    %c0_0 = arith.constant 0 : index
    %0 = vector.load %arg3[%c0, %c0_0] : memref<1152x128xbf16, #tpu.memory_space<vmem>>, vector<1152x128xbf16>
    %c0_1 = arith.constant 0 : index
    %c0_2 = arith.constant 0 : index
    %c0_3 = arith.constant 0 : index
    %1 = vector.load %arg2[%c0_1, %c0_2, %c0_3] : memref<9x256x256xbf16, #tpu.memory_space<vmem>>, vector<9x256x256xbf16>
    %c0_4 = arith.constant 0 : index
    %c0_5 = arith.constant 0 : index
    %c0_6 = arith.constant 0 : index
    %2 = vector.load %arg1[%c0_4, %c0_5, %c0_6] : memref<2x256x128xbf16, #tpu.memory_space<vmem>>, vector<1x256x128xbf16>
    %3 = vector.shape_cast %2 : vector<1x256x128xbf16> to vector<256x128xbf16>
    %4 = vector.extract_strided_slice %1 {offsets = [0, 0, 0], sizes = [1, 256, 256], strides = [1, 1, 1]} : vector<9x256x256xbf16> to vector<1x256x256xbf16>
    %5 = vector.shape_cast %4 : vector<1x256x256xbf16> to vector<256x256xbf16>
    %cst = arith.constant dense<0.000000e+00> : vector<256x128xf32>
    %6 = tpu.matmul %5, %3, %cst {dimension_numbers = #tpu.dot_dimension_numbers<[1], [0], [0], [1], [0, 0, 1, 1], [], []>} : vector<256x256xbf16>, vector<256x128xbf16>, vector<256x128xf32> -> vector<256x128xf32>
    %7 = arith.truncf %6 : vector<256x128xf32> to vector<256x128xbf16>
    %8 = vector.extract_strided_slice %1 {offsets = [1, 0, 0], sizes = [1, 256, 256], strides = [1, 1, 1]} : vector<9x256x256xbf16> to vector<1x256x256xbf16>
    %9 = vector.shape_cast %8 : vector<1x256x256xbf16> to vector<256x256xbf16>
    %cst_7 = arith.constant dense<0.000000e+00> : vector<256x128xf32>
    %10 = tpu.matmul %9, %3, %cst_7 {dimension_numbers = #tpu.dot_dimension_numbers<[1], [0], [0], [1], [0, 0, 1, 1], [], []>} : vector<256x256xbf16>, vector<256x128xbf16>, vector<256x128xf32> -> vector<256x128xf32>
    %11 = arith.truncf %10 : vector<256x128xf32> to vector<256x128xbf16>
    %12 = vector.extract_strided_slice %1 {offsets = [2, 0, 0], sizes = [1, 256, 256], strides = [1, 1, 1]} : vector<9x256x256xbf16> to vector<1x256x256xbf16>
    %13 = vector.shape_cast %12 : vector<1x256x256xbf16> to vector<256x256xbf16>
    %cst_8 = arith.constant dense<0.000000e+00> : vector<256x128xf32>
    %14 = tpu.matmul %13, %3, %cst_8 {dimension_numbers = #tpu.dot_dimension_numbers<[1], [0], [0], [1], [0, 0, 1, 1], [], []>} : vector<256x256xbf16>, vector<256x128xbf16>, vector<256x128xf32> -> vector<256x128xf32>
    %15 = arith.truncf %14 : vector<256x128xf32> to vector<256x128xbf16>
    %16 = vector.extract_strided_slice %1 {offsets = [3, 0, 0], sizes = [1, 256, 256], strides = [1, 1, 1]} : vector<9x256x256xbf16> to vector<1x256x256xbf16>
    %17 = vector.shape_cast %16 : vector<1x256x256xbf16> to vector<256x256xbf16>
    %cst_9 = arith.constant dense<0.000000e+00> : vector<256x128xf32>
    %18 = tpu.matmul %17, %3, %cst_9 {dimension_numbers = #tpu.dot_dimension_numbers<[1], [0], [0], [1], [0, 0, 1, 1], [], []>} : vector<256x256xbf16>, vector<256x128xbf16>, vector<256x128xf32> -> vector<256x128xf32>
    %19 = arith.truncf %18 : vector<256x128xf32> to vector<256x128xbf16>
    %20 = vector.extract_strided_slice %1 {offsets = [4, 0, 0], sizes = [1, 256, 256], strides = [1, 1, 1]} : vector<9x256x256xbf16> to vector<1x256x256xbf16>
    %21 = vector.shape_cast %20 : vector<1x256x256xbf16> to vector<256x256xbf16>
    %cst_10 = arith.constant dense<0.000000e+00> : vector<256x128xf32>
    %22 = tpu.matmul %21, %3, %cst_10 {dimension_numbers = #tpu.dot_dimension_numbers<[1], [0], [0], [1], [0, 0, 1, 1], [], []>} : vector<256x256xbf16>, vector<256x128xbf16>, vector<256x128xf32> -> vector<256x128xf32>
    %23 = arith.truncf %22 : vector<256x128xf32> to vector<256x128xbf16>
    %24 = vector.extract_strided_slice %1 {offsets = [5, 0, 0], sizes = [1, 256, 256], strides = [1, 1, 1]} : vector<9x256x256xbf16> to vector<1x256x256xbf16>
    %25 = vector.shape_cast %24 : vector<1x256x256xbf16> to vector<256x256xbf16>
    %cst_11 = arith.constant dense<0.000000e+00> : vector<256x128xf32>
    %26 = tpu.matmul %25, %3, %cst_11 {dimension_numbers = #tpu.dot_dimension_numbers<[1], [0], [0], [1], [0, 0, 1, 1], [], []>} : vector<256x256xbf16>, vector<256x128xbf16>, vector<256x128xf32> -> vector<256x128xf32>
    %27 = arith.truncf %26 : vector<256x128xf32> to vector<256x128xbf16>
    %28 = vector.extract_strided_slice %1 {offsets = [6, 0, 0], sizes = [1, 256, 256], strides = [1, 1, 1]} : vector<9x256x256xbf16> to vector<1x256x256xbf16>
    %29 = vector.shape_cast %28 : vector<1x256x256xbf16> to vector<256x256xbf16>
    %cst_12 = arith.constant dense<0.000000e+00> : vector<256x128xf32>
    %30 = tpu.matmul %29, %3, %cst_12 {dimension_numbers = #tpu.dot_dimension_numbers<[1], [0], [0], [1], [0, 0, 1, 1], [], []>} : vector<256x256xbf16>, vector<256x128xbf16>, vector<256x128xf32> -> vector<256x128xf32>
    %31 = arith.truncf %30 : vector<256x128xf32> to vector<256x128xbf16>
    %32 = vector.extract_strided_slice %1 {offsets = [7, 0, 0], sizes = [1, 256, 256], strides = [1, 1, 1]} : vector<9x256x256xbf16> to vector<1x256x256xbf16>
    %33 = vector.shape_cast %32 : vector<1x256x256xbf16> to vector<256x256xbf16>
    %cst_13 = arith.constant dense<0.000000e+00> : vector<256x128xf32>
    %34 = tpu.matmul %33, %3, %cst_13 {dimension_numbers = #tpu.dot_dimension_numbers<[1], [0], [0], [1], [0, 0, 1, 1], [], []>} : vector<256x256xbf16>, vector<256x128xbf16>, vector<256x128xf32> -> vector<256x128xf32>
    %35 = arith.truncf %34 : vector<256x128xf32> to vector<256x128xbf16>
    %36 = vector.extract_strided_slice %1 {offsets = [8, 0, 0], sizes = [1, 256, 256], strides = [1, 1, 1]} : vector<9x256x256xbf16> to vector<1x256x256xbf16>
    %37 = vector.shape_cast %36 : vector<1x256x256xbf16> to vector<256x256xbf16>
    %cst_14 = arith.constant dense<0.000000e+00> : vector<256x128xf32>
    %38 = tpu.matmul %37, %3, %cst_14 {dimension_numbers = #tpu.dot_dimension_numbers<[1], [0], [0], [1], [0, 0, 1, 1], [], []>} : vector<256x256xbf16>, vector<256x128xbf16>, vector<256x128xf32> -> vector<256x128xf32>
    %39 = arith.truncf %38 : vector<256x128xf32> to vector<256x128xbf16>
    %40 = tpu.concatenate %7, %11, %15, %19, %23, %27, %31, %35, %39 in 1 : vector<256x128xbf16>, vector<256x128xbf16>, vector<256x128xbf16>, vector<256x128xbf16>, vector<256x128xbf16>, vector<256x128xbf16>, vector<256x128xbf16>, vector<256x128xbf16>, vector<256x128xbf16> -> vector<256x1152xbf16>
    %cst_15 = arith.constant dense<0.000000e+00> : vector<256x128xf32>
    %41 = tpu.matmul %40, %0, %cst_15 {dimension_numbers = #tpu.dot_dimension_numbers<[1], [0], [0], [1], [0, 0, 1, 1], [], []>} : vector<256x1152xbf16>, vector<1152x128xbf16>, vector<256x128xf32> -> vector<256x128xf32>
    %c1 = arith.constant 1 : index
    %c0_16 = arith.constant 0 : index
    %c0_17 = arith.constant 0 : index
    %42 = vector.load %arg1[%c1, %c0_16, %c0_17] : memref<2x256x128xbf16, #tpu.memory_space<vmem>>, vector<1x256x128xbf16>
    %43 = vector.shape_cast %42 : vector<1x256x128xbf16> to vector<256x128xbf16>
    %44 = vector.extract_strided_slice %1 {offsets = [0, 0, 0], sizes = [1, 256, 256], strides = [1, 1, 1]} : vector<9x256x256xbf16> to vector<1x256x256xbf16>
    %45 = vector.shape_cast %44 : vector<1x256x256xbf16> to vector<256x256xbf16>
    %cst_18 = arith.constant dense<0.000000e+00> : vector<256x128xf32>
    %46 = tpu.matmul %45, %43, %cst_18 {dimension_numbers = #tpu.dot_dimension_numbers<[1], [0], [0], [1], [0, 0, 1, 1], [], []>} : vector<256x256xbf16>, vector<256x128xbf16>, vector<256x128xf32> -> vector<256x128xf32>
    %47 = arith.truncf %46 : vector<256x128xf32> to vector<256x128xbf16>
    %48 = vector.extract_strided_slice %1 {offsets = [1, 0, 0], sizes = [1, 256, 256], strides = [1, 1, 1]} : vector<9x256x256xbf16> to vector<1x256x256xbf16>
    %49 = vector.shape_cast %48 : vector<1x256x256xbf16> to vector<256x256xbf16>
    %cst_19 = arith.constant dense<0.000000e+00> : vector<256x128xf32>
    %50 = tpu.matmul %49, %43, %cst_19 {dimension_numbers = #tpu.dot_dimension_numbers<[1], [0], [0], [1], [0, 0, 1, 1], [], []>} : vector<256x256xbf16>, vector<256x128xbf16>, vector<256x128xf32> -> vector<256x128xf32>
    %51 = arith.truncf %50 : vector<256x128xf32> to vector<256x128xbf16>
    %52 = vector.extract_strided_slice %1 {offsets = [2, 0, 0], sizes = [1, 256, 256], strides = [1, 1, 1]} : vector<9x256x256xbf16> to vector<1x256x256xbf16>
    %53 = vector.shape_cast %52 : vector<1x256x256xbf16> to vector<256x256xbf16>
    %cst_20 = arith.constant dense<0.000000e+00> : vector<256x128xf32>
    %54 = tpu.matmul %53, %43, %cst_20 {dimension_numbers = #tpu.dot_dimension_numbers<[1], [0], [0], [1], [0, 0, 1, 1], [], []>} : vector<256x256xbf16>, vector<256x128xbf16>, vector<256x128xf32> -> vector<256x128xf32>
    %55 = arith.truncf %54 : vector<256x128xf32> to vector<256x128xbf16>
    %56 = vector.extract_strided_slice %1 {offsets = [3, 0, 0], sizes = [1, 256, 256], strides = [1, 1, 1]} : vector<9x256x256xbf16> to vector<1x256x256xbf16>
    %57 = vector.shape_cast %56 : vector<1x256x256xbf16> to vector<256x256xbf16>
    %cst_21 = arith.constant dense<0.000000e+00> : vector<256x128xf32>
    %58 = tpu.matmul %57, %43, %cst_21 {dimension_numbers = #tpu.dot_dimension_numbers<[1], [0], [0], [1], [0, 0, 1, 1], [], []>} : vector<256x256xbf16>, vector<256x128xbf16>, vector<256x128xf32> -> vector<256x128xf32>
    %59 = arith.truncf %58 : vector<256x128xf32> to vector<256x128xbf16>
    %60 = vector.extract_strided_slice %1 {offsets = [4, 0, 0], sizes = [1, 256, 256], strides = [1, 1, 1]} : vector<9x256x256xbf16> to vector<1x256x256xbf16>
    %61 = vector.shape_cast %60 : vector<1x256x256xbf16> to vector<256x256xbf16>
    %cst_22 = arith.constant dense<0.000000e+00> : vector<256x128xf32>
    %62 = tpu.matmul %61, %43, %cst_22 {dimension_numbers = #tpu.dot_dimension_numbers<[1], [0], [0], [1], [0, 0, 1, 1], [], []>} : vector<256x256xbf16>, vector<256x128xbf16>, vector<256x128xf32> -> vector<256x128xf32>
    %63 = arith.truncf %62 : vector<256x128xf32> to vector<256x128xbf16>
    %64 = vector.extract_strided_slice %1 {offsets = [5, 0, 0], sizes = [1, 256, 256], strides = [1, 1, 1]} : vector<9x256x256xbf16> to vector<1x256x256xbf16>
    %65 = vector.shape_cast %64 : vector<1x256x256xbf16> to vector<256x256xbf16>
    %cst_23 = arith.constant dense<0.000000e+00> : vector<256x128xf32>
    %66 = tpu.matmul %65, %43, %cst_23 {dimension_numbers = #tpu.dot_dimension_numbers<[1], [0], [0], [1], [0, 0, 1, 1], [], []>} : vector<256x256xbf16>, vector<256x128xbf16>, vector<256x128xf32> -> vector<256x128xf32>
    %67 = arith.truncf %66 : vector<256x128xf32> to vector<256x128xbf16>
    %68 = vector.extract_strided_slice %1 {offsets = [6, 0, 0], sizes = [1, 256, 256], strides = [1, 1, 1]} : vector<9x256x256xbf16> to vector<1x256x256xbf16>
    %69 = vector.shape_cast %68 : vector<1x256x256xbf16> to vector<256x256xbf16>
    %cst_24 = arith.constant dense<0.000000e+00> : vector<256x128xf32>
    %70 = tpu.matmul %69, %43, %cst_24 {dimension_numbers = #tpu.dot_dimension_numbers<[1], [0], [0], [1], [0, 0, 1, 1], [], []>} : vector<256x256xbf16>, vector<256x128xbf16>, vector<256x128xf32> -> vector<256x128xf32>
    %71 = arith.truncf %70 : vector<256x128xf32> to vector<256x128xbf16>
    %72 = vector.extract_strided_slice %1 {offsets = [7, 0, 0], sizes = [1, 256, 256], strides = [1, 1, 1]} : vector<9x256x256xbf16> to vector<1x256x256xbf16>
    %73 = vector.shape_cast %72 : vector<1x256x256xbf16> to vector<256x256xbf16>
    %cst_25 = arith.constant dense<0.000000e+00> : vector<256x128xf32>
    %74 = tpu.matmul %73, %43, %cst_25 {dimension_numbers = #tpu.dot_dimension_numbers<[1], [0], [0], [1], [0, 0, 1, 1], [], []>} : vector<256x256xbf16>, vector<256x128xbf16>, vector<256x128xf32> -> vector<256x128xf32>
    %75 = arith.truncf %74 : vector<256x128xf32> to vector<256x128xbf16>
    %76 = vector.extract_strided_slice %1 {offsets = [8, 0, 0], sizes = [1, 256, 256], strides = [1, 1, 1]} : vector<9x256x256xbf16> to vector<1x256x256xbf16>
    %77 = vector.shape_cast %76 : vector<1x256x256xbf16> to vector<256x256xbf16>
    %cst_26 = arith.constant dense<0.000000e+00> : vector<256x128xf32>
    %78 = tpu.matmul %77, %43, %cst_26 {dimension_numbers = #tpu.dot_dimension_numbers<[1], [0], [0], [1], [0, 0, 1, 1], [], []>} : vector<256x256xbf16>, vector<256x128xbf16>, vector<256x128xf32> -> vector<256x128xf32>
    %79 = arith.truncf %78 : vector<256x128xf32> to vector<256x128xbf16>
    %80 = tpu.concatenate %47, %51, %55, %59, %63, %67, %71, %75, %79 in 1 : vector<256x128xbf16>, vector<256x128xbf16>, vector<256x128xbf16>, vector<256x128xbf16>, vector<256x128xbf16>, vector<256x128xbf16>, vector<256x128xbf16>, vector<256x128xbf16>, vector<256x128xbf16> -> vector<256x1152xbf16>
    %cst_27 = arith.constant dense<0.000000e+00> : vector<256x128xf32>
    %81 = tpu.matmul %80, %0, %cst_27 {dimension_numbers = #tpu.dot_dimension_numbers<[1], [0], [0], [1], [0, 0, 1, 1], [], []>} : vector<256x1152xbf16>, vector<1152x128xbf16>, vector<256x128xf32> -> vector<256x128xf32>
    %82 = vector.shape_cast %41 : vector<256x128xf32> to vector<1x256x128xf32>
    %83 = vector.shape_cast %81 : vector<256x128xf32> to vector<1x256x128xf32>
    %84 = tpu.concatenate %82, %83 in 0 : vector<1x256x128xf32>, vector<1x256x128xf32> -> vector<2x256x128xf32>
    %c0_28 = arith.constant 0 : index
    %c0_29 = arith.constant 0 : index
    %85 = vector.load %arg4[%c0_28, %c0_29] : memref<1x128xf32, #tpu.memory_space<vmem>>, vector<1x128xf32>
    %c0_30 = arith.constant 0 : index
    %c0_31 = arith.constant 0 : index
    %86 = vector.load %arg5[%c0_30, %c0_31] : memref<1x128xf32, #tpu.memory_space<vmem>>, vector<1x128xf32>
    %cst_32 = arith.constant dense<0.000000e+00> : vector<128xf32>
    %87 = vector.multi_reduction <add>, %84, %cst_32 [0, 1] : vector<2x256x128xf32> to vector<128xf32>
    %88 = vector.shape_cast %87 : vector<128xf32> to vector<1x1x128xf32>
    %cst_33 = arith.constant 5.120000e+02 : f32
    %89 = vector.broadcast %cst_33 : f32 to vector<1x1x128xf32>
    %90 = arith.divf %88, %89 : vector<1x1x128xf32>
    %91 = vector.broadcast %90 : vector<1x1x128xf32> to vector<2x256x128xf32>
    %92 = arith.subf %84, %91 : vector<2x256x128xf32>
    %93 = arith.mulf %92, %92 : vector<2x256x128xf32>
    %cst_34 = arith.constant dense<0.000000e+00> : vector<128xf32>
    %94 = vector.multi_reduction <add>, %93, %cst_34 [0, 1] : vector<2x256x128xf32> to vector<128xf32>
    %95 = vector.shape_cast %94 : vector<128xf32> to vector<1x1x128xf32>
    %cst_35 = arith.constant 5.120000e+02 : f32
    %96 = vector.broadcast %cst_35 : f32 to vector<1x1x128xf32>
    %97 = arith.divf %95, %96 : vector<1x1x128xf32>
    %98 = vector.shape_cast %85 : vector<1x128xf32> to vector<1x1x128xf32>
    %cst_36 = arith.constant 9.99999974E-6 : f32
    %99 = vector.broadcast %cst_36 : f32 to vector<1x1x128xf32>
    %100 = arith.addf %97, %99 : vector<1x1x128xf32>
    %101 = math.rsqrt %100 : vector<1x1x128xf32>
    %102 = arith.mulf %98, %101 : vector<1x1x128xf32>
    %103 = vector.broadcast %90 : vector<1x1x128xf32> to vector<2x256x128xf32>
    %104 = arith.subf %84, %103 : vector<2x256x128xf32>
    %105 = vector.broadcast %102 : vector<1x1x128xf32> to vector<2x256x128xf32>
    %106 = arith.mulf %104, %105 : vector<2x256x128xf32>
    %107 = vector.shape_cast %86 : vector<1x128xf32> to vector<1x1x128xf32>
    %108 = vector.broadcast %107 : vector<1x1x128xf32> to vector<2x256x128xf32>
    %109 = arith.addf %106, %108 : vector<2x256x128xf32>
    %cst_37 = arith.constant 0.000000e+00 : f32
    %110 = vector.broadcast %cst_37 : f32 to vector<2x256x128xf32>
    %111 = arith.maximumf %109, %110 : vector<2x256x128xf32>
    %112 = arith.truncf %111 : vector<2x256x128xf32> to vector<2x256x128xbf16>
    %c0_38 = arith.constant 0 : index
    %c0_39 = arith.constant 0 : index
    %c0_40 = arith.constant 0 : index
    %113 = vector.load %arg6[%c0_38, %c0_39, %c0_40] : memref<2x256x128xbf16, #tpu.memory_space<vmem>>, vector<2x256x128xbf16>
    tpu.vector_store %arg6[%c0_38, %c0_39, %c0_40], %112 {strides = array<i32>} : memref<2x256x128xbf16, #tpu.memory_space<vmem>>, vector<2x256x128xbf16>,
    return
  }
  func.func @transform_0(%arg0: i32) -> (i32, i32, i32) {
    %c0_i32 = arith.constant 0 : i32
    %c0_i32_0 = arith.constant 0 : i32
    %c0_i32_1 = arith.constant 0 : i32
    return %arg0, %c0_i32, %c0_i32_0 : i32, i32, i32
  }
  func.func @transform_1(%arg0: i32) -> (i32, i32, i32) {
    %c0_i32 = arith.constant 0 : i32
    %c0_i32_0 = arith.constant 0 : i32
    %c0_i32_1 = arith.constant 0 : i32
    %c0_i32_2 = arith.constant 0 : i32
    return %c0_i32, %c0_i32_0, %c0_i32_1 : i32, i32, i32
  }
  func.func @transform_2(%arg0: i32) -> (i32, i32) {
    %c0_i32 = arith.constant 0 : i32
    %c0_i32_0 = arith.constant 0 : i32
    %c0_i32_1 = arith.constant 0 : i32
    return %c0_i32, %c0_i32_0 : i32, i32
  }
  func.func @transform_3(%arg0: i32) -> (i32, i32) {
    %c0_i32 = arith.constant 0 : i32
    %c0_i32_0 = arith.constant 0 : i32
    %c0_i32_1 = arith.constant 0 : i32
    return %c0_i32, %c0_i32_0 : i32, i32
  }
  func.func @transform_4(%arg0: i32) -> (i32, i32) {
    %c0_i32 = arith.constant 0 : i32
    %c0_i32_0 = arith.constant 0 : i32
    %c0_i32_1 = arith.constant 0 : i32
    return %c0_i32, %c0_i32_0 : i32, i32
  }
  func.func @transform_5(%arg0: i32) -> (i32, i32, i32) {
    %c0_i32 = arith.constant 0 : i32
    %c0_i32_0 = arith.constant 0 : i32
    %c0_i32_1 = arith.constant 0 : i32
    return %arg0, %c0_i32, %c0_i32_0 : i32, i32, i32
  }
}

</mosaic_0001>

<bundles_post_ra>
// kernel: tpu_custom_call.1
= control target key start
LH: loop header
LB: loop body
LE: loop exit
PB: predicated region body
PF: predicated region fallthrough
CT: control target
= control target key end

     0   :  { %10 = vsyncpa [#allocation3], 0  ;;  %s18542_s0 = inlined_call_operand.hbm [shape: bf16[4,256,128], index: 0, kind: input, shape index: {}]   ;;  %s18543_s1 = inlined_call_operand.hbm [shape: bf16[9,256,256], index: 1, kind: input, shape index: {}]   ;;  %s18544_s2 = inlined_call_operand.hbm [shape: bf16[1152,128], index: 2, kind: input, shape index: {}]   ;;  %s18545_s3 = inlined_call_operand.hbm [shape: f32[1,128], index: 3, kind: input, shape index: {}]   ;;  %s18546_s4 = inlined_call_operand.hbm [shape: f32[1,128], index: 4, kind: input, shape index: {}]   ;;  %s18547_s5 = inlined_call_operand.hbm [shape: bf16[4,256,128], index: 5, kind: output, shape index: {}]  }
   0x1   :  { %12 = vsyncpa [#allocation3 + $0x1], 0 }
   0x2   :  { %13 = vsyncpa [#allocation6], 0 }
   0x3   :  { %14 = vsyncpa [#allocation9], 0 }
   0x4   :  { %15 = vsyncpa [#allocation4], 0 }
   0x5   :  { %17 = vsyncpa [#allocation4 + $0x1], 0  ;;  %s13724_s18 = smov 0   ;;  %s13726_s19 = smov 0  }
   0x6   :  { %s13728_s20 = smov 0   ;;  %s13730_s21 = smov 0  }
   0x7 LB: > { %s13745_s22 = sadd.s32 4294967295, %s13680_s21   ;;  %s8582_s23 = sadd.s32 4294967294, %s13680_s21   ;;  %s13680_s21 = sphi %s13730_s21, %s20014_s21   ;;  %s13676_s20 = sphi %s13728_s20, %s20013_s20   ;;  %s13672_s19 = sphi %s13726_s19, %s20012_s19   ;;  %s13668_s18 = sphi %s13724_s18, %s20011_s18  }
   0x8   : > { %p43_p0 = scmp.ne.s32.totalorder %s13672_s19, %s13668_s18  ;;  %p18548_p1 = scmp.eq.s32.totalorder %s13745_s22, 0 }
   0x9   : > { %p157_p3 = scmp.eq.s32.totalorder %s8582_s23, 1  ;;  %p8583_p5 = scmp.ge.s32.totalorder %s13680_s21, 1 }
   0xa   : > { %p13754_p4 = por %p18548_p1, %p43_p0  ;;  %p164_p7 = scmp.lt.s32.totalorder %s13680_s21, 3 }
   0xb   : > { %p13759_p6 = por %p157_p3, %p43_p0  ;;  %s13682_s27 = smov [#allocation5]  }
   0xc   : > { %s18919_s24 = scalar_select %p13754_p4, 1, 0 }
   0xd   : > { %s18920_s25 = scalar_select %p13759_p6, 1, 0 }
   0xe   : > { %p13764_p8 = pnand %p8583_p5, %p164_p7  ;;  %s176_s28 = sshll.u32 %s13682_s27, 4  ;;  %s13768_s28 = int_to_ptr.vmem [resolvable:$true] %s176_s28 }
   0xf   : > { %s13683_s30 = smov [#allocation8]   ;;  %s13684_s7 = smov [#allocation7]  }
  0x10   : > { %s18921_s26 = scalar_select %p13764_p8, 1, 0 }
  0x11   : > { %p12430_p9 = pneg %p13764_p8  ;;  %s203_s6 = sshll.u32 %s13683_s30, 4  ;;  %s13779_s6 = int_to_ptr.vmem [resolvable:$true] %s203_s6 }
  0x12   : > { %s13781_s8 = sshll.u32 %s13684_s7, 4  ;;  %s13464_s11 = scalar_lea.hbm %s18543_s1, 36864  ;;  %s190_s8 = int_to_ptr.vmem [resolvable:$true] %s13781_s8 }
  0x13   : > { %p13775_p11 = pnand %p12430_p9, %p18548_p1  ;;  %p13465_p12 = scmp.ne.s32.totalorder %s18543_s1, %s13464_s11 }
  0x14   : > { %p13471_p5 = scmp.lt.u32.totalorder %s13464_s11, %s18543_s1 }
  0x15   : > { %p13791_p13 = pneg %p13775_p11 }
  0x17   : > { %p13467_p0 = pnand %p13791_p13, %p13465_p12 }
  0x19   : > { %p13468_p3 = pneg %p13467_p0 }
  0x1b   : > { %p13473_p7 = pnand %p13471_p5, %p13468_p3 }
  0x1d   : > { %13476 = shalt.err (!%p13473_p7)
}
  0x1e   : > { %s13477_s17 = scalar_lea.vmem %s13768_s28, 36864  ;;  %p13485_p2 = scmp.lt.s32.totalorder %s13768_s28, %s13768_s28 }
  0x1f   : > { %p13478_p9 = scmp.ne.s32.totalorder %s13768_s28, %s13477_s17  ;;  %p13486_p6 = scmp.lt.s32.totalorder %s13477_s17, %s13477_s17 }
  0x21   : > { %p13480_p10 = pnand %p13478_p9, %p13791_p13  ;;  %p13487_p12 = por %p13486_p6, %p13485_p2 }
  0x23   : > { %p13481_p1 = pneg %p13480_p10 }
  0x25   : > { %p13488_p0 = pnand %p13487_p12, %p13481_p1 }
  0x27   : > { %13491 = shalt.err (!%p13488_p0)
}
  0x28   : > { %s13685_s23 = smov 128   ;;  %s13686_s27 = smov 8  }
  0x29   : > { %12433 = dma.hbm_to_vmem [thread:$0]  (!%p13775_p11), %s18543_s1, 36864, %s13768_s28, [#allocation6], %s13685_s23, %s13685_s23, %s13686_s27  }
  0x2a   : > { %s13492_s11 = scalar_lea.hbm %s18545_s3, 16 }
  0x2b   : > { %p13493_p2 = scmp.ne.s32.totalorder %s18545_s3, %s13492_s11  ;;  %p13499_p10 = scmp.lt.u32.totalorder %s13492_s11, %s18545_s3 }
  0x2d   : > { %p13495_p1 = pnand %p13493_p2, %p13791_p13 }
  0x2f   : > { %p13496_p6 = pneg %p13495_p1 }
  0x31   : > { %p13501_p3 = pnand %p13499_p10, %p13496_p6 }
  0x33   : > { %13504 = shalt.err (!%p13501_p3)
}
  0x34   : > { %s13505_s28 = scalar_lea.vmem %s13779_s6, 16  ;;  %s13512_s17 = scalar_lea.vmem %s13779_s6, 32 }
  0x35   : > { %p13506_p5 = scmp.ne.s32.totalorder %s13779_s6, %s13505_s28  ;;  %p13513_p12 = scmp.lt.s32.totalorder %s13779_s6, %s13779_s6 }
  0x36   : > { %p13514_p0 = scmp.lt.s32.totalorder %s13512_s17, %s13505_s28 }
  0x37   : > { %p13508_p7 = pnand %p13506_p5, %p13791_p13 }
  0x38   : > { %p13515_p2 = por %p13514_p0, %p13513_p12 }
  0x39   : > { %p13509_p9 = pneg %p13508_p7 }
  0x3b   : > { %p13516_p1 = pnand %p13515_p2, %p13509_p9 }
  0x3d   : > { %13519 = shalt.err (!%p13516_p1)
}
  0x3e   : > { %12439 = dma.hbm_to_vmem [thread:$0]  (!%p13775_p11), %s18545_s3, 16, %s13779_s6, [#allocation9]  }
  0x3f   : > { %s13520_s9 = scalar_lea.hbm %s18544_s2, 9216 }
  0x40   : > { %p13521_p6 = scmp.ne.s32.totalorder %s18544_s2, %s13520_s9  ;;  %p13527_p5 = scmp.lt.u32.totalorder %s13520_s9, %s18544_s2 }
  0x42   : > { %p13523_p10 = pnand %p13521_p6, %p13791_p13 }
  0x44   : > { %p13524_p3 = pneg %p13523_p10 }
  0x46   : > { %p13529_p7 = pnand %p13527_p5, %p13524_p3 }
  0x48   : > { %13532 = shalt.err (!%p13529_p7)
}
  0x49   : > { %s13533_s15 = scalar_lea.vmem %s190_s8, 9216  ;;  %p13541_p2 = scmp.lt.s32.totalorder %s190_s8, %s190_s8 }
  0x4a   : > { %p13534_p9 = scmp.ne.s32.totalorder %s190_s8, %s13533_s15  ;;  %p13542_p1 = scmp.lt.s32.totalorder %s13533_s15, %s13533_s15 }
  0x4c   : > { %p13536_p12 = pnand %p13534_p9, %p13791_p13  ;;  %p13543_p4 = por %p13542_p1, %p13541_p2 }
  0x4e   : > { %p13537_p0 = pneg %p13536_p12 }
  0x50   : > { %p13544_p8 = pnand %p13543_p4, %p13537_p0 }
  0x52   : > { %13547 = shalt.err (!%p13544_p8)
}
  0x53   : > { %s13687_s6 = smov 64   ;;  %s13688_s16 = smov 4  }
  0x54   : > { %12436 = dma.hbm_to_vmem [thread:$0]  (!%p13775_p11), %s18544_s2, 9216, %s190_s8, [#allocation6], %s13687_s6, %s13687_s6, %s13688_s16  }
  0x55   : > { %s13689_s23 = smov [#allocation10]   ;;  %s13548_s9 = scalar_lea.hbm %s18546_s4, 16 }
  0x56   : > { %s214_s27 = sshll.u32 %s13689_s23, 4  ;;  %p13549_p4 = scmp.ne.s32.totalorder %s18546_s4, %s13548_s9  ;;  %s215_s27 = int_to_ptr.vmem [resolvable:$true] %s214_s27 }
  0x57   : > { %p13555_p10 = scmp.lt.u32.totalorder %s13548_s9, %s18546_s4 }
  0x58   : > { %p13551_p8 = pnand %p13549_p4, %p13791_p13 }
  0x5a   : > { %p13552_p6 = pneg %p13551_p8 }
  0x5c   : > { %p13557_p3 = pnand %p13555_p10, %p13552_p6 }
  0x5e   : > { %13560 = shalt.err (!%p13557_p3)
}
  0x5f   : > { %s13561_s8 = scalar_lea.vmem %s215_s27, 16  ;;  %s13568_s15 = scalar_lea.vmem %s215_s27, 32 }
  0x60   : > { %p13562_p5 = scmp.ne.s32.totalorder %s215_s27, %s13561_s8  ;;  %p13569_p12 = scmp.lt.s32.totalorder %s215_s27, %s215_s27 }
  0x61   : > { %p13570_p0 = scmp.lt.s32.totalorder %s13568_s15, %s13561_s8 }
  0x62   : > { %p13564_p7 = pnand %p13562_p5, %p13791_p13 }
  0x63   : > { %p13571_p2 = por %p13570_p0, %p13569_p12 }
  0x64   : > { %p13565_p9 = pneg %p13564_p7 }
  0x66   : > { %p13572_p1 = pnand %p13571_p2, %p13565_p9 }
  0x68   : > { %13575 = shalt.err (!%p13572_p1)
}
  0x69   : > { %12442 = dma.hbm_to_vmem [thread:$0]  (!%p13775_p11), %s18546_s4, 16, %s215_s27, [#allocation9]  }
  0x6a   : > { %s13877_s14 = sadd.s32 1, %s13680_s21   ;;  %s30_s23 = sadd.s32 1, %s13676_s20 }
  0x6b   : > { %s27_s29 = ssub.s32 %s13680_s21, %s13877_s14  ;;  %p37_p13 = scmp.ne.s32.totalorder %s13676_s20, %s13672_s19 }
  0x6c   : > { %p28_p4 = scmp.eq.s32.totalorder %s27_s29, 0  ;;  %p38_p8 = scmp.eq.s32.totalorder %s13680_s21, 0 }
  0x6d   : > { %p18924_p6 = scmp.eq.s32.totalorder %s13745_s22, 1  ;;  %p12455_p3 = scmp.lt.s32.totalorder %s13680_s21, 2 }
  0x6e   : > { %s13893_s7 = scalar_select %p28_p4, %s13676_s20, %s30_s23  }
  0x6f   : > { %p13887_p10 = por %p18924_p6, %p37_p13  ;;  %p39_p5 = por %p38_p8, %p37_p13 }
  0x70   : > { %s225_s9 = sand.u32 1, %s13676_s20   ;;  %s9096_s27 = sshll.u32 %s13680_s21, 12 }
  0x71   : > { %s8589_s10 = sshll.u32 %s225_s9, 8  ;;  %s13900_s13 = scalar_lea.hbm %s18542_s0, %s9096_s27 }
  0x72   : > { %s229_s8 = scalar_lea.vmem [#allocation2], %s8589_s10  ;;  %p13904_p11 = pnand %p12455_p3, %p39_p5 }
  0x73   : > { %s237_s15 = sshll.u32 %s229_s8, 4  ;;  %s13908_s17 = scalar_lea.sflag [#allocation3], %s225_s9  ;;  %s13902_s15 = int_to_ptr.vmem [resolvable:$true] %s237_s15 }
  0x74   : > { %s13576_s23 = scalar_lea.hbm %s13900_s13, 4096  ;;  %p13578_p9 = pneg %p13904_p11 }
  0x75   : > { %p13577_p7 = scmp.ne.s32.totalorder %s13900_s13, %s13576_s23  ;;  %s13581_s27 = scalar_lea.hbm %s18542_s0, 8192 }
  0x76   : > { %p13582_p2 = scmp.lt.u32.totalorder %s13900_s13, %s18542_s0  ;;  %p13583_p1 = scmp.lt.u32.totalorder %s13581_s27, %s13576_s23 }
  0x77   : > { %p13579_p12 = pnand %p13578_p9, %p13577_p7  ;;  %p13585_p4 = scmp.lt.u32.totalorder %s13576_s23, %s13900_s13 }
  0x78   : > { %p13584_p13 = por %p13583_p1, %p13582_p2 }
  0x79   : > { %p13580_p0 = pneg %p13579_p12 }
  0x7a   : > { %p13586_p8 = por %p13585_p4, %p13584_p13 }
  0x7c   : > { %p13587_p6 = pnand %p13586_p8, %p13580_p0 }
  0x7e   : > { %13590 = shalt.err (!%p13587_p6)
}
  0x7f   : > { %s13591_s9 = scalar_lea.vmem %s13902_s15, 4096  ;;  %s13690_s8 = smov [#allocation2]  }
  0x80   : > { %p13592_p3 = scmp.ne.s32.totalorder %s13902_s15, %s13591_s9  ;;  %s13596_s29 = sshll.u32 %s13690_s8, 4  ;;  %s13597_s29 = int_to_ptr.vmem [resolvable:$false] %s13596_s29 }
  0x81   : > { %s13598_s10 = scalar_lea.vmem %s13597_s29, 8192  ;;  %p13599_p12 = scmp.lt.s32.totalorder %s13902_s15, %s13597_s29 }
  0x82   : > { %p13594_p5 = pnand %p13592_p3, %p13578_p9  ;;  %p13600_p2 = scmp.lt.s32.totalorder %s13598_s10, %s13591_s9 }
  0x84   : > { %p13595_p7 = pneg %p13594_p5  ;;  %p13601_p1 = por %p13600_p2, %p13599_p12 }
  0x86   : > { %p13602_p13 = pnand %p13601_p1, %p13595_p7 }
  0x88   : > { %13605 = shalt.err (!%p13602_p13)
}
  0x89   : > { %12446 = dma.hbm_to_vmem [thread:$0]  (!%p13904_p11), %s13900_s13, 4096, %s13902_s15, %s13908_s17, %s13687_s6, %s13687_s6, %s13688_s16  }
  0x8a   : > { %p18927_p9 = scmp.ne.s32.totalorder %s18921_s26, 0 }
  0x8c   : > { %249 = sbr.rel (%p18927_p9) target bundleno = 2422 (0x976), region = 40 }
  0x93   : > { %s13942_s23 = sand.u32 1, %s13672_s19   ;;  %p18928_p0 = scmp.ne.s32.totalorder %s18919_s24, 0 }
  0x94   : > { %s8594_s27 = sshll.u32 %s13942_s23, 8  ;;  %s252_s11 = scalar_lea.sflag [#allocation3], %s13942_s23 }
  0x95   : > { %s13948_s28 = scalar_lea.vmem [#allocation2], %s8594_s27 }
  0x96   : > { %13651 = dma.done.wait (%p18928_p0), %s252_s11, 4096  }
  0x97   : > { %13653 = vsyncadd (%p18928_p0), %s252_s11, 4294963200  ;;  %p18929_p11 = scmp.eq.s32.totalorder %s13745_s22, 0 }
  0x99   : > { %13655 = dma.done.wait (%p18929_p11), [#allocation6], 46080   ;;  %p18930_p4 = pmov %p18929_p11 }
  0x9b   : > { %13657 = vsyncadd (%p18930_p4), [#allocation6], 4294921216  ;;  %p18931_p8 = pmov %p18930_p4 }
  0x9c   : > { %p18932_p6 = pmov %p18930_p4 }
  0x9d   : > { %13659 = dma.done.wait (%p18931_p8), [#allocation9], 32  }
  0x9e   : > { %13661 = vsyncadd (%p18932_p6), [#allocation9], 4294967264  ;;  %v13963_v0 = vld [vmem:[%s13948_s28 + $0x40] sm:$0xff]   ;;  %v12505_v2 = vld [vmem:[%s13948_s28 + $0x48] sm:$0xff]   ;;  %s18110_s24 = scalar_lea.vmem [#allocation11], %s8594_s27  ;;  %s9162_s26 = sshll.u32 %s13745_s22, 12 }
  0x9f   : > { %v13966_v1 = vld [vmem:[%s13948_s28] sm:$0xff]   ;;  %9354 = vmatprep.subr.bf16.mxu0 %v13963_v0  ;;  %9466 = vmatprep.subr.bf16.mxu1 %v13963_v0  ;;  %v13974_v3 = vld [vmem:[%s13948_s28 + $0x8] sm:$0xff]   ;;  %v13977_v4 = vld [vmem:[%s13948_s28 + $0x50] sm:$0xff]   ;;  %s8471_s6 = sshll.u32 %s18110_s24, 4  ;;  %s18484_s13 = scalar_lea.hbm %s18547_s5, %s9162_s26  ;;  %s18486_s6 = int_to_ptr.vmem [resolvable:$true] %s8471_s6 }
  0xa0   : > { %9355 = vmatpush3.bf16.msra.mxu0 %v13966_v1  ;;  %9467 = vmatpush3.bf16.msra.mxu1 %v13966_v1  ;;  %v13982_v5 = vld [vmem:[%s13948_s28 + $0x10] sm:$0xff]   ;;  %v13987_v6 = vld [vmem:[%s13948_s28 + $0x58] sm:$0xff]   ;;  %v13997_v8 = vld [vmem:[%s13948_s28 + $0x60] sm:$0xff]   ;;  %s8457_s15 = scalar_lea.sflag [#allocation4], %s13942_s23  ;;  %s13606_s17 = scalar_lea.vmem %s18486_s6, 4096 }
  0xa1   : > { %9356 = vmatprep.subr.bf16.mxu0 %v12505_v2  ;;  %9468 = vmatprep.subr.bf16.mxu1 %v12505_v2  ;;  %v13992_v7 = vld [vmem:[%s13948_s28 + $0x18] sm:$0xff]   ;;  %v14002_v9 = vld [vmem:[%s13948_s28 + $0x20] sm:$0xff]   ;;  %v14007_v10 = vld [vmem:[%s13948_s28 + $0x68] sm:$0xff]   ;;  %p13607_p3 = scmp.ne.s32.totalorder %s18486_s6, %s13606_s17  ;;  %s13691_s12 = smov [#allocation11]  }
  0xa2   : > { %v12521_v11 = vld [vmem:[#allocation5 + $0x4] ss:$8 sps:$4 sm:$0xff]   ;;  %v14017_v14 = vld [vmem:[%s13948_s28 + $0x70] sm:$0xff]   ;;  %v14027_v16 = vld [vmem:[%s13948_s28 + $0x78] sm:$0xff]   ;;  %s13610_s9 = sshll.u32 %s13691_s12, 4  ;;  %s13611_s9 = int_to_ptr.vmem [resolvable:$false] %s13610_s9 }
  0xa3   : > { %v12524_v12 = vld [vmem:[#allocation5 + $0x104] ss:$8 sps:$4 sm:$0xff]   ;;  %1053 = vmatprep.mubr.bf16.mxu0 %v12521_v11  ;;  %v14022_v15 = vld [vmem:[%s13948_s28 + $0x30] sm:$0xff]   ;;  %v14032_v17 = vld [vmem:[%s13948_s28 + $0x38] sm:$0xff]   ;;  %p13608_p5 = pnand %p13607_p3, %p13887_p10  ;;  %s13612_s8 = scalar_lea.vmem %s13611_s9, 8192 }
  0xa4   : > { %9357 = vmatpush3.bf16.msra.mxu0 %v13974_v3  ;;  %9469 = vmatpush3.bf16.msra.mxu1 %v13974_v3  ;;  %v14012_v13 = vld [vmem:[%s13948_s28 + $0x28] sm:$0xff]   ;;  %v12525_v20 = vld [vmem:[#allocation5 + $0x14] ss:$8 sps:$4 sm:$0xff]   ;;  %v12529_v22 = vld [vmem:[#allocation5 + $0x10] ss:$8 sps:$4 sm:$0xff]   ;;  %p13613_p12 = scmp.lt.s32.totalorder %s18486_s6, %s13611_s9  ;;  %p13614_p2 = scmp.lt.s32.totalorder %s13612_s8, %s13606_s17 }
  0xa5   : > { %9358 = vmatprep.subr.bf16.mxu0 %v13977_v4  ;;  %9470 = vmatprep.subr.bf16.mxu1 %v13977_v4  ;;  %v12519_v18 = vld [vmem:[#allocation5] ss:$8 sps:$4 sm:$0xff]   ;;  %v12527_v21 = vld [vmem:[#allocation5 + $0x114] ss:$8 sps:$4 sm:$0xff]   ;;  %v12530_v23 = vld [vmem:[#allocation5 + $0x110] ss:$8 sps:$4 sm:$0xff]   ;;  %p13609_p7 = pneg %p13608_p5 }
  0xa6   : > { %1390 = vmatprep.mubr.bf16.mxu1 %v12524_v12  ;;  %v12522_v19 = vld [vmem:[#allocation5 + $0x100] ss:$8 sps:$4 sm:$0xff]   ;;  %v12531_v24 = vld [vmem:[#allocation5 + $0x24] ss:$8 sps:$4 sm:$0xff]   ;;  %v12537_v28 = vld [vmem:[#allocation5 + $0x34] ss:$8 sps:$4 sm:$0xff]   ;;  %p13615_p1 = por %p13614_p2, %p13613_p12 }
  0xa7   : > { %v12533_v25 = vld [vmem:[#allocation5 + $0x124] ss:$8 sps:$4 sm:$0xff]   ;;  %v12535_v26 = vld [vmem:[#allocation5 + $0x20] ss:$8 sps:$4 sm:$0xff]   ;;  %v12539_v29 = vld [vmem:[#allocation5 + $0x134] ss:$8 sps:$4 sm:$0xff]  }
  0xa8   : > { %9359 = vmatpush3.bf16.msra.mxu0 %v13982_v5  ;;  %9471 = vmatpush3.bf16.msra.mxu1 %v13982_v5  ;;  %v12536_v27 = vld [vmem:[#allocation5 + $0x120] ss:$8 sps:$4 sm:$0xff]   ;;  %v12541_v30 = vld [vmem:[#allocation5 + $0x30] ss:$8 sps:$4 sm:$0xff]   ;;  %v12543_v32 = vld [vmem:[#allocation5 + $0x44] ss:$8 sps:$4 sm:$0xff]   ;;  %p13616_p13 = pnand %p13615_p1, %p13609_p7 }
  0xa9   : > { %9360 = vmatprep.subr.bf16.mxu0 %v13987_v6  ;;  %9472 = vmatprep.subr.bf16.mxu1 %v13987_v6  ;;  %v12542_v31 = vld [vmem:[#allocation5 + $0x130] ss:$8 sps:$4 sm:$0xff]   ;;  %v12545_v33 = vld [vmem:[#allocation5 + $0x144] ss:$8 sps:$4 sm:$0xff]   ;;  %v12547_v34 = vld [vmem:[#allocation5 + $0x40] ss:$8 sps:$4 sm:$0xff]  }
  0xaa   : > { %v12548_v35 = vld [vmem:[#allocation5 + $0x140] ss:$8 sps:$4 sm:$0xff]   ;;  %v12549_v36 = vld [vmem:[#allocation5 + $0x54] ss:$8 sps:$4 sm:$0xff]   ;;  %v12553_v38 = vld [vmem:[#allocation5 + $0x50] ss:$8 sps:$4 sm:$0xff]  }
  0xab   : > { %v12551_v37 = vld [vmem:[#allocation5 + $0x154] ss:$8 sps:$4 sm:$0xff]   ;;  %v12554_v39 = vld [vmem:[#allocation5 + $0x150] ss:$8 sps:$4 sm:$0xff]   ;;  %v12555_v40 = vld [vmem:[#allocation5 + $0x64] ss:$8 sps:$4 sm:$0xff]  }
  0xac   : > { %9361 = vmatpush3.bf16.msra.mxu0 %v13992_v7  ;;  %9473 = vmatpush3.bf16.msra.mxu1 %v13992_v7  ;;  %v12557_v41 = vld [vmem:[#allocation5 + $0x164] ss:$8 sps:$4 sm:$0xff]   ;;  %v12559_v42 = vld [vmem:[#allocation5 + $0x60] ss:$8 sps:$4 sm:$0xff]   ;;  %v12561_v44 = vld [vmem:[#allocation5 + $0x74] ss:$8 sps:$4 sm:$0xff]  }
  0xad   : > { %9362 = vmatprep.subr.bf16.mxu0 %v13997_v8  ;;  %9474 = vmatprep.subr.bf16.mxu1 %v13997_v8  ;;  %v12560_v43 = vld [vmem:[#allocation5 + $0x160] ss:$8 sps:$4 sm:$0xff]   ;;  %v12563_v45 = vld [vmem:[#allocation5 + $0x174] ss:$8 sps:$4 sm:$0xff]   ;;  %v12565_v46 = vld [vmem:[#allocation5 + $0x70] ss:$8 sps:$4 sm:$0xff]  }
  0xae   : > { %v12566_v47 = vld [vmem:[#allocation5 + $0x170] ss:$8 sps:$4 sm:$0xff]   ;;  %v12567_v48 = vld [vmem:[#allocation5 + $0x84] ss:$8 sps:$4 sm:$0xff]   ;;  %v12571_v50 = vld [vmem:[#allocation5 + $0x80] ss:$8 sps:$4 sm:$0xff]  }
  0xaf   : > { %v12569_v49 = vld [vmem:[#allocation5 + $0x184] ss:$8 sps:$4 sm:$0xff]   ;;  %v12572_v51 = vld [vmem:[#allocation5 + $0x180] ss:$8 sps:$4 sm:$0xff]   ;;  %v12573_v52 = vld [vmem:[#allocation5 + $0x94] ss:$8 sps:$4 sm:$0xff]  }
  0xb0   : > { %9363 = vmatpush3.bf16.msra.mxu0 %v14002_v9  ;;  %9475 = vmatpush3.bf16.msra.mxu1 %v14002_v9  ;;  %v12575_v53 = vld [vmem:[#allocation5 + $0x194] ss:$8 sps:$4 sm:$0xff]   ;;  %v12577_v54 = vld [vmem:[#allocation5 + $0x90] ss:$8 sps:$4 sm:$0xff]   ;;  %v12579_v56 = vld [vmem:[#allocation5 + $0xa4] ss:$8 sps:$4 sm:$0xff]  }
  0xb1   : > { %9364 = vmatprep.subr.bf16.mxu0 %v14007_v10  ;;  %9476 = vmatprep.subr.bf16.mxu1 %v14007_v10  ;;  %v12578_v55 = vld [vmem:[#allocation5 + $0x190] ss:$8 sps:$4 sm:$0xff]   ;;  %v12581_v57 = vld [vmem:[#allocation5 + $0x1a4] ss:$8 sps:$4 sm:$0xff]   ;;  %v12583_v58 = vld [vmem:[#allocation5 + $0xa0] ss:$8 sps:$4 sm:$0xff]  }
  0xb2   : > { %v12584_v59 = vld [vmem:[#allocation5 + $0x1a0] ss:$8 sps:$4 sm:$0xff]   ;;  %v12585_v60 = vld [vmem:[#allocation5 + $0xb4] ss:$8 sps:$4 sm:$0xff]   ;;  %v12589_v62 = vld [vmem:[#allocation5 + $0xb0] ss:$8 sps:$4 sm:$0xff]  }
  0xb3   : > { %v12587_v61 = vld [vmem:[#allocation5 + $0x1b4] ss:$8 sps:$4 sm:$0xff]   ;;  %v12590_v63 = vld [vmem:[#allocation5 + $0x1b0] ss:$8 sps:$4 sm:$0xff]   ;;  %v12608_v11 = vld [vmem:[#allocation5 + $0x1e0] ss:$8 sps:$4 sm:$0xff]  }
  0xb4   : > { %9365 = vmatpush3.bf16.msra.mxu0 %v14012_v13  ;;  %9477 = vmatpush3.bf16.msra.mxu1 %v14012_v13  ;;  %v12609_v12 = vld [vmem:[#allocation5 + $0xf4] ss:$8 sps:$4 sm:$0xff]  }
  0xb5   : > { %9366 = vmatprep.subr.bf16.mxu0 %v14017_v14  ;;  %9478 = vmatprep.subr.bf16.mxu1 %v14017_v14 }
  0xb8   : > { %9367 = vmatpush3.bf16.msra.mxu0 %v14022_v15  ;;  %9479 = vmatpush3.bf16.msra.mxu1 %v14022_v15 }
  0xb9   : > { %9368 = vmatprep.subr.bf16.mxu0 %v14027_v16  ;;  %9480 = vmatprep.subr.bf16.mxu1 %v14027_v16 }
  0xbc   : > { %9369 = vmatpush3.bf16.msra.mxu0 %v14032_v17  ;;  %9481 = vmatpush3.bf16.msra.mxu1 %v14032_v17 }
  0xbd   : > { %9578 = vmatprep.subr.bf16.mxu0 %v13963_v0  ;;  %9690 = vmatprep.subr.bf16.mxu1 %v13963_v0 }
  0xbf   : > { %1054 = vmatmul.mubr.bf16.vlgmr.msra.gmra.mrb[0].mxu0 %v12519_v18  ;;  %1391 = vmatmul.mubr.bf16.vlgmr.msra.gmra.mrb[0].mxu1 %v12522_v19  ;;  %v12615_v18 = vld [vmem:[#allocation5 + $0x200] ss:$8 sps:$4 sm:$0xff]  }
  0xc0   : > { %9579 = vmatpush3.bf16.msra.mxu0 %v13966_v1  ;;  %1061 = vmatprep.mubr.bf16.mxu0 %v12525_v20  ;;  %v12618_v19 = vld [vmem:[#allocation5 + $0x300] ss:$8 sps:$4 sm:$0xff]   ;;  %v12621_v20 = vld [vmem:[#allocation5 + $0x214] ss:$8 sps:$4 sm:$0xff]  }
  0xc1   : > { %1398 = vmatprep.mubr.bf16.mxu1 %v12527_v21  ;;  %9580 = vmatprep.subr.bf16.mxu0 %v12505_v2  ;;  %v12623_v21 = vld [vmem:[#allocation5 + $0x314] ss:$8 sps:$4 sm:$0xff]  }
  0xc2   : > { %9691 = vmatpush3.bf16.msra.mxu1 %v13966_v1  ;;  %v12593_v1 = vld [vmem:[#allocation5 + $0x1c4] ss:$8 sps:$4 sm:$0xff]  }
  0xc3   : > { %9692 = vmatprep.subr.bf16.mxu1 %v12505_v2  ;;  %v12595_v2 = vld [vmem:[#allocation5 + $0xc0] ss:$8 sps:$4 sm:$0xff]  }
  0xc4   : > { %9581 = vmatpush3.bf16.msra.mxu0 %v13974_v3 }
  0xc5   : > { %9582 = vmatprep.subr.bf16.mxu0 %v13977_v4 }
  0xc6   : > { %9693 = vmatpush3.bf16.msra.mxu1 %v13974_v3  ;;  %v12596_v3 = vld [vmem:[#allocation5 + $0x1c0] ss:$8 sps:$4 sm:$0xff]  }
  0xc7   : > { %1062 = vmatmul.mubr.bf16.gmra.mrb[4].mxu0 %v12529_v22  ;;  %1399 = vmatmul.mubr.bf16.gmra.mrb[4].mxu1 %v12530_v23  ;;  %v14071_v22 = vld [vmem:[%s13948_s28] sm:$0xff]   ;;  %v12625_v23 = vld [vmem:[#allocation5 + $0x210] ss:$8 sps:$4 sm:$0xff]  }
  0xc8   : > { %1069 = vmatprep.mubr.bf16.mxu0 %v12531_v24  ;;  %1406 = vmatprep.mubr.bf16.mxu1 %v12533_v25  ;;  %v12626_v24 = vld [vmem:[#allocation5 + $0x310] ss:$8 sps:$4 sm:$0xff]   ;;  %v14075_v25 = vld [vmem:[%s13948_s28 + $0x48] sm:$0xff]  }
  0xc9   : > { %9583 = vmatpush3.bf16.msra.mxu0 %v13982_v5  ;;  %9694 = vmatprep.subr.bf16.mxu1 %v13977_v4  ;;  %v12597_v4 = vld [vmem:[#allocation5 + $0xd4] ss:$8 sps:$4 sm:$0xff]  }
  0xca   : > { %9584 = vmatprep.subr.bf16.mxu0 %v13987_v6  ;;  %9695 = vmatpush3.bf16.msra.mxu1 %v13982_v5  ;;  %v12599_v5 = vld [vmem:[#allocation5 + $0x1d4] ss:$8 sps:$4 sm:$0xff]  }
  0xcb   : > { %9696 = vmatprep.subr.bf16.mxu1 %v13987_v6  ;;  %v12601_v6 = vld [vmem:[#allocation5 + $0xd0] ss:$8 sps:$4 sm:$0xff]  }
  0xcd   : > { %9585 = vmatpush3.bf16.msra.mxu0 %v13992_v7 }
  0xce   : > { %9586 = vmatprep.subr.bf16.mxu0 %v13997_v8  ;;  %9697 = vmatpush3.bf16.msra.mxu1 %v13992_v7  ;;  %v12602_v7 = vld [vmem:[#allocation5 + $0x1d0] ss:$8 sps:$4 sm:$0xff]  }
  0xcf   : > { %1070 = vmatmul.mubr.bf16.gmra.mrb[8].mxu0 %v12535_v26  ;;  %1407 = vmatmul.mubr.bf16.gmra.mrb[8].mxu1 %v12536_v27  ;;  %v12627_v26 = vld [vmem:[#allocation5 + $0x224] ss:$8 sps:$4 sm:$0xff]  }
  0xd0   : > { %1077 = vmatprep.mubr.bf16.mxu0 %v12537_v28  ;;  %1414 = vmatprep.mubr.bf16.mxu1 %v12539_v29  ;;  %v12629_v27 = vld [vmem:[#allocation5 + $0x324] ss:$8 sps:$4 sm:$0xff]   ;;  %v14085_v29 = vld [vmem:[%s13948_s28 + $0x50] sm:$0xff]  }
  0xd1   : > { %9587 = vmatpush3.bf16.msra.mxu0 %v14002_v9  ;;  %9698 = vmatprep.subr.bf16.mxu1 %v13997_v8  ;;  %v12603_v8 = vld [vmem:[#allocation5 + $0xe4] ss:$8 sps:$4 sm:$0xff]  }
  0xd2   : > { %9588 = vmatprep.subr.bf16.mxu0 %v14007_v10  ;;  %9699 = vmatpush3.bf16.msra.mxu1 %v14002_v9  ;;  %v12605_v9 = vld [vmem:[#allocation5 + $0x1e4] ss:$8 sps:$4 sm:$0xff]  }
  0xd3   : > { %9700 = vmatprep.subr.bf16.mxu1 %v14007_v10  ;;  %v12607_v10 = vld [vmem:[#allocation5 + $0xe0] ss:$8 sps:$4 sm:$0xff]  }
  0xd4   : > { %v14081_v28 = vld [vmem:[%s13948_s28 + $0x8] sm:$0xff]  }
  0xd5   : > { %9589 = vmatpush3.bf16.msra.mxu0 %v14012_v13 }
  0xd6   : > { %9590 = vmatprep.subr.bf16.mxu0 %v14017_v14  ;;  %9701 = vmatpush3.bf16.msra.mxu1 %v14012_v13  ;;  %v12611_v13 = vld [vmem:[#allocation5 + $0x1f4] ss:$8 sps:$4 sm:$0xff]  }
  0xd7   : > { %1078 = vmatmul.mubr.bf16.gmra.mrb[12].mxu0 %v12541_v30  ;;  %1415 = vmatmul.mubr.bf16.gmra.mrb[12].mxu1 %v12542_v31  ;;  %v12631_v30 = vld [vmem:[#allocation5 + $0x220] ss:$8 sps:$4 sm:$0xff]  }
  0xd8   : > { %1085 = vmatprep.mubr.bf16.mxu0 %v12543_v32  ;;  %1422 = vmatprep.mubr.bf16.mxu1 %v12545_v33  ;;  %v12632_v31 = vld [vmem:[#allocation5 + $0x320] ss:$8 sps:$4 sm:$0xff]   ;;  %v14090_v32 = vld [vmem:[%s13948_s28 + $0x10] sm:$0xff]   ;;  %v14095_v33 = vld [vmem:[%s13948_s28 + $0x58] sm:$0xff]  }
  0xd9   : > { %9591 = vmatpush3.bf16.msra.mxu0 %v14022_v15  ;;  %9702 = vmatprep.subr.bf16.mxu1 %v14017_v14  ;;  %v12613_v14 = vld [vmem:[#allocation5 + $0xf0] ss:$8 sps:$4 sm:$0xff]  }
  0xda   : > { %9592 = vmatprep.subr.bf16.mxu0 %v14027_v16  ;;  %9703 = vmatpush3.bf16.msra.mxu1 %v14022_v15  ;;  %v12614_v15 = vld [vmem:[#allocation5 + $0x1f0] ss:$8 sps:$4 sm:$0xff]  }
  0xdb   : > { %9704 = vmatprep.subr.bf16.mxu1 %v14027_v16  ;;  %v12617_v16 = vld [vmem:[#allocation5 + $0x204] ss:$8 sps:$4 sm:$0xff]  }
  0xdd   : > { %9593 = vmatpush3.bf16.msra.mxu0 %v14032_v17 }
  0xde   : > { %9705 = vmatpush3.bf16.msra.mxu1 %v14032_v17  ;;  %9802 = vmatprep.subr.bf16.mxu0 %v13963_v0  ;;  %v12620_v17 = vld [vmem:[#allocation5 + $0x304] ss:$8 sps:$4 sm:$0xff]  }
  0xdf   : > { %1086 = vmatmul.mubr.bf16.gmra.mrb[16].mxu0 %v12547_v34  ;;  %1423 = vmatmul.mubr.bf16.gmra.mrb[16].mxu1 %v12548_v35  ;;  %v12633_v34 = vld [vmem:[#allocation5 + $0x234] ss:$8 sps:$4 sm:$0xff]  }
  0xe0   : > { %1093 = vmatprep.mubr.bf16.mxu0 %v12549_v36  ;;  %1430 = vmatprep.mubr.bf16.mxu1 %v12551_v37  ;;  %v12635_v35 = vld [vmem:[#allocation5 + $0x334] ss:$8 sps:$4 sm:$0xff]   ;;  %v14105_v37 = vld [vmem:[%s13948_s28 + $0x60] sm:$0xff]  }
  0xe1   : > { %9914 = vmatprep.subr.bf16.mxu1 %v13963_v0  ;;  %v12591_v0 = vld [vmem:[#allocation5 + $0xc4] ss:$8 sps:$4 sm:$0xff]   ;;  %v14101_v36 = vld [vmem:[%s13948_s28 + $0x18] sm:$0xff]  }
  0xe7   : > { %1094 = vmatmul.mubr.bf16.gmra.mrb[20].mxu0 %v12553_v38  ;;  %1431 = vmatmul.mubr.bf16.gmra.mrb[20].mxu1 %v12554_v39  ;;  %v12637_v38 = vld [vmem:[#allocation5 + $0x230] ss:$8 sps:$4 sm:$0xff]  }
  0xe8   : > { %1101 = vmatprep.mubr.bf16.mxu0 %v12555_v40  ;;  %1438 = vmatprep.mubr.bf16.mxu1 %v12557_v41  ;;  %v12638_v39 = vld [vmem:[#allocation5 + $0x330] ss:$8 sps:$4 sm:$0xff]   ;;  %v14110_v40 = vld [vmem:[%s13948_s28 + $0x20] sm:$0xff]   ;;  %v14115_v41 = vld [vmem:[%s13948_s28 + $0x68] sm:$0xff]  }
  0xef   : > { %1102 = vmatmul.mubr.bf16.gmra.mrb[24].mxu0 %v12559_v42  ;;  %1439 = vmatmul.mubr.bf16.gmra.mrb[24].mxu1 %v12560_v43  ;;  %v12639_v42 = vld [vmem:[#allocation5 + $0x244] ss:$8 sps:$4 sm:$0xff]  }
  0xf0   : > { %1109 = vmatprep.mubr.bf16.mxu0 %v12561_v44  ;;  %1446 = vmatprep.mubr.bf16.mxu1 %v12563_v45  ;;  %v12641_v43 = vld [vmem:[#allocation5 + $0x344] ss:$8 sps:$4 sm:$0xff]   ;;  %v14125_v45 = vld [vmem:[%s13948_s28 + $0x70] sm:$0xff]  }
  0xf1   : > { %v14121_v44 = vld [vmem:[%s13948_s28 + $0x28] sm:$0xff]  }
  0xf7   : > { %1110 = vmatmul.mubr.bf16.gmra.mrb[28].mxu0 %v12565_v46  ;;  %1447 = vmatmul.mubr.bf16.gmra.mrb[28].mxu1 %v12566_v47  ;;  %v12643_v46 = vld [vmem:[#allocation5 + $0x240] ss:$8 sps:$4 sm:$0xff]  }
  0xf8   : > { %1117 = vmatprep.mubr.bf16.mxu0 %v12567_v48  ;;  %1454 = vmatprep.mubr.bf16.mxu1 %v12569_v49  ;;  %v12644_v47 = vld [vmem:[#allocation5 + $0x340] ss:$8 sps:$4 sm:$0xff]   ;;  %v14130_v48 = vld [vmem:[%s13948_s28 + $0x30] sm:$0xff]   ;;  %v14135_v49 = vld [vmem:[%s13948_s28 + $0x78] sm:$0xff]  }
  0xff   : > { %1118 = vmatmul.mubr.bf16.gmra.mrb[32].mxu0 %v12571_v50  ;;  %1455 = vmatmul.mubr.bf16.gmra.mrb[32].mxu1 %v12572_v51  ;;  %v12645_v50 = vld [vmem:[#allocation5 + $0x254] ss:$8 sps:$4 sm:$0xff]  }
 0x100   : > { %1125 = vmatprep.mubr.bf16.mxu0 %v12573_v52  ;;  %1462 = vmatprep.mubr.bf16.mxu1 %v12575_v53  ;;  %v12647_v51 = vld [vmem:[#allocation5 + $0x354] ss:$8 sps:$4 sm:$0xff]   ;;  %v14146_v53 = vld [vmem:[%s13948_s28 + $0x40] sm:$0xff]  }
 0x101   : > { %v14141_v52 = vld [vmem:[%s13948_s28 + $0x38] sm:$0xff]  }
 0x107   : > { %1126 = vmatmul.mubr.bf16.gmra.mrb[36].mxu0 %v12577_v54  ;;  %1463 = vmatmul.mubr.bf16.gmra.mrb[36].mxu1 %v12578_v55  ;;  %v12649_v54 = vld [vmem:[#allocation5 + $0x250] ss:$8 sps:$4 sm:$0xff]  }
 0x108   : > { %1133 = vmatprep.mubr.bf16.mxu0 %v12579_v56  ;;  %1470 = vmatprep.mubr.bf16.mxu1 %v12581_v57  ;;  %v12650_v55 = vld [vmem:[#allocation5 + $0x350] ss:$8 sps:$4 sm:$0xff]   ;;  %v12651_v56 = vld [vmem:[#allocation5 + $0x264] ss:$8 sps:$4 sm:$0xff]  }
 0x109   : > { %v12653_v57 = vld [vmem:[#allocation5 + $0x364] ss:$8 sps:$4 sm:$0xff]  }
 0x10f   : > { %1134 = vmatmul.mubr.bf16.gmra.mrb[40].mxu0 %v12583_v58  ;;  %1471 = vmatmul.mubr.bf16.gmra.mrb[40].mxu1 %v12584_v59  ;;  %v12655_v58 = vld [vmem:[#allocation5 + $0x260] ss:$8 sps:$4 sm:$0xff]  }
 0x110   : > { %1141 = vmatprep.mubr.bf16.mxu0 %v12585_v60  ;;  %1478 = vmatprep.mubr.bf16.mxu1 %v12587_v61  ;;  %v12656_v59 = vld [vmem:[#allocation5 + $0x360] ss:$8 sps:$4 sm:$0xff]   ;;  %v12657_v60 = vld [vmem:[#allocation5 + $0x274] ss:$8 sps:$4 sm:$0xff]  }
 0x111   : > { %v12659_v61 = vld [vmem:[#allocation5 + $0x374] ss:$8 sps:$4 sm:$0xff]  }
 0x117   : > { %1142 = vmatmul.mubr.bf16.gmra.mrb[44].mxu0 %v12589_v62  ;;  %1479 = vmatmul.mubr.bf16.gmra.mrb[44].mxu1 %v12590_v63  ;;  %v12661_v62 = vld [vmem:[#allocation5 + $0x270] ss:$8 sps:$4 sm:$0xff]  }
 0x118   : > { %1149 = vmatprep.mubr.bf16.mxu0 %v12591_v0  ;;  %1486 = vmatprep.mubr.bf16.mxu1 %v12593_v1  ;;  %v12662_v63 = vld [vmem:[#allocation5 + $0x370] ss:$8 sps:$4 sm:$0xff]   ;;  %v12663_v0 = vld [vmem:[#allocation5 + $0x284] ss:$8 sps:$4 sm:$0xff]  }
 0x119   : > { %v12665_v1 = vld [vmem:[#allocation5 + $0x384] ss:$8 sps:$4 sm:$0xff]  }
 0x11f   : > { %1150 = vmatmul.mubr.bf16.gmra.mrb[48].mxu0 %v12595_v2  ;;  %1487 = vmatmul.mubr.bf16.gmra.mrb[48].mxu1 %v12596_v3  ;;  %v12667_v2 = vld [vmem:[#allocation5 + $0x280] ss:$8 sps:$4 sm:$0xff]  }
 0x120   : > { %1157 = vmatprep.mubr.bf16.mxu0 %v12597_v4  ;;  %1494 = vmatprep.mubr.bf16.mxu1 %v12599_v5  ;;  %v12668_v3 = vld [vmem:[#allocation5 + $0x380] ss:$8 sps:$4 sm:$0xff]   ;;  %v12669_v4 = vld [vmem:[#allocation5 + $0x294] ss:$8 sps:$4 sm:$0xff]  }
 0x121   : > { %v12671_v5 = vld [vmem:[#allocation5 + $0x394] ss:$8 sps:$4 sm:$0xff]  }
 0x127   : > { %1158 = vmatmul.mubr.bf16.gmra.mrb[52].mxu0 %v12601_v6  ;;  %1495 = vmatmul.mubr.bf16.gmra.mrb[52].mxu1 %v12602_v7  ;;  %v12673_v6 = vld [vmem:[#allocation5 + $0x290] ss:$8 sps:$4 sm:$0xff]  }
 0x128   : > { %1165 = vmatprep.mubr.bf16.mxu0 %v12603_v8  ;;  %1502 = vmatprep.mubr.bf16.mxu1 %v12605_v9  ;;  %v12674_v7 = vld [vmem:[#allocation5 + $0x390] ss:$8 sps:$4 sm:$0xff]   ;;  %v12675_v8 = vld [vmem:[#allocation5 + $0x2a4] ss:$8 sps:$4 sm:$0xff]  }
 0x129   : > { %v12677_v9 = vld [vmem:[#allocation5 + $0x3a4] ss:$8 sps:$4 sm:$0xff]  }
 0x12f   : > { %1166 = vmatmul.mubr.bf16.gmra.mrb[56].mxu0 %v12607_v10  ;;  %1503 = vmatmul.mubr.bf16.gmra.mrb[56].mxu1 %v12608_v11  ;;  %v12679_v10 = vld [vmem:[#allocation5 + $0x2a0] ss:$8 sps:$4 sm:$0xff]  }
 0x130   : > { %1173 = vmatprep.mubr.bf16.mxu0 %v12609_v12  ;;  %1510 = vmatprep.mubr.bf16.mxu1 %v12611_v13  ;;  %v12680_v11 = vld [vmem:[#allocation5 + $0x3a0] ss:$8 sps:$4 sm:$0xff]   ;;  %v12681_v12 = vld [vmem:[#allocation5 + $0x2b4] ss:$8 sps:$4 sm:$0xff]  }
 0x131   : > { %v12683_v13 = vld [vmem:[#allocation5 + $0x3b4] ss:$8 sps:$4 sm:$0xff]  }
 0x137   : > { %1174 = vmatmul.mubr.bf16.gmra.mrb[60].mxu0 %v12613_v14  ;;  %1511 = vmatmul.mubr.bf16.gmra.mrb[60].mxu1 %v12614_v15 }
 0x138   : > { %1727 = vmatprep.mubr.bf16.mxu0 %v12617_v16  ;;  %2064 = vmatprep.mubr.bf16.mxu1 %v12620_v17  ;;  %v12685_v17 = vld [vmem:[#allocation5 + $0x2b0] ss:$8 sps:$4 sm:$0xff]  }
 0x13f   : > { %1728 = vmatmul.mubr.bf16.vlgmr.msra.gmra.mrb[64].mxu0 %v12615_v18  ;;  %2065 = vmatmul.mubr.bf16.vlgmr.msra.gmra.mrb[64].mxu1 %v12618_v19  ;;  %v12686_v18 = vld [vmem:[#allocation5 + $0x3b0] ss:$8 sps:$4 sm:$0xff]  }
 0x140   : > { %9803 = vmatpush3.bf16.msra.mxu0 %v14071_v22  ;;  %1735 = vmatprep.mubr.bf16.mxu0 %v12621_v20 }
 0x141   : > { %2072 = vmatprep.mubr.bf16.mxu1 %v12623_v21  ;;  %9804 = vmatprep.subr.bf16.mxu0 %v14075_v25 }
 0x142   : > { %9915 = vmatpush3.bf16.msra.mxu1 %v14071_v22 }
 0x143   : > { %9916 = vmatprep.subr.bf16.mxu1 %v14075_v25 }
 0x144   : > { %9805 = vmatpush3.bf16.msra.mxu0 %v14081_v28 }
 0x145   : > { %9806 = vmatprep.subr.bf16.mxu0 %v14085_v29 }
 0x146   : > { %9917 = vmatpush3.bf16.msra.mxu1 %v14081_v28 }
 0x147   : > { %1736 = vmatmul.mubr.bf16.gmra.mrb[68].mxu0 %v12625_v23  ;;  %2073 = vmatmul.mubr.bf16.gmra.mrb[68].mxu1 %v12626_v24  ;;  %v12687_v23 = vld [vmem:[#allocation5 + $0x2c4] ss:$8 sps:$4 sm:$0xff]  }
 0x148   : > { %1743 = vmatprep.mubr.bf16.mxu0 %v12627_v26  ;;  %2080 = vmatprep.mubr.bf16.mxu1 %v12629_v27  ;;  %v12689_v24 = vld [vmem:[#allocation5 + $0x3c4] ss:$8 sps:$4 sm:$0xff]  }
 0x149   : > { %9807 = vmatpush3.bf16.msra.mxu0 %v14090_v32  ;;  %9918 = vmatprep.subr.bf16.mxu1 %v14085_v29 }
 0x14a   : > { %9808 = vmatprep.subr.bf16.mxu0 %v14095_v33  ;;  %9919 = vmatpush3.bf16.msra.mxu1 %v14090_v32 }
 0x14b   : > { %9920 = vmatprep.subr.bf16.mxu1 %v14095_v33 }
 0x14d   : > { %9809 = vmatpush3.bf16.msra.mxu0 %v14101_v36 }
 0x14e   : > { %9810 = vmatprep.subr.bf16.mxu0 %v14105_v37  ;;  %9921 = vmatpush3.bf16.msra.mxu1 %v14101_v36 }
 0x14f   : > { %1744 = vmatmul.mubr.bf16.gmra.mrb[72].mxu0 %v12631_v30  ;;  %2081 = vmatmul.mubr.bf16.gmra.mrb[72].mxu1 %v12632_v31 }
 0x150   : > { %1751 = vmatprep.mubr.bf16.mxu0 %v12633_v34  ;;  %2088 = vmatprep.mubr.bf16.mxu1 %v12635_v35 }
 0x151   : > { %9811 = vmatpush3.bf16.msra.mxu0 %v14110_v40  ;;  %9922 = vmatprep.subr.bf16.mxu1 %v14105_v37 }
 0x152   : > { %9812 = vmatprep.subr.bf16.mxu0 %v14115_v41  ;;  %9923 = vmatpush3.bf16.msra.mxu1 %v14110_v40 }
 0x153   : > { %9924 = vmatprep.subr.bf16.mxu1 %v14115_v41 }
 0x155   : > { %9813 = vmatpush3.bf16.msra.mxu0 %v14121_v44 }
 0x156   : > { %9814 = vmatprep.subr.bf16.mxu0 %v14125_v45  ;;  %9925 = vmatpush3.bf16.msra.mxu1 %v14121_v44 }
 0x157   : > { %1752 = vmatmul.mubr.bf16.gmra.mrb[76].mxu0 %v12637_v38  ;;  %2089 = vmatmul.mubr.bf16.gmra.mrb[76].mxu1 %v12638_v39  ;;  %v12758_v38 = vld [vmem:[#allocation5 + $0x570] ss:$8 sps:$4 sm:$0xff]  }
 0x158   : > { %1759 = vmatprep.mubr.bf16.mxu0 %v12639_v42  ;;  %2096 = vmatprep.mubr.bf16.mxu1 %v12641_v43 }
 0x159   : > { %9815 = vmatpush3.bf16.msra.mxu0 %v14130_v48  ;;  %9926 = vmatprep.subr.bf16.mxu1 %v14125_v45 }
 0x15a   : > { %9816 = vmatprep.subr.bf16.mxu0 %v14135_v49  ;;  %9927 = vmatpush3.bf16.msra.mxu1 %v14130_v48 }
 0x15b   : > { %9928 = vmatprep.subr.bf16.mxu1 %v14135_v49 }
 0x15d   : > { %9817 = vmatpush3.bf16.msra.mxu0 %v14141_v52 }
 0x15e   : > { %9929 = vmatpush3.bf16.msra.mxu1 %v14141_v52  ;;  %10026 = vmatprep.subr.bf16.mxu0 %v14146_v53 }
 0x15f   : > { %1760 = vmatmul.mubr.bf16.gmra.mrb[80].mxu0 %v12643_v46  ;;  %2097 = vmatmul.mubr.bf16.gmra.mrb[80].mxu1 %v12644_v47  ;;  %v12691_v47 = vld [vmem:[#allocation5 + $0x2c0] ss:$8 sps:$4 sm:$0xff]  }
 0x160   : > { %1767 = vmatprep.mubr.bf16.mxu0 %v12645_v50  ;;  %2104 = vmatprep.mubr.bf16.mxu1 %v12647_v51  ;;  %v12692_v50 = vld [vmem:[#allocation5 + $0x3c0] ss:$8 sps:$4 sm:$0xff]  }
 0x161   : > { %10138 = vmatprep.subr.bf16.mxu1 %v14146_v53 }
 0x167   : > { %1768 = vmatmul.mubr.bf16.gmra.mrb[84].mxu0 %v12649_v54  ;;  %2105 = vmatmul.mubr.bf16.gmra.mrb[84].mxu1 %v12650_v55 }
 0x168   : > { %1775 = vmatprep.mubr.bf16.mxu0 %v12651_v56  ;;  %2112 = vmatprep.mubr.bf16.mxu1 %v12653_v57  ;;  %v12693_v56 = vld [vmem:[#allocation5 + $0x2d4] ss:$8 sps:$4 sm:$0xff]  }
 0x169   : > { %v12695_v57 = vld [vmem:[#allocation5 + $0x3d4] ss:$8 sps:$4 sm:$0xff]  }
 0x16f   : > { %1776 = vmatmul.mubr.bf16.gmra.mrb[88].mxu0 %v12655_v58  ;;  %2113 = vmatmul.mubr.bf16.gmra.mrb[88].mxu1 %v12656_v59 }
 0x170   : > { %1783 = vmatprep.mubr.bf16.mxu0 %v12657_v60  ;;  %2120 = vmatprep.mubr.bf16.mxu1 %v12659_v61 }
 0x177   : > { %1784 = vmatmul.mubr.bf16.gmra.mrb[92].mxu0 %v12661_v62  ;;  %2121 = vmatmul.mubr.bf16.gmra.mrb[92].mxu1 %v12662_v63 }
 0x178   : > { %1791 = vmatprep.mubr.bf16.mxu0 %v12663_v0  ;;  %2128 = vmatprep.mubr.bf16.mxu1 %v12665_v1  ;;  %v12757_v1 = vld [vmem:[#allocation5 + $0x470] ss:$8 sps:$4 sm:$0xff]  }
 0x17f   : > { %1792 = vmatmul.mubr.bf16.gmra.mrb[96].mxu0 %v12667_v2  ;;  %2129 = vmatmul.mubr.bf16.gmra.mrb[96].mxu1 %v12668_v3 }
 0x180   : > { %1799 = vmatprep.mubr.bf16.mxu0 %v12669_v4  ;;  %2136 = vmatprep.mubr.bf16.mxu1 %v12671_v5  ;;  %v12697_v5 = vld [vmem:[#allocation5 + $0x2d0] ss:$8 sps:$4 sm:$0xff]  }
 0x187   : > { %1800 = vmatmul.mubr.bf16.gmra.mrb[100].mxu0 %v12673_v6  ;;  %2137 = vmatmul.mubr.bf16.gmra.mrb[100].mxu1 %v12674_v7  ;;  %v12698_v6 = vld [vmem:[#allocation5 + $0x3d0] ss:$8 sps:$4 sm:$0xff]  }
 0x188   : > { %1807 = vmatprep.mubr.bf16.mxu0 %v12675_v8  ;;  %2144 = vmatprep.mubr.bf16.mxu1 %v12677_v9 }
 0x18f   : > { %1808 = vmatmul.mubr.bf16.gmra.mrb[104].mxu0 %v12679_v10  ;;  %2145 = vmatmul.mubr.bf16.gmra.mrb[104].mxu1 %v12680_v11  ;;  %v12699_v10 = vld [vmem:[#allocation5 + $0x2e4] ss:$8 sps:$4 sm:$0xff]  }
 0x190   : > { %1815 = vmatprep.mubr.bf16.mxu0 %v12681_v12  ;;  %2152 = vmatprep.mubr.bf16.mxu1 %v12683_v13  ;;  %v12701_v11 = vld [vmem:[#allocation5 + $0x3e4] ss:$8 sps:$4 sm:$0xff]  }
 0x192   : > { %v9370_v14 = vpop.f32.mrb[0].mxu0  ;;  %v9482_v15 = vpop.f32.mrb[0].mxu1 }
 0x193   : > { %v9371_v16 = vpop.f32.mrb[1].mxu0  ;;  %v9483_v19 = vpop.f32.mrb[1].mxu1 }
 0x194   : > { %v14150_v20 = vadd.f32 %v9371_v16, %v9370_v14  ;;  %v9373_v21 = vpop.f32.mrb[2].mxu0  ;;  %v14152_v26 = vadd.f32 %v9483_v19, %v9482_v15  ;;  %v9485_v27 = vpop.f32.mrb[2].mxu1 }
 0x195   : > { %v9374_v30 = vpop.f32.mrb[3].mxu0  ;;  %v9486_v31 = vpop.f32.mrb[3].mxu1 }
 0x196   : > { %v14154_v34 = vadd.f32 %v9374_v30, %v9373_v21  ;;  %v14156_v35 = vadd.f32 %v9486_v31, %v9485_v27  ;;  %v12703_v27 = vld [vmem:[#allocation5 + $0x2e0] ss:$8 sps:$4 sm:$0xff]  }
 0x197   : > { %1816 = vmatmul.mubr.bf16.gmra.mrb[108].mxu0 %v12685_v17  ;;  %2153 = vmatmul.mubr.bf16.gmra.mrb[108].mxu1 %v12686_v18  ;;  %v12704_v30 = vld [vmem:[#allocation5 + $0x3e0] ss:$8 sps:$4 sm:$0xff]  }
 0x198   : > { %1823 = vmatprep.mubr.bf16.mxu0 %v12687_v23  ;;  %2160 = vmatprep.mubr.bf16.mxu1 %v12689_v24  ;;  %v12752_v18 = vld [vmem:[#allocation5 + $0x560] ss:$8 sps:$4 sm:$0xff]  }
 0x19a   : > { %v9376_v42 = vpop.f32.mrb[4].mxu0  ;;  %v9488_v43 = vpop.f32.mrb[4].mxu1 }
 0x19b   : > { %v9377_v46 = vpop.f32.mrb[5].mxu0  ;;  %v9489_v51 = vpop.f32.mrb[5].mxu1 }
 0x19c   : > { %v14162_v54 = vadd.f32 %v9377_v46, %v9376_v42  ;;  %v9379_v55 = vpop.f32.mrb[6].mxu0  ;;  %v14164_v58 = vadd.f32 %v9489_v51, %v9488_v43  ;;  %v9491_v59 = vpop.f32.mrb[6].mxu1  ;;  %v12705_v46 = vld [vmem:[#allocation5 + $0x2f4] ss:$8 sps:$4 sm:$0xff]  }
 0x19d   : > { %v9380_v60 = vpop.f32.mrb[7].mxu0  ;;  %v9492_v61 = vpop.f32.mrb[7].mxu1 }
 0x19e   : > { %v14166_v62 = vadd.f32 %v9380_v60, %v9379_v55  ;;  %v14168_v63 = vadd.f32 %v9492_v61, %v9491_v59  ;;  %v12751_v61 = vld [vmem:[#allocation5 + $0x460] ss:$8 sps:$4 sm:$0xff]  }
 0x19f   : > { %1824 = vmatmul.mubr.bf16.gmra.mrb[112].mxu0 %v12691_v47  ;;  %2161 = vmatmul.mubr.bf16.gmra.mrb[112].mxu1 %v12692_v50  ;;  %v12707_v47 = vld [vmem:[#allocation5 + $0x3f4] ss:$8 sps:$4 sm:$0xff]  }
 0x1a0   : > { %1831 = vmatprep.mubr.bf16.mxu0 %v12693_v56  ;;  %2168 = vmatprep.mubr.bf16.mxu1 %v12695_v57 }
 0x1a2   : > { %v9382_v2 = vpop.f32.mrb[8].mxu0  ;;  %v9494_v3 = vpop.f32.mrb[8].mxu1 }
 0x1a3   : > { %v9383_v4 = vpop.f32.mrb[9].mxu0  ;;  %v9495_v7 = vpop.f32.mrb[9].mxu1 }
 0x1a4   : > { %v14174_v8 = vadd.f32 %v9383_v4, %v9382_v2  ;;  %v9385_v9 = vpop.f32.mrb[10].mxu0  ;;  %v14176_v12 = vadd.f32 %v9495_v7, %v9494_v3  ;;  %v9497_v13 = vpop.f32.mrb[10].mxu1 }
 0x1a5   : > { %v9386_v14 = vpop.f32.mrb[11].mxu0  ;;  %v9498_v15 = vpop.f32.mrb[11].mxu1 }
 0x1a6   : > { %v14178_v16 = vadd.f32 %v9386_v14, %v9385_v9  ;;  %v14180_v17 = vadd.f32 %v9498_v15, %v9497_v13  ;;  %v12716_v13 = vld [vmem:[#allocation5 + $0x504] ss:$8 sps:$4 sm:$0xff]  }
 0x1a7   : > { %1832 = vmatmul.mubr.bf16.gmra.mrb[116].mxu0 %v12697_v5  ;;  %2169 = vmatmul.mubr.bf16.gmra.mrb[116].mxu1 %v12698_v6  ;;  %v12709_v5 = vld [vmem:[#allocation5 + $0x2f0] ss:$8 sps:$4 sm:$0xff]  }
 0x1a8   : > { %1839 = vmatprep.mubr.bf16.mxu0 %v12699_v10  ;;  %2176 = vmatprep.mubr.bf16.mxu1 %v12701_v11  ;;  %v12710_v6 = vld [vmem:[#allocation5 + $0x3f0] ss:$8 sps:$4 sm:$0xff]   ;;  %v12713_v11 = vld [vmem:[#allocation5 + $0x404] ss:$8 sps:$4 sm:$0xff]  }
 0x1aa   : > { %v9388_v21 = vpop.f32.mrb[12].mxu0  ;;  %v9500_v23 = vpop.f32.mrb[12].mxu1 }
 0x1ab   : > { %v9389_v24 = vpop.f32.mrb[13].mxu0  ;;  %v9501_v31 = vpop.f32.mrb[13].mxu1 }
 0x1ac   : > { %v14186_v42 = vadd.f32 %v9389_v24, %v9388_v21  ;;  %v9391_v43 = vpop.f32.mrb[14].mxu0  ;;  %v14188_v50 = vadd.f32 %v9501_v31, %v9500_v23  ;;  %v9503_v51 = vpop.f32.mrb[14].mxu1 }
 0x1ad   : > { %v9392_v55 = vpop.f32.mrb[15].mxu0  ;;  %v9504_v56 = vpop.f32.mrb[15].mxu1 }
 0x1ae   : > { %v14190_v57 = vadd.f32 %v9392_v55, %v9391_v43  ;;  %v14192_v59 = vadd.f32 %v9504_v56, %v9503_v51  ;;  %v12711_v51 = vld [vmem:[#allocation5 + $0x400] ss:$8 sps:$4 sm:$0xff]  }
 0x1af   : > { %1840 = vmatmul.mubr.bf16.gmra.mrb[120].mxu0 %v12703_v27  ;;  %2177 = vmatmul.mubr.bf16.gmra.mrb[120].mxu1 %v12704_v30  ;;  %v12714_v55 = vld [vmem:[#allocation5 + $0x500] ss:$8 sps:$4 sm:$0xff]  }
 0x1b0   : > { %1847 = vmatprep.mubr.bf16.mxu0 %v12705_v46  ;;  %2184 = vmatprep.mubr.bf16.mxu1 %v12707_v47 }
 0x1b2   : > { %v9394_v2 = vpop.f32.mrb[16].mxu0  ;;  %v9506_v3 = vpop.f32.mrb[16].mxu1 }
 0x1b3   : > { %v9395_v4 = vpop.f32.mrb[17].mxu0  ;;  %v9507_v7 = vpop.f32.mrb[17].mxu1 }
 0x1b4   : > { %v14198_v9 = vadd.f32 %v9395_v4, %v9394_v2  ;;  %v9397_v10 = vpop.f32.mrb[18].mxu0  ;;  %v14200_v14 = vadd.f32 %v9507_v7, %v9506_v3  ;;  %v9509_v15 = vpop.f32.mrb[18].mxu1  ;;  %v12717_v4 = vld [vmem:[#allocation5 + $0x414] ss:$8 sps:$4 sm:$0xff]  }
 0x1b5   : > { %v9398_v21 = vpop.f32.mrb[19].mxu0  ;;  %v9510_v23 = vpop.f32.mrb[19].mxu1 }
 0x1b6   : > { %v14202_v24 = vadd.f32 %v9398_v21, %v9397_v10  ;;  %v14204_v27 = vadd.f32 %v9510_v23, %v9509_v15  ;;  %v12719_v10 = vld [vmem:[#allocation5 + $0x514] ss:$8 sps:$4 sm:$0xff]  }
 0x1b7   : > { %1848 = vmatmul.mubr.bf16.gmra.mrb[124].mxu0 %v12709_v5  ;;  %2185 = vmatmul.mubr.bf16.gmra.mrb[124].mxu1 %v12710_v6 }
 0x1b8   : > { %2401 = vmatprep.mubr.bf16.mxu0 %v12713_v11  ;;  %2738 = vmatprep.mubr.bf16.mxu1 %v12716_v13 }
 0x1ba   : > { %v9400_v43 = vpop.f32.mrb[20].mxu0  ;;  %v9512_v46 = vpop.f32.mrb[20].mxu1 }
 0x1bb   : > { %v9401_v47 = vpop.f32.mrb[21].mxu0  ;;  %v9513_v56 = vpop.f32.mrb[21].mxu1 }
 0x1bc   : > { %v14210_v2 = vadd.f32 %v9401_v47, %v9400_v43  ;;  %v9403_v3 = vpop.f32.mrb[22].mxu0  ;;  %v14212_v5 = vadd.f32 %v9513_v56, %v9512_v46  ;;  %v9515_v6 = vpop.f32.mrb[22].mxu1  ;;  %v12721_v56 = vld [vmem:[#allocation5 + $0x410] ss:$8 sps:$4 sm:$0xff]  }
 0x1bd   : > { %v9404_v7 = vpop.f32.mrb[23].mxu0  ;;  %v9516_v11 = vpop.f32.mrb[23].mxu1 }
 0x1be   : > { %v14214_v13 = vadd.f32 %v9404_v7, %v9403_v3  ;;  %v14216_v15 = vadd.f32 %v9516_v11, %v9515_v6  ;;  %v12725_v7 = vld [vmem:[#allocation5 + $0x524] ss:$8 sps:$4 sm:$0xff]  }
 0x1bf   : > { %2402 = vmatmul.mubr.bf16.vlgmr.msra.gmra.mrb[128].mxu0 %v12711_v51  ;;  %2739 = vmatmul.mubr.bf16.vlgmr.msra.gmra.mrb[128].mxu1 %v12714_v55  ;;  %v12722_v51 = vld [vmem:[#allocation5 + $0x510] ss:$8 sps:$4 sm:$0xff]  }
 0x1c0   : > { %10027 = vmatpush3.bf16.msra.mxu0 %v14071_v22  ;;  %2409 = vmatprep.mubr.bf16.mxu0 %v12717_v4  ;;  %v12723_v4 = vld [vmem:[#allocation5 + $0x424] ss:$8 sps:$4 sm:$0xff]  }
 0x1c1   : > { %2746 = vmatprep.mubr.bf16.mxu1 %v12719_v10  ;;  %10028 = vmatprep.subr.bf16.mxu0 %v14075_v25 }
 0x1c2   : > { %v9406_v43 = vpop.f32.mrb[24].mxu0  ;;  %v9518_v46 = vpop.f32.mrb[24].mxu1  ;;  %10139 = vmatpush3.bf16.msra.mxu1 %v14071_v22 }
 0x1c3   : > { %v9407_v47 = vpop.f32.mrb[25].mxu0  ;;  %v9519_v55 = vpop.f32.mrb[25].mxu1  ;;  %10140 = vmatprep.subr.bf16.mxu1 %v14075_v25 }
 0x1c4   : > { %v14226_v3 = vadd.f32 %v9407_v47, %v9406_v43  ;;  %v9409_v6 = vpop.f32.mrb[26].mxu0  ;;  %10029 = vmatpush3.bf16.msra.mxu0 %v14081_v28  ;;  %v14229_v10 = vadd.f32 %v9519_v55, %v9518_v46  ;;  %v9521_v11 = vpop.f32.mrb[26].mxu1  ;;  %v12728_v47 = vld [vmem:[#allocation5 + $0x520] ss:$8 sps:$4 sm:$0xff]  }
 0x1c5   : > { %v9410_v21 = vpop.f32.mrb[27].mxu0  ;;  %v9522_v23 = vpop.f32.mrb[27].mxu1  ;;  %10030 = vmatprep.subr.bf16.mxu0 %v14085_v29 }
 0x1c6   : > { %v14232_v22 = vadd.f32 %v9410_v21, %v9409_v6  ;;  %v14234_v30 = vadd.f32 %v9522_v23, %v9521_v11  ;;  %10141 = vmatpush3.bf16.msra.mxu1 %v14081_v28  ;;  %v12727_v23 = vld [vmem:[#allocation5 + $0x420] ss:$8 sps:$4 sm:$0xff]   ;;  %v12729_v6 = vld [vmem:[#allocation5 + $0x434] ss:$8 sps:$4 sm:$0xff]  }
 0x1c7   : > { %2410 = vmatmul.mubr.bf16.gmra.mrb[132].mxu0 %v12721_v56  ;;  %2747 = vmatmul.mubr.bf16.gmra.mrb[132].mxu1 %v12722_v51 }
 0x1c8   : > { %2417 = vmatprep.mubr.bf16.mxu0 %v12723_v4  ;;  %2754 = vmatprep.mubr.bf16.mxu1 %v12725_v7  ;;  %v12731_v4 = vld [vmem:[#allocation5 + $0x534] ss:$8 sps:$4 sm:$0xff]  }
 0x1c9   : > { %10031 = vmatpush3.bf16.msra.mxu0 %v14090_v32  ;;  %10142 = vmatprep.subr.bf16.mxu1 %v14085_v29 }
 0x1ca   : > { %v9412_v21 = vpop.f32.mrb[28].mxu0  ;;  %v9524_v46 = vpop.f32.mrb[28].mxu1  ;;  %10032 = vmatprep.subr.bf16.mxu0 %v14095_v33  ;;  %10143 = vmatpush3.bf16.msra.mxu1 %v14090_v32 }
 0x1cb   : > { %v9413_v28 = vpop.f32.mrb[29].mxu0  ;;  %v9525_v56 = vpop.f32.mrb[29].mxu1  ;;  %10144 = vmatprep.subr.bf16.mxu1 %v14095_v33 }
 0x1cc   : > { %v14246_v51 = vadd.f32 %v9413_v28, %v9412_v21  ;;  %v9415_v55 = vpop.f32.mrb[30].mxu0  ;;  %v14248_v7 = vadd.f32 %v9525_v56, %v9524_v46  ;;  %v9527_v29 = vpop.f32.mrb[30].mxu1  ;;  %v12733_v28 = vld [vmem:[#allocation5 + $0x430] ss:$8 sps:$4 sm:$0xff]  }
 0x1cd   : > { %v9416_v11 = vpop.f32.mrb[31].mxu0  ;;  %v9528_v25 = vpop.f32.mrb[31].mxu1  ;;  %10033 = vmatpush3.bf16.msra.mxu0 %v14101_v36 }
 0x1ce   : > { %v14251_v43 = vadd.f32 %v9416_v11, %v9415_v55  ;;  %v14253_v32 = vadd.f32 %v9528_v25, %v9527_v29  ;;  %10034 = vmatprep.subr.bf16.mxu0 %v14105_v37  ;;  %10145 = vmatpush3.bf16.msra.mxu1 %v14101_v36 }
 0x1cf   : > { %2418 = vmatmul.mubr.bf16.gmra.mrb[136].mxu0 %v12727_v23  ;;  %2755 = vmatmul.mubr.bf16.gmra.mrb[136].mxu1 %v12728_v47  ;;  %v12734_v23 = vld [vmem:[#allocation5 + $0x530] ss:$8 sps:$4 sm:$0xff]  }
 0x1d0   : > { %2425 = vmatprep.mubr.bf16.mxu0 %v12729_v6  ;;  %2762 = vmatprep.mubr.bf16.mxu1 %v12731_v4  ;;  %v12735_v6 = vld [vmem:[#allocation5 + $0x444] ss:$8 sps:$4 sm:$0xff]  }
 0x1d1   : > { %10035 = vmatpush3.bf16.msra.mxu0 %v14110_v40  ;;  %10146 = vmatprep.subr.bf16.mxu1 %v14105_v37  ;;  %v12737_v4 = vld [vmem:[#allocation5 + $0x544] ss:$8 sps:$4 sm:$0xff]  }
 0x1d2   : > { %v9418_v25 = vpop.f32.mrb[32].mxu0  ;;  %v9530_v46 = vpop.f32.mrb[32].mxu1  ;;  %10036 = vmatprep.subr.bf16.mxu0 %v14115_v41  ;;  %10147 = vmatpush3.bf16.msra.mxu1 %v14110_v40 }
 0x1d3   : > { %v9419_v36 = vpop.f32.mrb[33].mxu0  ;;  %v9531_v47 = vpop.f32.mrb[33].mxu1  ;;  %10148 = vmatprep.subr.bf16.mxu1 %v14115_v41 }
 0x1d4   : > { %v14266_v56 = vadd.f32 %v9419_v36, %v9418_v25  ;;  %v9421_v55 = vpop.f32.mrb[34].mxu0  ;;  %v14268_v29 = vadd.f32 %v9531_v47, %v9530_v46  ;;  %v9533_v37 = vpop.f32.mrb[34].mxu1  ;;  %v12739_v36 = vld [vmem:[#allocation5 + $0x440] ss:$8 sps:$4 sm:$0xff]  }
 0x1d5   : > { %v9422_v11 = vpop.f32.mrb[35].mxu0  ;;  %v9534_v33 = vpop.f32.mrb[35].mxu1  ;;  %10037 = vmatpush3.bf16.msra.mxu0 %v14121_v44  ;;  %v12831_v25 = vld [vmem:[#allocation7 + $0x40] sm:$0xff]  }
 0x1d6   : > { %v14271_v21 = vadd.f32 %v9422_v11, %v9421_v55  ;;  %v14273_v40 = vadd.f32 %v9534_v33, %v9533_v37  ;;  %10038 = vmatprep.subr.bf16.mxu0 %v14125_v45  ;;  %10149 = vmatpush3.bf16.msra.mxu1 %v14121_v44 }
 0x1d7   : > { %2426 = vmatmul.mubr.bf16.gmra.mrb[140].mxu0 %v12733_v28  ;;  %2763 = vmatmul.mubr.bf16.gmra.mrb[140].mxu1 %v12734_v23  ;;  %v12740_v28 = vld [vmem:[#allocation5 + $0x540] ss:$8 sps:$4 sm:$0xff]  }
 0x1d8   : > { %2433 = vmatprep.mubr.bf16.mxu0 %v12735_v6  ;;  %2770 = vmatprep.mubr.bf16.mxu1 %v12737_v4  ;;  %v12741_v6 = vld [vmem:[#allocation5 + $0x454] ss:$8 sps:$4 sm:$0xff]  }
 0x1d9   : > { %10039 = vmatpush3.bf16.msra.mxu0 %v14130_v48  ;;  %10150 = vmatprep.subr.bf16.mxu1 %v14125_v45  ;;  %v12743_v4 = vld [vmem:[#allocation5 + $0x554] ss:$8 sps:$4 sm:$0xff]  }
 0x1da   : > { %v9424_v33 = vpop.f32.mrb[36].mxu0  ;;  %v9536_v46 = vpop.f32.mrb[36].mxu1  ;;  %10040 = vmatprep.subr.bf16.mxu0 %v14135_v49  ;;  %10151 = vmatpush3.bf16.msra.mxu1 %v14130_v48 }
 0x1db   : > { %v9425_v44 = vpop.f32.mrb[37].mxu0  ;;  %v9537_v23 = vpop.f32.mrb[37].mxu1  ;;  %10152 = vmatprep.subr.bf16.mxu1 %v14135_v49 }
 0x1dc   : > { %v14286_v47 = vadd.f32 %v9425_v44, %v9424_v33  ;;  %v9427_v55 = vpop.f32.mrb[38].mxu0  ;;  %v14288_v37 = vadd.f32 %v9537_v23, %v9536_v46  ;;  %v9539_v45 = vpop.f32.mrb[38].mxu1 }
 0x1dd   : > { %v9428_v11 = vpop.f32.mrb[39].mxu0  ;;  %v9540_v41 = vpop.f32.mrb[39].mxu1  ;;  %10041 = vmatpush3.bf16.msra.mxu0 %v14141_v52 }
 0x1de   : > { %v14291_v48 = vadd.f32 %v9428_v11, %v9427_v55  ;;  %v14293_v31 = vadd.f32 %v9540_v41, %v9539_v45  ;;  %10153 = vmatpush3.bf16.msra.mxu1 %v14141_v52  ;;  %10250 = vmatprep.subr.bf16.mxu0 %v14146_v53  ;;  %v12745_v41 = vld [vmem:[#allocation5 + $0x450] ss:$8 sps:$4 sm:$0xff]  }
 0x1df   : > { %2434 = vmatmul.mubr.bf16.gmra.mrb[144].mxu0 %v12739_v36  ;;  %2771 = vmatmul.mubr.bf16.gmra.mrb[144].mxu1 %v12740_v28  ;;  %v12746_v55 = vld [vmem:[#allocation5 + $0x550] ss:$8 sps:$4 sm:$0xff]   ;;  %v12747_v36 = vld [vmem:[#allocation5 + $0x464] ss:$8 sps:$4 sm:$0xff]  }
 0x1e0   : > { %2441 = vmatprep.mubr.bf16.mxu0 %v12741_v6  ;;  %2778 = vmatprep.mubr.bf16.mxu1 %v12743_v4  ;;  %v12749_v28 = vld [vmem:[#allocation5 + $0x564] ss:$8 sps:$4 sm:$0xff]  }
 0x1e1   : > { %10362 = vmatprep.subr.bf16.mxu1 %v12831_v25 }
 0x1e2   : > { %v9430_v46 = vpop.f32.mrb[40].mxu0  ;;  %v9542_v44 = vpop.f32.mrb[40].mxu1 }
 0x1e3   : > { %v9431_v23 = vpop.f32.mrb[41].mxu0  ;;  %v9543_v45 = vpop.f32.mrb[41].mxu1 }
 0x1e4   : > { %v14301_v52 = vadd.f32 %v9431_v23, %v9430_v46  ;;  %v9433_v53 = vpop.f32.mrb[42].mxu0  ;;  %v14303_v11 = vadd.f32 %v9543_v45, %v9542_v44  ;;  %v9545_v49 = vpop.f32.mrb[42].mxu1 }
 0x1e5   : > { %v9434_v6 = vpop.f32.mrb[43].mxu0  ;;  %v9546_v4 = vpop.f32.mrb[43].mxu1 }
 0x1e6   : > { %18933 = vst [vmem:[#allocation16_spill] sm:$0xff] %v14301_v52  ;;  %v14305_v60 = vadd.f32 %v9434_v6, %v9433_v53  ;;  %v14307_v33 = vadd.f32 %v9546_v4, %v9545_v49  ;;  %v12753_v6 = vld [vmem:[#allocation5 + $0x474] ss:$8 sps:$4 sm:$0xff]   ;;  %v13064_v52 = vld [vmem:[%s13948_s28 + $0x60] sm:$0xff]  }
 0x1e7   : > { %2442 = vmatmul.mubr.bf16.gmra.mrb[148].mxu0 %v12745_v41  ;;  %2779 = vmatmul.mubr.bf16.gmra.mrb[148].mxu1 %v12746_v55  ;;  %v12755_v41 = vld [vmem:[#allocation5 + $0x574] ss:$8 sps:$4 sm:$0xff]  }
 0x1e8   : > { %2449 = vmatprep.mubr.bf16.mxu0 %v12747_v36  ;;  %2786 = vmatprep.mubr.bf16.mxu1 %v12749_v28 }
 0x1ea   : > { %v9436_v23 = vpop.f32.mrb[44].mxu0  ;;  %v9548_v44 = vpop.f32.mrb[44].mxu1 }
 0x1eb   : > { %v9437_v45 = vpop.f32.mrb[45].mxu0  ;;  %v9549_v19 = vpop.f32.mrb[45].mxu1 }
 0x1ec   : > { %v14313_v53 = vadd.f32 %v9437_v45, %v9436_v23  ;;  %v9439_v49 = vpop.f32.mrb[46].mxu0  ;;  %v14315_v55 = vadd.f32 %v9549_v19, %v9548_v44  ;;  %v9551_v4 = vpop.f32.mrb[46].mxu1 }
 0x1ed   : > { %v9440_v25 = vpop.f32.mrb[47].mxu0  ;;  %v9552_v36 = vpop.f32.mrb[47].mxu1 }
 0x1ee   : > { %18934 = vst [vmem:[#allocation17_spill] sm:$0xff] %v14313_v53  ;;  %18935 = vst [vmem:[#allocation18_spill] sm:$0xff] %v14315_v55  ;;  %v14317_v28 = vadd.f32 %v9440_v25, %v9439_v49  ;;  %v14319_v0 = vadd.f32 %v9552_v36, %v9551_v4  ;;  %v12759_v4 = vld [vmem:[#allocation5 + $0x484] ss:$8 sps:$4 sm:$0xff]   ;;  %v12764_v55 = vld [vmem:[#allocation5 + $0x580] ss:$8 sps:$4 sm:$0xff]  }
 0x1ef   : > { %2450 = vmatmul.mubr.bf16.gmra.mrb[152].mxu0 %v12751_v61  ;;  %2787 = vmatmul.mubr.bf16.gmra.mrb[152].mxu1 %v12752_v18  ;;  %v12761_v61 = vld [vmem:[#allocation5 + $0x584] ss:$8 sps:$4 sm:$0xff]  }
 0x1f0   : > { %18936 = vst [vmem:[#allocation19_spill] sm:$0xff] %v14317_v28  ;;  %18937 = vst [vmem:[#allocation20_spill] sm:$0xff] %v14319_v0  ;;  %2457 = vmatprep.mubr.bf16.mxu0 %v12753_v6  ;;  %2794 = vmatprep.mubr.bf16.mxu1 %v12755_v41  ;;  %v12763_v28 = vld [vmem:[#allocation5 + $0x480] ss:$8 sps:$4 sm:$0xff]  }
 0x1f2   : > { %v9442_v45 = vpop.f32.mrb[48].mxu0  ;;  %v9554_v19 = vpop.f32.mrb[48].mxu1 }
 0x1f3   : > { %v9443_v44 = vpop.f32.mrb[49].mxu0  ;;  %v9555_v39 = vpop.f32.mrb[49].mxu1 }
 0x1f4   : > { %v14325_v25 = vadd.f32 %v9443_v44, %v9442_v45  ;;  %v9445_v49 = vpop.f32.mrb[50].mxu0  ;;  %v14327_v18 = vadd.f32 %v9555_v39, %v9554_v19  ;;  %v9557_v36 = vpop.f32.mrb[50].mxu1 }
 0x1f5   : > { %v9446_v46 = vpop.f32.mrb[51].mxu0  ;;  %v9558_v6 = vpop.f32.mrb[51].mxu1 }
 0x1f6   : > { %18938 = vst [vmem:[#allocation21_spill] sm:$0xff] %v14325_v25  ;;  %18939 = vst [vmem:[#allocation22_spill] sm:$0xff] %v14327_v18  ;;  %v14329_v41 = vadd.f32 %v9446_v46, %v9445_v49  ;;  %v14331_v53 = vadd.f32 %v9558_v6, %v9557_v36  ;;  %v12765_v36 = vld [vmem:[#allocation5 + $0x494] ss:$8 sps:$4 sm:$0xff]   ;;  %v12770_v18 = vld [vmem:[#allocation5 + $0x590] ss:$8 sps:$4 sm:$0xff]  }
 0x1f7   : > { %2458 = vmatmul.mubr.bf16.gmra.mrb[156].mxu0 %v12757_v1  ;;  %2795 = vmatmul.mubr.bf16.gmra.mrb[156].mxu1 %v12758_v38  ;;  %v12767_v1 = vld [vmem:[#allocation5 + $0x594] ss:$8 sps:$4 sm:$0xff]  }
 0x1f8   : > { %18940 = vst [vmem:[#allocation23_spill] sm:$0xff] %v14329_v41  ;;  %18941 = vst [vmem:[#allocation24_spill] sm:$0xff] %v14331_v53  ;;  %2465 = vmatprep.mubr.bf16.mxu0 %v12759_v4  ;;  %2802 = vmatprep.mubr.bf16.mxu1 %v12761_v61  ;;  %v12769_v41 = vld [vmem:[#allocation5 + $0x490] ss:$8 sps:$4 sm:$0xff]  }
 0x1fa   : > { %v9448_v44 = vpop.f32.mrb[52].mxu0  ;;  %v9560_v39 = vpop.f32.mrb[52].mxu1 }
 0x1fb   : > { %v9449_v19 = vpop.f32.mrb[53].mxu0  ;;  %v9561_v0 = vpop.f32.mrb[53].mxu1 }
 0x1fc   : > { %v14337_v46 = vadd.f32 %v9449_v19, %v9448_v44  ;;  %v9451_v49 = vpop.f32.mrb[54].mxu0  ;;  %v14339_v38 = vadd.f32 %v9561_v0, %v9560_v39  ;;  %v9563_v6 = vpop.f32.mrb[54].mxu1 }
 0x1fd   : > { %v9452_v23 = vpop.f32.mrb[55].mxu0  ;;  %v9564_v4 = vpop.f32.mrb[55].mxu1 }
 0x1fe   : > { %18942 = vst [vmem:[#allocation25_spill] sm:$0xff] %v14337_v46  ;;  %18943 = vst [vmem:[#allocation26_spill] sm:$0xff] %v14339_v38  ;;  %v14341_v61 = vadd.f32 %v9452_v23, %v9451_v49  ;;  %v14343_v25 = vadd.f32 %v9564_v4, %v9563_v6  ;;  %v12771_v6 = vld [vmem:[#allocation5 + $0x4a4] ss:$8 sps:$4 sm:$0xff]   ;;  %v12776_v38 = vld [vmem:[#allocation5 + $0x5a0] ss:$8 sps:$4 sm:$0xff]  }
 0x1ff   : > { %2466 = vmatmul.mubr.bf16.gmra.mrb[160].mxu0 %v12763_v28  ;;  %2803 = vmatmul.mubr.bf16.gmra.mrb[160].mxu1 %v12764_v55  ;;  %v12773_v28 = vld [vmem:[#allocation5 + $0x5a4] ss:$8 sps:$4 sm:$0xff]  }
 0x200   : > { %18944 = vst [vmem:[#allocation27_spill] sm:$0xff] %v14341_v61  ;;  %18945 = vst [vmem:[#allocation28_spill] sm:$0xff] %v14343_v25  ;;  %2473 = vmatprep.mubr.bf16.mxu0 %v12765_v36  ;;  %2810 = vmatprep.mubr.bf16.mxu1 %v12767_v1  ;;  %v12775_v61 = vld [vmem:[#allocation5 + $0x4a0] ss:$8 sps:$4 sm:$0xff]  }
 0x202   : > { %v9454_v19 = vpop.f32.mrb[56].mxu0  ;;  %v9566_v0 = vpop.f32.mrb[56].mxu1 }
 0x203   : > { %v9455_v39 = vpop.f32.mrb[57].mxu0  ;;  %v9567_v53 = vpop.f32.mrb[57].mxu1 }
 0x204   : > { %v14349_v23 = vadd.f32 %v9455_v39, %v9454_v19  ;;  %v9457_v49 = vpop.f32.mrb[58].mxu0  ;;  %v14351_v55 = vadd.f32 %v9567_v53, %v9566_v0  ;;  %v9569_v4 = vpop.f32.mrb[58].mxu1 }
 0x205   : > { %v9458_v45 = vpop.f32.mrb[59].mxu0  ;;  %v9570_v36 = vpop.f32.mrb[59].mxu1 }
 0x206   : > { %18946 = vst [vmem:[#allocation29_spill] sm:$0xff] %v14349_v23  ;;  %18947 = vst [vmem:[#allocation30_spill] sm:$0xff] %v14351_v55  ;;  %v14353_v1 = vadd.f32 %v9458_v45, %v9457_v49  ;;  %v14355_v46 = vadd.f32 %v9570_v36, %v9569_v4  ;;  %v12777_v4 = vld [vmem:[#allocation5 + $0x4b4] ss:$8 sps:$4 sm:$0xff]   ;;  %v12782_v55 = vld [vmem:[#allocation5 + $0x5b0] ss:$8 sps:$4 sm:$0xff]  }
 0x207   : > { %2474 = vmatmul.mubr.bf16.gmra.mrb[164].mxu0 %v12769_v41  ;;  %2811 = vmatmul.mubr.bf16.gmra.mrb[164].mxu1 %v12770_v18  ;;  %v12779_v41 = vld [vmem:[#allocation5 + $0x5b4] ss:$8 sps:$4 sm:$0xff]  }
 0x208   : > { %18948 = vst [vmem:[#allocation31_spill] sm:$0xff] %v14353_v1  ;;  %18949 = vst [vmem:[#allocation32_spill] sm:$0xff] %v14355_v46  ;;  %2481 = vmatprep.mubr.bf16.mxu0 %v12771_v6  ;;  %2818 = vmatprep.mubr.bf16.mxu1 %v12773_v28  ;;  %v12781_v1 = vld [vmem:[#allocation5 + $0x4b0] ss:$8 sps:$4 sm:$0xff]  }
 0x20a   : > { %v9460_v39 = vpop.f32.mrb[60].mxu0  ;;  %v9572_v53 = vpop.f32.mrb[60].mxu1 }
 0x20b   : > { %v9461_v0 = vpop.f32.mrb[61].mxu0  ;;  %v9573_v25 = vpop.f32.mrb[61].mxu1 }
 0x20c   : > { %v14361_v45 = vadd.f32 %v9461_v0, %v9460_v39  ;;  %v9463_v49 = vpop.f32.mrb[62].mxu0  ;;  %v14363_v18 = vadd.f32 %v9573_v25, %v9572_v53  ;;  %v9575_v36 = vpop.f32.mrb[62].mxu1 }
 0x20d   : > { %v9464_v44 = vpop.f32.mrb[63].mxu0  ;;  %v9576_v6 = vpop.f32.mrb[63].mxu1 }
 0x20e   : > { %18950 = vst [vmem:[#allocation33_spill] sm:$0xff] %v14361_v45  ;;  %18951 = vst [vmem:[#allocation34_spill] sm:$0xff] %v14363_v18  ;;  %v14365_v28 = vadd.f32 %v9464_v44, %v9463_v49  ;;  %v14367_v23 = vadd.f32 %v9576_v6, %v9575_v36  ;;  %v12783_v36 = vld [vmem:[#allocation5 + $0x4c4] ss:$8 sps:$4 sm:$0xff]   ;;  %v12788_v18 = vld [vmem:[#allocation5 + $0x5c0] ss:$8 sps:$4 sm:$0xff]  }
 0x20f   : > { %2482 = vmatmul.mubr.bf16.gmra.mrb[168].mxu0 %v12775_v61  ;;  %2819 = vmatmul.mubr.bf16.gmra.mrb[168].mxu1 %v12776_v38  ;;  %v12785_v61 = vld [vmem:[#allocation5 + $0x5c4] ss:$8 sps:$4 sm:$0xff]  }
 0x210   : > { %18952 = vst [vmem:[#allocation35_spill] sm:$0xff] %v14365_v28  ;;  %18953 = vst [vmem:[#allocation36_spill] sm:$0xff] %v14367_v23  ;;  %2489 = vmatprep.mubr.bf16.mxu0 %v12777_v4  ;;  %2826 = vmatprep.mubr.bf16.mxu1 %v12779_v41  ;;  %v12787_v28 = vld [vmem:[#allocation5 + $0x4c0] ss:$8 sps:$4 sm:$0xff]  }
 0x212   : > { %v9594_v0 = vpop.f32.mrb[64].mxu0  ;;  %v9706_v25 = vpop.f32.mrb[64].mxu1 }
 0x213   : > { %v9595_v53 = vpop.f32.mrb[65].mxu0  ;;  %v9707_v46 = vpop.f32.mrb[65].mxu1 }
 0x214   : > { %v14373_v44 = vadd.f32 %v9595_v53, %v9594_v0  ;;  %v9597_v49 = vpop.f32.mrb[66].mxu0  ;;  %v14375_v38 = vadd.f32 %v9707_v46, %v9706_v25  ;;  %v9709_v6 = vpop.f32.mrb[66].mxu1 }
 0x215   : > { %v9598_v19 = vpop.f32.mrb[67].mxu0  ;;  %v9710_v4 = vpop.f32.mrb[67].mxu1 }
 0x216   : > { %18954 = vst [vmem:[#allocation37_spill] sm:$0xff] %v14373_v44  ;;  %18955 = vst [vmem:[#allocation38_spill] sm:$0xff] %v14375_v38  ;;  %v14377_v41 = vadd.f32 %v9598_v19, %v9597_v49  ;;  %v14379_v45 = vadd.f32 %v9710_v4, %v9709_v6  ;;  %v12789_v6 = vld [vmem:[#allocation5 + $0x4d4] ss:$8 sps:$4 sm:$0xff]   ;;  %v12794_v38 = vld [vmem:[#allocation5 + $0x5d0] ss:$8 sps:$4 sm:$0xff]  }
 0x217   : > { %2490 = vmatmul.mubr.bf16.gmra.mrb[172].mxu0 %v12781_v1  ;;  %2827 = vmatmul.mubr.bf16.gmra.mrb[172].mxu1 %v12782_v55  ;;  %v12791_v1 = vld [vmem:[#allocation5 + $0x5d4] ss:$8 sps:$4 sm:$0xff]  }
 0x218   : > { %18956 = vst [vmem:[#allocation39_spill] sm:$0xff] %v14377_v41  ;;  %18957 = vst [vmem:[#allocation40_spill] sm:$0xff] %v14379_v45  ;;  %2497 = vmatprep.mubr.bf16.mxu0 %v12783_v36  ;;  %2834 = vmatprep.mubr.bf16.mxu1 %v12785_v61  ;;  %v12793_v41 = vld [vmem:[#allocation5 + $0x4d0] ss:$8 sps:$4 sm:$0xff]  }
 0x21a   : > { %v9600_v53 = vpop.f32.mrb[68].mxu0  ;;  %v9712_v46 = vpop.f32.mrb[68].mxu1 }
 0x21b   : > { %v9601_v25 = vpop.f32.mrb[69].mxu0  ;;  %v9713_v23 = vpop.f32.mrb[69].mxu1 }
 0x21c   : > { %v14385_v19 = vadd.f32 %v9601_v25, %v9600_v53  ;;  %v9603_v49 = vpop.f32.mrb[70].mxu0  ;;  %v14387_v55 = vadd.f32 %v9713_v23, %v9712_v46  ;;  %v9715_v4 = vpop.f32.mrb[70].mxu1 }
 0x21d   : > { %v9604_v39 = vpop.f32.mrb[71].mxu0  ;;  %v9716_v36 = vpop.f32.mrb[71].mxu1 }
 0x21e   : > { %18958 = vst [vmem:[#allocation41_spill] sm:$0xff] %v14385_v19  ;;  %18959 = vst [vmem:[#allocation42_spill] sm:$0xff] %v14387_v55  ;;  %v14389_v61 = vadd.f32 %v9604_v39, %v9603_v49  ;;  %v14391_v44 = vadd.f32 %v9716_v36, %v9715_v4  ;;  %v12795_v4 = vld [vmem:[#allocation5 + $0x4e4] ss:$8 sps:$4 sm:$0xff]   ;;  %v12800_v55 = vld [vmem:[#allocation5 + $0x5e0] ss:$8 sps:$4 sm:$0xff]  }
 0x21f   : > { %2498 = vmatmul.mubr.bf16.gmra.mrb[176].mxu0 %v12787_v28  ;;  %2835 = vmatmul.mubr.bf16.gmra.mrb[176].mxu1 %v12788_v18  ;;  %v12797_v28 = vld [vmem:[#allocation5 + $0x5e4] ss:$8 sps:$4 sm:$0xff]  }
 0x220   : > { %18960 = vst [vmem:[#allocation43_spill] sm:$0xff] %v14389_v61  ;;  %18961 = vst [vmem:[#allocation44_spill] sm:$0xff] %v14391_v44  ;;  %2505 = vmatprep.mubr.bf16.mxu0 %v12789_v6  ;;  %2842 = vmatprep.mubr.bf16.mxu1 %v12791_v1  ;;  %v12799_v61 = vld [vmem:[#allocation5 + $0x4e0] ss:$8 sps:$4 sm:$0xff]  }
 0x222   : > { %v9606_v25 = vpop.f32.mrb[72].mxu0  ;;  %v9718_v23 = vpop.f32.mrb[72].mxu1 }
 0x223   : > { %v9607_v46 = vpop.f32.mrb[73].mxu0  ;;  %v9719_v45 = vpop.f32.mrb[73].mxu1 }
 0x224   : > { %v14397_v39 = vadd.f32 %v9607_v46, %v9606_v25  ;;  %v9609_v49 = vpop.f32.mrb[74].mxu0  ;;  %v14399_v18 = vadd.f32 %v9719_v45, %v9718_v23  ;;  %v9721_v36 = vpop.f32.mrb[74].mxu1 }
 0x225   : > { %v9610_v0 = vpop.f32.mrb[75].mxu0  ;;  %v9722_v6 = vpop.f32.mrb[75].mxu1 }
 0x226   : > { %18962 = vst [vmem:[#allocation45_spill] sm:$0xff] %v14397_v39  ;;  %18963 = vst [vmem:[#allocation46_spill] sm:$0xff] %v14399_v18  ;;  %v14401_v1 = vadd.f32 %v9610_v0, %v9609_v49  ;;  %v14403_v19 = vadd.f32 %v9722_v6, %v9721_v36  ;;  %v12801_v36 = vld [vmem:[#allocation5 + $0x4f4] ss:$8 sps:$4 sm:$0xff]   ;;  %v12806_v18 = vld [vmem:[#allocation5 + $0x5f0] ss:$8 sps:$4 sm:$0xff]  }
 0x227   : > { %2506 = vmatmul.mubr.bf16.gmra.mrb[180].mxu0 %v12793_v41  ;;  %2843 = vmatmul.mubr.bf16.gmra.mrb[180].mxu1 %v12794_v38  ;;  %v12803_v41 = vld [vmem:[#allocation5 + $0x5f4] ss:$8 sps:$4 sm:$0xff]  }
 0x228   : > { %18964 = vst [vmem:[#allocation47_spill] sm:$0xff] %v14401_v1  ;;  %18965 = vst [vmem:[#allocation48_spill] sm:$0xff] %v14403_v19  ;;  %2513 = vmatprep.mubr.bf16.mxu0 %v12795_v4  ;;  %2850 = vmatprep.mubr.bf16.mxu1 %v12797_v28  ;;  %v12805_v1 = vld [vmem:[#allocation5 + $0x4f0] ss:$8 sps:$4 sm:$0xff]  }
 0x22a   : > { %v9612_v46 = vpop.f32.mrb[76].mxu0  ;;  %v9724_v45 = vpop.f32.mrb[76].mxu1 }
 0x22b   : > { %v9613_v23 = vpop.f32.mrb[77].mxu0  ;;  %v9725_v44 = vpop.f32.mrb[77].mxu1 }
 0x22c   : > { %v14409_v0 = vadd.f32 %v9613_v23, %v9612_v46  ;;  %v9615_v49 = vpop.f32.mrb[78].mxu0  ;;  %v14411_v38 = vadd.f32 %v9725_v44, %v9724_v45  ;;  %v9727_v6 = vpop.f32.mrb[78].mxu1 }
 0x22d   : > { %v9616_v53 = vpop.f32.mrb[79].mxu0  ;;  %v9728_v4 = vpop.f32.mrb[79].mxu1 }
 0x22e   : > { %18966 = vst [vmem:[#allocation49_spill] sm:$0xff] %v14409_v0  ;;  %18967 = vst [vmem:[#allocation50_spill] sm:$0xff] %v14411_v38  ;;  %v14413_v28 = vadd.f32 %v9616_v53, %v9615_v49  ;;  %v14415_v39 = vadd.f32 %v9728_v4, %v9727_v6  ;;  %v12809_v6 = vld [vmem:[#allocation5 + $0x604] ss:$8 sps:$4 sm:$0xff]   ;;  %v12810_v38 = vld [vmem:[#allocation5 + $0x700] ss:$8 sps:$4 sm:$0xff]  }
 0x22f   : > { %2514 = vmatmul.mubr.bf16.gmra.mrb[184].mxu0 %v12799_v61  ;;  %2851 = vmatmul.mubr.bf16.gmra.mrb[184].mxu1 %v12800_v55  ;;  %v12812_v61 = vld [vmem:[#allocation5 + $0x704] ss:$8 sps:$4 sm:$0xff]  }
 0x230   : > { %18968 = vst [vmem:[#allocation51_spill] sm:$0xff] %v14413_v28  ;;  %18969 = vst [vmem:[#allocation52_spill] sm:$0xff] %v14415_v39  ;;  %2521 = vmatprep.mubr.bf16.mxu0 %v12801_v36  ;;  %2858 = vmatprep.mubr.bf16.mxu1 %v12803_v41  ;;  %v12807_v28 = vld [vmem:[#allocation5 + $0x600] ss:$8 sps:$4 sm:$0xff]  }
 0x232   : > { %v9618_v23 = vpop.f32.mrb[80].mxu0  ;;  %v9730_v44 = vpop.f32.mrb[80].mxu1 }
 0x233   : > { %v9619_v45 = vpop.f32.mrb[81].mxu0  ;;  %v9731_v19 = vpop.f32.mrb[81].mxu1 }
 0x234   : > { %v14421_v53 = vadd.f32 %v9619_v45, %v9618_v23  ;;  %v9621_v49 = vpop.f32.mrb[82].mxu0  ;;  %v14423_v55 = vadd.f32 %v9731_v19, %v9730_v44  ;;  %v9733_v4 = vpop.f32.mrb[82].mxu1 }
 0x235   : > { %v9622_v25 = vpop.f32.mrb[83].mxu0  ;;  %v9734_v36 = vpop.f32.mrb[83].mxu1 }
 0x236   : > { %18970 = vst [vmem:[#allocation53_spill] sm:$0xff] %v14421_v53  ;;  %18971 = vst [vmem:[#allocation54_spill] sm:$0xff] %v14423_v55  ;;  %v14425_v41 = vadd.f32 %v9622_v25, %v9621_v49  ;;  %v14427_v0 = vadd.f32 %v9734_v36, %v9733_v4  ;;  %v12832_v53 = vld [vmem:[#allocation7] sm:$0xff]  }
 0x237   : > { %2522 = vmatmul.mubr.bf16.gmra.mrb[188].mxu0 %v12805_v1  ;;  %2859 = vmatmul.mubr.bf16.gmra.mrb[188].mxu1 %v12806_v18  ;;  %v12813_v1 = vld [vmem:[#allocation5 + $0x614] ss:$8 sps:$4 sm:$0xff]  }
 0x238   : > { %18972 = vst [vmem:[#allocation55_spill] sm:$0xff] %v14425_v41  ;;  %18973 = vst [vmem:[#allocation56_spill] sm:$0xff] %v14427_v0  ;;  %3075 = vmatprep.mubr.bf16.mxu0 %v12809_v6  ;;  %3412 = vmatprep.mubr.bf16.mxu1 %v12812_v61  ;;  %v12815_v61 = vld [vmem:[#allocation5 + $0x714] ss:$8 sps:$4 sm:$0xff]   ;;  %v12845_v41 = vld [vmem:[#allocation7 + $0x48] sm:$0xff]  }
 0x23a   : > { %v9624_v45 = vpop.f32.mrb[84].mxu0  ;;  %v9736_v19 = vpop.f32.mrb[84].mxu1 }
 0x23b   : > { %v9625_v44 = vpop.f32.mrb[85].mxu0  ;;  %v9737_v39 = vpop.f32.mrb[85].mxu1 }
 0x23c   : > { %v14433_v25 = vadd.f32 %v9625_v44, %v9624_v45  ;;  %v9627_v49 = vpop.f32.mrb[86].mxu0  ;;  %v14435_v18 = vadd.f32 %v9737_v39, %v9736_v19  ;;  %v9739_v4 = vpop.f32.mrb[86].mxu1  ;;  %v13057_v44 = vld [vmem:[%s13948_s28] sm:$0xff]   ;;  %v13058_v19 = vld [vmem:[%s13948_s28 + $0x48] sm:$0xff]  }
 0x23d   : > { %v9628_v6 = vpop.f32.mrb[87].mxu0  ;;  %v9740_v36 = vpop.f32.mrb[87].mxu1  ;;  %v13059_v39 = vld [vmem:[%s13948_s28 + $0x8] sm:$0xff]  }
 0x23e   : > { %18974 = vst [vmem:[#allocation57_spill] sm:$0xff] %v14433_v25  ;;  %18975 = vst [vmem:[#allocation58_spill] sm:$0xff] %v14435_v18  ;;  %v14437_v46 = vadd.f32 %v9628_v6, %v9627_v49  ;;  %v14439_v23 = vadd.f32 %v9740_v36, %v9739_v4  ;;  %v12846_v6 = vld [vmem:[#allocation7 + $0x8] sm:$0xff]   ;;  %v12818_v36 = vld [vmem:[#allocation5 + $0x710] ss:$8 sps:$4 sm:$0xff]  }
 0x23f   : > { %3076 = vmatmul.mubr.bf16.vlgmr.msra.gmra.mrb[192].mxu0 %v12807_v28  ;;  %3413 = vmatmul.mubr.bf16.vlgmr.msra.gmra.mrb[192].mxu1 %v12810_v38  ;;  %v12817_v28 = vld [vmem:[#allocation5 + $0x610] ss:$8 sps:$4 sm:$0xff]   ;;  %v12821_v25 = vld [vmem:[#allocation5 + $0x724] ss:$8 sps:$4 sm:$0xff]  }
 0x240   : > { %18976 = vst [vmem:[#allocation59_spill] sm:$0xff] %v14437_v46  ;;  %18977 = vst [vmem:[#allocation60_spill] sm:$0xff] %v14439_v23  ;;  %10251 = vmatpush3.bf16.msra.mxu0 %v13057_v44  ;;  %3083 = vmatprep.mubr.bf16.mxu0 %v12813_v1  ;;  %v12819_v44 = vld [vmem:[#allocation5 + $0x624] ss:$8 sps:$4 sm:$0xff]   ;;  %v13060_v18 = vld [vmem:[%s13948_s28 + $0x50] sm:$0xff]  }
 0x241   : > { %3420 = vmatprep.mubr.bf16.mxu1 %v12815_v61  ;;  %10252 = vmatprep.subr.bf16.mxu0 %v13058_v19  ;;  %v12859_v23 = vld [vmem:[#allocation7 + $0x50] sm:$0xff]  }
 0x242   : > { %v9630_v49 = vpop.f32.mrb[88].mxu0  ;;  %v9742_v4 = vpop.f32.mrb[88].mxu1  ;;  %10363 = vmatpush3.bf16.msra.mxu1 %v12832_v53 }
 0x243   : > { %v9631_v38 = vpop.f32.mrb[89].mxu0  ;;  %v9743_v55 = vpop.f32.mrb[89].mxu1  ;;  %10364 = vmatprep.subr.bf16.mxu1 %v12845_v41 }
 0x244   : > { %v14447_v45 = vadd.f32 %v9631_v38, %v9630_v49  ;;  %v9633_v1 = vpop.f32.mrb[90].mxu0  ;;  %10253 = vmatpush3.bf16.msra.mxu0 %v13059_v39  ;;  %v14450_v61 = vadd.f32 %v9743_v55, %v9742_v4  ;;  %v9745_v19 = vpop.f32.mrb[90].mxu1  ;;  %v12860_v49 = vld [vmem:[#allocation7 + $0x10] sm:$0xff]   ;;  %v12873_v38 = vld [vmem:[#allocation7 + $0x58] sm:$0xff]  }
 0x245   : > { %v9634_v46 = vpop.f32.mrb[91].mxu0  ;;  %v9746_v53 = vpop.f32.mrb[91].mxu1  ;;  %10254 = vmatprep.subr.bf16.mxu0 %v13060_v18  ;;  %v13061_v18 = vld [vmem:[%s13948_s28 + $0x10] sm:$0xff]  }
 0x246   : > { %18978 = vst [vmem:[#allocation61_spill] sm:$0xff] %v14447_v45  ;;  %18979 = vst [vmem:[#allocation62_spill] sm:$0xff] %v14450_v61  ;;  %v14453_v0 = vadd.f32 %v9634_v46, %v9633_v1  ;;  %v14455_v41 = vadd.f32 %v9746_v53, %v9745_v19  ;;  %10365 = vmatpush3.bf16.msra.mxu1 %v12846_v6  ;;  %v13062_v1 = vld [vmem:[%s13948_s28 + $0x58] sm:$0xff]   ;;  %v12824_v19 = vld [vmem:[#allocation5 + $0x720] ss:$8 sps:$4 sm:$0xff]  }
 0x247   : > { %3084 = vmatmul.mubr.bf16.gmra.mrb[196].mxu0 %v12817_v28  ;;  %3421 = vmatmul.mubr.bf16.gmra.mrb[196].mxu1 %v12818_v36  ;;  %v12874_v6 = vld [vmem:[#allocation7 + $0x18] sm:$0xff]   ;;  %v12823_v36 = vld [vmem:[#allocation5 + $0x620] ss:$8 sps:$4 sm:$0xff]  }
 0x248   : > { %18980 = vst [vmem:[#allocation63_spill] sm:$0xff] %v14453_v0  ;;  %18981 = vst [vmem:[#allocation64_spill] sm:$0xff] %v14455_v41  ;;  %3091 = vmatprep.mubr.bf16.mxu0 %v12819_v44  ;;  %3428 = vmatprep.mubr.bf16.mxu1 %v12821_v25  ;;  %v12825_v55 = vld [vmem:[#allocation5 + $0x634] ss:$8 sps:$4 sm:$0xff]  }
 0x249   : > { %10255 = vmatpush3.bf16.msra.mxu0 %v13061_v18  ;;  %10366 = vmatprep.subr.bf16.mxu1 %v12859_v23  ;;  %v12827_v39 = vld [vmem:[#allocation5 + $0x734] ss:$8 sps:$4 sm:$0xff]  }
 0x24a   : > { %v9636_v46 = vpop.f32.mrb[92].mxu0  ;;  %v9748_v4 = vpop.f32.mrb[92].mxu1  ;;  %10256 = vmatprep.subr.bf16.mxu0 %v13062_v1  ;;  %10367 = vmatpush3.bf16.msra.mxu1 %v12860_v49  ;;  %v13063_v1 = vld [vmem:[%s13948_s28 + $0x18] sm:$0xff]   ;;  %v12887_v49 = vld [vmem:[#allocation7 + $0x60] sm:$0xff]  }
 0x24b   : > { %v9637_v28 = vpop.f32.mrb[93].mxu0  ;;  %v9749_v53 = vpop.f32.mrb[93].mxu1  ;;  %10368 = vmatprep.subr.bf16.mxu1 %v12873_v38  ;;  %v12888_v38 = vld [vmem:[#allocation7 + $0x20] sm:$0xff]  }
 0x24c   : > { %v14463_v25 = vadd.f32 %v9637_v28, %v9636_v46  ;;  %v9639_v44 = vpop.f32.mrb[94].mxu0  ;;  %v14465_v18 = vadd.f32 %v9749_v53, %v9748_v4  ;;  %v9751_v23 = vpop.f32.mrb[94].mxu1  ;;  %v12901_v46 = vld [vmem:[#allocation7 + $0x68] sm:$0xff]  }
 0x24d   : > { %v9640_v45 = vpop.f32.mrb[95].mxu0  ;;  %v9752_v0 = vpop.f32.mrb[95].mxu1  ;;  %10257 = vmatpush3.bf16.msra.mxu0 %v13063_v1  ;;  %v12833_v1 = vld [vmem:[#allocation5 + $0x644] ss:$8 sps:$4 sm:$0xff]  }
 0x24e   : > { %18982 = vst [vmem:[#allocation65_spill] sm:$0xff] %v14463_v25  ;;  %18983 = vst [vmem:[#allocation66_spill] sm:$0xff] %v14465_v18  ;;  %v14468_v61 = vadd.f32 %v9640_v45, %v9639_v44  ;;  %v14470_v41 = vadd.f32 %v9752_v0, %v9751_v23  ;;  %10258 = vmatprep.subr.bf16.mxu0 %v13064_v52  ;;  %10369 = vmatpush3.bf16.msra.mxu1 %v12874_v6  ;;  %v13065_v45 = vld [vmem:[%s13948_s28 + $0x20] sm:$0xff]   ;;  %v13066_v44 = vld [vmem:[%s13948_s28 + $0x68] sm:$0xff]  }
 0x24f   : > { %3092 = vmatmul.mubr.bf16.gmra.mrb[200].mxu0 %v12823_v36  ;;  %3429 = vmatmul.mubr.bf16.gmra.mrb[200].mxu1 %v12824_v19  ;;  %v12902_v52 = vld [vmem:[#allocation7 + $0x28] sm:$0xff]   ;;  %v12829_v36 = vld [vmem:[#allocation5 + $0x630] ss:$8 sps:$4 sm:$0xff]  }
 0x250   : > { %18984 = vst [vmem:[#allocation67_spill] sm:$0xff] %v14468_v61  ;;  %18985 = vst [vmem:[#allocation68_spill] sm:$0xff] %v14470_v41  ;;  %3099 = vmatprep.mubr.bf16.mxu0 %v12825_v55  ;;  %3436 = vmatprep.mubr.bf16.mxu1 %v12827_v39  ;;  %v12830_v19 = vld [vmem:[#allocation5 + $0x730] ss:$8 sps:$4 sm:$0xff]   ;;  %v12835_v4 = vld [vmem:[#allocation5 + $0x744] ss:$8 sps:$4 sm:$0xff]  }
 0x251   : > { %10259 = vmatpush3.bf16.msra.mxu0 %v13065_v45  ;;  %10370 = vmatprep.subr.bf16.mxu1 %v12887_v49  ;;  %v13068_v41 = vld [vmem:[%s13948_s28 + $0x70] sm:$0xff]  }
 0x252   : > { %v9642_v0 = vpop.f32.mrb[96].mxu0  ;;  %v9754_v53 = vpop.f32.mrb[96].mxu1  ;;  %10260 = vmatprep.subr.bf16.mxu0 %v13066_v44  ;;  %10371 = vmatpush3.bf16.msra.mxu1 %v12888_v38  ;;  %v13067_v44 = vld [vmem:[%s13948_s28 + $0x28] sm:$0xff]   ;;  %v12915_v38 = vld [vmem:[#allocation7 + $0x70] sm:$0xff]  }
 0x253   : > { %v9643_v6 = vpop.f32.mrb[97].mxu0  ;;  %v9755_v23 = vpop.f32.mrb[97].mxu1  ;;  %10372 = vmatprep.subr.bf16.mxu1 %v12901_v46  ;;  %v12916_v46 = vld [vmem:[#allocation7 + $0x30] sm:$0xff]  }
 0x254   : > { %v14479_v55 = vadd.f32 %v9643_v6, %v9642_v0  ;;  %v9645_v39 = vpop.f32.mrb[98].mxu0  ;;  %v14481_v45 = vadd.f32 %v9755_v23, %v9754_v53  ;;  %v9757_v49 = vpop.f32.mrb[98].mxu1  ;;  %v12917_v0 = vld [vmem:[#allocation7 + $0x78] sm:$0xff]  }
 0x255   : > { %v9646_v28 = vpop.f32.mrb[99].mxu0  ;;  %v9758_v25 = vpop.f32.mrb[99].mxu1  ;;  %10261 = vmatpush3.bf16.msra.mxu0 %v13067_v44  ;;  %v12839_v53 = vld [vmem:[#allocation5 + $0x654] ss:$8 sps:$4 sm:$0xff]  }
 0x256   : > { %18986 = vst [vmem:[#allocation69_spill] sm:$0xff] %v14479_v55  ;;  %18987 = vst [vmem:[#allocation70_spill] sm:$0xff] %v14481_v45  ;;  %v14484_v61 = vadd.f32 %v9646_v28, %v9645_v39  ;;  %v14486_v18 = vadd.f32 %v9758_v25, %v9757_v49  ;;  %10262 = vmatprep.subr.bf16.mxu0 %v13068_v41  ;;  %10373 = vmatpush3.bf16.msra.mxu1 %v12902_v52  ;;  %v13069_v28 = vld [vmem:[%s13948_s28 + $0x30] sm:$0xff]   ;;  %v13070_v39 = vld [vmem:[%s13948_s28 + $0x78] sm:$0xff]  }
 0x257   : > { %3100 = vmatmul.mubr.bf16.gmra.mrb[204].mxu0 %v12829_v36  ;;  %3437 = vmatmul.mubr.bf16.gmra.mrb[204].mxu1 %v12830_v19  ;;  %v12918_v41 = vld [vmem:[#allocation7 + $0x38] sm:$0xff]   ;;  %v12931_v52 = vld [vmem:[#allocation7 + $0xc0] sm:$0xff]  }
 0x258   : > { %18988 = vst [vmem:[#allocation71_spill] sm:$0xff] %v14484_v61  ;;  %18989 = vst [vmem:[#allocation72_spill] sm:$0xff] %v14486_v18  ;;  %3107 = vmatprep.mubr.bf16.mxu0 %v12833_v1  ;;  %3444 = vmatprep.mubr.bf16.mxu1 %v12835_v4  ;;  %v12837_v19 = vld [vmem:[#allocation5 + $0x640] ss:$8 sps:$4 sm:$0xff]   ;;  %v12841_v6 = vld [vmem:[#allocation5 + $0x754] ss:$8 sps:$4 sm:$0xff]  }
 0x259   : > { %10263 = vmatpush3.bf16.msra.mxu0 %v13069_v28  ;;  %10374 = vmatprep.subr.bf16.mxu1 %v12915_v38  ;;  %v12838_v49 = vld [vmem:[#allocation5 + $0x740] ss:$8 sps:$4 sm:$0xff]  }
 0x25a   : > { %v9648_v25 = vpop.f32.mrb[100].mxu0  ;;  %v9760_v23 = vpop.f32.mrb[100].mxu1  ;;  %10264 = vmatprep.subr.bf16.mxu0 %v13070_v39  ;;  %10375 = vmatpush3.bf16.msra.mxu1 %v12916_v46  ;;  %v13071_v39 = vld [vmem:[%s13948_s28 + $0x38] sm:$0xff]   ;;  %v12932_v46 = vld [vmem:[#allocation7 + $0x140] sm:$0xff]  }
 0x25b   : > { %v9649_v36 = vpop.f32.mrb[101].mxu0  ;;  %v9761_v44 = vpop.f32.mrb[101].mxu1  ;;  %10376 = vmatprep.subr.bf16.mxu1 %v12917_v0 }
 0x25c   : > { %v14495_v4 = vadd.f32 %v9649_v36, %v9648_v25  ;;  %v9651_v1 = vpop.f32.mrb[102].mxu0  ;;  %v14497_v28 = vadd.f32 %v9761_v44, %v9760_v23  ;;  %v9763_v38 = vpop.f32.mrb[102].mxu1 }
 0x25d   : > { %v9652_v55 = vpop.f32.mrb[103].mxu0  ;;  %v9764_v61 = vpop.f32.mrb[103].mxu1  ;;  %10265 = vmatpush3.bf16.msra.mxu0 %v13071_v39 }
 0x25e   : > { %18990 = vst [vmem:[#allocation73_spill] sm:$0xff] %v14495_v4  ;;  %18991 = vst [vmem:[#allocation74_spill] sm:$0xff] %v14497_v28  ;;  %v14500_v45 = vadd.f32 %v9652_v55, %v9651_v1  ;;  %v14502_v18 = vadd.f32 %v9764_v61, %v9763_v38  ;;  %10377 = vmatpush3.bf16.msra.mxu1 %v12918_v41  ;;  %10474 = vmatprep.subr.bf16.mxu0 %v12931_v52  ;;  %v12843_v55 = vld [vmem:[#allocation5 + $0x650] ss:$8 sps:$4 sm:$0xff]   ;;  %v12847_v52 = vld [vmem:[#allocation5 + $0x664] ss:$8 sps:$4 sm:$0xff]  }
 0x25f   : > { %3108 = vmatmul.mubr.bf16.gmra.mrb[208].mxu0 %v12837_v19  ;;  %3445 = vmatmul.mubr.bf16.gmra.mrb[208].mxu1 %v12838_v49  ;;  %v12844_v1 = vld [vmem:[#allocation5 + $0x750] ss:$8 sps:$4 sm:$0xff]   ;;  %v12849_v19 = vld [vmem:[#allocation5 + $0x764] ss:$8 sps:$4 sm:$0xff]   ;;  %v12851_v4 = vld [vmem:[#allocation5 + $0x660] ss:$8 sps:$4 sm:$0xff]  }
 0x260   : > { %18992 = vst [vmem:[#allocation75_spill] sm:$0xff] %v14500_v45  ;;  %18993 = vst [vmem:[#allocation76_spill] sm:$0xff] %v14502_v18  ;;  %3115 = vmatprep.mubr.bf16.mxu0 %v12839_v53  ;;  %3452 = vmatprep.mubr.bf16.mxu1 %v12841_v6  ;;  %v12852_v45 = vld [vmem:[#allocation5 + $0x760] ss:$8 sps:$4 sm:$0xff]  }
 0x261   : > { %10586 = vmatprep.subr.bf16.mxu1 %v12932_v46 }
 0x262   : > { %v9654_v23 = vpop.f32.mrb[104].mxu0  ;;  %v9766_v36 = vpop.f32.mrb[104].mxu1 }
 0x263   : > { %v9655_v44 = vpop.f32.mrb[105].mxu0  ;;  %v9767_v61 = vpop.f32.mrb[105].mxu1 }
 0x264   : > { %v14508_v38 = vadd.f32 %v9655_v44, %v9654_v23  ;;  %v9657_v41 = vpop.f32.mrb[106].mxu0  ;;  %v14510_v49 = vadd.f32 %v9767_v61, %v9766_v36  ;;  %v9769_v39 = vpop.f32.mrb[106].mxu1 }
 0x265   : > { %v9658_v53 = vpop.f32.mrb[107].mxu0  ;;  %v9770_v6 = vpop.f32.mrb[107].mxu1 }
 0x266   : > { %18994 = vst [vmem:[#allocation77_spill] sm:$0xff] %v14508_v38  ;;  %18995 = vst [vmem:[#allocation78_spill] sm:$0xff] %v14510_v49  ;;  %v14512_v0 = vadd.f32 %v9658_v53, %v9657_v41  ;;  %v14514_v25 = vadd.f32 %v9770_v6, %v9769_v39  ;;  %v12853_v53 = vld [vmem:[#allocation5 + $0x674] ss:$8 sps:$4 sm:$0xff]   ;;  %v12858_v49 = vld [vmem:[#allocation5 + $0x770] ss:$8 sps:$4 sm:$0xff]  }
 0x267   : > { %3116 = vmatmul.mubr.bf16.gmra.mrb[212].mxu0 %v12843_v55  ;;  %3453 = vmatmul.mubr.bf16.gmra.mrb[212].mxu1 %v12844_v1  ;;  %v12855_v55 = vld [vmem:[#allocation5 + $0x774] ss:$8 sps:$4 sm:$0xff]  }
 0x268   : > { %18996 = vst [vmem:[#allocation79_spill] sm:$0xff] %v14512_v0  ;;  %18997 = vst [vmem:[#allocation80_spill] sm:$0xff] %v14514_v25  ;;  %3123 = vmatprep.mubr.bf16.mxu0 %v12847_v52  ;;  %3460 = vmatprep.mubr.bf16.mxu1 %v12849_v19  ;;  %v12857_v0 = vld [vmem:[#allocation5 + $0x670] ss:$8 sps:$4 sm:$0xff]  }
 0x26a   : > { %v9660_v44 = vpop.f32.mrb[108].mxu0  ;;  %v9772_v36 = vpop.f32.mrb[108].mxu1 }
 0x26b   : > { %v9661_v61 = vpop.f32.mrb[109].mxu0  ;;  %v9773_v28 = vpop.f32.mrb[109].mxu1 }
 0x26c   : > { %v14520_v41 = vadd.f32 %v9661_v61, %v9660_v44  ;;  %v9663_v39 = vpop.f32.mrb[110].mxu0  ;;  %v14522_v1 = vadd.f32 %v9773_v28, %v9772_v36  ;;  %v9775_v6 = vpop.f32.mrb[110].mxu1 }
 0x26d   : > { %v9664_v46 = vpop.f32.mrb[111].mxu0  ;;  %v9776_v52 = vpop.f32.mrb[111].mxu1 }
 0x26e   : > { %18998 = vst [vmem:[#allocation81_spill] sm:$0xff] %v14520_v41  ;;  %18999 = vst [vmem:[#allocation82_spill] sm:$0xff] %v14522_v1  ;;  %v14524_v19 = vadd.f32 %v9664_v46, %v9663_v39  ;;  %v14526_v38 = vadd.f32 %v9776_v52, %v9775_v6  ;;  %v12861_v6 = vld [vmem:[#allocation5 + $0x684] ss:$8 sps:$4 sm:$0xff]   ;;  %v12866_v1 = vld [vmem:[#allocation5 + $0x780] ss:$8 sps:$4 sm:$0xff]  }
 0x26f   : > { %3124 = vmatmul.mubr.bf16.gmra.mrb[216].mxu0 %v12851_v4  ;;  %3461 = vmatmul.mubr.bf16.gmra.mrb[216].mxu1 %v12852_v45  ;;  %v12863_v4 = vld [vmem:[#allocation5 + $0x784] ss:$8 sps:$4 sm:$0xff]  }
 0x270   : > { %19000 = vst [vmem:[#allocation83_spill] sm:$0xff] %v14524_v19  ;;  %19001 = vst [vmem:[#allocation84_spill] sm:$0xff] %v14526_v38  ;;  %3131 = vmatprep.mubr.bf16.mxu0 %v12853_v53  ;;  %3468 = vmatprep.mubr.bf16.mxu1 %v12855_v55  ;;  %v12865_v19 = vld [vmem:[#allocation5 + $0x680] ss:$8 sps:$4 sm:$0xff]  }
 0x272   : > { %v9666_v61 = vpop.f32.mrb[112].mxu0  ;;  %v9778_v28 = vpop.f32.mrb[112].mxu1 }
 0x273   : > { %v9667_v36 = vpop.f32.mrb[113].mxu0  ;;  %v9779_v25 = vpop.f32.mrb[113].mxu1 }
 0x274   : > { %v14532_v46 = vadd.f32 %v9667_v36, %v9666_v61  ;;  %v9669_v39 = vpop.f32.mrb[114].mxu0  ;;  %v14534_v45 = vadd.f32 %v9779_v25, %v9778_v28  ;;  %v9781_v52 = vpop.f32.mrb[114].mxu1 }
 0x275   : > { %v9670_v23 = vpop.f32.mrb[115].mxu0  ;;  %v9782_v53 = vpop.f32.mrb[115].mxu1 }
 0x276   : > { %19002 = vst [vmem:[#allocation85_spill] sm:$0xff] %v14532_v46  ;;  %19003 = vst [vmem:[#allocation86_spill] sm:$0xff] %v14534_v45  ;;  %v14536_v55 = vadd.f32 %v9670_v23, %v9669_v39  ;;  %v14538_v41 = vadd.f32 %v9782_v53, %v9781_v52  ;;  %v12867_v52 = vld [vmem:[#allocation5 + $0x694] ss:$8 sps:$4 sm:$0xff]   ;;  %v12872_v45 = vld [vmem:[#allocation5 + $0x790] ss:$8 sps:$4 sm:$0xff]  }
 0x277   : > { %3132 = vmatmul.mubr.bf16.gmra.mrb[220].mxu0 %v12857_v0  ;;  %3469 = vmatmul.mubr.bf16.gmra.mrb[220].mxu1 %v12858_v49  ;;  %v12869_v0 = vld [vmem:[#allocation5 + $0x794] ss:$8 sps:$4 sm:$0xff]  }
 0x278   : > { %19004 = vst [vmem:[#allocation87_spill] sm:$0xff] %v14536_v55  ;;  %19005 = vst [vmem:[#allocation88_spill] sm:$0xff] %v14538_v41  ;;  %3139 = vmatprep.mubr.bf16.mxu0 %v12861_v6  ;;  %3476 = vmatprep.mubr.bf16.mxu1 %v12863_v4  ;;  %v12871_v55 = vld [vmem:[#allocation5 + $0x690] ss:$8 sps:$4 sm:$0xff]  }
 0x27a   : > { %v9672_v36 = vpop.f32.mrb[116].mxu0  ;;  %v9784_v25 = vpop.f32.mrb[116].mxu1 }
 0x27b   : > { %v9673_v28 = vpop.f32.mrb[117].mxu0  ;;  %v9785_v38 = vpop.f32.mrb[117].mxu1 }
 0x27c   : > { %v14544_v23 = vadd.f32 %v9673_v28, %v9672_v36  ;;  %v9675_v39 = vpop.f32.mrb[118].mxu0  ;;  %v14546_v49 = vadd.f32 %v9785_v38, %v9784_v25  ;;  %v9787_v53 = vpop.f32.mrb[118].mxu1 }
 0x27d   : > { %v9676_v44 = vpop.f32.mrb[119].mxu0  ;;  %v9788_v6 = vpop.f32.mrb[119].mxu1 }
 0x27e   : > { %19006 = vst [vmem:[#allocation89_spill] sm:$0xff] %v14544_v23  ;;  %19007 = vst [vmem:[#allocation90_spill] sm:$0xff] %v14546_v49  ;;  %v14548_v4 = vadd.f32 %v9676_v44, %v9675_v39  ;;  %v14550_v46 = vadd.f32 %v9788_v6, %v9787_v53  ;;  %v12875_v53 = vld [vmem:[#allocation5 + $0x6a4] ss:$8 sps:$4 sm:$0xff]   ;;  %v12880_v49 = vld [vmem:[#allocation5 + $0x7a0] ss:$8 sps:$4 sm:$0xff]  }
 0x27f   : > { %3140 = vmatmul.mubr.bf16.gmra.mrb[224].mxu0 %v12865_v19  ;;  %3477 = vmatmul.mubr.bf16.gmra.mrb[224].mxu1 %v12866_v1  ;;  %v12877_v19 = vld [vmem:[#allocation5 + $0x7a4] ss:$8 sps:$4 sm:$0xff]  }
 0x280   : > { %19008 = vst [vmem:[#allocation91_spill] sm:$0xff] %v14548_v4  ;;  %19009 = vst [vmem:[#allocation92_spill] sm:$0xff] %v14550_v46  ;;  %3147 = vmatprep.mubr.bf16.mxu0 %v12867_v52  ;;  %3484 = vmatprep.mubr.bf16.mxu1 %v12869_v0  ;;  %v12879_v4 = vld [vmem:[#allocation5 + $0x6a0] ss:$8 sps:$4 sm:$0xff]  }
 0x282   : > { %v9678_v28 = vpop.f32.mrb[120].mxu0  ;;  %v9790_v38 = vpop.f32.mrb[120].mxu1 }
 0x283   : > { %v9679_v25 = vpop.f32.mrb[121].mxu0  ;;  %v9791_v41 = vpop.f32.mrb[121].mxu1 }
 0x284   : > { %v14556_v44 = vadd.f32 %v9679_v25, %v9678_v28  ;;  %v9681_v39 = vpop.f32.mrb[122].mxu0  ;;  %v14558_v1 = vadd.f32 %v9791_v41, %v9790_v38  ;;  %v9793_v6 = vpop.f32.mrb[122].mxu1 }
 0x285   : > { %v9682_v61 = vpop.f32.mrb[123].mxu0  ;;  %v9794_v52 = vpop.f32.mrb[123].mxu1 }
 0x286   : > { %19010 = vst [vmem:[#allocation93_spill] sm:$0xff] %v14556_v44  ;;  %19011 = vst [vmem:[#allocation94_spill] sm:$0xff] %v14558_v1  ;;  %v14560_v0 = vadd.f32 %v9682_v61, %v9681_v39  ;;  %v14562_v23 = vadd.f32 %v9794_v52, %v9793_v6  ;;  %v12881_v6 = vld [vmem:[#allocation5 + $0x6b4] ss:$8 sps:$4 sm:$0xff]   ;;  %v12886_v1 = vld [vmem:[#allocation5 + $0x7b0] ss:$8 sps:$4 sm:$0xff]  }
 0x287   : > { %3148 = vmatmul.mubr.bf16.gmra.mrb[228].mxu0 %v12871_v55  ;;  %3485 = vmatmul.mubr.bf16.gmra.mrb[228].mxu1 %v12872_v45  ;;  %v12883_v55 = vld [vmem:[#allocation5 + $0x7b4] ss:$8 sps:$4 sm:$0xff]  }
 0x288   : > { %19012 = vst [vmem:[#allocation95_spill] sm:$0xff] %v14560_v0  ;;  %19013 = vst [vmem:[#allocation96_spill] sm:$0xff] %v14562_v23  ;;  %3155 = vmatprep.mubr.bf16.mxu0 %v12875_v53  ;;  %3492 = vmatprep.mubr.bf16.mxu1 %v12877_v19  ;;  %v12885_v0 = vld [vmem:[#allocation5 + $0x6b0] ss:$8 sps:$4 sm:$0xff]  }
 0x28a   : > { %v9684_v25 = vpop.f32.mrb[124].mxu0  ;;  %v9796_v41 = vpop.f32.mrb[124].mxu1 }
 0x28b   : > { %v9685_v38 = vpop.f32.mrb[125].mxu0  ;;  %v9797_v46 = vpop.f32.mrb[125].mxu1 }
 0x28c   : > { %v14568_v61 = vadd.f32 %v9685_v38, %v9684_v25  ;;  %v9687_v39 = vpop.f32.mrb[126].mxu0  ;;  %v14570_v45 = vadd.f32 %v9797_v46, %v9796_v41  ;;  %v9799_v52 = vpop.f32.mrb[126].mxu1 }
 0x28d   : > { %v9688_v36 = vpop.f32.mrb[127].mxu0  ;;  %v9800_v53 = vpop.f32.mrb[127].mxu1 }
 0x28e   : > { %19014 = vst [vmem:[#allocation97_spill] sm:$0xff] %v14568_v61  ;;  %19015 = vst [vmem:[#allocation98_spill] sm:$0xff] %v14570_v45  ;;  %v14572_v19 = vadd.f32 %v9688_v36, %v9687_v39  ;;  %v14574_v44 = vadd.f32 %v9800_v53, %v9799_v52  ;;  %v12889_v52 = vld [vmem:[#allocation5 + $0x6c4] ss:$8 sps:$4 sm:$0xff]   ;;  %v12894_v45 = vld [vmem:[#allocation5 + $0x7c0] ss:$8 sps:$4 sm:$0xff]  }
 0x28f   : > { %3156 = vmatmul.mubr.bf16.gmra.mrb[232].mxu0 %v12879_v4  ;;  %3493 = vmatmul.mubr.bf16.gmra.mrb[232].mxu1 %v12880_v49  ;;  %v12891_v4 = vld [vmem:[#allocation5 + $0x7c4] ss:$8 sps:$4 sm:$0xff]  }
 0x290   : > { %19016 = vst [vmem:[#allocation99_spill] sm:$0xff] %v14572_v19  ;;  %19017 = vst [vmem:[#allocation100_spill] sm:$0xff] %v14574_v44  ;;  %3163 = vmatprep.mubr.bf16.mxu0 %v12881_v6  ;;  %3500 = vmatprep.mubr.bf16.mxu1 %v12883_v55  ;;  %v12893_v19 = vld [vmem:[#allocation5 + $0x6c0] ss:$8 sps:$4 sm:$0xff]  }
 0x292   : > { %v9818_v38 = vpop.f32.mrb[128].mxu0  ;;  %v9930_v46 = vpop.f32.mrb[128].mxu1 }
 0x293   : > { %v9819_v41 = vpop.f32.mrb[129].mxu0  ;;  %v9931_v23 = vpop.f32.mrb[129].mxu1 }
 0x294   : > { %v14580_v36 = vadd.f32 %v9819_v41, %v9818_v38  ;;  %v9821_v39 = vpop.f32.mrb[130].mxu0  ;;  %v14582_v49 = vadd.f32 %v9931_v23, %v9930_v46  ;;  %v9933_v53 = vpop.f32.mrb[130].mxu1 }
 0x295   : > { %v9822_v28 = vpop.f32.mrb[131].mxu0  ;;  %v9934_v6 = vpop.f32.mrb[131].mxu1 }
 0x296   : > { %19018 = vst [vmem:[#allocation101_spill] sm:$0xff] %v14580_v36  ;;  %19019 = vst [vmem:[#allocation102_spill] sm:$0xff] %v14582_v49  ;;  %v14584_v55 = vadd.f32 %v9822_v28, %v9821_v39  ;;  %v14586_v61 = vadd.f32 %v9934_v6, %v9933_v53  ;;  %v12895_v53 = vld [vmem:[#allocation5 + $0x6d4] ss:$8 sps:$4 sm:$0xff]   ;;  %v12899_v36 = vld [vmem:[#allocation5 + $0x6d0] ss:$8 sps:$4 sm:$0xff]  }
 0x297   : > { %3164 = vmatmul.mubr.bf16.gmra.mrb[236].mxu0 %v12885_v0  ;;  %3501 = vmatmul.mubr.bf16.gmra.mrb[236].mxu1 %v12886_v1  ;;  %v12897_v0 = vld [vmem:[#allocation5 + $0x7d4] ss:$8 sps:$4 sm:$0xff]  }
 0x298   : > { %19020 = vst [vmem:[#allocation103_spill] sm:$0xff] %v14584_v55  ;;  %3171 = vmatprep.mubr.bf16.mxu0 %v12889_v52  ;;  %3508 = vmatprep.mubr.bf16.mxu1 %v12891_v4  ;;  %v12900_v55 = vld [vmem:[#allocation5 + $0x7d0] ss:$8 sps:$4 sm:$0xff]  }
 0x29a   : > { %v9824_v41 = vpop.f32.mrb[132].mxu0  ;;  %v9936_v23 = vpop.f32.mrb[132].mxu1 }
 0x29b   : > { %v9825_v46 = vpop.f32.mrb[133].mxu0  ;;  %v9937_v44 = vpop.f32.mrb[133].mxu1 }
 0x29c   : > { %v14592_v28 = vadd.f32 %v9825_v46, %v9824_v41  ;;  %v9827_v39 = vpop.f32.mrb[134].mxu0  ;;  %v14594_v1 = vadd.f32 %v9937_v44, %v9936_v23  ;;  %v9939_v6 = vpop.f32.mrb[134].mxu1 }
 0x29d   : > { %v9828_v25 = vpop.f32.mrb[135].mxu0  ;;  %v9940_v52 = vpop.f32.mrb[135].mxu1 }
 0x29e   : > { %19021 = vst [vmem:[#allocation104_spill] sm:$0xff] %v14592_v28  ;;  %19022 = vst [vmem:[#allocation105_spill] sm:$0xff] %v14594_v1  ;;  %v14596_v4 = vadd.f32 %v9828_v25, %v9827_v39  ;;  %v14598_v18 = vadd.f32 %v9940_v52, %v9939_v6  ;;  %v12903_v6 = vld [vmem:[#allocation5 + $0x6e4] ss:$8 sps:$4 sm:$0xff]   ;;  %v12908_v1 = vld [vmem:[#allocation5 + $0x7e0] ss:$8 sps:$4 sm:$0xff]  }
 0x29f   : > { %3172 = vmatmul.mubr.bf16.gmra.mrb[240].mxu0 %v12893_v19  ;;  %3509 = vmatmul.mubr.bf16.gmra.mrb[240].mxu1 %v12894_v45  ;;  %v12905_v19 = vld [vmem:[#allocation5 + $0x7e4] ss:$8 sps:$4 sm:$0xff]  }
 0x2a0   : > { %19023 = vst [vmem:[#allocation106_spill] sm:$0xff] %v14596_v4  ;;  %19024 = vst [vmem:[#allocation107_spill] sm:$0xff] %v14598_v18  ;;  %3179 = vmatprep.mubr.bf16.mxu0 %v12895_v53  ;;  %3516 = vmatprep.mubr.bf16.mxu1 %v12897_v0  ;;  %v12907_v4 = vld [vmem:[#allocation5 + $0x6e0] ss:$8 sps:$4 sm:$0xff]  }
 0x2a2   : > { %v9830_v46 = vpop.f32.mrb[136].mxu0  ;;  %v9942_v44 = vpop.f32.mrb[136].mxu1 }
 0x2a3   : > { %v9831_v23 = vpop.f32.mrb[137].mxu0  ;;  %v9943_v49 = vpop.f32.mrb[137].mxu1 }
 0x2a4   : > { %v14604_v25 = vadd.f32 %v9831_v23, %v9830_v46  ;;  %v9833_v39 = vpop.f32.mrb[138].mxu0  ;;  %v14606_v45 = vadd.f32 %v9943_v49, %v9942_v44  ;;  %v9945_v52 = vpop.f32.mrb[138].mxu1 }
 0x2a5   : > { %v9834_v38 = vpop.f32.mrb[139].mxu0  ;;  %v9946_v53 = vpop.f32.mrb[139].mxu1 }
 0x2a6   : > { %19025 = vst [vmem:[#allocation108_spill] sm:$0xff] %v14604_v25  ;;  %19026 = vst [vmem:[#allocation109_spill] sm:$0xff] %v14606_v45  ;;  %v14608_v0 = vadd.f32 %v9834_v38, %v9833_v39  ;;  %v14610_v28 = vadd.f32 %v9946_v53, %v9945_v52  ;;  %v12909_v52 = vld [vmem:[#allocation5 + $0x6f4] ss:$8 sps:$4 sm:$0xff]   ;;  %v12914_v45 = vld [vmem:[#allocation5 + $0x7f0] ss:$8 sps:$4 sm:$0xff]  }
 0x2a7   : > { %3180 = vmatmul.mubr.bf16.gmra.mrb[244].mxu0 %v12899_v36  ;;  %3517 = vmatmul.mubr.bf16.gmra.mrb[244].mxu1 %v12900_v55  ;;  %v12911_v36 = vld [vmem:[#allocation5 + $0x7f4] ss:$8 sps:$4 sm:$0xff]  }
 0x2a8   : > { %19027 = vst [vmem:[#allocation110_spill] sm:$0xff] %v14608_v0  ;;  %19028 = vst [vmem:[#allocation111_spill] sm:$0xff] %v14610_v28  ;;  %3187 = vmatprep.mubr.bf16.mxu0 %v12903_v6  ;;  %3524 = vmatprep.mubr.bf16.mxu1 %v12905_v19  ;;  %v12913_v0 = vld [vmem:[#allocation5 + $0x6f0] ss:$8 sps:$4 sm:$0xff]  }
 0x2aa   : > { %v9836_v23 = vpop.f32.mrb[140].mxu0  ;;  %v9948_v49 = vpop.f32.mrb[140].mxu1 }
 0x2ab   : > { %v9837_v44 = vpop.f32.mrb[141].mxu0  ;;  %v9949_v18 = vpop.f32.mrb[141].mxu1 }
 0x2ac   : > { %v14616_v38 = vadd.f32 %v9837_v44, %v9836_v23  ;;  %v9839_v39 = vpop.f32.mrb[142].mxu0  ;;  %v14618_v55 = vadd.f32 %v9949_v18, %v9948_v49  ;;  %v9951_v53 = vpop.f32.mrb[142].mxu1 }
 0x2ad   : > { %v9840_v41 = vpop.f32.mrb[143].mxu0  ;;  %v9952_v6 = vpop.f32.mrb[143].mxu1 }
 0x2ae   : > { %19029 = vst [vmem:[#allocation112_spill] sm:$0xff] %v14616_v38  ;;  %v14620_v19 = vadd.f32 %v9840_v41, %v9839_v39  ;;  %v14622_v25 = vadd.f32 %v9952_v6, %v9951_v53  ;;  %v12921_v53 = vld [vmem:[#allocation5 + $0x804] ss:$8 sps:$4 sm:$0xff]  }
 0x2af   : > { %3188 = vmatmul.mubr.bf16.gmra.mrb[248].mxu0 %v12907_v4  ;;  %3525 = vmatmul.mubr.bf16.gmra.mrb[248].mxu1 %v12908_v1 }
 0x2b0   : > { %3195 = vmatprep.mubr.bf16.mxu0 %v12909_v52  ;;  %3532 = vmatprep.mubr.bf16.mxu1 %v12911_v36 }
 0x2b2   : > { %v9842_v44 = vpop.f32.mrb[144].mxu0  ;;  %v9954_v18 = vpop.f32.mrb[144].mxu1 }
 0x2b3   : > { %v9843_v49 = vpop.f32.mrb[145].mxu0  ;;  %v9955_v28 = vpop.f32.mrb[145].mxu1 }
 0x2b4   : > { %v14628_v41 = vadd.f32 %v9843_v49, %v9842_v44  ;;  %v9845_v39 = vpop.f32.mrb[146].mxu0  ;;  %v14630_v4 = vadd.f32 %v9955_v28, %v9954_v18  ;;  %v9957_v1 = vpop.f32.mrb[146].mxu1  ;;  %v19033_v44 = vpack.c.bf16 %v14156_v35, %v14152_v26  ;;  %v12933_v26 = vld [vmem:[#allocation7 + $0x80] sm:$0xff]   ;;  %v12941_v28 = vld [vmem:[#allocation7 + $0xc8] sm:$0xff]  }
 0x2b5   : > { %v9846_v6 = vpop.f32.mrb[147].mxu0  ;;  %v9958_v46 = vpop.f32.mrb[147].mxu1  ;;  %v12934_v35 = vld [vmem:[#allocation7 + $0x100] sm:$0xff]  }
 0x2b6   : > { %19030 = vst [vmem:[#allocation113_spill] sm:$0xff] %v14628_v41  ;;  %19031 = vst [vmem:[#allocation114_spill] sm:$0xff] %v14630_v4  ;;  %v14632_v52 = vadd.f32 %v9846_v6, %v9845_v39  ;;  %v14634_v36 = vadd.f32 %v9958_v46, %v9957_v1  ;;  %v12919_v39 = vld [vmem:[#allocation5 + $0x800] ss:$8 sps:$4 sm:$0xff]  }
 0x2b7   : > { %3196 = vmatmul.mubr.bf16.gmra.mrb[252].mxu0 %v12913_v0  ;;  %3533 = vmatmul.mubr.bf16.gmra.mrb[252].mxu1 %v12914_v45  ;;  %v12924_v45 = vld [vmem:[#allocation5 + $0x814] ss:$8 sps:$4 sm:$0xff]   ;;  %v12942_v4 = vld [vmem:[#allocation7 + $0x148] sm:$0xff]  }
 0x2b8   : > { %19032 = vst [vmem:[#allocation115_spill] sm:$0xff] %v14632_v52  ;;  %4358 = vmatprep.mubr.bf16.mxu1 %v19033_v44  ;;  %3749 = vmatprep.mubr.bf16.mxu0 %v12921_v53 }
 0x2ba   : > { %v9848_v18 = vpop.f32.mrb[148].mxu0  ;;  %v9960_v49 = vpop.f32.mrb[148].mxu1 }
 0x2bb   : > { %v9849_v38 = vpop.f32.mrb[149].mxu0  ;;  %v9961_v6 = vpop.f32.mrb[149].mxu1 }
 0x2bc   : > { %v14643_v46 = vadd.f32 %v9849_v38, %v9848_v18  ;;  %v9851_v0 = vpop.f32.mrb[150].mxu0  ;;  %v14645_v1 = vadd.f32 %v9961_v6, %v9960_v49  ;;  %v9963_v23 = vpop.f32.mrb[150].mxu1  ;;  %v19037_v38 = vpack.c.bf16 %v14154_v34, %v14150_v20  ;;  %v19038_v49 = vpack.c.bf16 %v14168_v63, %v14164_v58  ;;  %v12951_v20 = vld [vmem:[#allocation7 + $0xd0] sm:$0xff]   ;;  %v12927_v63 = vld [vmem:[#allocation5 + $0x824] ss:$8 sps:$4 sm:$0xff]  }
 0x2bd   : > { %v9852_v41 = vpop.f32.mrb[151].mxu0  ;;  %v9964_v52 = vpop.f32.mrb[151].mxu1  ;;  %v12952_v34 = vld [vmem:[#allocation7 + $0x150] sm:$0xff]  }
 0x2be   : > { %19034 = vst [vmem:[#allocation116_spill] sm:$0xff] %v14643_v46  ;;  %19035 = vst [vmem:[#allocation117_spill] sm:$0xff] %v14645_v1  ;;  %v14647_v53 = vadd.f32 %v9852_v41, %v9851_v0  ;;  %v14649_v44 = vadd.f32 %v9964_v52, %v9963_v23  ;;  %v12943_v23 = vld [vmem:[#allocation7 + $0x88] sm:$0xff]   ;;  %v12953_v41 = vld [vmem:[#allocation7 + $0x90] sm:$0xff]  }
 0x2bf   : > { %3750 = vmatmul.mubr.bf16.vlgmr.msra.gmra.mrb[0].mxu0 %v12919_v39  ;;  %4359 = vmatmul.mubr.bf16.vlgmr.msra.gmra.mrb[0].mxu1 %v19037_v38  ;;  %v12944_v52 = vld [vmem:[#allocation7 + $0x108] sm:$0xff]   ;;  %v12922_v38 = vld [vmem:[#allocation5 + $0x810] ss:$8 sps:$4 sm:$0xff]  }
 0x2c0   : > { %19036 = vst [vmem:[#allocation118_spill] sm:$0xff] %v14647_v53  ;;  %4366 = vmatprep.mubr.bf16.mxu1 %v19038_v49  ;;  %3757 = vmatprep.mubr.bf16.mxu0 %v12924_v45  ;;  %v12954_v53 = vld [vmem:[#allocation7 + $0x110] sm:$0xff]   ;;  %v12961_v1 = vld [vmem:[#allocation7 + $0xd8] sm:$0xff]  }
 0x2c1   : > { %10475 = vmatpush3.bf16.msra.mxu0 %v12933_v26  ;;  %10587 = vmatpush3.bf16.msra.mxu1 %v12934_v35 }
 0x2c2   : > { %v9854_v39 = vpop.f32.mrb[152].mxu0  ;;  %v9966_v6 = vpop.f32.mrb[152].mxu1  ;;  %10476 = vmatprep.subr.bf16.mxu0 %v12941_v28  ;;  %10588 = vmatprep.subr.bf16.mxu1 %v12942_v4 }
 0x2c3   : > { %v9855_v0 = vpop.f32.mrb[153].mxu0  ;;  %v9967_v18 = vpop.f32.mrb[153].mxu1 }
 0x2c4   : > { %v14661_v46 = vadd.f32 %v9855_v0, %v9854_v39  ;;  %v9857_v58 = vpop.f32.mrb[154].mxu0  ;;  %v14663_v45 = vadd.f32 %v9967_v18, %v9966_v6  ;;  %v9969_v49 = vpop.f32.mrb[154].mxu1  ;;  %v12962_v39 = vld [vmem:[#allocation7 + $0x158] sm:$0xff]   ;;  %v19039_v18 = vpack.c.bf16 %v14166_v62, %v14162_v54  ;;  %v12971_v54 = vld [vmem:[#allocation7 + $0xe0] sm:$0xff]  }
 0x2c5   : > { %v9858_v26 = vpop.f32.mrb[155].mxu0  ;;  %v9970_v35 = vpop.f32.mrb[155].mxu1  ;;  %10477 = vmatpush3.bf16.msra.mxu0 %v12943_v23  ;;  %10589 = vmatpush3.bf16.msra.mxu1 %v12944_v52  ;;  %v19040_v23 = vpack.c.bf16 %v14180_v17, %v14176_v12  ;;  %v12972_v62 = vld [vmem:[#allocation7 + $0x160] sm:$0xff]   ;;  %v12930_v17 = vld [vmem:[#allocation5 + $0x834] ss:$8 sps:$4 sm:$0xff]   ;;  %v12981_v52 = vld [vmem:[#allocation7 + $0xe8] sm:$0xff]  }
 0x2c6   : > { %v14665_v28 = vadd.f32 %v9858_v26, %v9857_v58  ;;  %v14667_v4 = vadd.f32 %v9970_v35, %v9969_v49  ;;  %10478 = vmatprep.subr.bf16.mxu0 %v12951_v20  ;;  %10590 = vmatprep.subr.bf16.mxu1 %v12952_v34  ;;  %v12963_v20 = vld [vmem:[#allocation7 + $0x98] sm:$0xff]   ;;  %v12925_v49 = vld [vmem:[#allocation5 + $0x820] ss:$8 sps:$4 sm:$0xff]  }
 0x2c7   : > { %3758 = vmatmul.mubr.bf16.gmra.mrb[4].mxu0 %v12922_v38  ;;  %4367 = vmatmul.mubr.bf16.gmra.mrb[4].mxu1 %v19039_v18  ;;  %v12964_v34 = vld [vmem:[#allocation7 + $0x118] sm:$0xff]   ;;  %v12974_v6 = vld [vmem:[#allocation7 + $0x120] sm:$0xff]  }
 0x2c8   : > { %4374 = vmatprep.mubr.bf16.mxu1 %v19040_v23  ;;  %3765 = vmatprep.mubr.bf16.mxu0 %v12927_v63  ;;  %v12973_v23 = vld [vmem:[#allocation7 + $0xa0] sm:$0xff]  }
 0x2c9   : > { %10479 = vmatpush3.bf16.msra.mxu0 %v12953_v41  ;;  %10591 = vmatpush3.bf16.msra.mxu1 %v12954_v53 }
 0x2ca   : > { %v9860_v0 = vpop.f32.mrb[156].mxu0  ;;  %v9972_v38 = vpop.f32.mrb[156].mxu1  ;;  %10480 = vmatprep.subr.bf16.mxu0 %v12961_v1  ;;  %10592 = vmatprep.subr.bf16.mxu1 %v12962_v39 }
 0x2cb   : > { %v9861_v58 = vpop.f32.mrb[157].mxu0  ;;  %v9973_v26 = vpop.f32.mrb[157].mxu1 }
 0x2cc   : > { %v14679_v35 = vadd.f32 %v9861_v58, %v9860_v0  ;;  %v9863_v12 = vpop.f32.mrb[158].mxu0  ;;  %v14681_v63 = vadd.f32 %v9973_v26, %v9972_v38  ;;  %v9975_v18 = vpop.f32.mrb[158].mxu1  ;;  %v12982_v0 = vld [vmem:[#allocation7 + $0x168] sm:$0xff]   ;;  %v19041_v38 = vpack.c.bf16 %v14178_v16, %v14174_v8  ;;  %v12991_v8 = vld [vmem:[#allocation7 + $0xf0] sm:$0xff]  }
 0x2cd   : > { %v9864_v41 = vpop.f32.mrb[159].mxu0  ;;  %v9976_v53 = vpop.f32.mrb[159].mxu1  ;;  %10481 = vmatpush3.bf16.msra.mxu0 %v12963_v20  ;;  %10593 = vmatpush3.bf16.msra.mxu1 %v12964_v34  ;;  %v19042_v20 = vpack.c.bf16 %v14192_v59, %v14188_v50  ;;  %v12992_v16 = vld [vmem:[#allocation7 + $0x170] sm:$0xff]   ;;  %v12937_v59 = vld [vmem:[#allocation5 + $0x844] ss:$8 sps:$4 sm:$0xff]   ;;  %v12995_v34 = vld [vmem:[#allocation7 + $0xf8] sm:$0xff]  }
 0x2ce   : > { %v14683_v1 = vadd.f32 %v9864_v41, %v9863_v12  ;;  %v14685_v39 = vadd.f32 %v9976_v53, %v9975_v18  ;;  %10482 = vmatprep.subr.bf16.mxu0 %v12971_v54  ;;  %10594 = vmatprep.subr.bf16.mxu1 %v12972_v62  ;;  %v12983_v54 = vld [vmem:[#allocation7 + $0xa8] sm:$0xff]   ;;  %v12928_v18 = vld [vmem:[#allocation5 + $0x830] ss:$8 sps:$4 sm:$0xff]  }
 0x2cf   : > { %3766 = vmatmul.mubr.bf16.gmra.mrb[8].mxu0 %v12925_v49  ;;  %4375 = vmatmul.mubr.bf16.gmra.mrb[8].mxu1 %v19041_v38  ;;  %v12984_v62 = vld [vmem:[#allocation7 + $0x128] sm:$0xff]   ;;  %v12994_v58 = vld [vmem:[#allocation7 + $0x130] sm:$0xff]  }
 0x2d0   : > { %4382 = vmatprep.mubr.bf16.mxu1 %v19042_v20  ;;  %3773 = vmatprep.mubr.bf16.mxu0 %v12930_v17  ;;  %v12993_v20 = vld [vmem:[#allocation7 + $0xb0] sm:$0xff]  }
 0x2d1   : > { %10483 = vmatpush3.bf16.msra.mxu0 %v12973_v23  ;;  %10595 = vmatpush3.bf16.msra.mxu1 %v12974_v6 }
 0x2d2   : > { %v9866_v49 = vpop.f32.mrb[160].mxu0  ;;  %v9978_v26 = vpop.f32.mrb[160].mxu1  ;;  %10484 = vmatprep.subr.bf16.mxu0 %v12981_v52  ;;  %10596 = vmatprep.subr.bf16.mxu1 %v12982_v0 }
 0x2d3   : > { %v9867_v12 = vpop.f32.mrb[161].mxu0  ;;  %v9979_v41 = vpop.f32.mrb[161].mxu1 }
 0x2d4   : > { %v14697_v53 = vadd.f32 %v9867_v12, %v9866_v49  ;;  %v9869_v50 = vpop.f32.mrb[162].mxu0  ;;  %v14699_v17 = vadd.f32 %v9979_v41, %v9978_v26  ;;  %v9981_v38 = vpop.f32.mrb[162].mxu1  ;;  %v12996_v49 = vld [vmem:[#allocation7 + $0x178] sm:$0xff]   ;;  %v19043_v26 = vpack.c.bf16 %v14190_v57, %v14186_v42  ;;  %v12999_v42 = vld [vmem:[#allocation7 + $0x1c0] sm:$0xff]  }
 0x2d5   : > { %v9870_v23 = vpop.f32.mrb[163].mxu0  ;;  %v9982_v6 = vpop.f32.mrb[163].mxu1  ;;  %10485 = vmatpush3.bf16.msra.mxu0 %v12983_v54  ;;  %10597 = vmatpush3.bf16.msra.mxu1 %v12984_v62  ;;  %v19044_v54 = vpack.c.bf16 %v14204_v27, %v14200_v14  ;;  %v14715_v57 = vld [vmem:[#allocation7 + $0x200] sm:$0xff]  }
 0x2d6   : > { %v14701_v52 = vadd.f32 %v9870_v23, %v9869_v50  ;;  %v14703_v0 = vadd.f32 %v9982_v6, %v9981_v38  ;;  %10486 = vmatprep.subr.bf16.mxu0 %v12991_v8  ;;  %10598 = vmatprep.subr.bf16.mxu1 %v12992_v16  ;;  %v12997_v8 = vld [vmem:[#allocation7 + $0xb8] sm:$0xff]   ;;  %v12935_v38 = vld [vmem:[#allocation5 + $0x840] ss:$8 sps:$4 sm:$0xff]  }
 0x2d7   : > { %3774 = vmatmul.mubr.bf16.gmra.mrb[12].mxu0 %v12928_v18  ;;  %4383 = vmatmul.mubr.bf16.gmra.mrb[12].mxu1 %v19043_v26  ;;  %v12998_v16 = vld [vmem:[#allocation7 + $0x138] sm:$0xff]  }
 0x2d8   : > { %4390 = vmatprep.mubr.bf16.mxu1 %v19044_v54  ;;  %3781 = vmatprep.mubr.bf16.mxu0 %v12937_v59  ;;  %v12940_v59 = vld [vmem:[#allocation5 + $0x854] ss:$8 sps:$4 sm:$0xff]  }
 0x2d9   : > { %10487 = vmatpush3.bf16.msra.mxu0 %v12993_v20  ;;  %10599 = vmatpush3.bf16.msra.mxu1 %v12994_v58 }
 0x2da   : > { %v9872_v18 = vpop.f32.mrb[164].mxu0  ;;  %v9984_v41 = vpop.f32.mrb[164].mxu1  ;;  %10488 = vmatprep.subr.bf16.mxu0 %v12995_v34  ;;  %10600 = vmatprep.subr.bf16.mxu1 %v12996_v49  ;;  %v19045_v49 = vpack.c.bf16 %v14202_v24, %v14198_v9  ;;  %v12947_v24 = vld [vmem:[#allocation5 + $0x864] ss:$8 sps:$4 sm:$0xff]  }
 0x2db   : > { %v9873_v50 = vpop.f32.mrb[165].mxu0  ;;  %v9985_v23 = vpop.f32.mrb[165].mxu1 }
 0x2dc   : > { %v14717_v14 = vadd.f32 %v9873_v50, %v9872_v18  ;;  %v9875_v27 = vpop.f32.mrb[166].mxu0  ;;  %v14719_v6 = vadd.f32 %v9985_v23, %v9984_v41  ;;  %v9987_v20 = vpop.f32.mrb[166].mxu1  ;;  %v19046_v41 = vpack.c.bf16 %v14216_v15, %v14212_v5  ;;  %v12938_v23 = vld [vmem:[#allocation5 + $0x850] ss:$8 sps:$4 sm:$0xff]  }
 0x2dd   : > { %v9876_v58 = vpop.f32.mrb[167].mxu0  ;;  %v9988_v26 = vpop.f32.mrb[167].mxu1  ;;  %10489 = vmatpush3.bf16.msra.mxu0 %v12997_v8  ;;  %10601 = vmatpush3.bf16.msra.mxu1 %v12998_v16 }
 0x2de   : > { %v14721_v54 = vadd.f32 %v9876_v58, %v9875_v27  ;;  %v14723_v34 = vadd.f32 %v9988_v26, %v9987_v20  ;;  %10698 = vmatprep.subr.bf16.mxu0 %v12999_v42  ;;  %12314 = vmatprep.subr.bf16.mxu1 %v14715_v57 }
 0x2df   : > { %3782 = vmatmul.mubr.bf16.gmra.mrb[16].mxu0 %v12935_v38  ;;  %4391 = vmatmul.mubr.bf16.gmra.mrb[16].mxu1 %v19045_v49 }
 0x2e0   : > { %4398 = vmatprep.mubr.bf16.mxu1 %v19046_v41  ;;  %3789 = vmatprep.mubr.bf16.mxu0 %v12940_v59  ;;  %v19047_v59 = vpack.c.bf16 %v14214_v13, %v14210_v2  ;;  %v12950_v13 = vld [vmem:[#allocation5 + $0x874] ss:$8 sps:$4 sm:$0xff]  }
 0x2e2   : > { %v9878_v16 = vpop.f32.mrb[168].mxu0  ;;  %v9990_v42 = vpop.f32.mrb[168].mxu1 }
 0x2e3   : > { %v9879_v50 = vpop.f32.mrb[169].mxu0  ;;  %v9991_v38 = vpop.f32.mrb[169].mxu1 }
 0x2e4   : > { %v14736_v27 = vadd.f32 %v9879_v50, %v9878_v16  ;;  %v9881_v9 = vpop.f32.mrb[170].mxu0  ;;  %v14738_v20 = vadd.f32 %v9991_v38, %v9990_v42  ;;  %v9993_v58 = vpop.f32.mrb[170].mxu1  ;;  %v19048_v16 = vpack.c.bf16 %v14234_v30, %v14229_v10 }
 0x2e5   : > { %v9882_v26 = vpop.f32.mrb[171].mxu0  ;;  %v9994_v49 = vpop.f32.mrb[171].mxu1 }
 0x2e6   : > { %v14740_v5 = vadd.f32 %v9882_v26, %v9881_v9  ;;  %v14742_v15 = vadd.f32 %v9994_v49, %v9993_v58  ;;  %v12945_v58 = vld [vmem:[#allocation5 + $0x860] ss:$8 sps:$4 sm:$0xff]  }
 0x2e7   : > { %3790 = vmatmul.mubr.bf16.gmra.mrb[20].mxu0 %v12938_v23  ;;  %4399 = vmatmul.mubr.bf16.gmra.mrb[20].mxu1 %v19047_v59 }
 0x2e8   : > { %4406 = vmatprep.mubr.bf16.mxu1 %v19048_v16  ;;  %3797 = vmatprep.mubr.bf16.mxu0 %v12947_v24  ;;  %v19049_v24 = vpack.c.bf16 %v14232_v22, %v14226_v3  ;;  %v12957_v22 = vld [vmem:[#allocation5 + $0x884] ss:$8 sps:$4 sm:$0xff]  }
 0x2ea   : > { %v9884_v50 = vpop.f32.mrb[172].mxu0  ;;  %v9996_v38 = vpop.f32.mrb[172].mxu1 }
 0x2eb   : > { %v9885_v9 = vpop.f32.mrb[173].mxu0  ;;  %v9997_v23 = vpop.f32.mrb[173].mxu1 }
 0x2ec   : > { %v14754_v26 = vadd.f32 %v9885_v9, %v9884_v50  ;;  %v9887_v2 = vpop.f32.mrb[174].mxu0  ;;  %v14756_v49 = vadd.f32 %v9997_v23, %v9996_v38  ;;  %v9999_v59 = vpop.f32.mrb[174].mxu1  ;;  %v19050_v50 = vpack.c.bf16 %v14253_v32, %v14248_v7  ;;  %v12948_v23 = vld [vmem:[#allocation5 + $0x870] ss:$8 sps:$4 sm:$0xff]  }
 0x2ed   : > { %v9888_v41 = vpop.f32.mrb[175].mxu0  ;;  %v10000_v18 = vpop.f32.mrb[175].mxu1 }
 0x2ee   : > { %v14758_v30 = vadd.f32 %v9888_v41, %v9887_v2  ;;  %v14760_v10 = vadd.f32 %v10000_v18, %v9999_v59 }
 0x2ef   : > { %3798 = vmatmul.mubr.bf16.gmra.mrb[24].mxu0 %v12945_v58  ;;  %4407 = vmatmul.mubr.bf16.gmra.mrb[24].mxu1 %v19049_v24 }
 0x2f0   : > { %4414 = vmatprep.mubr.bf16.mxu1 %v19050_v50  ;;  %3805 = vmatprep.mubr.bf16.mxu0 %v12950_v13  ;;  %v19051_v13 = vpack.c.bf16 %v14251_v43, %v14246_v51  ;;  %v12960_v51 = vld [vmem:[#allocation5 + $0x894] ss:$8 sps:$4 sm:$0xff]  }
 0x2f2   : > { %v9890_v41 = vpop.f32.mrb[176].mxu0  ;;  %v10002_v9 = vpop.f32.mrb[176].mxu1 }
 0x2f3   : > { %v9891_v18 = vpop.f32.mrb[177].mxu0  ;;  %v10003_v58 = vpop.f32.mrb[177].mxu1 }
 0x2f4   : > { %v14772_v2 = vadd.f32 %v9891_v18, %v9890_v41  ;;  %v9893_v3 = vpop.f32.mrb[178].mxu0  ;;  %v14774_v59 = vadd.f32 %v10003_v58, %v10002_v9  ;;  %v10005_v24 = vpop.f32.mrb[178].mxu1  ;;  %v19052_v41 = vpack.c.bf16 %v14273_v40, %v14268_v29  ;;  %v12955_v58 = vld [vmem:[#allocation5 + $0x880] ss:$8 sps:$4 sm:$0xff]  }
 0x2f5   : > { %v9894_v16 = vpop.f32.mrb[179].mxu0  ;;  %v10006_v42 = vpop.f32.mrb[179].mxu1 }
 0x2f6   : > { %v14776_v7 = vadd.f32 %v9894_v16, %v9893_v3  ;;  %v14778_v32 = vadd.f32 %v10006_v42, %v10005_v24 }
 0x2f7   : > { %3806 = vmatmul.mubr.bf16.gmra.mrb[28].mxu0 %v12948_v23  ;;  %4415 = vmatmul.mubr.bf16.gmra.mrb[28].mxu1 %v19051_v13 }
 0x2f8   : > { %4422 = vmatprep.mubr.bf16.mxu1 %v19052_v41  ;;  %3813 = vmatprep.mubr.bf16.mxu0 %v12957_v22  ;;  %v19053_v22 = vpack.c.bf16 %v14271_v21, %v14266_v56  ;;  %v12967_v56 = vld [vmem:[#allocation5 + $0x8a4] ss:$8 sps:$4 sm:$0xff]  }
 0x2fa   : > { %v9896_v16 = vpop.f32.mrb[180].mxu0  ;;  %v10008_v18 = vpop.f32.mrb[180].mxu1 }
 0x2fb   : > { %v9897_v42 = vpop.f32.mrb[181].mxu0  ;;  %v10009_v23 = vpop.f32.mrb[181].mxu1 }
 0x2fc   : > { %v14790_v3 = vadd.f32 %v9897_v42, %v9896_v16  ;;  %v9899_v43 = vpop.f32.mrb[182].mxu0  ;;  %v14792_v24 = vadd.f32 %v10009_v23, %v10008_v18  ;;  %v10011_v13 = vpop.f32.mrb[182].mxu1  ;;  %v19054_v16 = vpack.c.bf16 %v14293_v31, %v14288_v37  ;;  %v12958_v23 = vld [vmem:[#allocation5 + $0x890] ss:$8 sps:$4 sm:$0xff]  }
 0x2fd   : > { %v9900_v50 = vpop.f32.mrb[183].mxu0  ;;  %v10012_v38 = vpop.f32.mrb[183].mxu1 }
 0x2fe   : > { %v14794_v29 = vadd.f32 %v9900_v50, %v9899_v43  ;;  %v14796_v40 = vadd.f32 %v10012_v38, %v10011_v13 }
 0x2ff   : > { %3814 = vmatmul.mubr.bf16.gmra.mrb[32].mxu0 %v12955_v58  ;;  %4423 = vmatmul.mubr.bf16.gmra.mrb[32].mxu1 %v19053_v22 }
 0x300   : > { %4430 = vmatprep.mubr.bf16.mxu1 %v19054_v16  ;;  %3821 = vmatprep.mubr.bf16.mxu0 %v12960_v51  ;;  %v19055_v51 = vpack.c.bf16 %v14291_v48, %v14286_v47  ;;  %v12970_v48 = vld [vmem:[#allocation5 + $0x8b4] ss:$8 sps:$4 sm:$0xff]  }
 0x302   : > { %v9902_v50 = vpop.f32.mrb[184].mxu0  ;;  %v10014_v42 = vpop.f32.mrb[184].mxu1 }
 0x303   : > { %v9903_v38 = vpop.f32.mrb[185].mxu0  ;;  %v10015_v58 = vpop.f32.mrb[185].mxu1 }
 0x304   : > { %v14808_v43 = vadd.f32 %v9903_v38, %v9902_v50  ;;  %v9905_v21 = vpop.f32.mrb[186].mxu0  ;;  %v14810_v13 = vadd.f32 %v10015_v58, %v10014_v42  ;;  %v10017_v22 = vpop.f32.mrb[186].mxu1  ;;  %v19056_v50 = vpack.c.bf16 %v14307_v33, %v14303_v11  ;;  %v12965_v58 = vld [vmem:[#allocation5 + $0x8a0] ss:$8 sps:$4 sm:$0xff]   ;;  %v19063_v42 = vld [vmem:[#allocation18_spill] sm:$0xff] }
 0x305   : > { %v9906_v41 = vpop.f32.mrb[187].mxu0  ;;  %v10018_v9 = vpop.f32.mrb[187].mxu1 }
 0x306   : > { %v14812_v31 = vadd.f32 %v9906_v41, %v9905_v21  ;;  %v14814_v37 = vadd.f32 %v10018_v9, %v10017_v22 }
 0x307   : > { %3822 = vmatmul.mubr.bf16.gmra.mrb[36].mxu0 %v12958_v23  ;;  %4431 = vmatmul.mubr.bf16.gmra.mrb[36].mxu1 %v19055_v51 }
 0x308   : > { %4438 = vmatprep.mubr.bf16.mxu1 %v19056_v50  ;;  %3829 = vmatprep.mubr.bf16.mxu0 %v12967_v56  ;;  %v19060_v56 = vld [vmem:[#allocation16_spill] sm:$0xff] }
 0x309   : > { %v19061_v50 = vpack.c.bf16 %v14305_v60, %v19060_v56  ;;  %v12977_v56 = vld [vmem:[#allocation5 + $0x8c4] ss:$8 sps:$4 sm:$0xff]  }
 0x30a   : > { %v9908_v41 = vpop.f32.mrb[188].mxu0  ;;  %v10020_v38 = vpop.f32.mrb[188].mxu1 }
 0x30b   : > { %v9909_v9 = vpop.f32.mrb[189].mxu0  ;;  %v10021_v23 = vpop.f32.mrb[189].mxu1 }
 0x30c   : > { %v14826_v21 = vadd.f32 %v9909_v9, %v9908_v41  ;;  %v9911_v47 = vpop.f32.mrb[190].mxu0  ;;  %v14828_v22 = vadd.f32 %v10021_v23, %v10020_v38  ;;  %v10023_v51 = vpop.f32.mrb[190].mxu1  ;;  %v19062_v9 = vld [vmem:[#allocation20_spill] sm:$0xff] }
 0x30d   : > { %v9912_v16 = vpop.f32.mrb[191].mxu0  ;;  %v10024_v18 = vpop.f32.mrb[191].mxu1  ;;  %v19064_v8 = vpack.c.bf16 %v19062_v9, %v19063_v42  ;;  %v19070_v9 = vld [vmem:[#allocation17_spill] sm:$0xff] }
 0x30e   : > { %19057 = vst [vmem:[#allocation119_spill] sm:$0xff] %v14826_v21  ;;  %19058 = vst [vmem:[#allocation120_spill] sm:$0xff] %v14828_v22  ;;  %v14830_v33 = vadd.f32 %v9912_v16, %v9911_v47  ;;  %v14832_v11 = vadd.f32 %v10024_v18, %v10023_v51  ;;  %v12968_v47 = vld [vmem:[#allocation5 + $0x8b0] ss:$8 sps:$4 sm:$0xff]  }
 0x30f   : > { %3830 = vmatmul.mubr.bf16.gmra.mrb[40].mxu0 %v12965_v58  ;;  %4439 = vmatmul.mubr.bf16.gmra.mrb[40].mxu1 %v19061_v50  ;;  %v19073_v21 = vld [vmem:[#allocation22_spill] sm:$0xff] }
 0x310   : > { %19059 = vst [vmem:[#allocation121_spill] sm:$0xff] %v14830_v33  ;;  %4446 = vmatprep.mubr.bf16.mxu1 %v19064_v8  ;;  %3837 = vmatprep.mubr.bf16.mxu0 %v12970_v48  ;;  %v19069_v48 = vld [vmem:[#allocation19_spill] sm:$0xff] }
 0x311   : > { %v19071_v38 = vpack.c.bf16 %v19069_v48, %v19070_v9 }
 0x312   : > { %v10042_v16 = vpop.f32.mrb[192].mxu0  ;;  %v10154_v23 = vpop.f32.mrb[192].mxu1 }
 0x313   : > { %v10043_v18 = vpop.f32.mrb[193].mxu0  ;;  %v10155_v58 = vpop.f32.mrb[193].mxu1 }
 0x314   : > { %v14844_v51 = vadd.f32 %v10043_v18, %v10042_v16  ;;  %v10045_v60 = vpop.f32.mrb[194].mxu0  ;;  %v14846_v50 = vadd.f32 %v10155_v58, %v10154_v23  ;;  %v10157_v41 = vpop.f32.mrb[194].mxu1  ;;  %v19072_v18 = vld [vmem:[#allocation24_spill] sm:$0xff] }
 0x315   : > { %v10046_v12 = vpop.f32.mrb[195].mxu0  ;;  %v10158_v62 = vpop.f32.mrb[195].mxu1  ;;  %v19074_v33 = vpack.c.bf16 %v19072_v18, %v19073_v21  ;;  %v19080_v18 = vld [vmem:[#allocation21_spill] sm:$0xff] }
 0x316   : > { %19065 = vst [vmem:[#allocation16_spill] sm:$0xff] %v14844_v51  ;;  %19066 = vst [vmem:[#allocation20_spill] sm:$0xff] %v14846_v50  ;;  %v14848_v42 = vadd.f32 %v10046_v12, %v10045_v60  ;;  %v14850_v8 = vadd.f32 %v10158_v62, %v10157_v41  ;;  %v12975_v41 = vld [vmem:[#allocation5 + $0x8c0] ss:$8 sps:$4 sm:$0xff]   ;;  %v19083_v50 = vld [vmem:[#allocation26_spill] sm:$0xff] }
 0x317   : > { %3838 = vmatmul.mubr.bf16.gmra.mrb[44].mxu0 %v12968_v47  ;;  %4447 = vmatmul.mubr.bf16.gmra.mrb[44].mxu1 %v19071_v38  ;;  %v12980_v38 = vld [vmem:[#allocation5 + $0x8d4] ss:$8 sps:$4 sm:$0xff]  }
 0x318   : > { %19067 = vst [vmem:[#allocation18_spill] sm:$0xff] %v14848_v42  ;;  %19068 = vst [vmem:[#allocation122_spill] sm:$0xff] %v14850_v8  ;;  %4454 = vmatprep.mubr.bf16.mxu1 %v19074_v33  ;;  %3845 = vmatprep.mubr.bf16.mxu0 %v12977_v56  ;;  %v19079_v56 = vld [vmem:[#allocation23_spill] sm:$0xff] }
 0x319   : > { %v19081_v23 = vpack.c.bf16 %v19079_v56, %v19080_v18 }
 0x31a   : > { %v10048_v12 = vpop.f32.mrb[196].mxu0  ;;  %v10160_v58 = vpop.f32.mrb[196].mxu1 }
 0x31b   : > { %v10049_v62 = vpop.f32.mrb[197].mxu0  ;;  %v10161_v47 = vpop.f32.mrb[197].mxu1 }
 0x31c   : > { %v14862_v60 = vadd.f32 %v10049_v62, %v10048_v12  ;;  %v10051_v48 = vpop.f32.mrb[198].mxu0  ;;  %v14864_v9 = vadd.f32 %v10161_v47, %v10160_v58  ;;  %v10163_v16 = vpop.f32.mrb[198].mxu1  ;;  %v19082_v62 = vld [vmem:[#allocation28_spill] sm:$0xff] }
 0x31d   : > { %v10052_v51 = vpop.f32.mrb[199].mxu0  ;;  %v10164_v42 = vpop.f32.mrb[199].mxu1  ;;  %v19084_v8 = vpack.c.bf16 %v19082_v62, %v19083_v50  ;;  %v19090_v62 = vld [vmem:[#allocation25_spill] sm:$0xff] }
 0x31e   : > { %19075 = vst [vmem:[#allocation19_spill] sm:$0xff] %v14862_v60  ;;  %19076 = vst [vmem:[#allocation17_spill] sm:$0xff] %v14864_v9  ;;  %v14866_v21 = vadd.f32 %v10052_v51, %v10051_v48  ;;  %v14868_v33 = vadd.f32 %v10164_v42, %v10163_v16  ;;  %v12978_v16 = vld [vmem:[#allocation5 + $0x8d0] ss:$8 sps:$4 sm:$0xff]  }
 0x31f   : > { %3846 = vmatmul.mubr.bf16.gmra.mrb[48].mxu0 %v12975_v41  ;;  %4455 = vmatmul.mubr.bf16.gmra.mrb[48].mxu1 %v19081_v23  ;;  %v12987_v23 = vld [vmem:[#allocation5 + $0x8e4] ss:$8 sps:$4 sm:$0xff]   ;;  %v19093_v9 = vld [vmem:[#allocation30_spill] sm:$0xff] }
 0x320   : > { %19077 = vst [vmem:[#allocation24_spill] sm:$0xff] %v14866_v21  ;;  %19078 = vst [vmem:[#allocation22_spill] sm:$0xff] %v14868_v33  ;;  %4462 = vmatprep.mubr.bf16.mxu1 %v19084_v8  ;;  %3853 = vmatprep.mubr.bf16.mxu0 %v12980_v38  ;;  %v19089_v38 = vld [vmem:[#allocation27_spill] sm:$0xff] }
 0x321   : > { %v19091_v58 = vpack.c.bf16 %v19089_v38, %v19090_v62 }
 0x322   : > { %v10054_v51 = vpop.f32.mrb[200].mxu0  ;;  %v10166_v47 = vpop.f32.mrb[200].mxu1 }
 0x323   : > { %v10055_v42 = vpop.f32.mrb[201].mxu0  ;;  %v10167_v41 = vpop.f32.mrb[201].mxu1 }
 0x324   : > { %v14880_v48 = vadd.f32 %v10055_v42, %v10054_v51  ;;  %v10057_v56 = vpop.f32.mrb[202].mxu0  ;;  %v14882_v18 = vadd.f32 %v10167_v41, %v10166_v47  ;;  %v10169_v12 = vpop.f32.mrb[202].mxu1  ;;  %v19092_v42 = vld [vmem:[#allocation32_spill] sm:$0xff] }
 0x325   : > { %v10058_v60 = vpop.f32.mrb[203].mxu0  ;;  %v10170_v21 = vpop.f32.mrb[203].mxu1  ;;  %v19094_v33 = vpack.c.bf16 %v19092_v42, %v19093_v9  ;;  %v19100_v42 = vld [vmem:[#allocation29_spill] sm:$0xff] }
 0x326   : > { %19085 = vst [vmem:[#allocation23_spill] sm:$0xff] %v14880_v48  ;;  %19086 = vst [vmem:[#allocation21_spill] sm:$0xff] %v14882_v18  ;;  %v14884_v50 = vadd.f32 %v10058_v60, %v10057_v56  ;;  %v14886_v8 = vadd.f32 %v10170_v21, %v10169_v12  ;;  %v12985_v12 = vld [vmem:[#allocation5 + $0x8e0] ss:$8 sps:$4 sm:$0xff]   ;;  %v19103_v18 = vld [vmem:[#allocation34_spill] sm:$0xff] }
 0x327   : > { %3854 = vmatmul.mubr.bf16.gmra.mrb[52].mxu0 %v12978_v16  ;;  %4463 = vmatmul.mubr.bf16.gmra.mrb[52].mxu1 %v19091_v58  ;;  %v12990_v58 = vld [vmem:[#allocation5 + $0x8f4] ss:$8 sps:$4 sm:$0xff]  }
 0x328   : > { %19087 = vst [vmem:[#allocation28_spill] sm:$0xff] %v14884_v50  ;;  %19088 = vst [vmem:[#allocation26_spill] sm:$0xff] %v14886_v8  ;;  %4470 = vmatprep.mubr.bf16.mxu1 %v19094_v33  ;;  %3861 = vmatprep.mubr.bf16.mxu0 %v12987_v23  ;;  %v19099_v23 = vld [vmem:[#allocation31_spill] sm:$0xff] }
 0x329   : > { %v19101_v47 = vpack.c.bf16 %v19099_v23, %v19100_v42 }
 0x32a   : > { %v10060_v60 = vpop.f32.mrb[204].mxu0  ;;  %v10172_v41 = vpop.f32.mrb[204].mxu1 }
 0x32b   : > { %v10061_v21 = vpop.f32.mrb[205].mxu0  ;;  %v10173_v16 = vpop.f32.mrb[205].mxu1 }
 0x32c   : > { %v14898_v56 = vadd.f32 %v10061_v21, %v10060_v60  ;;  %v10063_v38 = vpop.f32.mrb[206].mxu0  ;;  %v14900_v62 = vadd.f32 %v10173_v16, %v10172_v41  ;;  %v10175_v51 = vpop.f32.mrb[206].mxu1  ;;  %v19102_v21 = vld [vmem:[#allocation36_spill] sm:$0xff] }
 0x32d   : > { %v10064_v48 = vpop.f32.mrb[207].mxu0  ;;  %v10176_v50 = vpop.f32.mrb[207].mxu1  ;;  %v19104_v8 = vpack.c.bf16 %v19102_v21, %v19103_v18 }
 0x32e   : > { %19095 = vst [vmem:[#allocation27_spill] sm:$0xff] %v14898_v56  ;;  %19096 = vst [vmem:[#allocation25_spill] sm:$0xff] %v14900_v62  ;;  %v14902_v9 = vadd.f32 %v10064_v48, %v10063_v38  ;;  %v14904_v33 = vadd.f32 %v10176_v50, %v10175_v51  ;;  %v12988_v51 = vld [vmem:[#allocation5 + $0x8f0] ss:$8 sps:$4 sm:$0xff]  }
 0x32f   : > { %3862 = vmatmul.mubr.bf16.gmra.mrb[56].mxu0 %v12985_v12  ;;  %4471 = vmatmul.mubr.bf16.gmra.mrb[56].mxu1 %v19101_v47 }
 0x330   : > { %19097 = vst [vmem:[#allocation32_spill] sm:$0xff] %v14902_v9  ;;  %19098 = vst [vmem:[#allocation30_spill] sm:$0xff] %v14904_v33  ;;  %4478 = vmatprep.mubr.bf16.mxu1 %v19104_v8  ;;  %3869 = vmatprep.mubr.bf16.mxu0 %v12990_v58  ;;  %v19109_v8 = vld [vmem:[#allocation35_spill] sm:$0xff]  ;;  %v19110_v58 = vld [vmem:[#allocation33_spill] sm:$0xff] }
 0x331   : > { %v19111_v21 = vpack.c.bf16 %v19109_v8, %v19110_v58  ;;  %v19128_v33 = vld [vmem:[#allocation42_spill] sm:$0xff] }
 0x332   : > { %v10066_v48 = vpop.f32.mrb[208].mxu0  ;;  %v10178_v16 = vpop.f32.mrb[208].mxu1 }
 0x333   : > { %v10067_v50 = vpop.f32.mrb[209].mxu0  ;;  %v10179_v12 = vpop.f32.mrb[209].mxu1 }
 0x334   : > { %v14916_v38 = vadd.f32 %v10067_v50, %v10066_v48  ;;  %v10069_v23 = vpop.f32.mrb[210].mxu0  ;;  %v14918_v47 = vadd.f32 %v10179_v12, %v10178_v16  ;;  %v10181_v42 = vpop.f32.mrb[210].mxu1  ;;  %v19112_v48 = vld [vmem:[#allocation40_spill] sm:$0xff]  ;;  %v19113_v50 = vld [vmem:[#allocation38_spill] sm:$0xff] }
 0x335   : > { %v10070_v60 = vpop.f32.mrb[211].mxu0  ;;  %v10182_v56 = vpop.f32.mrb[211].mxu1  ;;  %v19114_v62 = vpack.c.bf16 %v19112_v48, %v19113_v50  ;;  %v19115_v16 = vld [vmem:[#allocation102_spill] sm:$0xff] }
 0x336   : > { %19105 = vst [vmem:[#allocation31_spill] sm:$0xff] %v14916_v38  ;;  %19106 = vst [vmem:[#allocation29_spill] sm:$0xff] %v14918_v47  ;;  %v14920_v9 = vadd.f32 %v10070_v60, %v10069_v23  ;;  %v14922_v18 = vadd.f32 %v10182_v56, %v10181_v42  ;;  %v19116_v12 = vpack.c.bf16 %v14586_v61, %v19115_v16  ;;  %v13002_v16 = vld [vmem:[#allocation7 + $0x1c8] sm:$0xff]   ;;  %v19121_v56 = vld [vmem:[#allocation39_spill] sm:$0xff] }
 0x337   : > { %3870 = vmatmul.mubr.bf16.gmra.mrb[60].mxu0 %v12988_v51  ;;  %4479 = vmatmul.mubr.bf16.gmra.mrb[60].mxu1 %v19111_v21 }
 0x338   : > { %19107 = vst [vmem:[#allocation36_spill] sm:$0xff] %v14920_v9  ;;  %19108 = vst [vmem:[#allocation34_spill] sm:$0xff] %v14922_v18  ;;  %4519 = vmatprep.mubr.bf16.mxu0 %v19114_v62  ;;  %4680 = vmatprep.mubr.bf16.mxu1 %v19116_v12  ;;  %v13001_v62 = vld [vmem:[#allocation7 + $0x180] sm:$0xff]   ;;  %v13003_v12 = vld [vmem:[#allocation7 + $0x208] sm:$0xff]  }
 0x339   : > { %v19122_v9 = vld [vmem:[#allocation37_spill] sm:$0xff]  ;;  %v19124_v18 = vld [vmem:[#allocation103_spill] sm:$0xff] }
 0x33a   : > { %v10072_v60 = vpop.f32.mrb[212].mxu0  ;;  %v10184_v51 = vpop.f32.mrb[212].mxu1  ;;  %v19123_v47 = vpack.c.bf16 %v19121_v56, %v19122_v9  ;;  %v13004_v9 = vld [vmem:[#allocation7 + $0x188] sm:$0xff]   ;;  %v13005_v56 = vld [vmem:[#allocation7 + $0x1d0] sm:$0xff]  }
 0x33b   : > { %v10073_v23 = vpop.f32.mrb[213].mxu0  ;;  %v10185_v42 = vpop.f32.mrb[213].mxu1 }
 0x33c   : > { %v14937_v8 = vadd.f32 %v10073_v23, %v10072_v60  ;;  %v10075_v58 = vpop.f32.mrb[214].mxu0  ;;  %v14939_v21 = vadd.f32 %v10185_v42, %v10184_v51  ;;  %v10187_v41 = vpop.f32.mrb[214].mxu1  ;;  %v19125_v60 = vld [vmem:[#allocation101_spill] sm:$0xff]  ;;  %v19127_v42 = vld [vmem:[#allocation44_spill] sm:$0xff] }
 0x33d   : > { %v10076_v38 = vpop.f32.mrb[215].mxu0  ;;  %v10188_v48 = vpop.f32.mrb[215].mxu1  ;;  %v19126_v23 = vpack.c.bf16 %v19124_v18, %v19125_v60  ;;  %v19129_v22 = vpack.c.bf16 %v19127_v42, %v19128_v33  ;;  %v13006_v60 = vld [vmem:[#allocation7 + $0x210] sm:$0xff]  }
 0x33e   : > { %19117 = vst [vmem:[#allocation35_spill] sm:$0xff] %v14937_v8  ;;  %19118 = vst [vmem:[#allocation33_spill] sm:$0xff] %v14939_v21  ;;  %v14941_v50 = vadd.f32 %v10076_v38, %v10075_v58  ;;  %v14943_v61 = vadd.f32 %v10188_v48, %v10187_v41  ;;  %v19130_v38 = vld [vmem:[#allocation107_spill] sm:$0xff]  ;;  %v19131_v41 = vld [vmem:[#allocation105_spill] sm:$0xff] }
 0x33f   : > { %4520 = vmatmul.mubr.bf16.vlgmr.msra.gmra.mrb[64].mxu0 %v19123_v47  ;;  %4681 = vmatmul.mubr.bf16.vlgmr.msra.gmra.mrb[64].mxu1 %v19126_v23  ;;  %v19132_v58 = vpack.c.bf16 %v19130_v38, %v19131_v41  ;;  %v13009_v8 = vld [vmem:[#allocation7 + $0x218] sm:$0xff]  }
 0x340   : > { %19119 = vst [vmem:[#allocation40_spill] sm:$0xff] %v14941_v50  ;;  %19120 = vst [vmem:[#allocation38_spill] sm:$0xff] %v14943_v61  ;;  %4527 = vmatprep.mubr.bf16.mxu0 %v19129_v22  ;;  %10699 = vmatpush3.bf16.msra.mxu0 %v13001_v62  ;;  %v19136_v50 = vld [vmem:[#allocation43_spill] sm:$0xff] }
 0x341   : > { %4688 = vmatprep.mubr.bf16.mxu1 %v19132_v58  ;;  %12315 = vmatpush3.bf16.msra.mxu1 %v14715_v57  ;;  %v13007_v57 = vld [vmem:[#allocation7 + $0x190] sm:$0xff]  }
 0x342   : > { %v10078_v47 = vpop.f32.mrb[216].mxu0  ;;  %v10190_v18 = vpop.f32.mrb[216].mxu1  ;;  %10700 = vmatprep.subr.bf16.mxu0 %v13002_v16  ;;  %12316 = vmatprep.subr.bf16.mxu1 %v13003_v12  ;;  %v13008_v16 = vld [vmem:[#allocation7 + $0x1d8] sm:$0xff]  }
 0x343   : > { %v10079_v23 = vpop.f32.mrb[217].mxu0  ;;  %v10191_v33 = vpop.f32.mrb[217].mxu1 }
 0x344   : > { %v14962_v22 = vadd.f32 %v10079_v23, %v10078_v47  ;;  %v10081_v42 = vpop.f32.mrb[218].mxu0  ;;  %v14964_v38 = vadd.f32 %v10191_v33, %v10190_v18  ;;  %v10193_v41 = vpop.f32.mrb[218].mxu1  ;;  %10701 = vmatpush3.bf16.msra.mxu0 %v13004_v9  ;;  %v19137_v47 = vld [vmem:[#allocation41_spill] sm:$0xff]  ;;  %v19139_v18 = vld [vmem:[#allocation106_spill] sm:$0xff]  ;;  %v19140_v33 = vld [vmem:[#allocation104_spill] sm:$0xff] }
 0x345   : > { %v10082_v58 = vpop.f32.mrb[219].mxu0  ;;  %v10194_v51 = vpop.f32.mrb[219].mxu1  ;;  %12317 = vmatpush3.bf16.msra.mxu1 %v13003_v12  ;;  %10702 = vmatprep.subr.bf16.mxu0 %v13005_v56  ;;  %v19138_v23 = vpack.c.bf16 %v19136_v50, %v19137_v47  ;;  %v19141_v21 = vpack.c.bf16 %v19139_v18, %v19140_v33  ;;  %v19142_v9 = vld [vmem:[#allocation48_spill] sm:$0xff]  ;;  %v19146_v56 = vld [vmem:[#allocation109_spill] sm:$0xff]  ;;  %v13010_v50 = vld [vmem:[#allocation7 + $0x198] sm:$0xff]  }
 0x346   : > { %19133 = vst [vmem:[#allocation102_spill] sm:$0xff] %v14962_v22  ;;  %19134 = vst [vmem:[#allocation39_spill] sm:$0xff] %v14964_v38  ;;  %v14966_v62 = vadd.f32 %v10082_v58, %v10081_v42  ;;  %v14968_v48 = vadd.f32 %v10194_v51, %v10193_v41  ;;  %12318 = vmatprep.subr.bf16.mxu1 %v13006_v60  ;;  %v19143_v42 = vld [vmem:[#allocation46_spill] sm:$0xff]  ;;  %v19145_v51 = vld [vmem:[#allocation111_spill] sm:$0xff] }
 0x347   : > { %4528 = vmatmul.mubr.bf16.gmra.mrb[68].mxu0 %v19138_v23  ;;  %4689 = vmatmul.mubr.bf16.gmra.mrb[68].mxu1 %v19141_v21  ;;  %v19144_v58 = vpack.c.bf16 %v19142_v9, %v19143_v42  ;;  %v19147_v41 = vpack.c.bf16 %v19145_v51, %v19146_v56  ;;  %v13011_v21 = vld [vmem:[#allocation7 + $0x1e0] sm:$0xff]   ;;  %v13015_v22 = vld [vmem:[#allocation7 + $0x228] sm:$0xff]  }
 0x348   : > { %19135 = vst [vmem:[#allocation37_spill] sm:$0xff] %v14966_v62  ;;  %10703 = vmatpush3.bf16.msra.mxu0 %v13007_v57  ;;  %v13012_v18 = vld [vmem:[#allocation7 + $0x220] sm:$0xff]  }
 0x349   : > { %4535 = vmatprep.mubr.bf16.mxu0 %v19144_v58  ;;  %4696 = vmatprep.mubr.bf16.mxu1 %v19147_v41  ;;  %v19149_v62 = vld [vmem:[#allocation47_spill] sm:$0xff] }
 0x34a   : > { %12319 = vmatpush3.bf16.msra.mxu1 %v13006_v60  ;;  %v10084_v47 = vpop.f32.mrb[220].mxu0  ;;  %v10196_v23 = vpop.f32.mrb[220].mxu1  ;;  %10704 = vmatprep.subr.bf16.mxu0 %v13008_v16  ;;  %v13013_v60 = vld [vmem:[#allocation7 + $0x1a0] sm:$0xff]   ;;  %v13014_v16 = vld [vmem:[#allocation7 + $0x1e8] sm:$0xff]  }
 0x34b   : > { %12320 = vmatprep.subr.bf16.mxu1 %v13009_v8  ;;  %v10085_v33 = vpop.f32.mrb[221].mxu0  ;;  %v10197_v12 = vpop.f32.mrb[221].mxu1 }
 0x34c   : > { %v14986_v9 = vadd.f32 %v10085_v33, %v10084_v47  ;;  %v10087_v42 = vpop.f32.mrb[222].mxu0  ;;  %v14988_v58 = vadd.f32 %v10197_v12, %v10196_v23  ;;  %v10199_v51 = vpop.f32.mrb[222].mxu1  ;;  %10705 = vmatpush3.bf16.msra.mxu0 %v13010_v50  ;;  %v19150_v47 = vld [vmem:[#allocation45_spill] sm:$0xff]  ;;  %v19152_v12 = vld [vmem:[#allocation110_spill] sm:$0xff]  ;;  %v19153_v23 = vld [vmem:[#allocation108_spill] sm:$0xff] }
 0x34d   : > { %v10088_v56 = vpop.f32.mrb[223].mxu0  ;;  %v10200_v41 = vpop.f32.mrb[223].mxu1  ;;  %10706 = vmatprep.subr.bf16.mxu0 %v13011_v21  ;;  %v19151_v33 = vpack.c.bf16 %v19149_v62, %v19150_v47  ;;  %v19154_v38 = vpack.c.bf16 %v19152_v12, %v19153_v23  ;;  %v19155_v50 = vld [vmem:[#allocation52_spill] sm:$0xff]  ;;  %v19158_v21 = vpack.c.bf16 %v14622_v25, %v14618_v55 }
 0x34e   : > { %19148 = vst [vmem:[#allocation103_spill] sm:$0xff] %v14986_v9  ;;  %12321 = vmatpush3.bf16.msra.mxu1 %v13009_v8  ;;  %v14990_v57 = vadd.f32 %v10088_v56, %v10087_v42  ;;  %v14992_v61 = vadd.f32 %v10200_v41, %v10199_v51  ;;  %v19156_v42 = vld [vmem:[#allocation50_spill] sm:$0xff]  ;;  %v13016_v62 = vld [vmem:[#allocation7 + $0x1a8] sm:$0xff]  }
 0x34f   : > { %12322 = vmatprep.subr.bf16.mxu1 %v13012_v18  ;;  %4536 = vmatmul.mubr.bf16.gmra.mrb[72].mxu0 %v19151_v33  ;;  %v19157_v56 = vpack.c.bf16 %v19155_v50, %v19156_v42  ;;  %v13018_v33 = vld [vmem:[#allocation7 + $0x230] sm:$0xff]   ;;  %v13021_v51 = vld [vmem:[#allocation7 + $0x238] sm:$0xff]  }
 0x350   : > { %4697 = vmatmul.mubr.bf16.gmra.mrb[72].mxu1 %v19154_v38  ;;  %10707 = vmatpush3.bf16.msra.mxu0 %v13013_v60  ;;  %v13017_v38 = vld [vmem:[#allocation7 + $0x1f0] sm:$0xff]  }
 0x351   : > { %4543 = vmatprep.mubr.bf16.mxu0 %v19157_v56  ;;  %4704 = vmatprep.mubr.bf16.mxu1 %v19158_v21 }
 0x352   : > { %12323 = vmatpush3.bf16.msra.mxu1 %v13012_v18  ;;  %v10090_v41 = vpop.f32.mrb[224].mxu0  ;;  %v10202_v47 = vpop.f32.mrb[224].mxu1  ;;  %10708 = vmatprep.subr.bf16.mxu0 %v13014_v16  ;;  %v13019_v18 = vld [vmem:[#allocation7 + $0x1b0] sm:$0xff]   ;;  %v13020_v16 = vld [vmem:[#allocation7 + $0x1f8] sm:$0xff]  }
 0x353   : > { %12324 = vmatprep.subr.bf16.mxu1 %v13015_v22  ;;  %v10091_v12 = vpop.f32.mrb[225].mxu0  ;;  %v10203_v23 = vpop.f32.mrb[225].mxu1 }
 0x354   : > { %v15010_v50 = vadd.f32 %v10091_v12, %v10090_v41  ;;  %v10093_v42 = vpop.f32.mrb[226].mxu0  ;;  %v15012_v56 = vadd.f32 %v10203_v23, %v10202_v47  ;;  %v10205_v25 = vpop.f32.mrb[226].mxu1  ;;  %10709 = vmatpush3.bf16.msra.mxu0 %v13016_v62  ;;  %v19160_v41 = vld [vmem:[#allocation51_spill] sm:$0xff]  ;;  %v19161_v12 = vld [vmem:[#allocation49_spill] sm:$0xff]  ;;  %v19163_v47 = vld [vmem:[#allocation112_spill] sm:$0xff] }
 0x355   : > { %v10094_v55 = vpop.f32.mrb[227].mxu0  ;;  %v10206_v21 = vpop.f32.mrb[227].mxu1  ;;  %10710 = vmatprep.subr.bf16.mxu0 %v13017_v38  ;;  %v19162_v9 = vpack.c.bf16 %v19160_v41, %v19161_v12  ;;  %v19164_v23 = vpack.c.bf16 %v14620_v19, %v19163_v47  ;;  %v19165_v62 = vld [vmem:[#allocation56_spill] sm:$0xff]  ;;  %v19168_v38 = vld [vmem:[#allocation114_spill] sm:$0xff] }
 0x356   : > { %19159 = vst [vmem:[#allocation101_spill] sm:$0xff] %v15010_v50  ;;  %12325 = vmatpush3.bf16.msra.mxu1 %v13015_v22  ;;  %v15014_v60 = vadd.f32 %v10094_v55, %v10093_v42  ;;  %v15016_v8 = vadd.f32 %v10206_v21, %v10205_v25  ;;  %v19166_v42 = vld [vmem:[#allocation54_spill] sm:$0xff]  ;;  %v19169_v55 = vpack.c.bf16 %v14634_v36, %v19168_v38  ;;  %v15035_v12 = vld [vmem:[%s13948_s28 + $0xc0] sm:$0xff]   ;;  %v19174_v22 = vld [vmem:[#allocation53_spill] sm:$0xff] }
 0x357   : > { %12326 = vmatprep.subr.bf16.mxu1 %v13018_v33  ;;  %4544 = vmatmul.mubr.bf16.gmra.mrb[76].mxu0 %v19162_v9  ;;  %v19167_v25 = vpack.c.bf16 %v19165_v62, %v19166_v42  ;;  %v13022_v9 = vld [vmem:[#allocation7 + $0x1b8] sm:$0xff]  }
 0x358   : > { %4705 = vmatmul.mubr.bf16.gmra.mrb[76].mxu1 %v19164_v23  ;;  %10711 = vmatpush3.bf16.msra.mxu0 %v13019_v18  ;;  %v19187_v21 = vld [vmem:[#allocation118_spill] sm:$0xff] }
 0x359   : > { %4551 = vmatprep.mubr.bf16.mxu0 %v19167_v25  ;;  %4712 = vmatprep.mubr.bf16.mxu1 %v19169_v55 }
 0x35a   : > { %12327 = vmatpush3.bf16.msra.mxu1 %v13018_v33  ;;  %v10096_v41 = vpop.f32.mrb[228].mxu0  ;;  %v10208_v19 = vpop.f32.mrb[228].mxu1  ;;  %10712 = vmatprep.subr.bf16.mxu0 %v13020_v16  ;;  %v19173_v16 = vld [vmem:[#allocation55_spill] sm:$0xff] }
 0x35b   : > { %12328 = vmatprep.subr.bf16.mxu1 %v13021_v51  ;;  %v10097_v47 = vpop.f32.mrb[229].mxu0  ;;  %v10209_v23 = vpop.f32.mrb[229].mxu1 }
 0x35c   : > { %v15037_v62 = vadd.f32 %v10097_v47, %v10096_v41  ;;  %v10099_v42 = vpop.f32.mrb[230].mxu0  ;;  %v15039_v25 = vadd.f32 %v10209_v23, %v10208_v19  ;;  %v10211_v36 = vpop.f32.mrb[230].mxu1  ;;  %10713 = vmatpush3.bf16.msra.mxu0 %v13022_v9  ;;  %v19175_v41 = vpack.c.bf16 %v19173_v16, %v19174_v22  ;;  %v19176_v47 = vld [vmem:[#allocation115_spill] sm:$0xff]  ;;  %v19177_v19 = vld [vmem:[#allocation113_spill] sm:$0xff] }
 0x35d   : > { %v10100_v38 = vpop.f32.mrb[231].mxu0  ;;  %v10212_v55 = vpop.f32.mrb[231].mxu1  ;;  %10946 = vmatprep.subr.bf16.mxu0 %v15035_v12  ;;  %v19178_v23 = vpack.c.bf16 %v19176_v47, %v19177_v19 }
 0x35e   : > { %19170 = vst [vmem:[#allocation44_spill] sm:$0xff] %v15037_v62  ;;  %19171 = vst [vmem:[#allocation42_spill] sm:$0xff] %v15039_v25  ;;  %12329 = vmatpush3.bf16.msra.mxu1 %v13021_v51  ;;  %v15041_v33 = vadd.f32 %v10100_v38, %v10099_v42  ;;  %v15043_v18 = vadd.f32 %v10212_v55, %v10211_v36  ;;  %v19179_v51 = vld [vmem:[#allocation60_spill] sm:$0xff]  ;;  %v19180_v42 = vld [vmem:[#allocation58_spill] sm:$0xff] }
 0x35f   : > { %10834 = vmatprep.subr.bf16.mxu1 %v15035_v12  ;;  %4552 = vmatmul.mubr.bf16.gmra.mrb[80].mxu0 %v19175_v41  ;;  %v19181_v38 = vpack.c.bf16 %v19179_v51, %v19180_v42  ;;  %v19182_v36 = vld [vmem:[#allocation117_spill] sm:$0xff] }
 0x360   : > { %19172 = vst [vmem:[#allocation107_spill] sm:$0xff] %v15041_v33  ;;  %4713 = vmatmul.mubr.bf16.gmra.mrb[80].mxu1 %v19178_v23  ;;  %v19183_v55 = vpack.c.bf16 %v14649_v44, %v19182_v36  ;;  %v19184_v44 = vld [vmem:[#allocation59_spill] sm:$0xff]  ;;  %v19185_v36 = vld [vmem:[#allocation57_spill] sm:$0xff]  ;;  %v19188_v33 = vld [vmem:[#allocation116_spill] sm:$0xff] }
 0x361   : > { %4559 = vmatprep.mubr.bf16.mxu0 %v19181_v38  ;;  %v19189_v25 = vpack.c.bf16 %v19187_v21, %v19188_v33 }
 0x362   : > { %4720 = vmatprep.mubr.bf16.mxu1 %v19183_v55  ;;  %v10102_v22 = vpop.f32.mrb[232].mxu0  ;;  %v10214_v16 = vpop.f32.mrb[232].mxu1  ;;  %v19186_v55 = vpack.c.bf16 %v19184_v44, %v19185_v36 }
 0x363   : > { %v10103_v41 = vpop.f32.mrb[233].mxu0  ;;  %v10215_v50 = vpop.f32.mrb[233].mxu1 }
 0x364   : > { %v15063_v47 = vadd.f32 %v10103_v41, %v10102_v22  ;;  %v10105_v19 = vpop.f32.mrb[234].mxu0  ;;  %v15065_v23 = vadd.f32 %v10215_v50, %v10214_v16  ;;  %v10217_v9 = vpop.f32.mrb[234].mxu1  ;;  %v19190_v50 = vld [vmem:[#allocation64_spill] sm:$0xff]  ;;  %v19191_v16 = vld [vmem:[#allocation62_spill] sm:$0xff] }
 0x365   : > { %v10106_v62 = vpop.f32.mrb[235].mxu0  ;;  %v10218_v51 = vpop.f32.mrb[235].mxu1  ;;  %v19192_v41 = vpack.c.bf16 %v19190_v50, %v19191_v16 }
 0x366   : > { %v15067_v42 = vadd.f32 %v10106_v62, %v10105_v19  ;;  %v15069_v38 = vadd.f32 %v10218_v51, %v10217_v9  ;;  %v19193_v62 = vpack.c.bf16 %v14667_v4, %v14663_v45  ;;  %v19194_v45 = vld [vmem:[#allocation63_spill] sm:$0xff]  ;;  %v19195_v4 = vld [vmem:[#allocation61_spill] sm:$0xff]  ;;  %v19197_v9 = vpack.c.bf16 %v14665_v28, %v14661_v46 }
 0x367   : > { %4560 = vmatmul.mubr.bf16.gmra.mrb[84].mxu0 %v19186_v55 }
 0x368   : > { %4721 = vmatmul.mubr.bf16.gmra.mrb[84].mxu1 %v19189_v25  ;;  %4567 = vmatprep.mubr.bf16.mxu0 %v19192_v41 }
 0x369   : > { %4728 = vmatprep.mubr.bf16.mxu1 %v19193_v62  ;;  %v19196_v62 = vpack.c.bf16 %v19194_v45, %v19195_v4 }
 0x36a   : > { %v10108_v19 = vpop.f32.mrb[236].mxu0  ;;  %v10220_v51 = vpop.f32.mrb[236].mxu1 }
 0x36b   : > { %v10109_v44 = vpop.f32.mrb[237].mxu0  ;;  %v10221_v36 = vpop.f32.mrb[237].mxu1 }
 0x36c   : > { %v15087_v21 = vadd.f32 %v10109_v44, %v10108_v19  ;;  %v10111_v25 = vpop.f32.mrb[238].mxu0  ;;  %v15089_v33 = vadd.f32 %v10221_v36, %v10220_v51  ;;  %v10223_v55 = vpop.f32.mrb[238].mxu1  ;;  %v19198_v51 = vld [vmem:[#allocation68_spill] sm:$0xff]  ;;  %v19199_v44 = vld [vmem:[#allocation66_spill] sm:$0xff] }
 0x36d   : > { %v10112_v22 = vpop.f32.mrb[239].mxu0  ;;  %v10224_v50 = vpop.f32.mrb[239].mxu1  ;;  %v19200_v36 = vpack.c.bf16 %v19198_v51, %v19199_v44 }
 0x36e   : > { %v15091_v16 = vadd.f32 %v10112_v22, %v10111_v25  ;;  %v15093_v41 = vadd.f32 %v10224_v50, %v10223_v55  ;;  %v19201_v22 = vpack.c.bf16 %v14685_v39, %v14681_v63  ;;  %v19202_v63 = vld [vmem:[#allocation67_spill] sm:$0xff]  ;;  %v19203_v39 = vld [vmem:[#allocation65_spill] sm:$0xff]  ;;  %v19205_v25 = vpack.c.bf16 %v14683_v1, %v14679_v35 }
 0x36f   : > { %4568 = vmatmul.mubr.bf16.gmra.mrb[88].mxu0 %v19196_v62 }
 0x370   : > { %4729 = vmatmul.mubr.bf16.gmra.mrb[88].mxu1 %v19197_v9  ;;  %4575 = vmatprep.mubr.bf16.mxu0 %v19200_v36 }
 0x371   : > { %4736 = vmatprep.mubr.bf16.mxu1 %v19201_v22  ;;  %v19204_v22 = vpack.c.bf16 %v19202_v63, %v19203_v39 }
 0x372   : > { %v10114_v55 = vpop.f32.mrb[240].mxu0  ;;  %v10226_v50 = vpop.f32.mrb[240].mxu1 }
 0x373   : > { %v10115_v45 = vpop.f32.mrb[241].mxu0  ;;  %v10227_v4 = vpop.f32.mrb[241].mxu1 }
 0x374   : > { %v15111_v46 = vadd.f32 %v10115_v45, %v10114_v55  ;;  %v10117_v28 = vpop.f32.mrb[242].mxu0  ;;  %v15113_v9 = vadd.f32 %v10227_v4, %v10226_v50  ;;  %v10229_v62 = vpop.f32.mrb[242].mxu1  ;;  %v19206_v50 = vld [vmem:[#allocation72_spill] sm:$0xff]  ;;  %v19207_v45 = vld [vmem:[#allocation70_spill] sm:$0xff] }
 0x375   : > { %v10118_v19 = vpop.f32.mrb[243].mxu0  ;;  %v10230_v51 = vpop.f32.mrb[243].mxu1  ;;  %v19208_v4 = vpack.c.bf16 %v19206_v50, %v19207_v45 }
 0x376   : > { %v15115_v44 = vadd.f32 %v10118_v19, %v10117_v28  ;;  %v15117_v36 = vadd.f32 %v10230_v51, %v10229_v62  ;;  %v19209_v19 = vpack.c.bf16 %v14703_v0, %v14699_v17  ;;  %v19210_v17 = vld [vmem:[#allocation71_spill] sm:$0xff]  ;;  %v19211_v0 = vld [vmem:[#allocation69_spill] sm:$0xff]  ;;  %v19213_v28 = vpack.c.bf16 %v14701_v52, %v14697_v53 }
 0x377   : > { %4576 = vmatmul.mubr.bf16.gmra.mrb[92].mxu0 %v19204_v22 }
 0x378   : > { %4737 = vmatmul.mubr.bf16.gmra.mrb[92].mxu1 %v19205_v25  ;;  %4583 = vmatprep.mubr.bf16.mxu0 %v19208_v4 }
 0x379   : > { %4744 = vmatprep.mubr.bf16.mxu1 %v19209_v19  ;;  %v19212_v19 = vpack.c.bf16 %v19210_v17, %v19211_v0 }
 0x37a   : > { %v10120_v62 = vpop.f32.mrb[244].mxu0  ;;  %v10232_v51 = vpop.f32.mrb[244].mxu1 }
 0x37b   : > { %v10121_v63 = vpop.f32.mrb[245].mxu0  ;;  %v10233_v39 = vpop.f32.mrb[245].mxu1 }
 0x37c   : > { %v15135_v35 = vadd.f32 %v10121_v63, %v10120_v62  ;;  %v10123_v1 = vpop.f32.mrb[246].mxu0  ;;  %v15137_v25 = vadd.f32 %v10233_v39, %v10232_v51  ;;  %v10235_v22 = vpop.f32.mrb[246].mxu1  ;;  %v19214_v51 = vld [vmem:[#allocation76_spill] sm:$0xff]  ;;  %v19215_v63 = vld [vmem:[#allocation74_spill] sm:$0xff] }
 0x37d   : > { %v10124_v55 = vpop.f32.mrb[247].mxu0  ;;  %v10236_v50 = vpop.f32.mrb[247].mxu1  ;;  %v19216_v39 = vpack.c.bf16 %v19214_v51, %v19215_v63 }
 0x37e   : > { %v15139_v45 = vadd.f32 %v10124_v55, %v10123_v1  ;;  %v15141_v4 = vadd.f32 %v10236_v50, %v10235_v22  ;;  %v19217_v55 = vpack.c.bf16 %v14723_v34, %v14719_v6  ;;  %v19219_v6 = vld [vmem:[#allocation75_spill] sm:$0xff]  ;;  %v19220_v34 = vld [vmem:[#allocation73_spill] sm:$0xff]  ;;  %v19222_v1 = vpack.c.bf16 %v14721_v54, %v14717_v14 }
 0x37f   : > { %4584 = vmatmul.mubr.bf16.gmra.mrb[96].mxu0 %v19212_v19 }
 0x380   : > { %4745 = vmatmul.mubr.bf16.gmra.mrb[96].mxu1 %v19213_v28  ;;  %4591 = vmatprep.mubr.bf16.mxu0 %v19216_v39 }
 0x381   : > { %4752 = vmatprep.mubr.bf16.mxu1 %v19217_v55  ;;  %v19221_v55 = vpack.c.bf16 %v19219_v6, %v19220_v34 }
 0x382   : > { %v10126_v22 = vpop.f32.mrb[248].mxu0  ;;  %v10238_v50 = vpop.f32.mrb[248].mxu1 }
 0x383   : > { %v10127_v17 = vpop.f32.mrb[249].mxu0  ;;  %v10239_v0 = vpop.f32.mrb[249].mxu1 }
 0x384   : > { %v15159_v53 = vadd.f32 %v10127_v17, %v10126_v22  ;;  %v10129_v52 = vpop.f32.mrb[250].mxu0  ;;  %v15161_v28 = vadd.f32 %v10239_v0, %v10238_v50  ;;  %v10241_v19 = vpop.f32.mrb[250].mxu1  ;;  %v19223_v50 = vld [vmem:[#allocation80_spill] sm:$0xff]  ;;  %v19224_v17 = vld [vmem:[#allocation78_spill] sm:$0xff] }
 0x385   : > { %v10130_v62 = vpop.f32.mrb[251].mxu0  ;;  %v10242_v51 = vpop.f32.mrb[251].mxu1  ;;  %v19225_v0 = vpack.c.bf16 %v19223_v50, %v19224_v17 }
 0x386   : > { %19218 = vst [vmem:[#allocation105_spill] sm:$0xff] %v15159_v53  ;;  %v15163_v63 = vadd.f32 %v10130_v62, %v10129_v52  ;;  %v15165_v39 = vadd.f32 %v10242_v51, %v10241_v19  ;;  %v19226_v62 = vpack.c.bf16 %v14742_v15, %v14738_v20  ;;  %v19231_v20 = vld [vmem:[#allocation79_spill] sm:$0xff]  ;;  %v19232_v15 = vld [vmem:[#allocation77_spill] sm:$0xff]  ;;  %v19234_v52 = vpack.c.bf16 %v14740_v5, %v14736_v27 }
 0x387   : > { %4592 = vmatmul.mubr.bf16.gmra.mrb[100].mxu0 %v19221_v55 }
 0x388   : > { %4753 = vmatmul.mubr.bf16.gmra.mrb[100].mxu1 %v19222_v1  ;;  %4599 = vmatprep.mubr.bf16.mxu0 %v19225_v0 }
 0x389   : > { %4760 = vmatprep.mubr.bf16.mxu1 %v19226_v62  ;;  %v19233_v62 = vpack.c.bf16 %v19231_v20, %v19232_v15 }
 0x38a   : > { %v10132_v19 = vpop.f32.mrb[252].mxu0  ;;  %v10244_v51 = vpop.f32.mrb[252].mxu1 }
 0x38b   : > { %v10133_v6 = vpop.f32.mrb[253].mxu0  ;;  %v10245_v34 = vpop.f32.mrb[253].mxu1 }
 0x38c   : > { %v15183_v14 = vadd.f32 %v10133_v6, %v10132_v19  ;;  %v10135_v54 = vpop.f32.mrb[254].mxu0  ;;  %v15185_v1 = vadd.f32 %v10245_v34, %v10244_v51  ;;  %v10247_v55 = vpop.f32.mrb[254].mxu1  ;;  %v19235_v51 = vld [vmem:[#allocation84_spill] sm:$0xff]  ;;  %v19236_v6 = vld [vmem:[#allocation82_spill] sm:$0xff] }
 0x38d   : > { %v10136_v22 = vpop.f32.mrb[255].mxu0  ;;  %v10248_v50 = vpop.f32.mrb[255].mxu1  ;;  %v19237_v34 = vpack.c.bf16 %v19235_v51, %v19236_v6 }
 0x38e   : > { %19227 = vst [vmem:[#allocation43_spill] sm:$0xff] %v15183_v14  ;;  %19228 = vst [vmem:[#allocation41_spill] sm:$0xff] %v15185_v1  ;;  %v15187_v17 = vadd.f32 %v10136_v22, %v10135_v54  ;;  %v15189_v0 = vadd.f32 %v10248_v50, %v10247_v55  ;;  %v19238_v22 = vpack.c.bf16 %v14760_v10, %v14756_v49  ;;  %v19239_v49 = vld [vmem:[#allocation83_spill] sm:$0xff]  ;;  %v19240_v10 = vld [vmem:[#allocation81_spill] sm:$0xff] }
 0x38f   : > { %4600 = vmatmul.mubr.bf16.gmra.mrb[104].mxu0 %v19233_v62  ;;  %v19242_v54 = vpack.c.bf16 %v14758_v30, %v14754_v26  ;;  %v19281_v1 = vld [vmem:[#allocation122_spill] sm:$0xff] }
 0x390   : > { %19229 = vst [vmem:[#allocation106_spill] sm:$0xff] %v15187_v17  ;;  %19230 = vst [vmem:[#allocation104_spill] sm:$0xff] %v15189_v0  ;;  %4761 = vmatmul.mubr.bf16.gmra.mrb[104].mxu1 %v19234_v52  ;;  %4607 = vmatprep.mubr.bf16.mxu0 %v19237_v34  ;;  %v15414_v0 = vld [vmem:[%s13948_s28 + $0xf8] sm:$0xff]  }
 0x391   : > { %4768 = vmatprep.mubr.bf16.mxu1 %v19238_v22  ;;  %v19241_v22 = vpack.c.bf16 %v19239_v49, %v19240_v10  ;;  %19316 = vst [vmem:[#allocation54_spill] sm:$0xff] %v15414_v0 }
 0x392   : > { %v10266_v55 = vpop.f32.mrb[0].mxu0  ;;  %v10378_v50 = vpop.f32.mrb[0].mxu1 }
 0x393   : > { %v10267_v20 = vpop.f32.mrb[1].mxu0  ;;  %v10379_v15 = vpop.f32.mrb[1].mxu1 }
 0x394   : > { %v15207_v27 = vadd.f32 %v10267_v20, %v10266_v55  ;;  %v15209_v5 = vadd.f32 %v10379_v15, %v10378_v50  ;;  %v10269_v52 = vpop.f32.mrb[2].mxu0  ;;  %v10381_v62 = vpop.f32.mrb[2].mxu1  ;;  %v19243_v55 = vld [vmem:[#allocation88_spill] sm:$0xff]  ;;  %v19244_v20 = vld [vmem:[#allocation86_spill] sm:$0xff]  ;;  %v19246_v15 = vpack.c.bf16 %v14778_v32, %v14774_v59  ;;  %v19247_v59 = vld [vmem:[#allocation87_spill] sm:$0xff] }
 0x395   : > { %v10270_v19 = vpop.f32.mrb[3].mxu0  ;;  %v10382_v51 = vpop.f32.mrb[3].mxu1  ;;  %v19245_v50 = vpack.c.bf16 %v19243_v55, %v19244_v20  ;;  %v19248_v32 = vld [vmem:[#allocation85_spill] sm:$0xff] }
 0x396   : > { %v15211_v6 = vadd.f32 %v10270_v19, %v10269_v52  ;;  %v15213_v34 = vadd.f32 %v10382_v51, %v10381_v62  ;;  %v19250_v19 = vpack.c.bf16 %v14776_v7, %v14772_v2 }
 0x397   : > { %4608 = vmatmul.mubr.bf16.gmra.mrb[108].mxu0 %v19241_v22 }
 0x398   : > { %4769 = vmatmul.mubr.bf16.gmra.mrb[108].mxu1 %v19242_v54  ;;  %4615 = vmatprep.mubr.bf16.mxu0 %v19245_v50 }
 0x399   : > { %4776 = vmatprep.mubr.bf16.mxu1 %v19246_v15  ;;  %v19249_v15 = vpack.c.bf16 %v19247_v59, %v19248_v32 }
 0x39a   : > { %v10272_v52 = vpop.f32.mrb[4].mxu0  ;;  %v10384_v62 = vpop.f32.mrb[4].mxu1 }
 0x39b   : > { %v10273_v51 = vpop.f32.mrb[5].mxu0  ;;  %v10385_v49 = vpop.f32.mrb[5].mxu1 }
 0x39c   : > { %v15229_v10 = vadd.f32 %v10273_v51, %v10272_v52  ;;  %v15231_v22 = vadd.f32 %v10385_v49, %v10384_v62  ;;  %v10275_v26 = vpop.f32.mrb[6].mxu0  ;;  %v10387_v30 = vpop.f32.mrb[6].mxu1  ;;  %v19251_v62 = vld [vmem:[#allocation92_spill] sm:$0xff]  ;;  %v19252_v51 = vld [vmem:[#allocation90_spill] sm:$0xff] }
 0x39d   : > { %v10276_v54 = vpop.f32.mrb[7].mxu0  ;;  %v10388_v55 = vpop.f32.mrb[7].mxu1  ;;  %v19253_v49 = vpack.c.bf16 %v19251_v62, %v19252_v51  ;;  %v19255_v62 = vld [vmem:[#allocation91_spill] sm:$0xff]  ;;  %v19256_v51 = vld [vmem:[#allocation89_spill] sm:$0xff] }
 0x39e   : > { %v15233_v20 = vadd.f32 %v10276_v54, %v10275_v26  ;;  %v15235_v50 = vadd.f32 %v10388_v55, %v10387_v30  ;;  %v19254_v26 = vpack.c.bf16 %v14796_v40, %v14792_v24  ;;  %v19258_v24 = vpack.c.bf16 %v14794_v29, %v14790_v3  ;;  %v19259_v40 = vld [vmem:[#allocation96_spill] sm:$0xff] }
 0x39f   : > { %4616 = vmatmul.mubr.bf16.gmra.mrb[112].mxu0 %v19249_v15 }
 0x3a0   : > { %4777 = vmatmul.mubr.bf16.gmra.mrb[112].mxu1 %v19250_v19  ;;  %4623 = vmatprep.mubr.bf16.mxu0 %v19253_v49  ;;  %v19257_v49 = vpack.c.bf16 %v19255_v62, %v19256_v51 }
 0x3a1   : > { %4784 = vmatprep.mubr.bf16.mxu1 %v19254_v26  ;;  %v19260_v26 = vld [vmem:[#allocation94_spill] sm:$0xff] }
 0x3a2   : > { %v10278_v30 = vpop.f32.mrb[8].mxu0  ;;  %v10390_v54 = vpop.f32.mrb[8].mxu1 }
 0x3a3   : > { %v10279_v55 = vpop.f32.mrb[9].mxu0  ;;  %v10391_v59 = vpop.f32.mrb[9].mxu1 }
 0x3a4   : > { %v15251_v32 = vadd.f32 %v10279_v55, %v10278_v30  ;;  %v15253_v15 = vadd.f32 %v10391_v59, %v10390_v54  ;;  %v10281_v2 = vpop.f32.mrb[10].mxu0  ;;  %v10393_v7 = vpop.f32.mrb[10].mxu1  ;;  %v19261_v30 = vpack.c.bf16 %v19259_v40, %v19260_v26  ;;  %v19262_v54 = vpack.c.bf16 %v14814_v37, %v14810_v13  ;;  %v19264_v13 = vld [vmem:[#allocation95_spill] sm:$0xff]  ;;  %v19265_v37 = vld [vmem:[#allocation93_spill] sm:$0xff] }
 0x3a5   : > { %v10282_v19 = vpop.f32.mrb[11].mxu0  ;;  %v10394_v52 = vpop.f32.mrb[11].mxu1  ;;  %v19266_v26 = vpack.c.bf16 %v19264_v13, %v19265_v37 }
 0x3a6   : > { %v10283_v14 = vadd.f32 %v10282_v19, %v10281_v2  ;;  %v15255_v17 = vadd.f32 %v10394_v52, %v10393_v7 }
 0x3a7   : > { %4624 = vmatmul.mubr.bf16.gmra.mrb[116].mxu0 %v19257_v49 }
 0x3a8   : > { %4785 = vmatmul.mubr.bf16.gmra.mrb[116].mxu1 %v19258_v24  ;;  %4631 = vmatprep.mubr.bf16.mxu0 %v19261_v30  ;;  %v3880_v55 = vpack.c.bf16 %v10283_v14, %v15251_v32  ;;  %v19267_v14 = vpack.c.bf16 %v14812_v31, %v14808_v43  ;;  %v19268_v30 = vld [vmem:[#allocation100_spill] sm:$0xff] }
 0x3a9   : > { %4792 = vmatprep.mubr.bf16.mxu1 %v19262_v54  ;;  %v19269_v54 = vld [vmem:[#allocation98_spill] sm:$0xff] }
 0x3aa   : > { %v10284_v52 = vpop.f32.mrb[12].mxu0  ;;  %v10396_v59 = vpop.f32.mrb[12].mxu1 }
 0x3ab   : > { %v10285_v2 = vpop.f32.mrb[13].mxu0  ;;  %v10397_v7 = vpop.f32.mrb[13].mxu1 }
 0x3ac   : > { %v15270_v19 = vadd.f32 %v10285_v2, %v10284_v52  ;;  %v15272_v62 = vadd.f32 %v10397_v7, %v10396_v59  ;;  %v10287_v3 = vpop.f32.mrb[14].mxu0  ;;  %v10399_v29 = vpop.f32.mrb[14].mxu1  ;;  %v19270_v52 = vpack.c.bf16 %v19268_v30, %v19269_v54  ;;  %v19271_v59 = vld [vmem:[#allocation120_spill] sm:$0xff]  ;;  %v19275_v30 = vld [vmem:[#allocation99_spill] sm:$0xff]  ;;  %v19276_v54 = vld [vmem:[#allocation97_spill] sm:$0xff] }
 0x3ad   : > { %v10288_v51 = vpop.f32.mrb[15].mxu0  ;;  %v10400_v49 = vpop.f32.mrb[15].mxu1  ;;  %v19272_v2 = vpack.c.bf16 %v14832_v11, %v19271_v59  ;;  %v19278_v11 = vld [vmem:[#allocation121_spill] sm:$0xff]  ;;  %v19279_v59 = vld [vmem:[#allocation119_spill] sm:$0xff] }
 0x3ae   : > { %v15274_v24 = vadd.f32 %v10288_v51, %v10287_v3  ;;  %v15276_v40 = vadd.f32 %v10400_v49, %v10399_v29 }
 0x3af   : > { %4632 = vmatmul.mubr.bf16.gmra.mrb[120].mxu0 %v19266_v26 }
 0x3b0   : > { %19263 = vst [vmem:[#allocation48_spill] sm:$0xff] %v15276_v40  ;;  %4793 = vmatmul.mubr.bf16.gmra.mrb[120].mxu1 %v19267_v14  ;;  %4639 = vmatprep.mubr.bf16.mxu0 %v19270_v52  ;;  %v19277_v52 = vpack.c.bf16 %v19275_v30, %v19276_v54 }
 0x3b1   : > { %4800 = vmatprep.mubr.bf16.mxu1 %v19272_v2  ;;  %v19280_v2 = vpack.c.bf16 %v19278_v11, %v19279_v59 }
 0x3b2   : > { %v10290_v7 = vpop.f32.mrb[16].mxu0  ;;  %v10402_v3 = vpop.f32.mrb[16].mxu1 }
 0x3b3   : > { %v10291_v29 = vpop.f32.mrb[17].mxu0  ;;  %v10403_v51 = vpop.f32.mrb[17].mxu1 }
 0x3b4   : > { %v10292_v49 = vadd.f32 %v10291_v29, %v10290_v7  ;;  %v15292_v13 = vadd.f32 %v10403_v51, %v10402_v3  ;;  %v10293_v43 = vpop.f32.mrb[18].mxu0  ;;  %v10405_v31 = vpop.f32.mrb[18].mxu1  ;;  %v19282_v7 = vld [vmem:[#allocation20_spill] sm:$0xff]  ;;  %v19284_v29 = vpack.c.bf16 %v15211_v6, %v15207_v27 }
 0x3b5   : > { %v10294_v37 = vpop.f32.mrb[19].mxu0  ;;  %v10406_v26 = vpop.f32.mrb[19].mxu1  ;;  %v19283_v3 = vpack.c.bf16 %v19281_v1, %v19282_v7  ;;  %v19288_v7 = vld [vmem:[#allocation16_spill] sm:$0xff] }
 0x3b6   : > { %19273 = vst [vmem:[#allocation46_spill] sm:$0xff] %v15292_v13  ;;  %v10295_v14 = vadd.f32 %v10294_v37, %v10293_v43  ;;  %v15294_v32 = vadd.f32 %v10406_v26, %v10405_v31 }
 0x3b7   : > { %4640 = vmatmul.mubr.bf16.gmra.mrb[124].mxu0 %v19277_v52 }
 0x3b8   : > { %19274 = vst [vmem:[#allocation111_spill] sm:$0xff] %v15294_v32  ;;  %4801 = vmatmul.mubr.bf16.gmra.mrb[124].mxu1 %v19280_v2  ;;  %4841 = vmatprep.mubr.bf16.mxu0 %v19283_v3  ;;  %v3882_v51 = vpack.c.bf16 %v10295_v14, %v10292_v49  ;;  %v15313_v2 = vld [vmem:[%s13948_s28 + $0x80] sm:$0xff]   ;;  %v15318_v49 = vld [vmem:[%s13948_s28 + $0xc8] sm:$0xff]   ;;  %v19287_v14 = vld [vmem:[#allocation18_spill] sm:$0xff] }
 0x3b9   : > { %12330 = vmatprep.mubr.bf16.mxu1 %v19284_v29  ;;  %v19289_v3 = vpack.c.bf16 %v19287_v14, %v19288_v7  ;;  %v19290_v29 = vpack.c.bf16 %v15233_v20, %v15229_v10  ;;  %v15337_v10 = vld [vmem:[%s13948_s28 + $0xd0] sm:$0xff]  }
 0x3ba   : > { %v10296_v43 = vpop.f32.mrb[20].mxu0  ;;  %v10408_v31 = vpop.f32.mrb[20].mxu1  ;;  %v19309_v32 = vld [vmem:[#allocation25_spill] sm:$0xff] }
 0x3bb   : > { %v10297_v37 = vpop.f32.mrb[21].mxu0  ;;  %v10409_v26 = vpop.f32.mrb[21].mxu1 }
 0x3bc   : > { %v15308_v30 = vadd.f32 %v10297_v37, %v10296_v43  ;;  %v15310_v54 = vadd.f32 %v10409_v26, %v10408_v31  ;;  %v10299_v52 = vpop.f32.mrb[22].mxu0  ;;  %v10411_v11 = vpop.f32.mrb[22].mxu1  ;;  %v19291_v31 = vld [vmem:[#allocation22_spill] sm:$0xff]  ;;  %v19292_v37 = vld [vmem:[#allocation17_spill] sm:$0xff] }
 0x3bd   : > { %v10300_v59 = vpop.f32.mrb[23].mxu0  ;;  %v10412_v1 = vpop.f32.mrb[23].mxu1  ;;  %v19293_v26 = vpack.c.bf16 %v19291_v31, %v19292_v37 }
 0x3be   : > { %19285 = vst [vmem:[#allocation109_spill] sm:$0xff] %v15310_v54  ;;  %v10301_v27 = vadd.f32 %v10300_v59, %v10299_v52  ;;  %v15315_v6 = vadd.f32 %v10412_v1, %v10411_v11  ;;  %v15333_v52 = vld [vmem:[%s13948_s28 + $0x88] sm:$0xff]   ;;  %v19308_v54 = vld [vmem:[#allocation30_spill] sm:$0xff] }
 0x3bf   : > { %4842 = vmatmul.mubr.bf16.vlgmr.msra.gmra.mrb[128].mxu0 %v19289_v3  ;;  %v19310_v13 = vpack.c.bf16 %v19308_v54, %v19309_v32 }
 0x3c0   : > { %19286 = vst [vmem:[#allocation47_spill] sm:$0xff] %v15315_v6  ;;  %12331 = vmatmul.mubr.bf16.vlgmr.msra.gmra.mrb[128].mxu1 %v19290_v29  ;;  %v3883_v43 = vpack.c.bf16 %v10301_v27, %v15308_v30  ;;  %4849 = vmatprep.mubr.bf16.mxu0 %v19293_v26  ;;  %v15344_v29 = vld [vmem:[%s13948_s28 + $0x90] sm:$0xff]   ;;  %v15351_v26 = vld [vmem:[%s13948_s28 + $0xd8] sm:$0xff]  }
 0x3c1   : > { %12334 = vmatprep.mubr.bf16.mxu1 %v3880_v55  ;;  %10835 = vmatpush3.bf16.msra.mxu1 %v15313_v2  ;;  %v19301_v6 = vld [vmem:[#allocation21_spill] sm:$0xff] }
 0x3c2   : > { %10947 = vmatpush3.bf16.msra.mxu0 %v15313_v2  ;;  %v10302_v11 = vpop.f32.mrb[24].mxu0  ;;  %v10414_v59 = vpop.f32.mrb[24].mxu1  ;;  %10836 = vmatprep.subr.bf16.mxu1 %v15318_v49 }
 0x3c3   : > { %10948 = vmatprep.subr.bf16.mxu0 %v15318_v49  ;;  %v10303_v20 = vpop.f32.mrb[25].mxu0  ;;  %v10415_v30 = vpop.f32.mrb[25].mxu1 }
 0x3c4   : > { %v10304_v1 = vadd.f32 %v10303_v20, %v10302_v11  ;;  %v15340_v55 = vadd.f32 %v10415_v30, %v10414_v59  ;;  %v10305_v27 = vpop.f32.mrb[26].mxu0  ;;  %v10417_v14 = vpop.f32.mrb[26].mxu1  ;;  %v19296_v11 = vld [vmem:[#allocation24_spill] sm:$0xff]  ;;  %v19297_v59 = vld [vmem:[#allocation19_spill] sm:$0xff]  ;;  %v19299_v30 = vpack.c.bf16 %v15274_v24, %v15270_v19 }
 0x3c5   : > { %v10306_v7 = vpop.f32.mrb[27].mxu0  ;;  %v10418_v3 = vpop.f32.mrb[27].mxu1  ;;  %10837 = vmatpush3.bf16.msra.mxu1 %v15333_v52  ;;  %v19298_v20 = vpack.c.bf16 %v19296_v11, %v19297_v59  ;;  %v15370_v59 = vld [vmem:[%s13948_s28 + $0xe0] sm:$0xff]  }
 0x3c6   : > { %19294 = vst [vmem:[#allocation45_spill] sm:$0xff] %v15340_v55  ;;  %10949 = vmatpush3.bf16.msra.mxu0 %v15333_v52  ;;  %v10307_v31 = vadd.f32 %v10306_v7, %v10305_v27  ;;  %v15347_v37 = vadd.f32 %v10418_v3, %v10417_v14  ;;  %10838 = vmatprep.subr.bf16.mxu1 %v15337_v10  ;;  %v19300_v55 = vld [vmem:[#allocation26_spill] sm:$0xff] }
 0x3c7   : > { %10950 = vmatprep.subr.bf16.mxu0 %v15337_v10  ;;  %4850 = vmatmul.mubr.bf16.gmra.mrb[132].mxu0 %v19298_v20  ;;  %v19302_v27 = vpack.c.bf16 %v19300_v55, %v19301_v6  ;;  %v15365_v7 = vld [vmem:[%s13948_s28 + $0x98] sm:$0xff]  }
 0x3c8   : > { %19295 = vst [vmem:[#allocation110_spill] sm:$0xff] %v15347_v37  ;;  %12335 = vmatmul.mubr.bf16.gmra.mrb[132].mxu1 %v19299_v30  ;;  %v3884_v14 = vpack.c.bf16 %v10307_v31, %v10304_v1  ;;  %v15377_v30 = vld [vmem:[%s13948_s28 + $0xa0] sm:$0xff]  }
 0x3c9   : > { %4857 = vmatprep.mubr.bf16.mxu0 %v19302_v27  ;;  %12338 = vmatprep.mubr.bf16.mxu1 %v3882_v51 }
 0x3ca   : > { %10839 = vmatpush3.bf16.msra.mxu1 %v15344_v29  ;;  %10951 = vmatpush3.bf16.msra.mxu0 %v15344_v29  ;;  %v10308_v3 = vpop.f32.mrb[28].mxu0  ;;  %v10420_v11 = vpop.f32.mrb[28].mxu1 }
 0x3cb   : > { %10840 = vmatprep.subr.bf16.mxu1 %v15351_v26  ;;  %10952 = vmatprep.subr.bf16.mxu0 %v15351_v26  ;;  %v10309_v19 = vpop.f32.mrb[29].mxu0  ;;  %v10421_v24 = vpop.f32.mrb[29].mxu1 }
 0x3cc   : > { %v10310_v51 = vadd.f32 %v10309_v19, %v10308_v3  ;;  %v15373_v6 = vadd.f32 %v10421_v24, %v10420_v11  ;;  %v10311_v1 = vpop.f32.mrb[30].mxu0  ;;  %v10423_v55 = vpop.f32.mrb[30].mxu1  ;;  %v15384_v3 = vld [vmem:[%s13948_s28 + $0xe8] sm:$0xff]   ;;  %v19306_v19 = vld [vmem:[#allocation23_spill] sm:$0xff] }
 0x3cd   : > { %v10312_v31 = vpop.f32.mrb[31].mxu0  ;;  %v10424_v20 = vpop.f32.mrb[31].mxu1  ;;  %v19305_v11 = vld [vmem:[#allocation28_spill] sm:$0xff] }
 0x3ce   : > { %19303 = vst [vmem:[#allocation108_spill] sm:$0xff] %v15373_v6  ;;  %10841 = vmatpush3.bf16.msra.mxu1 %v15365_v7  ;;  %10953 = vmatpush3.bf16.msra.mxu0 %v15365_v7  ;;  %v10313_v27 = vadd.f32 %v10312_v31, %v10311_v1  ;;  %v15380_v37 = vadd.f32 %v10424_v20, %v10423_v55  ;;  %v15395_v1 = vld [vmem:[%s13948_s28 + $0xa8] sm:$0xff]   ;;  %v15400_v20 = vld [vmem:[%s13948_s28 + $0xf0] sm:$0xff]  }
 0x3cf   : > { %10842 = vmatprep.subr.bf16.mxu1 %v15370_v59  ;;  %10954 = vmatprep.subr.bf16.mxu0 %v15370_v59  ;;  %v19307_v24 = vpack.c.bf16 %v19305_v11, %v19306_v19  ;;  %19311 = vst [vmem:[#allocation50_spill] sm:$0xff] %v15395_v1  ;;  %19312 = vst [vmem:[#allocation51_spill] sm:$0xff] %v15400_v20  ;;  %v15407_v19 = vld [vmem:[%s13948_s28 + $0xb0] sm:$0xff]  }
 0x3d0   : > { %19304 = vst [vmem:[#allocation52_spill] sm:$0xff] %v15380_v37  ;;  %12339 = vmatmul.mubr.bf16.gmra.mrb[136].mxu1 %v3883_v43  ;;  %v3885_v6 = vpack.c.bf16 %v10313_v27, %v10310_v51  ;;  %19314 = vst [vmem:[#allocation112_spill] sm:$0xff] %v15407_v19 }
 0x3d1   : > { %4858 = vmatmul.mubr.bf16.gmra.mrb[136].mxu0 %v19307_v24  ;;  %12342 = vmatprep.mubr.bf16.mxu1 %v3884_v14 }
 0x3d2   : > { %4865 = vmatprep.mubr.bf16.mxu0 %v19310_v13  ;;  %10843 = vmatpush3.bf16.msra.mxu1 %v15377_v30  ;;  %v10314_v55 = vpop.f32.mrb[32].mxu0  ;;  %v10426_v31 = vpop.f32.mrb[32].mxu1 }
 0x3d3   : > { %10955 = vmatpush3.bf16.msra.mxu0 %v15377_v30  ;;  %10844 = vmatprep.subr.bf16.mxu1 %v15384_v3  ;;  %v10315_v43 = vpop.f32.mrb[33].mxu0  ;;  %v10427_v32 = vpop.f32.mrb[33].mxu1 }
 0x3d4   : > { %10956 = vmatprep.subr.bf16.mxu0 %v15384_v3  ;;  %v10316_v13 = vadd.f32 %v10315_v43, %v10314_v55  ;;  %v15403_v54 = vadd.f32 %v10427_v32, %v10426_v31  ;;  %v10317_v14 = vpop.f32.mrb[34].mxu0  ;;  %v10429_v51 = vpop.f32.mrb[34].mxu1  ;;  %v19317_v55 = vld [vmem:[#allocation32_spill] sm:$0xff]  ;;  %v19318_v31 = vld [vmem:[#allocation27_spill] sm:$0xff]  ;;  %v19320_v32 = vld [vmem:[#allocation34_spill] sm:$0xff] }
 0x3d5   : > { %v10318_v27 = vpop.f32.mrb[35].mxu0  ;;  %v10430_v11 = vpop.f32.mrb[35].mxu1  ;;  %v19319_v43 = vpack.c.bf16 %v19317_v55, %v19318_v31 }
 0x3d6   : > { %19313 = vst [vmem:[#allocation49_spill] sm:$0xff] %v15403_v54  ;;  %10845 = vmatpush3.bf16.msra.mxu1 %v15395_v1  ;;  %v10319_v24 = vadd.f32 %v10318_v27, %v10317_v14  ;;  %v15410_v37 = vadd.f32 %v10430_v11, %v10429_v51  ;;  %v19321_v54 = vld [vmem:[#allocation29_spill] sm:$0xff]  ;;  %v15425_v14 = vld [vmem:[%s13948_s28 + $0xb8] sm:$0xff]  }
 0x3d7   : > { %10957 = vmatpush3.bf16.msra.mxu0 %v15395_v1  ;;  %10846 = vmatprep.subr.bf16.mxu1 %v15400_v20  ;;  %v19322_v40 = vpack.c.bf16 %v19320_v32, %v19321_v54  ;;  %19323 = vst [vmem:[#allocation114_spill] sm:$0xff] %v15425_v14 }
 0x3d8   : > { %19315 = vst [vmem:[#allocation56_spill] sm:$0xff] %v15410_v37  ;;  %10958 = vmatprep.subr.bf16.mxu0 %v15400_v20  ;;  %12343 = vmatmul.mubr.bf16.gmra.mrb[140].mxu1 %v3885_v6  ;;  %v3886_v53 = vpack.c.bf16 %v10319_v24, %v10316_v13  ;;  %v19327_v37 = vld [vmem:[#allocation31_spill] sm:$0xff] }
 0x3d9   : > { %4866 = vmatmul.mubr.bf16.gmra.mrb[140].mxu0 %v19319_v43 }
 0x3da   : > { %4873 = vmatprep.mubr.bf16.mxu0 %v19322_v40  ;;  %10847 = vmatpush3.bf16.msra.mxu1 %v15407_v19  ;;  %v10320_v51 = vpop.f32.mrb[36].mxu0  ;;  %v10432_v27 = vpop.f32.mrb[36].mxu1 }
 0x3db   : > { %10959 = vmatpush3.bf16.msra.mxu0 %v15407_v19  ;;  %12346 = vmatprep.mubr.bf16.mxu1 %v3886_v53  ;;  %v10321_v11 = vpop.f32.mrb[37].mxu0  ;;  %v10433_v55 = vpop.f32.mrb[37].mxu1  ;;  %v19326_v53 = vld [vmem:[#allocation36_spill] sm:$0xff] }
 0x3dc   : > { %10848 = vmatprep.subr.bf16.mxu1 %v15414_v0  ;;  %10960 = vmatprep.subr.bf16.mxu0 %v15414_v0  ;;  %v10322_v6 = vadd.f32 %v10321_v11, %v10320_v51  ;;  %v15430_v31 = vadd.f32 %v10433_v55, %v10432_v27  ;;  %v10323_v40 = vpop.f32.mrb[38].mxu0  ;;  %v10435_v13 = vpop.f32.mrb[38].mxu1  ;;  %v19328_v51 = vpack.c.bf16 %v19326_v53, %v19327_v37  ;;  %v19329_v11 = vld [vmem:[#allocation38_spill] sm:$0xff]  ;;  %v19330_v55 = vld [vmem:[#allocation33_spill] sm:$0xff] }
 0x3dd   : > { %v10324_v54 = vpop.f32.mrb[39].mxu0  ;;  %v10436_v24 = vpop.f32.mrb[39].mxu1 }
 0x3de   : > { %19324 = vst [vmem:[#allocation55_spill] sm:$0xff] %v15430_v31  ;;  %10849 = vmatpush3.bf16.msra.mxu1 %v15425_v14  ;;  %v10325_v43 = vadd.f32 %v10324_v54, %v10323_v40  ;;  %v15434_v32 = vadd.f32 %v10436_v24, %v10435_v13  ;;  %v19331_v31 = vpack.c.bf16 %v19329_v11, %v19330_v55 }
 0x3df   : > { %10961 = vmatpush3.bf16.msra.mxu0 %v15425_v14  ;;  %11058 = vmatprep.subr.bf16.mxu1 %v15035_v12 }
 0x3e0   : > { %19325 = vst [vmem:[#allocation53_spill] sm:$0xff] %v15434_v32  ;;  %11170 = vmatprep.subr.bf16.mxu0 %v15035_v12  ;;  %v3887_v27 = vpack.c.bf16 %v10325_v43, %v10322_v6  ;;  %v19333_v6 = vld [vmem:[#allocation40_spill] sm:$0xff]  ;;  %v19334_v43 = vld [vmem:[#allocation35_spill] sm:$0xff] }
 0x3e1   : > { %4874 = vmatmul.mubr.bf16.gmra.mrb[144].mxu0 %v19328_v51  ;;  %v19335_v53 = vpack.c.bf16 %v19333_v6, %v19334_v43  ;;  %v19338_v43 = vld [vmem:[#allocation37_spill] sm:$0xff] }
 0x3e2   : > { %4881 = vmatprep.mubr.bf16.mxu0 %v19331_v31  ;;  %v10326_v0 = vpop.f32.mrb[40].mxu0  ;;  %v10438_v19 = vpop.f32.mrb[40].mxu1  ;;  %12347 = vmatmul.mubr.bf16.gmra.mrb[144].mxu1 %v3887_v27  ;;  %v19336_v31 = vld [vmem:[#allocation39_spill] sm:$0xff] }
 0x3e3   : > { %v10327_v14 = vpop.f32.mrb[41].mxu0  ;;  %v10439_v40 = vpop.f32.mrb[41].mxu1  ;;  %v19337_v51 = vpack.c.bf16 %v14968_v48, %v19336_v31 }
 0x3e4   : > { %v10328_v13 = vadd.f32 %v10327_v14, %v10326_v0  ;;  %v15444_v54 = vadd.f32 %v10439_v40, %v10438_v19  ;;  %v10329_v24 = vpop.f32.mrb[42].mxu0  ;;  %v10441_v32 = vpop.f32.mrb[42].mxu1 }
 0x3e5   : > { %v10330_v12 = vpop.f32.mrb[43].mxu0  ;;  %v10442_v20 = vpop.f32.mrb[43].mxu1 }
 0x3e6   : > { %v10331_v1 = vadd.f32 %v10330_v12, %v10329_v24  ;;  %v15446_v37 = vadd.f32 %v10442_v20, %v10441_v32 }
 0x3e8   : > { %19332 = vst [vmem:[#allocation115_spill] sm:$0xff] %v15446_v37  ;;  %v3888_v27 = vpack.c.bf16 %v10331_v1, %v10328_v13  ;;  %v19341_v13 = vpack.c.bf16 %v14992_v61, %v14988_v58  ;;  %v19344_v61 = vpack.c.bf16 %v15016_v8, %v15012_v56 }
 0x3e9   : > { %4882 = vmatmul.mubr.bf16.gmra.mrb[148].mxu0 %v19335_v53  ;;  %v19339_v53 = vld [vmem:[#allocation102_spill] sm:$0xff] }
 0x3ea   : > { %4889 = vmatprep.mubr.bf16.mxu0 %v19337_v51  ;;  %v10332_v11 = vpop.f32.mrb[44].mxu0  ;;  %v10444_v0 = vpop.f32.mrb[44].mxu1  ;;  %12350 = vmatprep.mubr.bf16.mxu1 %v3888_v27  ;;  %v19340_v48 = vpack.c.bf16 %v19338_v43, %v19339_v53 }
 0x3eb   : > { %v10333_v19 = vpop.f32.mrb[45].mxu0  ;;  %v10445_v14 = vpop.f32.mrb[45].mxu1 }
 0x3ec   : > { %v10334_v55 = vadd.f32 %v10333_v19, %v10332_v11  ;;  %v15454_v40 = vadd.f32 %v10445_v14, %v10444_v0  ;;  %v10335_v24 = vpop.f32.mrb[46].mxu0  ;;  %v10447_v20 = vpop.f32.mrb[46].mxu1 }
 0x3ed   : > { %v10336_v32 = vpop.f32.mrb[47].mxu0  ;;  %v10448_v12 = vpop.f32.mrb[47].mxu1 }
 0x3ee   : > { %v10337_v37 = vadd.f32 %v10336_v32, %v10335_v24  ;;  %v15456_v6 = vadd.f32 %v10448_v12, %v10447_v20 }
 0x3f0   : > { %v3889_v1 = vpack.c.bf16 %v10337_v37, %v10334_v55  ;;  %v19342_v37 = vld [vmem:[#allocation103_spill] sm:$0xff] }
 0x3f1   : > { %4890 = vmatmul.mubr.bf16.gmra.mrb[152].mxu0 %v19340_v48  ;;  %v19343_v55 = vpack.c.bf16 %v14990_v57, %v19342_v37 }
 0x3f2   : > { %4897 = vmatprep.mubr.bf16.mxu0 %v19341_v13  ;;  %v10338_v31 = vpop.f32.mrb[48].mxu0  ;;  %v10450_v51 = vpop.f32.mrb[48].mxu1  ;;  %12351 = vmatmul.mubr.bf16.gmra.mrb[148].mxu1 %v3889_v1 }
 0x3f3   : > { %v10339_v27 = vpop.f32.mrb[49].mxu0  ;;  %v10451_v11 = vpop.f32.mrb[49].mxu1 }
 0x3f4   : > { %v10340_v0 = vadd.f32 %v10339_v27, %v10338_v31  ;;  %v15464_v19 = vadd.f32 %v10451_v11, %v10450_v51  ;;  %v10341_v14 = vpop.f32.mrb[50].mxu0  ;;  %v10453_v24 = vpop.f32.mrb[50].mxu1 }
 0x3f5   : > { %v10342_v20 = vpop.f32.mrb[51].mxu0  ;;  %v10454_v32 = vpop.f32.mrb[51].mxu1 }
 0x3f6   : > { %v10343_v12 = vadd.f32 %v10342_v20, %v10341_v14  ;;  %v15466_v43 = vadd.f32 %v10454_v32, %v10453_v24  ;;  %v19345_v32 = vld [vmem:[#allocation101_spill] sm:$0xff] }
 0x3f7   : > { %v19346_v8 = vpack.c.bf16 %v15014_v60, %v19345_v32 }
 0x3f8   : > { %v3890_v58 = vpack.c.bf16 %v10343_v12, %v10340_v0  ;;  %v19347_v0 = vld [vmem:[#allocation42_spill] sm:$0xff] }
 0x3f9   : > { %4898 = vmatmul.mubr.bf16.gmra.mrb[156].mxu0 %v19343_v55  ;;  %v19348_v12 = vpack.c.bf16 %v15043_v18, %v19347_v0  ;;  %v19352_v18 = vpack.c.bf16 %v15069_v38, %v15065_v23  ;;  %v19353_v23 = vpack.c.bf16 %v15067_v42, %v15063_v47 }
 0x3fa   : > { %4905 = vmatprep.mubr.bf16.mxu0 %v19344_v61  ;;  %v10344_v53 = vpop.f32.mrb[52].mxu0  ;;  %v10456_v48 = vpop.f32.mrb[52].mxu1  ;;  %12354 = vmatprep.mubr.bf16.mxu1 %v3890_v58 }
 0x3fb   : > { %v10345_v1 = vpop.f32.mrb[53].mxu0  ;;  %v10457_v13 = vpop.f32.mrb[53].mxu1 }
 0x3fc   : > { %v10346_v31 = vadd.f32 %v10345_v1, %v10344_v53  ;;  %v15474_v51 = vadd.f32 %v10457_v13, %v10456_v48  ;;  %v10347_v27 = vpop.f32.mrb[54].mxu0  ;;  %v10459_v11 = vpop.f32.mrb[54].mxu1 }
 0x3fd   : > { %v10348_v14 = vpop.f32.mrb[55].mxu0  ;;  %v10460_v24 = vpop.f32.mrb[55].mxu1 }
 0x3fe   : > { %v10349_v20 = vadd.f32 %v10348_v14, %v10347_v27  ;;  %v15476_v57 = vadd.f32 %v10460_v24, %v10459_v11  ;;  %v19350_v24 = vld [vmem:[#allocation44_spill] sm:$0xff] }
 0x400   : > { %v3891_v56 = vpack.c.bf16 %v10349_v20, %v10346_v31  ;;  %v19349_v31 = vld [vmem:[#allocation107_spill] sm:$0xff] }
 0x401   : > { %4906 = vmatmul.mubr.bf16.gmra.mrb[160].mxu0 %v19346_v8  ;;  %v19351_v20 = vpack.c.bf16 %v19349_v31, %v19350_v24 }
 0x402   : > { %4913 = vmatprep.mubr.bf16.mxu0 %v19348_v12  ;;  %v10350_v37 = vpop.f32.mrb[56].mxu0  ;;  %v10462_v55 = vpop.f32.mrb[56].mxu1  ;;  %12355 = vmatmul.mubr.bf16.gmra.mrb[152].mxu1 %v3891_v56 }
 0x403   : > { %v10351_v61 = vpop.f32.mrb[57].mxu0  ;;  %v10463_v58 = vpop.f32.mrb[57].mxu1 }
 0x404   : > { %v10352_v53 = vadd.f32 %v10351_v61, %v10350_v37  ;;  %v15484_v48 = vadd.f32 %v10463_v58, %v10462_v55  ;;  %v10353_v1 = vpop.f32.mrb[58].mxu0  ;;  %v10465_v13 = vpop.f32.mrb[58].mxu1 }
 0x405   : > { %v10354_v27 = vpop.f32.mrb[59].mxu0  ;;  %v10466_v11 = vpop.f32.mrb[59].mxu1 }
 0x406   : > { %v10355_v14 = vadd.f32 %v10354_v27, %v10353_v1  ;;  %v15486_v60 = vadd.f32 %v10466_v11, %v10465_v13 }
 0x408   : > { %v3892_v32 = vpack.c.bf16 %v10355_v14, %v10352_v53  ;;  %v19354_v53 = vpack.c.bf16 %v15093_v41, %v15089_v33  ;;  %v19355_v33 = vpack.c.bf16 %v15091_v16, %v15087_v21  ;;  %v13074_v21 = vld [vmem:[#allocation5 + $0x14] ss:$8 sps:$4 sm:$0xff]  }
 0x409   : > { %4914 = vmatmul.mubr.bf16.gmra.mrb[164].mxu0 %v19351_v20 }
 0x40a   : > { %4921 = vmatprep.mubr.bf16.mxu0 %v19352_v18  ;;  %v10356_v8 = vpop.f32.mrb[60].mxu0  ;;  %v10468_v56 = vpop.f32.mrb[60].mxu1  ;;  %12358 = vmatprep.mubr.bf16.mxu1 %v3892_v32  ;;  %v13072_v18 = vld [vmem:[#allocation5 + $0x4] ss:$8 sps:$4 sm:$0xff]  }
 0x40b   : > { %v10357_v0 = vpop.f32.mrb[61].mxu0  ;;  %v10469_v12 = vpop.f32.mrb[61].mxu1 }
 0x40c   : > { %v10358_v37 = vadd.f32 %v10357_v0, %v10356_v8  ;;  %v15494_v55 = vadd.f32 %v10469_v12, %v10468_v56  ;;  %v10359_v61 = vpop.f32.mrb[62].mxu0  ;;  %v10471_v58 = vpop.f32.mrb[62].mxu1 }
 0x40d   : > { %v10360_v1 = vpop.f32.mrb[63].mxu0  ;;  %v10472_v13 = vpop.f32.mrb[63].mxu1 }
 0x40e   : > { %v10361_v27 = vadd.f32 %v10360_v1, %v10359_v61  ;;  %v15496_v11 = vadd.f32 %v10472_v13, %v10471_v58  ;;  %v19356_v1 = vpack.c.bf16 %v15117_v36, %v15113_v9 }
 0x410   : > { %v3893_v38 = vpack.c.bf16 %v10361_v27, %v10358_v37 }
 0x411   : > { %4922 = vmatmul.mubr.bf16.gmra.mrb[168].mxu0 %v19353_v23 }
 0x412   : > { %4929 = vmatprep.mubr.bf16.mxu0 %v19354_v53  ;;  %v10490_v14 = vpop.f32.mrb[64].mxu0  ;;  %v10602_v31 = vpop.f32.mrb[64].mxu1  ;;  %12359 = vmatmul.mubr.bf16.gmra.mrb[156].mxu1 %v3893_v38  ;;  %v13073_v38 = vld [vmem:[#allocation5] ss:$8 sps:$4 sm:$0xff]  }
 0x413   : > { %v10491_v24 = vpop.f32.mrb[65].mxu0  ;;  %v10603_v20 = vpop.f32.mrb[65].mxu1  ;;  %5292 = vmatprep.mubr.bf16.mxu1 %v13072_v18 }
 0x414   : > { %v10492_v32 = vadd.f32 %v10491_v24, %v10490_v14  ;;  %v10604_v8 = vadd.f32 %v10603_v20, %v10602_v31  ;;  %v10493_v56 = vpop.f32.mrb[66].mxu0  ;;  %v10605_v0 = vpop.f32.mrb[66].mxu1 }
 0x415   : > { %v10494_v12 = vpop.f32.mrb[67].mxu0  ;;  %v10606_v61 = vpop.f32.mrb[67].mxu1 }
 0x416   : > { %v4522_v47 = vadd.f32 %v10492_v32, %v15209_v5  ;;  %v10495_v42 = vadd.f32 %v10494_v12, %v10493_v56  ;;  %v10607_v37 = vadd.f32 %v10606_v61, %v10605_v0  ;;  %v19357_v32 = vpack.c.bf16 %v15115_v44, %v15111_v46 }
 0x417   : > { %v19358_v0 = vpack.c.bf16 %v15141_v4, %v15137_v25 }
 0x418   : > { %v15508_v41 = vadd.f32 %v10604_v8, %v4522_v47  ;;  %v4525_v58 = vadd.f32 %v10495_v42, %v15213_v34  ;;  %v13075_v47 = vld [vmem:[#allocation5 + $0x10] ss:$8 sps:$4 sm:$0xff]   ;;  %v13076_v42 = vld [vmem:[#allocation5 + $0x24] ss:$8 sps:$4 sm:$0xff]  }
 0x419   : > { %4930 = vmatmul.mubr.bf16.gmra.mrb[172].mxu0 %v19355_v33 }
 0x41a   : > { %4937 = vmatprep.mubr.bf16.mxu0 %v19356_v1  ;;  %v15514_v13 = vadd.f32 %v10607_v37, %v4525_v58  ;;  %v10496_v27 = vpop.f32.mrb[68].mxu0  ;;  %v10608_v23 = vpop.f32.mrb[68].mxu1  ;;  %5293 = vmatmul.mubr.bf16.vlgmr.msra.gmra.mrb[160].mxu1 %v13073_v38  ;;  %v19359_v38 = vpack.c.bf16 %v15139_v45, %v15135_v35 }
 0x41b   : > { %v10497_v5 = vpop.f32.mrb[69].mxu0  ;;  %v10609_v53 = vpop.f32.mrb[69].mxu1  ;;  %11059 = vmatpush3.bf16.msra.mxu1 %v15313_v2  ;;  %5300 = vmatprep.mubr.bf16.mxu1 %v13074_v21  ;;  %v19360_v21 = vpack.c.bf16 %v15165_v39, %v15161_v28 }
 0x41c   : > { %v10498_v16 = vadd.f32 %v10497_v5, %v10496_v27  ;;  %v10610_v14 = vadd.f32 %v10609_v53, %v10608_v23  ;;  %v10499_v31 = vpop.f32.mrb[70].mxu0  ;;  %v10611_v34 = vpop.f32.mrb[70].mxu1  ;;  %11060 = vmatprep.subr.bf16.mxu1 %v15318_v49 }
 0x41d   : > { %v10500_v9 = vpop.f32.mrb[71].mxu0  ;;  %v10612_v36 = vpop.f32.mrb[71].mxu1 }
 0x41e   : > { %v4530_v24 = vadd.f32 %v10498_v16, %v15231_v22  ;;  %v10501_v20 = vadd.f32 %v10500_v9, %v10499_v31  ;;  %v10613_v18 = vadd.f32 %v10612_v36, %v10611_v34  ;;  %v13077_v31 = vld [vmem:[#allocation5 + $0x20] ss:$8 sps:$4 sm:$0xff]   ;;  %v13078_v34 = vld [vmem:[#allocation5 + $0x34] ss:$8 sps:$4 sm:$0xff]  }
 0x41f   : > { %11061 = vmatpush3.bf16.msra.mxu1 %v15333_v52 }
 0x420   : > { %v15523_v8 = vadd.f32 %v10610_v14, %v4530_v24  ;;  %v4533_v56 = vadd.f32 %v10501_v20, %v15235_v50  ;;  %11062 = vmatprep.subr.bf16.mxu1 %v15337_v10 }
 0x421   : > { %4938 = vmatmul.mubr.bf16.gmra.mrb[176].mxu0 %v19357_v32 }
 0x422   : > { %4945 = vmatprep.mubr.bf16.mxu0 %v19358_v0  ;;  %v15530_v12 = vadd.f32 %v10613_v18, %v4533_v56  ;;  %v10502_v22 = vpop.f32.mrb[72].mxu0  ;;  %5301 = vmatmul.mubr.bf16.gmra.mrb[164].mxu1 %v13075_v47  ;;  %v19361_v56 = vld [vmem:[#allocation105_spill] sm:$0xff]  ;;  %v19364_v47 = vld [vmem:[#allocation48_spill] sm:$0xff] }
 0x423   : > { %v10614_v61 = vpop.f32.mrb[72].mxu1  ;;  %v10503_v46 = vpop.f32.mrb[73].mxu0  ;;  %5308 = vmatprep.mubr.bf16.mxu1 %v13076_v42  ;;  %11063 = vmatpush3.bf16.msra.mxu1 %v15344_v29  ;;  %v19362_v0 = vpack.c.bf16 %v15163_v63, %v19361_v56  ;;  %v19366_v42 = vld [vmem:[#allocation41_spill] sm:$0xff]  ;;  %v15575_v56 = vld [vmem:[%s13948_s28 + $0xc0] sm:$0xff]  }
 0x424   : > { %v10615_v44 = vpop.f32.mrb[73].mxu1  ;;  %v10504_v37 = vadd.f32 %v10503_v46, %v10502_v22  ;;  %v10505_v33 = vpop.f32.mrb[74].mxu0  ;;  %11064 = vmatprep.subr.bf16.mxu1 %v15351_v26  ;;  %v19363_v22 = vld [vmem:[#allocation50_spill] sm:$0xff] }
 0x425   : > { %v10616_v50 = vadd.f32 %v10615_v44, %v10614_v61  ;;  %v10617_v58 = vpop.f32.mrb[74].mxu1  ;;  %v10506_v25 = vpop.f32.mrb[75].mxu0  ;;  %v19365_v44 = vld [vmem:[#allocation104_spill] sm:$0xff] }
 0x426   : > { %v10618_v4 = vpop.f32.mrb[75].mxu1  ;;  %v4538_v1 = vadd.f32 %v10504_v37, %v15253_v15  ;;  %v10507_v27 = vadd.f32 %v10506_v25, %v10505_v33  ;;  %v19367_v37 = vpack.c.bf16 %v19365_v44, %v19366_v42  ;;  %v13079_v25 = vld [vmem:[#allocation5 + $0x30] ss:$8 sps:$4 sm:$0xff]   ;;  %v13083_v44 = vld [vmem:[#allocation5 + $0x40] ss:$8 sps:$4 sm:$0xff]  }
 0x427   : > { %v10619_v23 = vadd.f32 %v10618_v4, %v10617_v58  ;;  %11065 = vmatpush3.bf16.msra.mxu1 %v15365_v7 }
 0x428   : > { %v15539_v5 = vadd.f32 %v10616_v50, %v4538_v1  ;;  %v4541_v53 = vadd.f32 %v10507_v27, %v15255_v17  ;;  %11066 = vmatprep.subr.bf16.mxu1 %v15370_v59  ;;  %v19368_v50 = vld [vmem:[#allocation51_spill] sm:$0xff]  ;;  %v13080_v1 = vld [vmem:[#allocation5 + $0x44] ss:$8 sps:$4 sm:$0xff]  }
 0x429   : > { %4946 = vmatmul.mubr.bf16.gmra.mrb[180].mxu0 %v19359_v38  ;;  %v19369_v27 = vld [vmem:[#allocation112_spill] sm:$0xff] }
 0x42a   : > { %4953 = vmatprep.mubr.bf16.mxu0 %v19360_v21  ;;  %v15546_v16 = vadd.f32 %v10619_v23, %v4541_v53  ;;  %v10508_v15 = vpop.f32.mrb[76].mxu0  ;;  %5309 = vmatmul.mubr.bf16.gmra.mrb[168].mxu1 %v13077_v31 }
 0x42b   : > { %v10620_v14 = vpop.f32.mrb[76].mxu1  ;;  %v10509_v35 = vpop.f32.mrb[77].mxu0  ;;  %5316 = vmatprep.mubr.bf16.mxu1 %v13078_v34  ;;  %11067 = vmatpush3.bf16.msra.mxu1 %v15377_v30 }
 0x42c   : > { %v10621_v45 = vpop.f32.mrb[77].mxu1  ;;  %v10510_v9 = vadd.f32 %v10509_v35, %v10508_v15  ;;  %v10511_v36 = vpop.f32.mrb[78].mxu0  ;;  %11068 = vmatprep.subr.bf16.mxu1 %v15384_v3  ;;  %v19370_v15 = vld [vmem:[#allocation54_spill] sm:$0xff] }
 0x42d   : > { %v10622_v17 = vadd.f32 %v10621_v45, %v10620_v14  ;;  %v10623_v24 = vpop.f32.mrb[78].mxu1  ;;  %v10512_v28 = vpop.f32.mrb[79].mxu0  ;;  %v19371_v35 = vld [vmem:[#allocation46_spill] sm:$0xff] }
 0x42e   : > { %v10624_v39 = vpop.f32.mrb[79].mxu1  ;;  %v4546_v20 = vadd.f32 %v10510_v9, %v15272_v62  ;;  %v10513_v18 = vadd.f32 %v10512_v28, %v10511_v36  ;;  %v19373_v36 = vld [vmem:[#allocation43_spill] sm:$0xff]  ;;  %v19375_v28 = vld [vmem:[#allocation114_spill] sm:$0xff] }
 0x42f   : > { %v10625_v32 = vadd.f32 %v10624_v39, %v10623_v24  ;;  %11069 = vmatpush3.bf16.msra.mxu1 %v19363_v22 }
 0x430   : > { %v15555_v61 = vadd.f32 %v10622_v17, %v4546_v20  ;;  %v4549_v46 = vadd.f32 %v10513_v18, %v19364_v47  ;;  %11070 = vmatprep.subr.bf16.mxu1 %v19368_v50  ;;  %v19372_v17 = vld [vmem:[#allocation106_spill] sm:$0xff]  ;;  %v19376_v20 = vld [vmem:[#allocation111_spill] sm:$0xff] }
 0x431   : > { %4954 = vmatmul.mubr.bf16.gmra.mrb[184].mxu0 %v19362_v0  ;;  %v19374_v24 = vpack.c.bf16 %v19372_v17, %v19373_v36 }
 0x432   : > { %4961 = vmatprep.mubr.bf16.mxu0 %v19367_v37  ;;  %v15562_v33 = vadd.f32 %v10625_v32, %v4549_v46  ;;  %v10514_v62 = vpop.f32.mrb[80].mxu0  ;;  %5317 = vmatmul.mubr.bf16.gmra.mrb[172].mxu1 %v13079_v25  ;;  %v13081_v32 = vld [vmem:[#allocation5 + $0x104] ss:$8 sps:$4 sm:$0xff]  }
 0x433   : > { %v10626_v58 = vpop.f32.mrb[80].mxu1  ;;  %v10515_v63 = vpop.f32.mrb[81].mxu0  ;;  %5324 = vmatprep.mubr.bf16.mxu1 %v13080_v1  ;;  %11071 = vmatpush3.bf16.msra.mxu1 %v19369_v27 }
 0x434   : > { %v10627_v4 = vpop.f32.mrb[81].mxu1  ;;  %v10516_v23 = vadd.f32 %v10515_v63, %v10514_v62  ;;  %v10517_v53 = vpop.f32.mrb[82].mxu0  ;;  %11072 = vmatprep.subr.bf16.mxu1 %v19370_v15  ;;  %v13084_v62 = vld [vmem:[#allocation5 + $0x54] ss:$8 sps:$4 sm:$0xff]  }
 0x435   : > { %v10628_v38 = vadd.f32 %v10627_v4, %v10626_v58  ;;  %v10629_v21 = vpop.f32.mrb[82].mxu1  ;;  %v10518_v14 = vpop.f32.mrb[83].mxu0 }
 0x436   : > { %v10630_v31 = vpop.f32.mrb[83].mxu1  ;;  %v4554_v45 = vadd.f32 %v10516_v23, %v19371_v35  ;;  %v10519_v34 = vadd.f32 %v10518_v14, %v10517_v53 }
 0x437   : > { %v10631_v9 = vadd.f32 %v10630_v31, %v10629_v21  ;;  %11073 = vmatpush3.bf16.msra.mxu1 %v19375_v28  ;;  %v13085_v31 = vld [vmem:[#allocation5 + $0x100] ss:$8 sps:$4 sm:$0xff]  }
 0x438   : > { %v15571_v39 = vadd.f32 %v10628_v38, %v4554_v45  ;;  %v4557_v18 = vadd.f32 %v10519_v34, %v19376_v20  ;;  %11282 = vmatprep.subr.bf16.mxu1 %v15575_v56  ;;  %v19377_v38 = vld [vmem:[#allocation109_spill] sm:$0xff]  ;;  %v19378_v45 = vld [vmem:[#allocation47_spill] sm:$0xff] }
 0x439   : > { %4962 = vmatmul.mubr.bf16.gmra.mrb[188].mxu0 %v19374_v24  ;;  %v13087_v20 = vld [vmem:[#allocation5 + $0x50] ss:$8 sps:$4 sm:$0xff]  }
 0x43a   : > { %5469 = vmatprep.mubr.bf16.mxu0 %v13081_v32  ;;  %v15578_v0 = vadd.f32 %v10631_v9, %v4557_v18  ;;  %v10520_v47 = vpop.f32.mrb[84].mxu0  ;;  %5325 = vmatmul.mubr.bf16.gmra.mrb[176].mxu1 %v13083_v44  ;;  %v13086_v9 = vld [vmem:[#allocation5 + $0x114] ss:$8 sps:$4 sm:$0xff]  }
 0x43b   : > { %v10632_v46 = vpop.f32.mrb[84].mxu1  ;;  %v10521_v42 = vpop.f32.mrb[85].mxu0  ;;  %5332 = vmatprep.mubr.bf16.mxu1 %v13084_v62 }
 0x43c   : > { %v10633_v37 = vpop.f32.mrb[85].mxu1  ;;  %v10522_v58 = vadd.f32 %v10521_v42, %v10520_v47  ;;  %v10523_v63 = vpop.f32.mrb[86].mxu0  ;;  %v13088_v47 = vld [vmem:[#allocation5 + $0x64] ss:$8 sps:$4 sm:$0xff]  }
 0x43d   : > { %v10634_v25 = vadd.f32 %v10633_v37, %v10632_v46  ;;  %v10635_v4 = vpop.f32.mrb[86].mxu1  ;;  %v10524_v1 = vpop.f32.mrb[87].mxu0 }
 0x43e   : > { %v10636_v23 = vpop.f32.mrb[87].mxu1  ;;  %v4562_v53 = vadd.f32 %v10522_v58, %v19377_v38  ;;  %v10525_v21 = vadd.f32 %v10524_v1, %v10523_v63 }
 0x43f   : > { %v10637_v14 = vadd.f32 %v10636_v23, %v10635_v4  ;;  %v13089_v4 = vld [vmem:[#allocation5 + $0x110] ss:$8 sps:$4 sm:$0xff]  }
 0x440   : > { %v15581_v35 = vadd.f32 %v10634_v25, %v4562_v53  ;;  %v4565_v34 = vadd.f32 %v10525_v21, %v19378_v45  ;;  %v19380_v23 = vld [vmem:[#allocation110_spill] sm:$0xff]  ;;  %v13090_v53 = vld [vmem:[#allocation5 + $0x124] ss:$8 sps:$4 sm:$0xff]  }
 0x441   : > { %5470 = vmatmul.mubr.bf16.vlgmr.msra.gmra.mrb[192].mxu0 %v13085_v31 }
 0x442   : > { %5477 = vmatprep.mubr.bf16.mxu0 %v13086_v9  ;;  %11171 = vmatpush3.bf16.msra.mxu0 %v15313_v2  ;;  %v15586_v17 = vadd.f32 %v10637_v14, %v4565_v34  ;;  %v10526_v36 = vpop.f32.mrb[88].mxu0  ;;  %v13091_v14 = vld [vmem:[#allocation5 + $0x60] ss:$8 sps:$4 sm:$0xff]   ;;  %v13092_v34 = vld [vmem:[#allocation5 + $0x74] ss:$8 sps:$4 sm:$0xff]  }
 0x443   : > { %11172 = vmatprep.subr.bf16.mxu0 %v15318_v49  ;;  %v10638_v24 = vpop.f32.mrb[88].mxu1  ;;  %5333 = vmatmul.mubr.bf16.gmra.mrb[180].mxu1 %v13087_v20  ;;  %v10527_v18 = vpop.f32.mrb[89].mxu0  ;;  %v19379_v49 = vld [vmem:[#allocation45_spill] sm:$0xff] }
 0x444   : > { %v10639_v32 = vpop.f32.mrb[89].mxu1  ;;  %5340 = vmatprep.mubr.bf16.mxu1 %v13088_v47  ;;  %v10528_v46 = vadd.f32 %v10527_v18, %v10526_v36  ;;  %v10529_v42 = vpop.f32.mrb[90].mxu0 }
 0x445   : > { %v10640_v44 = vadd.f32 %v10639_v32, %v10638_v24  ;;  %v10641_v37 = vpop.f32.mrb[90].mxu1  ;;  %v10530_v62 = vpop.f32.mrb[91].mxu0 }
 0x446   : > { %11173 = vmatpush3.bf16.msra.mxu0 %v15333_v52  ;;  %v10642_v2 = vpop.f32.mrb[91].mxu1  ;;  %v4570_v58 = vadd.f32 %v10528_v46, %v19379_v49  ;;  %v10531_v25 = vadd.f32 %v10530_v62, %v10529_v42 }
 0x447   : > { %11174 = vmatprep.subr.bf16.mxu0 %v15337_v10  ;;  %v10643_v63 = vadd.f32 %v10642_v2, %v10641_v37  ;;  %v19382_v37 = vld [vmem:[#allocation52_spill] sm:$0xff]  ;;  %v13094_v2 = vld [vmem:[#allocation5 + $0x134] ss:$8 sps:$4 sm:$0xff]  }
 0x448   : > { %v15591_v1 = vadd.f32 %v10640_v44, %v4570_v58  ;;  %v4573_v38 = vadd.f32 %v10531_v25, %v19380_v23  ;;  %v13093_v44 = vld [vmem:[#allocation5 + $0x120] ss:$8 sps:$4 sm:$0xff]   ;;  %v13095_v58 = vld [vmem:[#allocation5 + $0x70] ss:$8 sps:$4 sm:$0xff]  }
 0x449   : > { %5478 = vmatmul.mubr.bf16.gmra.mrb[196].mxu0 %v13089_v4  ;;  %v13096_v4 = vld [vmem:[#allocation5 + $0x84] ss:$8 sps:$4 sm:$0xff]  }
 0x44a   : > { %5485 = vmatprep.mubr.bf16.mxu0 %v13090_v53  ;;  %11175 = vmatpush3.bf16.msra.mxu0 %v15344_v29  ;;  %v15596_v52 = vadd.f32 %v10643_v63, %v4573_v38  ;;  %v10532_v21 = vpop.f32.mrb[92].mxu0 }
 0x44b   : > { %11176 = vmatprep.subr.bf16.mxu0 %v15351_v26  ;;  %v10644_v10 = vpop.f32.mrb[92].mxu1  ;;  %5341 = vmatmul.mubr.bf16.gmra.mrb[184].mxu1 %v13091_v14  ;;  %v10533_v31 = vpop.f32.mrb[93].mxu0  ;;  %v19381_v26 = vld [vmem:[#allocation108_spill] sm:$0xff] }
 0x44c   : > { %v10645_v45 = vpop.f32.mrb[93].mxu1  ;;  %5348 = vmatprep.mubr.bf16.mxu1 %v13092_v34  ;;  %v10534_v9 = vadd.f32 %v10533_v31, %v10532_v21  ;;  %v10535_v24 = vpop.f32.mrb[94].mxu0  ;;  %v13097_v34 = vld [vmem:[#allocation5 + $0x130] ss:$8 sps:$4 sm:$0xff]  }
 0x44d   : > { %v10646_v36 = vadd.f32 %v10645_v45, %v10644_v10  ;;  %v10647_v20 = vpop.f32.mrb[94].mxu1  ;;  %v10536_v18 = vpop.f32.mrb[95].mxu0 }
 0x44e   : > { %11177 = vmatpush3.bf16.msra.mxu0 %v15365_v7  ;;  %v10648_v29 = vpop.f32.mrb[95].mxu1  ;;  %v4578_v32 = vadd.f32 %v10534_v9, %v19381_v26  ;;  %v10537_v47 = vadd.f32 %v10536_v18, %v10535_v24 }
 0x44f   : > { %11178 = vmatprep.subr.bf16.mxu0 %v15370_v59  ;;  %v10649_v46 = vadd.f32 %v10648_v29, %v10647_v20  ;;  %v13098_v20 = vld [vmem:[#allocation5 + $0x144] ss:$8 sps:$4 sm:$0xff]   ;;  %v13099_v29 = vld [vmem:[#allocation5 + $0x80] ss:$8 sps:$4 sm:$0xff]  }
 0x450   : > { %v15601_v42 = vadd.f32 %v10646_v36, %v4578_v32  ;;  %v4581_v62 = vadd.f32 %v10537_v47, %v19382_v37  ;;  %v19384_v36 = vld [vmem:[#allocation56_spill] sm:$0xff]  ;;  %v13100_v47 = vld [vmem:[#allocation5 + $0x94] ss:$8 sps:$4 sm:$0xff]  }
 0x451   : > { %5486 = vmatmul.mubr.bf16.gmra.mrb[200].mxu0 %v13093_v44 }
 0x452   : > { %5493 = vmatprep.mubr.bf16.mxu0 %v13094_v2  ;;  %11179 = vmatpush3.bf16.msra.mxu0 %v15377_v30  ;;  %v15606_v7 = vadd.f32 %v10649_v46, %v4581_v62  ;;  %v10538_v49 = vpop.f32.mrb[96].mxu0 }
 0x453   : > { %11180 = vmatprep.subr.bf16.mxu0 %v15384_v3  ;;  %v10650_v59 = vpop.f32.mrb[96].mxu1  ;;  %5349 = vmatmul.mubr.bf16.gmra.mrb[188].mxu1 %v13095_v58  ;;  %v10539_v25 = vpop.f32.mrb[97].mxu0  ;;  %v19383_v3 = vld [vmem:[#allocation49_spill] sm:$0xff] }
 0x454   : > { %v10651_v63 = vpop.f32.mrb[97].mxu1  ;;  %5356 = vmatprep.mubr.bf16.mxu1 %v13096_v4  ;;  %v10540_v23 = vadd.f32 %v10539_v25, %v10538_v49  ;;  %v10541_v53 = vpop.f32.mrb[98].mxu0  ;;  %v13101_v25 = vld [vmem:[#allocation5 + $0x140] ss:$8 sps:$4 sm:$0xff]   ;;  %v19386_v4 = vld [vmem:[#allocation53_spill] sm:$0xff] }
 0x455   : > { %v10652_v38 = vadd.f32 %v10651_v63, %v10650_v59  ;;  %v10653_v21 = vpop.f32.mrb[98].mxu1  ;;  %v10542_v10 = vpop.f32.mrb[99].mxu0 }
 0x456   : > { %11181 = vmatpush3.bf16.msra.mxu0 %v19363_v22  ;;  %v10654_v30 = vpop.f32.mrb[99].mxu1  ;;  %v4586_v14 = vadd.f32 %v10540_v23, %v19383_v3  ;;  %v10543_v31 = vadd.f32 %v10542_v10, %v10541_v53  ;;  %v13103_v10 = vld [vmem:[#allocation5 + $0x90] ss:$8 sps:$4 sm:$0xff]  }
 0x457   : > { %11182 = vmatprep.subr.bf16.mxu0 %v19368_v50  ;;  %v10655_v45 = vadd.f32 %v10654_v30, %v10653_v21 }
 0x458   : > { %v15611_v9 = vadd.f32 %v10652_v38, %v4586_v14  ;;  %v4589_v24 = vadd.f32 %v10543_v31, %v19384_v36  ;;  %v13102_v38 = vld [vmem:[#allocation5 + $0x154] ss:$8 sps:$4 sm:$0xff]   ;;  %v13104_v14 = vld [vmem:[#allocation5 + $0xa4] ss:$8 sps:$4 sm:$0xff]  }
 0x459   : > { %5494 = vmatmul.mubr.bf16.gmra.mrb[204].mxu0 %v13097_v34 }
 0x45a   : > { %5501 = vmatprep.mubr.bf16.mxu0 %v13098_v20  ;;  %11183 = vmatpush3.bf16.msra.mxu0 %v19369_v27  ;;  %v15616_v22 = vadd.f32 %v10655_v45, %v4589_v24  ;;  %v10544_v18 = vpop.f32.mrb[100].mxu0 }
 0x45b   : > { %11184 = vmatprep.subr.bf16.mxu0 %v19370_v15  ;;  %v10656_v50 = vpop.f32.mrb[100].mxu1  ;;  %5357 = vmatmul.mubr.bf16.gmra.mrb[192].mxu1 %v13099_v29  ;;  %v10545_v26 = vpop.f32.mrb[101].mxu0  ;;  %v19385_v15 = vld [vmem:[#allocation55_spill] sm:$0xff] }
 0x45c   : > { %v10657_v32 = vpop.f32.mrb[101].mxu1  ;;  %5364 = vmatprep.mubr.bf16.mxu1 %v13100_v47  ;;  %v10546_v46 = vadd.f32 %v10545_v26, %v10544_v18  ;;  %v10547_v37 = vpop.f32.mrb[102].mxu0  ;;  %v13105_v26 = vld [vmem:[#allocation5 + $0x150] ss:$8 sps:$4 sm:$0xff]   ;;  %v19387_v47 = vld [vmem:[#allocation115_spill] sm:$0xff] }
 0x45d   : > { %v10658_v44 = vadd.f32 %v10657_v32, %v10656_v50  ;;  %v10659_v62 = vpop.f32.mrb[102].mxu1  ;;  %v10548_v2 = vpop.f32.mrb[103].mxu0 }
 0x45e   : > { %11185 = vmatpush3.bf16.msra.mxu0 %v19375_v28  ;;  %v10660_v27 = vpop.f32.mrb[103].mxu1  ;;  %v4594_v49 = vadd.f32 %v10546_v46, %v19385_v15  ;;  %v10549_v59 = vadd.f32 %v10548_v2, %v10547_v37 }
 0x45f   : > { %11394 = vmatprep.subr.bf16.mxu0 %v15575_v56  ;;  %v10661_v58 = vadd.f32 %v10660_v27, %v10659_v62  ;;  %v13107_v27 = vld [vmem:[#allocation5 + $0xa0] ss:$8 sps:$4 sm:$0xff]  }
 0x460   : > { %v15621_v63 = vadd.f32 %v10658_v44, %v4594_v49  ;;  %v4597_v23 = vadd.f32 %v10549_v59, %v19386_v4  ;;  %v13106_v44 = vld [vmem:[#allocation5 + $0x164] ss:$8 sps:$4 sm:$0xff]   ;;  %v13108_v59 = vld [vmem:[#allocation5 + $0xb4] ss:$8 sps:$4 sm:$0xff]  }
 0x461   : > { %5502 = vmatmul.mubr.bf16.gmra.mrb[208].mxu0 %v13101_v25 }
 0x462   : > { %5509 = vmatprep.mubr.bf16.mxu0 %v13102_v38  ;;  %v15624_v53 = vadd.f32 %v10661_v58, %v4597_v23  ;;  %v10550_v21 = vpop.f32.mrb[104].mxu0 }
 0x463   : > { %v10662_v28 = vpop.f32.mrb[104].mxu1  ;;  %5365 = vmatmul.mubr.bf16.gmra.mrb[196].mxu1 %v13103_v10  ;;  %v10551_v30 = vpop.f32.mrb[105].mxu0 }
 0x464   : > { %v10663_v3 = vpop.f32.mrb[105].mxu1  ;;  %5372 = vmatprep.mubr.bf16.mxu1 %v13104_v14  ;;  %v10552_v31 = vadd.f32 %v10551_v30, %v10550_v21  ;;  %v10553_v34 = vpop.f32.mrb[106].mxu0  ;;  %v13109_v30 = vld [vmem:[#allocation5 + $0x160] ss:$8 sps:$4 sm:$0xff]  }
 0x465   : > { %v10664_v45 = vadd.f32 %v10663_v3, %v10662_v28  ;;  %v10665_v36 = vpop.f32.mrb[106].mxu1  ;;  %v10554_v24 = vpop.f32.mrb[107].mxu0 }
 0x466   : > { %v10666_v20 = vpop.f32.mrb[107].mxu1  ;;  %v4602_v18 = vadd.f32 %v10552_v31, %v15444_v54  ;;  %v10555_v50 = vadd.f32 %v10554_v24, %v10553_v34  ;;  %v13110_v31 = vld [vmem:[#allocation5 + $0x174] ss:$8 sps:$4 sm:$0xff]   ;;  %v13111_v24 = vld [vmem:[#allocation5 + $0xb0] ss:$8 sps:$4 sm:$0xff]  }
 0x467   : > { %v10667_v29 = vadd.f32 %v10666_v20, %v10665_v36 }
 0x468   : > { %v15627_v32 = vadd.f32 %v10664_v45, %v4602_v18  ;;  %v4605_v46 = vadd.f32 %v10555_v50, %v19387_v47  ;;  %v13112_v50 = vld [vmem:[#allocation5 + $0xc4] ss:$8 sps:$4 sm:$0xff]  }
 0x469   : > { %5510 = vmatmul.mubr.bf16.gmra.mrb[212].mxu0 %v13105_v26 }
 0x46a   : > { %5517 = vmatprep.mubr.bf16.mxu0 %v13106_v44  ;;  %v15630_v37 = vadd.f32 %v10667_v29, %v4605_v46  ;;  %v10556_v62 = vpop.f32.mrb[108].mxu0 }
 0x46b   : > { %v10668_v2 = vpop.f32.mrb[108].mxu1  ;;  %5373 = vmatmul.mubr.bf16.gmra.mrb[200].mxu1 %v13107_v27  ;;  %v10557_v15 = vpop.f32.mrb[109].mxu0  ;;  %v13113_v27 = vld [vmem:[#allocation5 + $0x170] ss:$8 sps:$4 sm:$0xff]  }
 0x46c   : > { %v10669_v49 = vpop.f32.mrb[109].mxu1  ;;  %5380 = vmatprep.mubr.bf16.mxu1 %v13108_v59  ;;  %v10558_v54 = vadd.f32 %v10557_v15, %v10556_v62  ;;  %v10559_v25 = vpop.f32.mrb[110].mxu0  ;;  %v13114_v59 = vld [vmem:[#allocation5 + $0x184] ss:$8 sps:$4 sm:$0xff]  }
 0x46d   : > { %v10670_v58 = vadd.f32 %v10669_v49, %v10668_v2  ;;  %v10671_v4 = vpop.f32.mrb[110].mxu1  ;;  %v10560_v23 = vpop.f32.mrb[111].mxu0 }
 0x46e   : > { %v10672_v38 = vpop.f32.mrb[111].mxu1  ;;  %v4610_v21 = vadd.f32 %v10558_v54, %v15454_v40  ;;  %v10561_v28 = vadd.f32 %v10560_v23, %v10559_v25 }
 0x46f   : > { %v10673_v10 = vadd.f32 %v10672_v38, %v10671_v4  ;;  %v13115_v4 = vld [vmem:[#allocation5 + $0xc0] ss:$8 sps:$4 sm:$0xff]  }
 0x470   : > { %v15633_v3 = vadd.f32 %v10670_v58, %v4610_v21  ;;  %v4613_v14 = vadd.f32 %v10561_v28, %v15456_v6  ;;  %v13116_v21 = vld [vmem:[#allocation5 + $0xd4] ss:$8 sps:$4 sm:$0xff]  }
 0x471   : > { %5518 = vmatmul.mubr.bf16.gmra.mrb[216].mxu0 %v13109_v30 }
 0x472   : > { %5525 = vmatprep.mubr.bf16.mxu0 %v13110_v31  ;;  %v15636_v45 = vadd.f32 %v10673_v10, %v4613_v14  ;;  %v10562_v34 = vpop.f32.mrb[112].mxu0 }
 0x473   : > { %v10674_v36 = vpop.f32.mrb[112].mxu1  ;;  %5381 = vmatmul.mubr.bf16.gmra.mrb[204].mxu1 %v13111_v24  ;;  %v10563_v20 = vpop.f32.mrb[113].mxu0  ;;  %v13117_v24 = vld [vmem:[#allocation5 + $0x180] ss:$8 sps:$4 sm:$0xff]  }
 0x474   : > { %v10675_v18 = vpop.f32.mrb[113].mxu1  ;;  %5388 = vmatprep.mubr.bf16.mxu1 %v13112_v50  ;;  %v10564_v40 = vadd.f32 %v10563_v20, %v10562_v34  ;;  %v10565_v26 = vpop.f32.mrb[114].mxu0  ;;  %v13118_v50 = vld [vmem:[#allocation5 + $0x194] ss:$8 sps:$4 sm:$0xff]  }
 0x475   : > { %v10676_v29 = vadd.f32 %v10675_v18, %v10674_v36  ;;  %v10677_v47 = vpop.f32.mrb[114].mxu1  ;;  %v10566_v46 = vpop.f32.mrb[115].mxu0 }
 0x476   : > { %v10678_v44 = vpop.f32.mrb[115].mxu1  ;;  %v4618_v6 = vadd.f32 %v10564_v40, %v15464_v19  ;;  %v10567_v62 = vadd.f32 %v10566_v46, %v10565_v26 }
 0x477   : > { %v10679_v2 = vadd.f32 %v10678_v44, %v10677_v47  ;;  %v13119_v47 = vld [vmem:[#allocation5 + $0xd0] ss:$8 sps:$4 sm:$0xff]  }
 0x478   : > { %v15639_v15 = vadd.f32 %v10676_v29, %v4618_v6  ;;  %v4621_v49 = vadd.f32 %v10567_v62, %v15466_v43  ;;  %v13120_v6 = vld [vmem:[#allocation5 + $0xe4] ss:$8 sps:$4 sm:$0xff]  }
 0x479   : > { %5526 = vmatmul.mubr.bf16.gmra.mrb[220].mxu0 %v13113_v27 }
 0x47a   : > { %5533 = vmatprep.mubr.bf16.mxu0 %v13114_v59  ;;  %v15642_v54 = vadd.f32 %v10679_v2, %v4621_v49  ;;  %v10568_v58 = vpop.f32.mrb[116].mxu0 }
 0x47b   : > { %v10680_v25 = vpop.f32.mrb[116].mxu1  ;;  %5389 = vmatmul.mubr.bf16.gmra.mrb[208].mxu1 %v13115_v4  ;;  %v10569_v23 = vpop.f32.mrb[117].mxu0  ;;  %v13121_v4 = vld [vmem:[#allocation5 + $0x190] ss:$8 sps:$4 sm:$0xff]  }
 0x47c   : > { %v10681_v38 = vpop.f32.mrb[117].mxu1  ;;  %5396 = vmatprep.mubr.bf16.mxu1 %v13116_v21  ;;  %v10570_v19 = vadd.f32 %v10569_v23, %v10568_v58  ;;  %v10571_v10 = vpop.f32.mrb[118].mxu0  ;;  %v13122_v21 = vld [vmem:[#allocation5 + $0x1a4] ss:$8 sps:$4 sm:$0xff]  }
 0x47d   : > { %v10682_v28 = vadd.f32 %v10681_v38, %v10680_v25  ;;  %v10683_v30 = vpop.f32.mrb[118].mxu1  ;;  %v10572_v14 = vpop.f32.mrb[119].mxu0 }
 0x47e   : > { %v10684_v31 = vpop.f32.mrb[119].mxu1  ;;  %v4626_v43 = vadd.f32 %v10570_v19, %v15474_v51  ;;  %v10573_v34 = vadd.f32 %v10572_v14, %v10571_v10 }
 0x47f   : > { %v10685_v36 = vadd.f32 %v10684_v31, %v10683_v30  ;;  %v13123_v30 = vld [vmem:[#allocation5 + $0xe0] ss:$8 sps:$4 sm:$0xff]  }
 0x480   : > { %v15645_v20 = vadd.f32 %v10682_v28, %v4626_v43  ;;  %v4629_v18 = vadd.f32 %v10573_v34, %v15476_v57  ;;  %v13124_v43 = vld [vmem:[#allocation5 + $0xf4] ss:$8 sps:$4 sm:$0xff]  }
 0x481   : > { %5534 = vmatmul.mubr.bf16.gmra.mrb[224].mxu0 %v13117_v24 }
 0x482   : > { %5541 = vmatprep.mubr.bf16.mxu0 %v13118_v50  ;;  %v15648_v40 = vadd.f32 %v10685_v36, %v4629_v18  ;;  %v10574_v29 = vpop.f32.mrb[120].mxu0 }
 0x483   : > { %v10686_v26 = vpop.f32.mrb[120].mxu1  ;;  %5397 = vmatmul.mubr.bf16.gmra.mrb[212].mxu1 %v13119_v47  ;;  %v10575_v46 = vpop.f32.mrb[121].mxu0  ;;  %v13125_v47 = vld [vmem:[#allocation5 + $0x1a0] ss:$8 sps:$4 sm:$0xff]  }
 0x484   : > { %v10687_v44 = vpop.f32.mrb[121].mxu1  ;;  %5404 = vmatprep.mubr.bf16.mxu1 %v13120_v6  ;;  %v10576_v51 = vadd.f32 %v10575_v46, %v10574_v29  ;;  %v10577_v2 = vpop.f32.mrb[122].mxu0  ;;  %v13126_v6 = vld [vmem:[#allocation5 + $0x1b4] ss:$8 sps:$4 sm:$0xff]  }
 0x485   : > { %v10688_v62 = vadd.f32 %v10687_v44, %v10686_v26  ;;  %v10689_v27 = vpop.f32.mrb[122].mxu1  ;;  %v10578_v49 = vpop.f32.mrb[123].mxu0 }
 0x486   : > { %v10690_v59 = vpop.f32.mrb[123].mxu1  ;;  %v4634_v57 = vadd.f32 %v10576_v51, %v15484_v48  ;;  %v10579_v58 = vadd.f32 %v10578_v49, %v10577_v2 }
 0x487   : > { %v10691_v25 = vadd.f32 %v10690_v59, %v10689_v27  ;;  %v13127_v27 = vld [vmem:[#allocation5 + $0xf0] ss:$8 sps:$4 sm:$0xff]  }
 0x488   : > { %v15651_v23 = vadd.f32 %v10688_v62, %v4634_v57  ;;  %v4637_v38 = vadd.f32 %v10579_v58, %v15486_v60  ;;  %v13128_v57 = vld [vmem:[#allocation5 + $0x204] ss:$8 sps:$4 sm:$0xff]  }
 0x489   : > { %5542 = vmatmul.mubr.bf16.gmra.mrb[228].mxu0 %v13121_v4 }
 0x48a   : > { %5549 = vmatprep.mubr.bf16.mxu0 %v13122_v21  ;;  %v15654_v19 = vadd.f32 %v10691_v25, %v4637_v38  ;;  %v10580_v28 = vpop.f32.mrb[124].mxu0 }
 0x48b   : > { %v10692_v10 = vpop.f32.mrb[124].mxu1  ;;  %5405 = vmatmul.mubr.bf16.gmra.mrb[216].mxu1 %v13123_v30  ;;  %v10581_v14 = vpop.f32.mrb[125].mxu0 }
 0x48c   : > { %v10693_v31 = vpop.f32.mrb[125].mxu1  ;;  %5412 = vmatprep.mubr.bf16.mxu1 %v13124_v43  ;;  %v10582_v48 = vadd.f32 %v10581_v14, %v10580_v28  ;;  %v10583_v36 = vpop.f32.mrb[126].mxu0  ;;  %v13129_v28 = vld [vmem:[#allocation5 + $0x1b0] ss:$8 sps:$4 sm:$0xff]   ;;  %v13130_v14 = vld [vmem:[#allocation5 + $0x1c4] ss:$8 sps:$4 sm:$0xff]  }
 0x48d   : > { %v10694_v34 = vadd.f32 %v10693_v31, %v10692_v10  ;;  %v10695_v24 = vpop.f32.mrb[126].mxu1  ;;  %v10584_v18 = vpop.f32.mrb[127].mxu0 }
 0x48e   : > { %v10696_v50 = vpop.f32.mrb[127].mxu1  ;;  %v4642_v60 = vadd.f32 %v10582_v48, %v15494_v55  ;;  %v10585_v29 = vadd.f32 %v10584_v18, %v10583_v36  ;;  %v13133_v18 = vld [vmem:[#allocation5 + $0x214] ss:$8 sps:$4 sm:$0xff]  }
 0x48f   : > { %v10697_v26 = vadd.f32 %v10696_v50, %v10695_v24 }
 0x490   : > { %v15657_v46 = vadd.f32 %v10694_v34, %v4642_v60  ;;  %v4645_v44 = vadd.f32 %v10585_v29, %v15496_v11  ;;  %v13131_v34 = vld [vmem:[#allocation5 + $0x200] ss:$8 sps:$4 sm:$0xff]  }
 0x491   : > { %5550 = vmatmul.mubr.bf16.gmra.mrb[232].mxu0 %v13125_v47  ;;  %v15677_v29 = vld [vmem:[%s13948_s28 + $0xc8] sm:$0xff]  }
 0x492   : > { %5557 = vmatprep.mubr.bf16.mxu0 %v13126_v6  ;;  %v15660_v51 = vadd.f32 %v10697_v26, %v4645_v44  ;;  %v10714_v62 = vpop.f32.mrb[128].mxu0 }
 0x493   : > { %v12332_v2 = vpop.f32.mrb[128].mxu1  ;;  %5413 = vmatmul.mubr.bf16.gmra.mrb[220].mxu1 %v13127_v27  ;;  %v10715_v49 = vpop.f32.mrb[129].mxu0  ;;  %v15682_v27 = vld [vmem:[%s13948_s28 + $0x88] sm:$0xff]  }
 0x494   : > { %v5004_v59 = vpop.f32.mrb[129].mxu1  ;;  %5646 = vmatprep.mubr.bf16.mxu1 %v13128_v57  ;;  %v10716_v55 = vadd.f32 %v10715_v49, %v10714_v62  ;;  %v10717_v58 = vpop.f32.mrb[130].mxu0  ;;  %v13135_v62 = vld [vmem:[#allocation5 + $0x1c0] ss:$8 sps:$4 sm:$0xff]   ;;  %v13137_v57 = vld [vmem:[#allocation5 + $0x1d4] ss:$8 sps:$4 sm:$0xff]  }
 0x495   : > { %v12333_v25 = vpop.f32.mrb[130].mxu1  ;;  %v10718_v4 = vpop.f32.mrb[131].mxu0 }
 0x496   : > { %v5007_v38 = vpop.f32.mrb[131].mxu1  ;;  %v4844_v11 = vadd.f32 %v10716_v55, %v15508_v41  ;;  %v10719_v21 = vadd.f32 %v10718_v4, %v10717_v58  ;;  %v15671_v41 = vld [vmem:[%s13948_s28 + $0x80] sm:$0xff]   ;;  %v15689_v55 = vld [vmem:[%s13948_s28 + $0xd0] sm:$0xff]  }
 0x498   : > { %v15663_v10 = vadd.f32 %v5004_v59, %v4844_v11  ;;  %v4847_v30 = vadd.f32 %v10719_v21, %v15514_v13 }
 0x499   : > { %5558 = vmatmul.mubr.bf16.gmra.mrb[236].mxu0 %v13129_v28 }
 0x49a   : > { %19388 = vst [vmem:[#allocation113_spill] sm:$0xff] %v15663_v10  ;;  %5565 = vmatprep.mubr.bf16.mxu0 %v13130_v14  ;;  %v15666_v31 = vadd.f32 %v5007_v38, %v4847_v30  ;;  %v10720_v43 = vpop.f32.mrb[132].mxu0  ;;  %v13139_v38 = vld [vmem:[#allocation5 + $0x210] ss:$8 sps:$4 sm:$0xff]  }
 0x49b   : > { %v15668_v48 = vpop.f32.mrb[132].mxu1  ;;  %5647 = vmatmul.mubr.bf16.vlgmr.msra.gmra.mrb[224].mxu1 %v13131_v34  ;;  %v10721_v36 = vpop.f32.mrb[133].mxu0  ;;  %v15705_v14 = vld [vmem:[%s13948_s28 + $0xd8] sm:$0xff]  }
 0x49c   : > { %19389 = vst [vmem:[#allocation60_spill] sm:$0xff] %v15666_v31  ;;  %v5020_v24 = vpop.f32.mrb[133].mxu1  ;;  %11283 = vmatpush3.bf16.msra.mxu1 %v15671_v41  ;;  %5654 = vmatprep.mubr.bf16.mxu1 %v13133_v18  ;;  %v10722_v13 = vadd.f32 %v10721_v36, %v10720_v43  ;;  %v10723_v50 = vpop.f32.mrb[134].mxu0 }
 0x49d   : > { %v15674_v60 = vpop.f32.mrb[134].mxu1  ;;  %11284 = vmatprep.subr.bf16.mxu1 %v15677_v29  ;;  %v10724_v26 = vpop.f32.mrb[135].mxu0 }
 0x49e   : > { %v5023_v47 = vpop.f32.mrb[135].mxu1  ;;  %v4852_v44 = vadd.f32 %v10722_v13, %v15523_v8  ;;  %v10725_v6 = vadd.f32 %v10724_v26, %v10723_v50  ;;  %v13143_v13 = vld [vmem:[#allocation5 + $0x1d0] ss:$8 sps:$4 sm:$0xff]  }
 0x49f   : > { %v15712_v50 = vld [vmem:[%s13948_s28 + $0x98] sm:$0xff]  }
 0x4a0   : > { %11285 = vmatpush3.bf16.msra.mxu1 %v15682_v27  ;;  %v15685_v49 = vadd.f32 %v12332_v2, %v4852_v44  ;;  %v4855_v59 = vadd.f32 %v10725_v6, %v15530_v12  ;;  %v13140_v2 = vld [vmem:[#allocation5 + $0x224] ss:$8 sps:$4 sm:$0xff]   ;;  %v15699_v12 = vld [vmem:[%s13948_s28 + $0x90] sm:$0xff]  }
 0x4a1   : > { %5566 = vmatmul.mubr.bf16.gmra.mrb[240].mxu0 %v13135_v62  ;;  %11286 = vmatprep.subr.bf16.mxu1 %v15689_v55  ;;  %v13145_v6 = vld [vmem:[#allocation5 + $0x1e4] ss:$8 sps:$4 sm:$0xff]  }
 0x4a2   : > { %19390 = vst [vmem:[#allocation58_spill] sm:$0xff] %v15685_v49  ;;  %5573 = vmatprep.mubr.bf16.mxu0 %v13137_v57  ;;  %v15692_v8 = vadd.f32 %v12333_v25, %v4855_v59  ;;  %v15719_v62 = vld [vmem:[%s13948_s28 + $0xe0] sm:$0xff]  }
 0x4a3   : > { %v15694_v4 = vpop.f32.mrb[136].mxu1  ;;  %5655 = vmatmul.mubr.bf16.gmra.mrb[228].mxu1 %v13139_v38 }
 0x4a4   : > { %19391 = vst [vmem:[#allocation117_spill] sm:$0xff] %v15692_v8  ;;  %v10726_v58 = vpop.f32.mrb[136].mxu0  ;;  %v15696_v21 = vpop.f32.mrb[137].mxu1  ;;  %5662 = vmatprep.mubr.bf16.mxu1 %v13140_v2  ;;  %11287 = vmatpush3.bf16.msra.mxu1 %v15699_v12  ;;  %v13161_v8 = vld [vmem:[#allocation5 + $0x304] ss:$8 sps:$4 sm:$0xff]  }
 0x4a5   : > { %v10727_v11 = vpop.f32.mrb[137].mxu0  ;;  %v15702_v25 = vpop.f32.mrb[138].mxu1  ;;  %11288 = vmatprep.subr.bf16.mxu1 %v15705_v14 }
 0x4a6   : > { %v10728_v28 = vadd.f32 %v10727_v11, %v10726_v58  ;;  %v10729_v30 = vpop.f32.mrb[138].mxu0  ;;  %v15708_v34 = vpop.f32.mrb[139].mxu1  ;;  %v13147_v58 = vld [vmem:[#allocation5 + $0x220] ss:$8 sps:$4 sm:$0xff]  }
 0x4a7   : > { %v10730_v43 = vpop.f32.mrb[139].mxu0 }
 0x4a8   : > { %v4860_v36 = vadd.f32 %v10728_v28, %v15539_v5  ;;  %v10731_v18 = vadd.f32 %v10730_v43, %v10729_v30  ;;  %11289 = vmatpush3.bf16.msra.mxu1 %v15712_v50  ;;  %v15735_v30 = vld [vmem:[%s13948_s28 + $0xe8] sm:$0xff]  }
 0x4a9   : > { %5574 = vmatmul.mubr.bf16.gmra.mrb[244].mxu0 %v13143_v13  ;;  %11290 = vmatprep.subr.bf16.mxu1 %v15719_v62 }
 0x4aa   : > { %v15715_v26 = vadd.f32 %v5020_v24, %v4860_v36  ;;  %v4863_v44 = vadd.f32 %v10731_v18, %v15546_v16  ;;  %5581 = vmatprep.mubr.bf16.mxu0 %v13145_v6  ;;  %v13148_v24 = vld [vmem:[#allocation5 + $0x234] ss:$8 sps:$4 sm:$0xff]   ;;  %v15729_v16 = vld [vmem:[%s13948_s28 + $0xa0] sm:$0xff]   ;;  %v15742_v6 = vld [vmem:[%s13948_s28 + $0xa8] sm:$0xff]  }
 0x4ab   : > { %v15724_v57 = vpop.f32.mrb[140].mxu1  ;;  %5663 = vmatmul.mubr.bf16.gmra.mrb[232].mxu1 %v13147_v58 }
 0x4ac   : > { %19392 = vst [vmem:[#allocation59_spill] sm:$0xff] %v15715_v26  ;;  %v15722_v5 = vadd.f32 %v5023_v47, %v4863_v44  ;;  %v10732_v59 = vpop.f32.mrb[140].mxu0  ;;  %v15726_v11 = vpop.f32.mrb[141].mxu1  ;;  %5670 = vmatprep.mubr.bf16.mxu1 %v13148_v24  ;;  %11291 = vmatpush3.bf16.msra.mxu1 %v15729_v16  ;;  %v13151_v44 = vld [vmem:[#allocation5 + $0x1e0] ss:$8 sps:$4 sm:$0xff]   ;;  %v15750_v24 = vld [vmem:[%s13948_s28 + $0xf0] sm:$0xff]  }
 0x4ad   : > { %v10733_v38 = vpop.f32.mrb[141].mxu0  ;;  %v15732_v47 = vpop.f32.mrb[142].mxu1  ;;  %11292 = vmatprep.subr.bf16.mxu1 %v15735_v30 }
 0x4ae   : > { %19393 = vst [vmem:[#allocation57_spill] sm:$0xff] %v15722_v5  ;;  %v10734_v2 = vadd.f32 %v10733_v38, %v10732_v59  ;;  %v10735_v28 = vpop.f32.mrb[142].mxu0  ;;  %v15738_v36 = vpop.f32.mrb[143].mxu1  ;;  %v13153_v38 = vld [vmem:[#allocation5 + $0x1f4] ss:$8 sps:$4 sm:$0xff]  }
 0x4af   : > { %v10736_v43 = vpop.f32.mrb[143].mxu0  ;;  %v15772_v5 = vld [vmem:[%s13948_s28 + $0xb8] sm:$0xff]  }
 0x4b0   : > { %v4868_v18 = vadd.f32 %v10734_v2, %v15555_v61  ;;  %v10737_v13 = vadd.f32 %v10736_v43, %v10735_v28  ;;  %11293 = vmatpush3.bf16.msra.mxu1 %v15742_v6  ;;  %v13155_v28 = vld [vmem:[#allocation5 + $0x230] ss:$8 sps:$4 sm:$0xff]  }
 0x4b1   : > { %5582 = vmatmul.mubr.bf16.gmra.mrb[248].mxu0 %v13151_v44  ;;  %11294 = vmatprep.subr.bf16.mxu1 %v15750_v24  ;;  %v13156_v44 = vld [vmem:[#allocation5 + $0x244] ss:$8 sps:$4 sm:$0xff]  }
 0x4b2   : > { %v15746_v59 = vadd.f32 %v15668_v48, %v4868_v18  ;;  %v4871_v58 = vadd.f32 %v10737_v13, %v15562_v33  ;;  %5589 = vmatprep.mubr.bf16.mxu0 %v13153_v38  ;;  %v15757_v48 = vld [vmem:[%s13948_s28 + $0xb0] sm:$0xff]   ;;  %v15761_v13 = vld [vmem:[%s13948_s28 + $0xf8] sm:$0xff]  }
 0x4b3   : > { %5671 = vmatmul.mubr.bf16.gmra.mrb[236].mxu1 %v13155_v28 }
 0x4b4   : > { %19394 = vst [vmem:[#allocation118_spill] sm:$0xff] %v15746_v59  ;;  %v15754_v61 = vadd.f32 %v15674_v60, %v4871_v58  ;;  %v10738_v2 = vpop.f32.mrb[144].mxu0  ;;  %5678 = vmatprep.mubr.bf16.mxu1 %v13156_v44  ;;  %11295 = vmatpush3.bf16.msra.mxu1 %v15757_v48  ;;  %v13159_v44 = vld [vmem:[#allocation5 + $0x1f0] ss:$8 sps:$4 sm:$0xff]  }
 0x4b5   : > { %v10739_v43 = vpop.f32.mrb[145].mxu0  ;;  %11296 = vmatprep.subr.bf16.mxu1 %v15761_v13  ;;  %v15764_v60 = vpop.f32.mrb[144].mxu1 }
 0x4b6   : > { %19395 = vst [vmem:[#allocation116_spill] sm:$0xff] %v15754_v61  ;;  %v10740_v33 = vadd.f32 %v10739_v43, %v10738_v2  ;;  %v10741_v18 = vpop.f32.mrb[146].mxu0  ;;  %v15767_v61 = vpop.f32.mrb[145].mxu1 }
 0x4b7   : > { %v10742_v38 = vpop.f32.mrb[147].mxu0  ;;  %v15769_v59 = vpop.f32.mrb[146].mxu1 }
 0x4b8   : > { %v4876_v58 = vadd.f32 %v10740_v33, %v15571_v39  ;;  %v10743_v28 = vadd.f32 %v10742_v38, %v10741_v18  ;;  %11297 = vmatpush3.bf16.msra.mxu1 %v15772_v5  ;;  %v15779_v26 = vpop.f32.mrb[147].mxu1  ;;  %v13162_v18 = vld [vmem:[#allocation5 + $0x240] ss:$8 sps:$4 sm:$0xff]  }
 0x4b9   : > { %5590 = vmatmul.mubr.bf16.gmra.mrb[252].mxu0 %v13159_v44  ;;  %11506 = vmatprep.subr.bf16.mxu1 %v15575_v56  ;;  %v13163_v44 = vld [vmem:[#allocation5 + $0x254] ss:$8 sps:$4 sm:$0xff]  }
 0x4ba   : > { %v15776_v2 = vadd.f32 %v15696_v21, %v4876_v58  ;;  %v4879_v43 = vadd.f32 %v10743_v28, %v15578_v0  ;;  %5823 = vmatprep.mubr.bf16.mxu0 %v13161_v8 }
 0x4bb   : > { %5679 = vmatmul.mubr.bf16.gmra.mrb[240].mxu1 %v13162_v18 }
 0x4bc   : > { %19396 = vst [vmem:[#allocation64_spill] sm:$0xff] %v15776_v2  ;;  %v15783_v39 = vadd.f32 %v15708_v34, %v4879_v43  ;;  %v10744_v33 = vpop.f32.mrb[148].mxu0  ;;  %5686 = vmatprep.mubr.bf16.mxu1 %v13163_v44  ;;  %v13164_v2 = vld [vmem:[#allocation5 + $0x300] ss:$8 sps:$4 sm:$0xff]   ;;  %v13165_v43 = vld [vmem:[#allocation5 + $0x314] ss:$8 sps:$4 sm:$0xff]  }
 0x4bd   : > { %v10745_v38 = vpop.f32.mrb[149].mxu0 }
 0x4be   : > { %19397 = vst [vmem:[#allocation62_spill] sm:$0xff] %v15783_v39  ;;  %v10746_v49 = vadd.f32 %v10745_v38, %v10744_v33  ;;  %v10747_v21 = vpop.f32.mrb[150].mxu0  ;;  %v13166_v38 = vld [vmem:[#allocation5 + $0x250] ss:$8 sps:$4 sm:$0xff]  }
 0x4bf   : > { %v10748_v58 = vpop.f32.mrb[151].mxu0 }
 0x4c0   : > { %v4884_v0 = vadd.f32 %v10746_v49, %v15581_v35  ;;  %v10749_v28 = vadd.f32 %v10748_v58, %v10747_v21  ;;  %v13167_v49 = vld [vmem:[#allocation5 + $0x264] ss:$8 sps:$4 sm:$0xff]  }
 0x4c1   : > { %5824 = vmatmul.mubr.bf16.vlgmr.msra.gmra.mrb[0].mxu0 %v13164_v2 }
 0x4c2   : > { %v15787_v8 = vadd.f32 %v15694_v4, %v4884_v0  ;;  %v4887_v34 = vadd.f32 %v10749_v28, %v15586_v17  ;;  %5831 = vmatprep.mubr.bf16.mxu0 %v13165_v43  ;;  %11395 = vmatpush3.bf16.msra.mxu0 %v15671_v41  ;;  %v13168_v28 = vld [vmem:[#allocation5 + $0x310] ss:$8 sps:$4 sm:$0xff]  }
 0x4c3   : > { %11396 = vmatprep.subr.bf16.mxu0 %v15677_v29  ;;  %5687 = vmatmul.mubr.bf16.gmra.mrb[244].mxu1 %v13166_v38  ;;  %v13169_v38 = vld [vmem:[#allocation5 + $0x324] ss:$8 sps:$4 sm:$0xff]  }
 0x4c4   : > { %19398 = vst [vmem:[#allocation63_spill] sm:$0xff] %v15787_v8  ;;  %v15793_v33 = vadd.f32 %v15702_v25, %v4887_v34  ;;  %v10750_v18 = vpop.f32.mrb[152].mxu0  ;;  %5694 = vmatprep.mubr.bf16.mxu1 %v13167_v49  ;;  %v13170_v49 = vld [vmem:[#allocation5 + $0x260] ss:$8 sps:$4 sm:$0xff]  }
 0x4c5   : > { %v10751_v35 = vpop.f32.mrb[153].mxu0  ;;  %v15796_v44 = vpop.f32.mrb[148].mxu1  ;;  %v13246_v8 = vld [vmem:[#allocation5 + $0x540] ss:$8 sps:$4 sm:$0xff]  }
 0x4c6   : > { %19399 = vst [vmem:[#allocation61_spill] sm:$0xff] %v15793_v33  ;;  %v10752_v2 = vadd.f32 %v10751_v35, %v10750_v18  ;;  %v10753_v4 = vpop.f32.mrb[154].mxu0  ;;  %11397 = vmatpush3.bf16.msra.mxu0 %v15682_v27  ;;  %v15800_v25 = vpop.f32.mrb[149].mxu1  ;;  %v13230_v33 = vld [vmem:[#allocation5 + $0x514] ss:$8 sps:$4 sm:$0xff]  }
 0x4c7   : > { %v10754_v17 = vpop.f32.mrb[155].mxu0  ;;  %11398 = vmatprep.subr.bf16.mxu0 %v15689_v55  ;;  %v15802_v0 = vpop.f32.mrb[150].mxu1 }
 0x4c8   : > { %v4892_v21 = vadd.f32 %v10752_v2, %v15591_v1  ;;  %v10755_v58 = vadd.f32 %v10754_v17, %v10753_v4  ;;  %v15808_v18 = vpop.f32.mrb[151].mxu1  ;;  %v13171_v4 = vld [vmem:[#allocation5 + $0x274] ss:$8 sps:$4 sm:$0xff]  }
 0x4c9   : > { %5832 = vmatmul.mubr.bf16.gmra.mrb[4].mxu0 %v13168_v28  ;;  %v13172_v28 = vld [vmem:[#allocation5 + $0x320] ss:$8 sps:$4 sm:$0xff]  }
 0x4ca   : > { %v15805_v34 = vadd.f32 %v15726_v11, %v4892_v21  ;;  %v4895_v43 = vadd.f32 %v10755_v58, %v15596_v52  ;;  %5839 = vmatprep.mubr.bf16.mxu0 %v13169_v38  ;;  %11399 = vmatpush3.bf16.msra.mxu0 %v15699_v12  ;;  %v13173_v38 = vld [vmem:[#allocation5 + $0x334] ss:$8 sps:$4 sm:$0xff]  }
 0x4cb   : > { %11400 = vmatprep.subr.bf16.mxu0 %v15705_v14  ;;  %5695 = vmatmul.mubr.bf16.gmra.mrb[248].mxu1 %v13170_v49 }
 0x4cc   : > { %19400 = vst [vmem:[#allocation68_spill] sm:$0xff] %v15805_v34  ;;  %v15813_v1 = vadd.f32 %v15738_v36, %v4895_v43  ;;  %v10756_v35 = vpop.f32.mrb[156].mxu0  ;;  %5702 = vmatprep.mubr.bf16.mxu1 %v13171_v4  ;;  %v13175_v4 = vld [vmem:[#allocation5 + $0x284] ss:$8 sps:$4 sm:$0xff]  }
 0x4cd   : > { %v10757_v2 = vpop.f32.mrb[157].mxu0 }
 0x4ce   : > { %19401 = vst [vmem:[#allocation66_spill] sm:$0xff] %v15813_v1  ;;  %v10758_v11 = vadd.f32 %v10757_v2, %v10756_v35  ;;  %v10759_v17 = vpop.f32.mrb[158].mxu0  ;;  %11401 = vmatpush3.bf16.msra.mxu0 %v15712_v50  ;;  %v13174_v2 = vld [vmem:[#allocation5 + $0x270] ss:$8 sps:$4 sm:$0xff]  }
 0x4cf   : > { %v10760_v52 = vpop.f32.mrb[159].mxu0  ;;  %11402 = vmatprep.subr.bf16.mxu0 %v15719_v62 }
 0x4d0   : > { %v4900_v21 = vadd.f32 %v10758_v11, %v15601_v42  ;;  %v10761_v58 = vadd.f32 %v10760_v52, %v10759_v17 }
 0x4d1   : > { %5840 = vmatmul.mubr.bf16.gmra.mrb[8].mxu0 %v13172_v28  ;;  %v13176_v28 = vld [vmem:[#allocation5 + $0x330] ss:$8 sps:$4 sm:$0xff]  }
 0x4d2   : > { %v15819_v36 = vadd.f32 %v15724_v57, %v4900_v21  ;;  %v4903_v43 = vadd.f32 %v10761_v58, %v15606_v7  ;;  %5847 = vmatprep.mubr.bf16.mxu0 %v13173_v38  ;;  %11403 = vmatpush3.bf16.msra.mxu0 %v15729_v16 }
 0x4d3   : > { %11404 = vmatprep.subr.bf16.mxu0 %v15735_v30  ;;  %5703 = vmatmul.mubr.bf16.gmra.mrb[252].mxu1 %v13174_v2  ;;  %v13177_v2 = vld [vmem:[#allocation5 + $0x344] ss:$8 sps:$4 sm:$0xff]  }
 0x4d4   : > { %19402 = vst [vmem:[#allocation67_spill] sm:$0xff] %v15819_v36  ;;  %v15825_v35 = vadd.f32 %v15732_v47, %v4903_v43  ;;  %v10762_v49 = vpop.f32.mrb[160].mxu0  ;;  %5710 = vmatprep.mubr.bf16.mxu1 %v13175_v4  ;;  %v13178_v4 = vld [vmem:[#allocation5 + $0x280] ss:$8 sps:$4 sm:$0xff]  }
 0x4d5   : > { %v10763_v42 = vpop.f32.mrb[161].mxu0  ;;  %v15828_v17 = vpop.f32.mrb[152].mxu1 }
 0x4d6   : > { %19403 = vst [vmem:[#allocation65_spill] sm:$0xff] %v15825_v35  ;;  %v10764_v11 = vadd.f32 %v10763_v42, %v10762_v49  ;;  %v10765_v57 = vpop.f32.mrb[162].mxu0  ;;  %11405 = vmatpush3.bf16.msra.mxu0 %v15742_v6  ;;  %v15832_v47 = vpop.f32.mrb[153].mxu1  ;;  %v13227_v35 = vld [vmem:[#allocation5 + $0x440] ss:$8 sps:$4 sm:$0xff]  }
 0x4d7   : > { %v10766_v7 = vpop.f32.mrb[163].mxu0  ;;  %11406 = vmatprep.subr.bf16.mxu0 %v15750_v24  ;;  %v15834_v58 = vpop.f32.mrb[154].mxu1 }
 0x4d8   : > { %v4908_v52 = vadd.f32 %v10764_v11, %v15611_v9  ;;  %v10767_v21 = vadd.f32 %v10766_v7, %v10765_v57  ;;  %v15840_v49 = vpop.f32.mrb[155].mxu1  ;;  %v13179_v57 = vld [vmem:[#allocation5 + $0x294] ss:$8 sps:$4 sm:$0xff]  }
 0x4d9   : > { %5848 = vmatmul.mubr.bf16.gmra.mrb[12].mxu0 %v13176_v28  ;;  %v13180_v28 = vld [vmem:[#allocation5 + $0x340] ss:$8 sps:$4 sm:$0xff]  }
 0x4da   : > { %v15837_v43 = vadd.f32 %v15767_v61, %v4908_v52  ;;  %v4911_v38 = vadd.f32 %v10767_v21, %v15616_v22  ;;  %5855 = vmatprep.mubr.bf16.mxu0 %v13177_v2  ;;  %11407 = vmatpush3.bf16.msra.mxu0 %v15757_v48  ;;  %v13181_v2 = vld [vmem:[#allocation5 + $0x354] ss:$8 sps:$4 sm:$0xff]  }
 0x4db   : > { %11408 = vmatprep.subr.bf16.mxu0 %v15761_v13  ;;  %5711 = vmatmul.mubr.bf16.gmra.mrb[0].mxu1 %v13178_v4 }
 0x4dc   : > { %19404 = vst [vmem:[#allocation72_spill] sm:$0xff] %v15837_v43  ;;  %v15845_v9 = vadd.f32 %v15779_v26, %v4911_v38  ;;  %v10768_v42 = vpop.f32.mrb[164].mxu0  ;;  %5718 = vmatprep.mubr.bf16.mxu1 %v13179_v57 }
 0x4dd   : > { %v10769_v11 = vpop.f32.mrb[165].mxu0 }
 0x4de   : > { %19405 = vst [vmem:[#allocation70_spill] sm:$0xff] %v15845_v9  ;;  %v10770_v61 = vadd.f32 %v10769_v11, %v10768_v42  ;;  %v10771_v7 = vpop.f32.mrb[166].mxu0  ;;  %11409 = vmatpush3.bf16.msra.mxu0 %v15772_v5  ;;  %v13182_v11 = vld [vmem:[#allocation5 + $0x290] ss:$8 sps:$4 sm:$0xff]   ;;  %v13225_v9 = vld [vmem:[#allocation5 + $0x504] ss:$8 sps:$4 sm:$0xff]  }
 0x4df   : > { %v10772_v22 = vpop.f32.mrb[167].mxu0  ;;  %11618 = vmatprep.subr.bf16.mxu0 %v15575_v56  ;;  %v13183_v56 = vld [vmem:[#allocation5 + $0x2a4] ss:$8 sps:$4 sm:$0xff]  }
 0x4e0   : > { %v4916_v52 = vadd.f32 %v10770_v61, %v15621_v63  ;;  %v10773_v21 = vadd.f32 %v10772_v22, %v10771_v7 }
 0x4e1   : > { %5856 = vmatmul.mubr.bf16.gmra.mrb[16].mxu0 %v13180_v28 }
 0x4e2   : > { %v15851_v26 = vadd.f32 %v15764_v60, %v4916_v52  ;;  %v4919_v38 = vadd.f32 %v10773_v21, %v15624_v53  ;;  %5863 = vmatprep.mubr.bf16.mxu0 %v13181_v2 }
 0x4e3   : > { %5719 = vmatmul.mubr.bf16.gmra.mrb[4].mxu1 %v13182_v11 }
 0x4e4   : > { %19406 = vst [vmem:[#allocation71_spill] sm:$0xff] %v15851_v26  ;;  %v15855_v42 = vadd.f32 %v15769_v59, %v4919_v38  ;;  %v10774_v4 = vpop.f32.mrb[168].mxu0  ;;  %5726 = vmatprep.mubr.bf16.mxu1 %v13183_v56  ;;  %v13184_v59 = vld [vmem:[#allocation5 + $0x350] ss:$8 sps:$4 sm:$0xff]  }
 0x4e5   : > { %v10775_v57 = vpop.f32.mrb[169].mxu0  ;;  %v15857_v22 = vpop.f32.mrb[156].mxu1 }
 0x4e6   : > { %19407 = vst [vmem:[#allocation69_spill] sm:$0xff] %v15855_v42  ;;  %v10776_v63 = vadd.f32 %v10775_v57, %v10774_v4  ;;  %v10777_v61 = vpop.f32.mrb[170].mxu0  ;;  %v15860_v53 = vpop.f32.mrb[157].mxu1  ;;  %v13185_v4 = vld [vmem:[#allocation5 + $0x364] ss:$8 sps:$4 sm:$0xff]  }
 0x4e7   : > { %v10778_v7 = vpop.f32.mrb[171].mxu0  ;;  %v15862_v21 = vpop.f32.mrb[158].mxu1  ;;  %v13186_v57 = vld [vmem:[#allocation5 + $0x2a0] ss:$8 sps:$4 sm:$0xff]  }
 0x4e8   : > { %v4924_v60 = vadd.f32 %v10776_v63, %v15627_v32  ;;  %v10779_v52 = vadd.f32 %v10778_v7, %v10777_v61  ;;  %v15868_v2 = vpop.f32.mrb[159].mxu1  ;;  %v13187_v63 = vld [vmem:[#allocation5 + $0x2b4] ss:$8 sps:$4 sm:$0xff]   ;;  %v13188_v42 = vld [vmem:[#allocation5 + $0x360] ss:$8 sps:$4 sm:$0xff]  }
 0x4e9   : > { %5864 = vmatmul.mubr.bf16.gmra.mrb[20].mxu0 %v13184_v59 }
 0x4ea   : > { %v15865_v28 = vadd.f32 %v15800_v25, %v4924_v60  ;;  %v4927_v38 = vadd.f32 %v10779_v52, %v15630_v37  ;;  %5871 = vmatprep.mubr.bf16.mxu0 %v13185_v4 }
 0x4eb   : > { %5727 = vmatmul.mubr.bf16.gmra.mrb[8].mxu1 %v13186_v57 }
 0x4ec   : > { %19408 = vst [vmem:[#allocation76_spill] sm:$0xff] %v15865_v28  ;;  %v15871_v11 = vadd.f32 %v15808_v18, %v4927_v38  ;;  %v10780_v32 = vpop.f32.mrb[172].mxu0  ;;  %5734 = vmatprep.mubr.bf16.mxu1 %v13187_v63  ;;  %v13189_v63 = vld [vmem:[#allocation5 + $0x374] ss:$8 sps:$4 sm:$0xff]  }
 0x4ed   : > { %v10781_v56 = vpop.f32.mrb[173].mxu0  ;;  %v10850_v25 = vpop.f32.mrb[160].mxu1 }
 0x4ee   : > { %19409 = vst [vmem:[#allocation74_spill] sm:$0xff] %v15871_v11  ;;  %v10782_v61 = vadd.f32 %v10781_v56, %v10780_v32  ;;  %v10783_v7 = vpop.f32.mrb[174].mxu0  ;;  %v10851_v52 = vpop.f32.mrb[161].mxu1 }
 0x4ef   : > { %v10784_v59 = vpop.f32.mrb[175].mxu0  ;;  %v15874_v28 = vadd.f32 %v10851_v52, %v10850_v25  ;;  %v10853_v4 = vpop.f32.mrb[162].mxu1 }
 0x4f0   : > { %v4932_v60 = vadd.f32 %v10782_v61, %v15633_v3  ;;  %v10785_v37 = vadd.f32 %v10784_v59, %v10783_v7  ;;  %v10854_v57 = vpop.f32.mrb[163].mxu1  ;;  %v13190_v61 = vld [vmem:[#allocation5 + $0x2b0] ss:$8 sps:$4 sm:$0xff]   ;;  %v13191_v59 = vld [vmem:[#allocation5 + $0x2c4] ss:$8 sps:$4 sm:$0xff]  }
 0x4f1   : > { %5872 = vmatmul.mubr.bf16.gmra.mrb[24].mxu0 %v13188_v42  ;;  %v15880_v32 = vadd.f32 %v10854_v57, %v10853_v4 }
 0x4f2   : > { %v15877_v18 = vadd.f32 %v15796_v44, %v4932_v60  ;;  %v4935_v38 = vadd.f32 %v10785_v37, %v15636_v45  ;;  %5879 = vmatprep.mubr.bf16.mxu0 %v13189_v63 }
 0x4f3   : > { %5735 = vmatmul.mubr.bf16.gmra.mrb[12].mxu1 %v13190_v61 }
 0x4f4   : > { %19410 = vst [vmem:[#allocation75_spill] sm:$0xff] %v15877_v18  ;;  %v15883_v56 = vadd.f32 %v15802_v0, %v4935_v38  ;;  %v10786_v3 = vpop.f32.mrb[176].mxu0  ;;  %5742 = vmatprep.mubr.bf16.mxu1 %v13191_v59  ;;  %v13192_v38 = vld [vmem:[#allocation5 + $0x370] ss:$8 sps:$4 sm:$0xff]   ;;  %v13193_v59 = vld [vmem:[#allocation5 + $0x384] ss:$8 sps:$4 sm:$0xff]  }
 0x4f5   : > { %v10787_v42 = vpop.f32.mrb[177].mxu0  ;;  %v10856_v60 = vpop.f32.mrb[164].mxu1  ;;  %v13222_v18 = vld [vmem:[#allocation5 + $0x430] ss:$8 sps:$4 sm:$0xff]  }
 0x4f6   : > { %19411 = vst [vmem:[#allocation73_spill] sm:$0xff] %v15883_v56  ;;  %v10788_v44 = vadd.f32 %v10787_v42, %v10786_v3  ;;  %v10789_v25 = vpop.f32.mrb[178].mxu0  ;;  %v10857_v4 = vpop.f32.mrb[165].mxu1  ;;  %v13220_v56 = vld [vmem:[#allocation5 + $0x3e0] ss:$8 sps:$4 sm:$0xff]  }
 0x4f7   : > { %v10790_v45 = vpop.f32.mrb[179].mxu0  ;;  %v15888_v57 = vadd.f32 %v10857_v4, %v10856_v60  ;;  %v10859_v0 = vpop.f32.mrb[166].mxu1  ;;  %v13195_v60 = vld [vmem:[#allocation5 + $0x2d4] ss:$8 sps:$4 sm:$0xff]  }
 0x4f8   : > { %v4940_v37 = vadd.f32 %v10788_v44, %v15639_v15  ;;  %v10791_v52 = vadd.f32 %v10790_v45, %v10789_v25  ;;  %v10860_v7 = vpop.f32.mrb[167].mxu1  ;;  %v13194_v44 = vld [vmem:[#allocation5 + $0x2c0] ss:$8 sps:$4 sm:$0xff]  }
 0x4f9   : > { %5880 = vmatmul.mubr.bf16.gmra.mrb[28].mxu0 %v13192_v38  ;;  %v15894_v3 = vadd.f32 %v10860_v7, %v10859_v0 }
 0x4fa   : > { %v15891_v63 = vadd.f32 %v15832_v47, %v4940_v37  ;;  %v4943_v61 = vadd.f32 %v10791_v52, %v15642_v54  ;;  %5887 = vmatprep.mubr.bf16.mxu0 %v13193_v59 }
 0x4fb   : > { %5743 = vmatmul.mubr.bf16.gmra.mrb[16].mxu1 %v13194_v44 }
 0x4fc   : > { %19412 = vst [vmem:[#allocation80_spill] sm:$0xff] %v15891_v63  ;;  %v15897_v42 = vadd.f32 %v15840_v49, %v4943_v61  ;;  %v10792_v15 = vpop.f32.mrb[180].mxu0  ;;  %5750 = vmatprep.mubr.bf16.mxu1 %v13195_v60  ;;  %v13196_v61 = vld [vmem:[#allocation5 + $0x380] ss:$8 sps:$4 sm:$0xff]   ;;  %v13197_v60 = vld [vmem:[#allocation5 + $0x394] ss:$8 sps:$4 sm:$0xff]  }
 0x4fd   : > { %v10793_v45 = vpop.f32.mrb[181].mxu0  ;;  %v10862_v52 = vpop.f32.mrb[168].mxu1 }
 0x4fe   : > { %19413 = vst [vmem:[#allocation78_spill] sm:$0xff] %v15897_v42  ;;  %v10794_v47 = vadd.f32 %v10793_v45, %v10792_v15  ;;  %v10795_v37 = vpop.f32.mrb[182].mxu0  ;;  %v10863_v0 = vpop.f32.mrb[169].mxu1 }
 0x4ff   : > { %v10796_v54 = vpop.f32.mrb[183].mxu0  ;;  %v15902_v38 = vadd.f32 %v10863_v0, %v10862_v52  ;;  %v10865_v49 = vpop.f32.mrb[170].mxu1  ;;  %v13199_v52 = vld [vmem:[#allocation5 + $0x2e4] ss:$8 sps:$4 sm:$0xff]  }
 0x500   : > { %v4948_v4 = vadd.f32 %v10794_v47, %v15645_v20  ;;  %v10797_v7 = vadd.f32 %v10796_v54, %v10795_v37  ;;  %v10866_v25 = vpop.f32.mrb[171].mxu1  ;;  %v13198_v47 = vld [vmem:[#allocation5 + $0x2d0] ss:$8 sps:$4 sm:$0xff]  }
 0x501   : > { %5888 = vmatmul.mubr.bf16.gmra.mrb[32].mxu0 %v13196_v61  ;;  %v15908_v15 = vadd.f32 %v10866_v25, %v10865_v49 }
 0x502   : > { %v15905_v59 = vadd.f32 %v15828_v17, %v4948_v4  ;;  %v4951_v44 = vadd.f32 %v10797_v7, %v15648_v40  ;;  %5895 = vmatprep.mubr.bf16.mxu0 %v13197_v60 }
 0x503   : > { %5751 = vmatmul.mubr.bf16.gmra.mrb[20].mxu1 %v13198_v47 }
 0x504   : > { %19414 = vst [vmem:[#allocation79_spill] sm:$0xff] %v15905_v59  ;;  %v15911_v45 = vadd.f32 %v15834_v58, %v4951_v44  ;;  %v10798_v20 = vpop.f32.mrb[184].mxu0  ;;  %5758 = vmatprep.mubr.bf16.mxu1 %v13199_v52  ;;  %v13200_v44 = vld [vmem:[#allocation5 + $0x390] ss:$8 sps:$4 sm:$0xff]   ;;  %v13201_v52 = vld [vmem:[#allocation5 + $0x3a4] ss:$8 sps:$4 sm:$0xff]  }
 0x505   : > { %v10799_v54 = vpop.f32.mrb[185].mxu0  ;;  %v10868_v7 = vpop.f32.mrb[172].mxu1  ;;  %v13218_v59 = vld [vmem:[#allocation5 + $0x420] ss:$8 sps:$4 sm:$0xff]  }
 0x506   : > { %19415 = vst [vmem:[#allocation77_spill] sm:$0xff] %v15911_v45  ;;  %v10800_v17 = vadd.f32 %v10799_v54, %v10798_v20  ;;  %v10801_v4 = vpop.f32.mrb[186].mxu0  ;;  %v10869_v49 = vpop.f32.mrb[173].mxu1  ;;  %v13216_v45 = vld [vmem:[#allocation5 + $0x3d0] ss:$8 sps:$4 sm:$0xff]  }
 0x507   : > { %v10802_v40 = vpop.f32.mrb[187].mxu0  ;;  %v15916_v61 = vadd.f32 %v10869_v49, %v10868_v7  ;;  %v10871_v58 = vpop.f32.mrb[174].mxu1  ;;  %v13203_v7 = vld [vmem:[#allocation5 + $0x2f4] ss:$8 sps:$4 sm:$0xff]  }
 0x508   : > { %v4956_v0 = vadd.f32 %v10800_v17, %v15651_v23  ;;  %v10803_v25 = vadd.f32 %v10802_v40, %v10801_v4  ;;  %v10872_v37 = vpop.f32.mrb[175].mxu1  ;;  %v13202_v17 = vld [vmem:[#allocation5 + $0x2e0] ss:$8 sps:$4 sm:$0xff]  }
 0x509   : > { %5896 = vmatmul.mubr.bf16.gmra.mrb[36].mxu0 %v13200_v44  ;;  %v15922_v20 = vadd.f32 %v10872_v37, %v10871_v58 }
 0x50a   : > { %v15919_v60 = vadd.f32 %v15860_v53, %v4956_v0  ;;  %v4959_v47 = vadd.f32 %v10803_v25, %v15654_v19  ;;  %5903 = vmatprep.mubr.bf16.mxu0 %v13201_v52 }
 0x50b   : > { %5759 = vmatmul.mubr.bf16.gmra.mrb[24].mxu1 %v13202_v17 }
 0x50c   : > { %19416 = vst [vmem:[#allocation84_spill] sm:$0xff] %v15919_v60  ;;  %v15925_v54 = vadd.f32 %v15868_v2, %v4959_v47  ;;  %v10804_v23 = vpop.f32.mrb[188].mxu0  ;;  %5766 = vmatprep.mubr.bf16.mxu1 %v13203_v7  ;;  %v13204_v47 = vld [vmem:[#allocation5 + $0x3a0] ss:$8 sps:$4 sm:$0xff]   ;;  %v13205_v7 = vld [vmem:[#allocation5 + $0x3b4] ss:$8 sps:$4 sm:$0xff]  }
 0x50d   : > { %v10805_v40 = vpop.f32.mrb[189].mxu0  ;;  %v10874_v25 = vpop.f32.mrb[176].mxu1 }
 0x50e   : > { %19417 = vst [vmem:[#allocation82_spill] sm:$0xff] %v15925_v54  ;;  %v10806_v53 = vadd.f32 %v10805_v40, %v10804_v23  ;;  %v10807_v0 = vpop.f32.mrb[190].mxu0  ;;  %v10875_v58 = vpop.f32.mrb[177].mxu1  ;;  %v13206_v40 = vld [vmem:[#allocation5 + $0x2f0] ss:$8 sps:$4 sm:$0xff]  }
 0x50f   : > { %v10808_v19 = vpop.f32.mrb[191].mxu0  ;;  %v15930_v44 = vadd.f32 %v10875_v58, %v10874_v25  ;;  %v10877_v2 = vpop.f32.mrb[178].mxu1 }
 0x510   : > { %v4964_v49 = vadd.f32 %v10806_v53, %v15657_v46  ;;  %v10809_v37 = vadd.f32 %v10808_v19, %v10807_v0  ;;  %v10878_v4 = vpop.f32.mrb[179].mxu1  ;;  %v13207_v19 = vld [vmem:[#allocation5 + $0x404] ss:$8 sps:$4 sm:$0xff]  }
 0x511   : > { %5904 = vmatmul.mubr.bf16.gmra.mrb[40].mxu0 %v13204_v47  ;;  %v15936_v23 = vadd.f32 %v10878_v4, %v10877_v2 }
 0x512   : > { %v15933_v52 = vadd.f32 %v15857_v22, %v4964_v49  ;;  %v4967_v17 = vadd.f32 %v10809_v37, %v15660_v51  ;;  %5911 = vmatprep.mubr.bf16.mxu0 %v13205_v7  ;;  %v13208_v7 = vld [vmem:[#allocation5 + $0x3b0] ss:$8 sps:$4 sm:$0xff]  }
 0x513   : > { %5767 = vmatmul.mubr.bf16.gmra.mrb[28].mxu1 %v13206_v40 }
 0x514   : > { %19418 = vst [vmem:[#allocation83_spill] sm:$0xff] %v15933_v52  ;;  %v10962_v46 = vpop.f32.mrb[192].mxu0  ;;  %v15939_v53 = vadd.f32 %v15862_v21, %v4967_v17  ;;  %6000 = vmatprep.mubr.bf16.mxu1 %v13207_v19  ;;  %v13209_v17 = vld [vmem:[#allocation5 + $0x3c4] ss:$8 sps:$4 sm:$0xff]   ;;  %v13214_v52 = vld [vmem:[#allocation5 + $0x410] ss:$8 sps:$4 sm:$0xff]  }
 0x515   : > { %v10963_v22 = vpop.f32.mrb[193].mxu0 }
 0x516   : > { %19419 = vst [vmem:[#allocation81_spill] sm:$0xff] %v15939_v53  ;;  %v15943_v25 = vadd.f32 %v10963_v22, %v10962_v46  ;;  %v10965_v51 = vpop.f32.mrb[194].mxu0  ;;  %v10880_v49 = vpop.f32.mrb[180].mxu1  ;;  %v13210_v46 = vld [vmem:[#allocation5 + $0x400] ss:$8 sps:$4 sm:$0xff]  }
 0x517   : > { %v10966_v37 = vpop.f32.mrb[195].mxu0  ;;  %v10881_v58 = vpop.f32.mrb[181].mxu1  ;;  %v13212_v53 = vld [vmem:[#allocation5 + $0x3c0] ss:$8 sps:$4 sm:$0xff]  }
 0x518   : > { %v15945_v4 = vadd.f32 %v10966_v37, %v10965_v51  ;;  %v15947_v2 = vadd.f32 %v10881_v58, %v10880_v49  ;;  %v10883_v47 = vpop.f32.mrb[182].mxu1  ;;  %v13211_v49 = vld [vmem:[#allocation5 + $0x414] ss:$8 sps:$4 sm:$0xff]  }
 0x519   : > { %5912 = vmatmul.mubr.bf16.gmra.mrb[44].mxu0 %v13208_v7  ;;  %v10884_v21 = vpop.f32.mrb[183].mxu1 }
 0x51a   : > { %5919 = vmatprep.mubr.bf16.mxu0 %v13209_v17  ;;  %v15951_v19 = vadd.f32 %v10884_v21, %v10883_v47 }
 0x51b   : > { %6001 = vmatmul.mubr.bf16.vlgmr.msra.gmra.mrb[32].mxu1 %v13210_v46 }
 0x51c   : > { %v10968_v22 = vpop.f32.mrb[196].mxu0  ;;  %11507 = vmatpush3.bf16.msra.mxu1 %v15671_v41  ;;  %6008 = vmatprep.mubr.bf16.mxu1 %v13211_v49  ;;  %v13213_v49 = vld [vmem:[#allocation5 + $0x3d4] ss:$8 sps:$4 sm:$0xff]  }
 0x51d   : > { %v10969_v37 = vpop.f32.mrb[197].mxu0  ;;  %11508 = vmatprep.subr.bf16.mxu1 %v15677_v29 }
 0x51e   : > { %v15957_v58 = vadd.f32 %v10969_v37, %v10968_v22  ;;  %v10971_v7 = vpop.f32.mrb[198].mxu0  ;;  %v10886_v17 = vpop.f32.mrb[184].mxu1 }
 0x51f   : > { %v10972_v0 = vpop.f32.mrb[199].mxu0  ;;  %v10887_v47 = vpop.f32.mrb[185].mxu1 }
 0x520   : > { %v15959_v21 = vadd.f32 %v10972_v0, %v10971_v7  ;;  %v15961_v46 = vadd.f32 %v10887_v47, %v10886_v17  ;;  %v10889_v40 = vpop.f32.mrb[186].mxu1  ;;  %11509 = vmatpush3.bf16.msra.mxu1 %v15682_v27  ;;  %v13215_v17 = vld [vmem:[#allocation5 + $0x424] ss:$8 sps:$4 sm:$0xff]  }
 0x521   : > { %5920 = vmatmul.mubr.bf16.gmra.mrb[48].mxu0 %v13212_v53  ;;  %v10890_v51 = vpop.f32.mrb[187].mxu1  ;;  %11510 = vmatprep.subr.bf16.mxu1 %v15689_v55  ;;  %v13217_v7 = vld [vmem:[#allocation5 + $0x3e4] ss:$8 sps:$4 sm:$0xff]  }
 0x522   : > { %5927 = vmatprep.mubr.bf16.mxu0 %v13213_v49  ;;  %v15967_v37 = vadd.f32 %v10890_v51, %v10889_v40 }
 0x523   : > { %6009 = vmatmul.mubr.bf16.gmra.mrb[36].mxu1 %v13214_v52 }
 0x524   : > { %v10974_v0 = vpop.f32.mrb[200].mxu0  ;;  %6016 = vmatprep.mubr.bf16.mxu1 %v13215_v17  ;;  %11511 = vmatpush3.bf16.msra.mxu1 %v15699_v12 }
 0x525   : > { %v10975_v53 = vpop.f32.mrb[201].mxu0  ;;  %11512 = vmatprep.subr.bf16.mxu1 %v15705_v14 }
 0x526   : > { %v15972_v47 = vadd.f32 %v10975_v53, %v10974_v0  ;;  %v10977_v49 = vpop.f32.mrb[202].mxu0  ;;  %v10892_v54 = vpop.f32.mrb[188].mxu1 }
 0x527   : > { %v10978_v22 = vpop.f32.mrb[203].mxu0  ;;  %v10893_v40 = vpop.f32.mrb[189].mxu1 }
 0x528   : > { %v15975_v51 = vadd.f32 %v10978_v22, %v10977_v49  ;;  %v15977_v52 = vadd.f32 %v10893_v40, %v10892_v54  ;;  %v10895_v60 = vpop.f32.mrb[190].mxu1  ;;  %11513 = vmatpush3.bf16.msra.mxu1 %v15712_v50  ;;  %v13219_v49 = vld [vmem:[#allocation5 + $0x434] ss:$8 sps:$4 sm:$0xff]  }
 0x529   : > { %5928 = vmatmul.mubr.bf16.gmra.mrb[52].mxu0 %v13216_v45  ;;  %v10896_v17 = vpop.f32.mrb[191].mxu1  ;;  %11514 = vmatprep.subr.bf16.mxu1 %v15719_v62  ;;  %v13221_v54 = vld [vmem:[#allocation5 + $0x3f4] ss:$8 sps:$4 sm:$0xff]  }
 0x52a   : > { %5935 = vmatprep.mubr.bf16.mxu0 %v13217_v7  ;;  %v15983_v53 = vadd.f32 %v10896_v17, %v10895_v60 }
 0x52b   : > { %6017 = vmatmul.mubr.bf16.gmra.mrb[40].mxu1 %v13218_v59 }
 0x52c   : > { %v10980_v22 = vpop.f32.mrb[204].mxu0  ;;  %6024 = vmatprep.mubr.bf16.mxu1 %v13219_v49  ;;  %11515 = vmatpush3.bf16.msra.mxu1 %v15729_v16 }
 0x52d   : > { %v10981_v45 = vpop.f32.mrb[205].mxu0  ;;  %11516 = vmatprep.subr.bf16.mxu1 %v15735_v30 }
 0x52e   : > { %v15988_v40 = vadd.f32 %v10981_v45, %v10980_v22  ;;  %v10983_v7 = vpop.f32.mrb[206].mxu0  ;;  %v10898_v42 = vpop.f32.mrb[192].mxu1 }
 0x52f   : > { %v10984_v0 = vpop.f32.mrb[207].mxu0  ;;  %v10899_v60 = vpop.f32.mrb[193].mxu1 }
 0x530   : > { %v15991_v17 = vadd.f32 %v10984_v0, %v10983_v7  ;;  %v15993_v59 = vadd.f32 %v10899_v60, %v10898_v42  ;;  %v10901_v63 = vpop.f32.mrb[194].mxu1  ;;  %11517 = vmatpush3.bf16.msra.mxu1 %v15742_v6  ;;  %v13223_v7 = vld [vmem:[#allocation5 + $0x444] ss:$8 sps:$4 sm:$0xff]   ;;  %v13224_v42 = vld [vmem:[#allocation5 + $0x3f0] ss:$8 sps:$4 sm:$0xff]  }
 0x531   : > { %5936 = vmatmul.mubr.bf16.gmra.mrb[56].mxu0 %v13220_v56  ;;  %v10902_v49 = vpop.f32.mrb[195].mxu1  ;;  %11518 = vmatprep.subr.bf16.mxu1 %v15750_v24 }
 0x532   : > { %5943 = vmatprep.mubr.bf16.mxu0 %v13221_v54  ;;  %v15999_v45 = vadd.f32 %v10902_v49, %v10901_v63 }
 0x533   : > { %6025 = vmatmul.mubr.bf16.gmra.mrb[44].mxu1 %v13222_v18 }
 0x534   : > { %v10986_v0 = vpop.f32.mrb[208].mxu0  ;;  %6032 = vmatprep.mubr.bf16.mxu1 %v13223_v7  ;;  %11519 = vmatpush3.bf16.msra.mxu1 %v15757_v48 }
 0x535   : > { %v10987_v56 = vpop.f32.mrb[209].mxu0  ;;  %11520 = vmatprep.subr.bf16.mxu1 %v15761_v13 }
 0x536   : > { %v16004_v54 = vadd.f32 %v10987_v56, %v10986_v0  ;;  %v10989_v60 = vpop.f32.mrb[210].mxu0  ;;  %v10904_v22 = vpop.f32.mrb[196].mxu1  ;;  %v13226_v0 = vld [vmem:[%s13948_s28 + $0xc0] sm:$0xff]  }
 0x537   : > { %v10990_v63 = vpop.f32.mrb[211].mxu0  ;;  %v10905_v49 = vpop.f32.mrb[197].mxu1 }
 0x538   : > { %v16007_v11 = vadd.f32 %v10990_v63, %v10989_v60  ;;  %v16009_v18 = vadd.f32 %v10905_v49, %v10904_v22  ;;  %v10907_v26 = vpop.f32.mrb[198].mxu1  ;;  %11521 = vmatpush3.bf16.msra.mxu1 %v15772_v5  ;;  %v13228_v63 = vld [vmem:[#allocation5 + $0x454] ss:$8 sps:$4 sm:$0xff]  }
 0x539   : > { %5944 = vmatmul.mubr.bf16.gmra.mrb[60].mxu0 %v13224_v42  ;;  %v10908_v7 = vpop.f32.mrb[199].mxu1  ;;  %11730 = vmatprep.subr.bf16.mxu1 %v13226_v0 }
 0x53a   : > { %6177 = vmatprep.mubr.bf16.mxu0 %v13225_v9  ;;  %v16015_v43 = vadd.f32 %v10908_v7, %v10907_v26  ;;  %v13229_v7 = vld [vmem:[#allocation5 + $0x500] ss:$8 sps:$4 sm:$0xff]  }
 0x53b   : > { %6033 = vmatmul.mubr.bf16.gmra.mrb[48].mxu1 %v13227_v35 }
 0x53c   : > { %v10992_v60 = vpop.f32.mrb[212].mxu0  ;;  %6040 = vmatprep.mubr.bf16.mxu1 %v13228_v63 }
 0x53d   : > { %v10993_v42 = vpop.f32.mrb[213].mxu0 }
 0x53e   : > { %v16019_v49 = vadd.f32 %v10993_v42, %v10992_v60  ;;  %v10995_v36 = vpop.f32.mrb[214].mxu0  ;;  %v10910_v9 = vpop.f32.mrb[200].mxu1  ;;  %v13231_v42 = vld [vmem:[#allocation5 + $0x450] ss:$8 sps:$4 sm:$0xff]  }
 0x53f   : > { %v10996_v1 = vpop.f32.mrb[215].mxu0  ;;  %v10911_v0 = vpop.f32.mrb[201].mxu1  ;;  %v13233_v60 = vld [vmem:[#allocation5 + $0x510] ss:$8 sps:$4 sm:$0xff]  }
 0x540   : > { %v16021_v34 = vadd.f32 %v10996_v1, %v10995_v36  ;;  %v16023_v56 = vadd.f32 %v10911_v0, %v10910_v9  ;;  %v10913_v26 = vpop.f32.mrb[202].mxu1  ;;  %v13232_v9 = vld [vmem:[#allocation5 + $0x464] ss:$8 sps:$4 sm:$0xff]  }
 0x541   : > { %6178 = vmatmul.mubr.bf16.vlgmr.msra.gmra.mrb[64].mxu0 %v13229_v7  ;;  %v10914_v35 = vpop.f32.mrb[203].mxu1 }
 0x542   : > { %6185 = vmatprep.mubr.bf16.mxu0 %v13230_v33  ;;  %11619 = vmatpush3.bf16.msra.mxu0 %v15671_v41  ;;  %v16028_v63 = vadd.f32 %v10914_v35, %v10913_v26 }
 0x543   : > { %11620 = vmatprep.subr.bf16.mxu0 %v15677_v29  ;;  %6041 = vmatmul.mubr.bf16.gmra.mrb[52].mxu1 %v13231_v42 }
 0x544   : > { %v10998_v1 = vpop.f32.mrb[216].mxu0  ;;  %6048 = vmatprep.mubr.bf16.mxu1 %v13232_v9  ;;  %v13234_v9 = vld [vmem:[#allocation5 + $0x524] ss:$8 sps:$4 sm:$0xff]  }
 0x545   : > { %v10999_v0 = vpop.f32.mrb[217].mxu0 }
 0x546   : > { %v16033_v7 = vadd.f32 %v10999_v0, %v10998_v1  ;;  %v11001_v33 = vpop.f32.mrb[218].mxu0  ;;  %11621 = vmatpush3.bf16.msra.mxu0 %v15682_v27  ;;  %v10916_v41 = vpop.f32.mrb[204].mxu1  ;;  %v13237_v27 = vld [vmem:[#allocation5 + $0x520] ss:$8 sps:$4 sm:$0xff]  }
 0x547   : > { %v11002_v22 = vpop.f32.mrb[219].mxu0  ;;  %11622 = vmatprep.subr.bf16.mxu0 %v15689_v55  ;;  %v10917_v26 = vpop.f32.mrb[205].mxu1  ;;  %v13235_v55 = vld [vmem:[#allocation5 + $0x460] ss:$8 sps:$4 sm:$0xff]  }
 0x548   : > { %v16037_v29 = vadd.f32 %v11002_v22, %v11001_v33  ;;  %v16039_v35 = vadd.f32 %v10917_v26, %v10916_v41  ;;  %v10919_v42 = vpop.f32.mrb[206].mxu1  ;;  %v13236_v33 = vld [vmem:[#allocation5 + $0x474] ss:$8 sps:$4 sm:$0xff]  }
 0x549   : > { %6186 = vmatmul.mubr.bf16.gmra.mrb[68].mxu0 %v13233_v60  ;;  %v10920_v36 = vpop.f32.mrb[207].mxu1 }
 0x54a   : > { %19420 = vst [vmem:[#allocation88_spill] sm:$0xff] %v16039_v35  ;;  %6193 = vmatprep.mubr.bf16.mxu0 %v13234_v9  ;;  %11623 = vmatpush3.bf16.msra.mxu0 %v15699_v12  ;;  %v16044_v1 = vadd.f32 %v10920_v36, %v10919_v42  ;;  %v13259_v35 = vld [vmem:[#allocation5 + $0x584] ss:$8 sps:$4 sm:$0xff]  }
 0x54b   : > { %11624 = vmatprep.subr.bf16.mxu0 %v15705_v14  ;;  %6049 = vmatmul.mubr.bf16.gmra.mrb[56].mxu1 %v13235_v55 }
 0x54c   : > { %19421 = vst [vmem:[#allocation86_spill] sm:$0xff] %v16044_v1  ;;  %v11004_v22 = vpop.f32.mrb[220].mxu0  ;;  %6056 = vmatprep.mubr.bf16.mxu1 %v13236_v33  ;;  %v13238_v33 = vld [vmem:[#allocation5 + $0x534] ss:$8 sps:$4 sm:$0xff]  }
 0x54d   : > { %v11005_v60 = vpop.f32.mrb[221].mxu0 }
 0x54e   : > { %v16049_v41 = vadd.f32 %v11005_v60, %v11004_v22  ;;  %v11007_v26 = vpop.f32.mrb[222].mxu0  ;;  %11625 = vmatpush3.bf16.msra.mxu0 %v15712_v50  ;;  %v10922_v12 = vpop.f32.mrb[208].mxu1  ;;  %v13241_v50 = vld [vmem:[#allocation5 + $0x530] ss:$8 sps:$4 sm:$0xff]  }
 0x54f   : > { %v11008_v9 = vpop.f32.mrb[223].mxu0  ;;  %11626 = vmatprep.subr.bf16.mxu0 %v15719_v62  ;;  %v10923_v36 = vpop.f32.mrb[209].mxu1  ;;  %v13239_v62 = vld [vmem:[#allocation5 + $0x470] ss:$8 sps:$4 sm:$0xff]  }
 0x550   : > { %v16053_v14 = vadd.f32 %v11008_v9, %v11007_v26  ;;  %v16055_v42 = vadd.f32 %v10923_v36, %v10922_v12  ;;  %v10925_v55 = vpop.f32.mrb[210].mxu1  ;;  %v13240_v12 = vld [vmem:[#allocation5 + $0x484] ss:$8 sps:$4 sm:$0xff]  }
 0x551   : > { %6194 = vmatmul.mubr.bf16.gmra.mrb[72].mxu0 %v13237_v27  ;;  %v10926_v0 = vpop.f32.mrb[211].mxu1 }
 0x552   : > { %19422 = vst [vmem:[#allocation87_spill] sm:$0xff] %v16055_v42  ;;  %6201 = vmatprep.mubr.bf16.mxu0 %v13238_v33  ;;  %11627 = vmatpush3.bf16.msra.mxu0 %v15729_v16  ;;  %v16060_v22 = vadd.f32 %v10926_v0, %v10925_v55  ;;  %v13255_v42 = vld [vmem:[#allocation5 + $0x574] ss:$8 sps:$4 sm:$0xff]  }
 0x553   : > { %11628 = vmatprep.subr.bf16.mxu0 %v15735_v30  ;;  %6057 = vmatmul.mubr.bf16.gmra.mrb[60].mxu1 %v13239_v62 }
 0x554   : > { %19423 = vst [vmem:[#allocation85_spill] sm:$0xff] %v16060_v22  ;;  %v11010_v60 = vpop.f32.mrb[224].mxu0  ;;  %6064 = vmatprep.mubr.bf16.mxu1 %v13240_v12  ;;  %v13242_v12 = vld [vmem:[#allocation5 + $0x544] ss:$8 sps:$4 sm:$0xff]  }
 0x555   : > { %v11011_v27 = vpop.f32.mrb[225].mxu0 }
 0x556   : > { %v16065_v9 = vadd.f32 %v11011_v27, %v11010_v60  ;;  %v11013_v36 = vpop.f32.mrb[226].mxu0  ;;  %11629 = vmatpush3.bf16.msra.mxu0 %v15742_v6  ;;  %v10928_v16 = vpop.f32.mrb[212].mxu1 }
 0x557   : > { %v11014_v33 = vpop.f32.mrb[227].mxu0  ;;  %11630 = vmatprep.subr.bf16.mxu0 %v15750_v24  ;;  %v10929_v0 = vpop.f32.mrb[213].mxu1  ;;  %v13243_v24 = vld [vmem:[#allocation5 + $0x480] ss:$8 sps:$4 sm:$0xff]  }
 0x558   : > { %v16069_v30 = vadd.f32 %v11014_v33, %v11013_v36  ;;  %v16071_v55 = vadd.f32 %v10929_v0, %v10928_v16  ;;  %v10931_v62 = vpop.f32.mrb[214].mxu1  ;;  %v13244_v16 = vld [vmem:[#allocation5 + $0x494] ss:$8 sps:$4 sm:$0xff]  }
 0x559   : > { %6202 = vmatmul.mubr.bf16.gmra.mrb[76].mxu0 %v13241_v50  ;;  %v10932_v26 = vpop.f32.mrb[215].mxu1 }
 0x55a   : > { %19424 = vst [vmem:[#allocation92_spill] sm:$0xff] %v16071_v55  ;;  %6209 = vmatprep.mubr.bf16.mxu0 %v13242_v12  ;;  %11631 = vmatpush3.bf16.msra.mxu0 %v15757_v48  ;;  %v16076_v60 = vadd.f32 %v10932_v26, %v10931_v62  ;;  %v13245_v26 = vld [vmem:[#allocation7 + $0x40] sm:$0xff]  }
 0x55b   : > { %11632 = vmatprep.subr.bf16.mxu0 %v15761_v13  ;;  %6065 = vmatmul.mubr.bf16.gmra.mrb[64].mxu1 %v13243_v24  ;;  %v13251_v55 = vld [vmem:[#allocation5 + $0x564] ss:$8 sps:$4 sm:$0xff]  }
 0x55c   : > { %19425 = vst [vmem:[#allocation90_spill] sm:$0xff] %v16076_v60  ;;  %v11016_v27 = vpop.f32.mrb[228].mxu0  ;;  %6072 = vmatprep.mubr.bf16.mxu1 %v13244_v16  ;;  %v13247_v16 = vld [vmem:[#allocation5 + $0x554] ss:$8 sps:$4 sm:$0xff]  }
 0x55d   : > { %v11017_v50 = vpop.f32.mrb[229].mxu0 }
 0x55e   : > { %v16081_v33 = vadd.f32 %v11017_v50, %v11016_v27  ;;  %v11019_v0 = vpop.f32.mrb[230].mxu0  ;;  %11633 = vmatpush3.bf16.msra.mxu0 %v15772_v5  ;;  %v10934_v48 = vpop.f32.mrb[216].mxu1  ;;  %v13248_v5 = vld [vmem:[#allocation5 + $0x490] ss:$8 sps:$4 sm:$0xff]  }
 0x55f   : > { %v11020_v12 = vpop.f32.mrb[231].mxu0  ;;  %11842 = vmatprep.subr.bf16.mxu0 %v13245_v26  ;;  %v10935_v62 = vpop.f32.mrb[217].mxu1 }
 0x560   : > { %v16084_v13 = vadd.f32 %v11020_v12, %v11019_v0  ;;  %v16086_v24 = vadd.f32 %v10935_v62, %v10934_v48  ;;  %v10937_v6 = vpop.f32.mrb[218].mxu1  ;;  %v13249_v12 = vld [vmem:[#allocation5 + $0x4a4] ss:$8 sps:$4 sm:$0xff]  }
 0x561   : > { %6210 = vmatmul.mubr.bf16.gmra.mrb[80].mxu0 %v13246_v8  ;;  %v10938_v36 = vpop.f32.mrb[219].mxu1 }
 0x562   : > { %19426 = vst [vmem:[#allocation91_spill] sm:$0xff] %v16086_v24  ;;  %6217 = vmatprep.mubr.bf16.mxu0 %v13247_v16  ;;  %v16090_v50 = vadd.f32 %v10938_v36, %v10937_v6  ;;  %v13250_v36 = vld [vmem:[#allocation5 + $0x550] ss:$8 sps:$4 sm:$0xff]  }
 0x563   : > { %6073 = vmatmul.mubr.bf16.gmra.mrb[68].mxu1 %v13248_v5 }
 0x564   : > { %19427 = vst [vmem:[#allocation89_spill] sm:$0xff] %v16090_v50  ;;  %v11022_v39 = vpop.f32.mrb[232].mxu0  ;;  %6080 = vmatprep.mubr.bf16.mxu1 %v13249_v12 }
 0x565   : > { %v11023_v48 = vpop.f32.mrb[233].mxu0 }
 0x566   : > { %v16094_v26 = vadd.f32 %v11023_v48, %v11022_v39  ;;  %v11025_v8 = vpop.f32.mrb[234].mxu0  ;;  %v10940_v62 = vpop.f32.mrb[220].mxu1  ;;  %v13252_v39 = vld [vmem:[#allocation5 + $0x4a0] ss:$8 sps:$4 sm:$0xff]  }
 0x567   : > { %v11026_v31 = vpop.f32.mrb[235].mxu0  ;;  %v10941_v16 = vpop.f32.mrb[221].mxu1 }
 0x568   : > { %v16096_v10 = vadd.f32 %v11026_v31, %v11025_v8  ;;  %v16098_v27 = vadd.f32 %v10941_v16, %v10940_v62  ;;  %v10943_v6 = vpop.f32.mrb[222].mxu1  ;;  %v13253_v8 = vld [vmem:[#allocation5 + $0x4b4] ss:$8 sps:$4 sm:$0xff]  }
 0x569   : > { %6218 = vmatmul.mubr.bf16.gmra.mrb[84].mxu0 %v13250_v36  ;;  %v10944_v5 = vpop.f32.mrb[223].mxu1 }
 0x56a   : > { %19428 = vst [vmem:[#allocation96_spill] sm:$0xff] %v16098_v27  ;;  %6225 = vmatprep.mubr.bf16.mxu0 %v13251_v55  ;;  %v16102_v0 = vadd.f32 %v10944_v5, %v10943_v6  ;;  %v13254_v5 = vld [vmem:[#allocation5 + $0x560] ss:$8 sps:$4 sm:$0xff]  }
 0x56b   : > { %6081 = vmatmul.mubr.bf16.gmra.mrb[72].mxu1 %v13252_v39 }
 0x56c   : > { %19429 = vst [vmem:[#allocation94_spill] sm:$0xff] %v16102_v0  ;;  %v11028_v48 = vpop.f32.mrb[236].mxu0  ;;  %6088 = vmatprep.mubr.bf16.mxu1 %v13253_v8 }
 0x56d   : > { %v11029_v62 = vpop.f32.mrb[237].mxu0 }
 0x56e   : > { %v16106_v16 = vadd.f32 %v11029_v62, %v11028_v48  ;;  %v11031_v36 = vpop.f32.mrb[238].mxu0  ;;  %v11074_v24 = vpop.f32.mrb[224].mxu1  ;;  %v13256_v48 = vld [vmem:[#allocation5 + $0x4b0] ss:$8 sps:$4 sm:$0xff]  }
 0x56f   : > { %v11032_v50 = vpop.f32.mrb[239].mxu0  ;;  %v11075_v55 = vpop.f32.mrb[225].mxu1 }
 0x570   : > { %v16108_v60 = vadd.f32 %v11032_v50, %v11031_v36  ;;  %v16110_v12 = vadd.f32 %v11075_v55, %v11074_v24  ;;  %v11077_v6 = vpop.f32.mrb[226].mxu1  ;;  %v13257_v36 = vld [vmem:[#allocation5 + $0x4c4] ss:$8 sps:$4 sm:$0xff]  }
 0x571   : > { %6226 = vmatmul.mubr.bf16.gmra.mrb[88].mxu0 %v13254_v5  ;;  %v11078_v39 = vpop.f32.mrb[227].mxu1 }
 0x572   : > { %19430 = vst [vmem:[#allocation95_spill] sm:$0xff] %v16110_v12  ;;  %6233 = vmatprep.mubr.bf16.mxu0 %v13255_v42  ;;  %v16114_v31 = vadd.f32 %v11078_v39, %v11077_v6  ;;  %v13258_v39 = vld [vmem:[#allocation5 + $0x570] ss:$8 sps:$4 sm:$0xff]  }
 0x573   : > { %6089 = vmatmul.mubr.bf16.gmra.mrb[76].mxu1 %v13256_v48 }
 0x574   : > { %19431 = vst [vmem:[#allocation93_spill] sm:$0xff] %v16114_v31  ;;  %v11034_v62 = vpop.f32.mrb[240].mxu0  ;;  %6096 = vmatprep.mubr.bf16.mxu1 %v13257_v36 }
 0x575   : > { %v11035_v24 = vpop.f32.mrb[241].mxu0 }
 0x576   : > { %v16118_v55 = vadd.f32 %v11035_v24, %v11034_v62  ;;  %v11037_v5 = vpop.f32.mrb[242].mxu0  ;;  %v11080_v27 = vpop.f32.mrb[228].mxu1  ;;  %v13260_v62 = vld [vmem:[#allocation5 + $0x4c0] ss:$8 sps:$4 sm:$0xff]  }
 0x577   : > { %v11038_v0 = vpop.f32.mrb[243].mxu0  ;;  %v11081_v42 = vpop.f32.mrb[229].mxu1 }
 0x578   : > { %19432 = vst [vmem:[#allocation100_spill] sm:$0xff] %v16118_v55  ;;  %v16120_v22 = vadd.f32 %v11038_v0, %v11037_v5  ;;  %v16122_v8 = vadd.f32 %v11081_v42, %v11080_v27  ;;  %v11083_v6 = vpop.f32.mrb[230].mxu1  ;;  %v13261_v5 = vld [vmem:[#allocation5 + $0x4d4] ss:$8 sps:$4 sm:$0xff]  }
 0x579   : > { %6234 = vmatmul.mubr.bf16.gmra.mrb[92].mxu0 %v13258_v39  ;;  %v11084_v48 = vpop.f32.mrb[231].mxu1  ;;  %v13263_v55 = vld [vmem:[#allocation5 + $0x594] ss:$8 sps:$4 sm:$0xff]  }
 0x57a   : > { %19433 = vst [vmem:[#allocation98_spill] sm:$0xff] %v16120_v22  ;;  %19434 = vst [vmem:[#allocation120_spill] sm:$0xff] %v16122_v8  ;;  %6241 = vmatprep.mubr.bf16.mxu0 %v13259_v35  ;;  %v16126_v50 = vadd.f32 %v11084_v48, %v11083_v6  ;;  %v13262_v48 = vld [vmem:[#allocation5 + $0x580] ss:$8 sps:$4 sm:$0xff]  }
 0x57b   : > { %6097 = vmatmul.mubr.bf16.gmra.mrb[80].mxu1 %v13260_v62 }
 0x57c   : > { %19435 = vst [vmem:[#allocation99_spill] sm:$0xff] %v16126_v50  ;;  %v11040_v24 = vpop.f32.mrb[244].mxu0  ;;  %6104 = vmatprep.mubr.bf16.mxu1 %v13261_v5 }
 0x57d   : > { %v11041_v27 = vpop.f32.mrb[245].mxu0 }
 0x57e   : > { %v16130_v42 = vadd.f32 %v11041_v27, %v11040_v24  ;;  %v11043_v39 = vpop.f32.mrb[246].mxu0  ;;  %v11086_v12 = vpop.f32.mrb[232].mxu1  ;;  %v13264_v24 = vld [vmem:[#allocation5 + $0x4d0] ss:$8 sps:$4 sm:$0xff]  }
 0x57f   : > { %v11044_v31 = vpop.f32.mrb[247].mxu0  ;;  %v11087_v35 = vpop.f32.mrb[233].mxu1 }
 0x580   : > { %19436 = vst [vmem:[#allocation97_spill] sm:$0xff] %v16130_v42  ;;  %v16132_v1 = vadd.f32 %v11044_v31, %v11043_v39  ;;  %v16134_v36 = vadd.f32 %v11087_v35, %v11086_v12  ;;  %v11089_v6 = vpop.f32.mrb[234].mxu1  ;;  %v13265_v39 = vld [vmem:[#allocation5 + $0x4e4] ss:$8 sps:$4 sm:$0xff]  }
 0x581   : > { %6242 = vmatmul.mubr.bf16.gmra.mrb[96].mxu0 %v13262_v48  ;;  %v11090_v62 = vpop.f32.mrb[235].mxu1  ;;  %v13267_v42 = vld [vmem:[#allocation5 + $0x5a4] ss:$8 sps:$4 sm:$0xff]  }
 0x582   : > { %19437 = vst [vmem:[#allocation121_spill] sm:$0xff] %v16132_v1  ;;  %19438 = vst [vmem:[#allocation119_spill] sm:$0xff] %v16134_v36  ;;  %6249 = vmatprep.mubr.bf16.mxu0 %v13263_v55  ;;  %v16138_v0 = vadd.f32 %v11090_v62, %v11089_v6  ;;  %v13266_v62 = vld [vmem:[#allocation5 + $0x590] ss:$8 sps:$4 sm:$0xff]  }
 0x583   : > { %6105 = vmatmul.mubr.bf16.gmra.mrb[84].mxu1 %v13264_v24 }
 0x584   : > { %19439 = vst [vmem:[#allocation122_spill] sm:$0xff] %v16138_v0  ;;  %v11046_v27 = vpop.f32.mrb[248].mxu0  ;;  %6112 = vmatprep.mubr.bf16.mxu1 %v13265_v39 }
 0x585   : > { %v11047_v12 = vpop.f32.mrb[249].mxu0 }
 0x586   : > { %v16142_v35 = vadd.f32 %v11047_v12, %v11046_v27  ;;  %v11049_v48 = vpop.f32.mrb[250].mxu0  ;;  %v11092_v8 = vpop.f32.mrb[236].mxu1  ;;  %v13268_v27 = vld [vmem:[#allocation5 + $0x4e0] ss:$8 sps:$4 sm:$0xff]  }
 0x587   : > { %v11050_v50 = vpop.f32.mrb[251].mxu0  ;;  %v11093_v55 = vpop.f32.mrb[237].mxu1 }
 0x588   : > { %19440 = vst [vmem:[#allocation20_spill] sm:$0xff] %v16142_v35  ;;  %v16144_v22 = vadd.f32 %v11050_v50, %v11049_v48  ;;  %v16146_v5 = vadd.f32 %v11093_v55, %v11092_v8  ;;  %v11095_v6 = vpop.f32.mrb[238].mxu1  ;;  %v13269_v48 = vld [vmem:[#allocation5 + $0x4f4] ss:$8 sps:$4 sm:$0xff]  }
 0x589   : > { %6250 = vmatmul.mubr.bf16.gmra.mrb[100].mxu0 %v13266_v62  ;;  %v11096_v24 = vpop.f32.mrb[239].mxu1  ;;  %v13271_v35 = vld [vmem:[#allocation5 + $0x5b4] ss:$8 sps:$4 sm:$0xff]  }
 0x58a   : > { %19441 = vst [vmem:[#allocation18_spill] sm:$0xff] %v16144_v22  ;;  %19442 = vst [vmem:[#allocation16_spill] sm:$0xff] %v16146_v5  ;;  %6257 = vmatprep.mubr.bf16.mxu0 %v13267_v42  ;;  %v16150_v31 = vadd.f32 %v11096_v24, %v11095_v6  ;;  %v13270_v24 = vld [vmem:[#allocation5 + $0x5a0] ss:$8 sps:$4 sm:$0xff]  }
 0x58b   : > { %6113 = vmatmul.mubr.bf16.gmra.mrb[88].mxu1 %v13268_v27 }
 0x58c   : > { %19443 = vst [vmem:[#allocation22_spill] sm:$0xff] %v16150_v31  ;;  %v11052_v12 = vpop.f32.mrb[252].mxu0  ;;  %6120 = vmatprep.mubr.bf16.mxu1 %v13269_v48 }
 0x58d   : > { %v11053_v8 = vpop.f32.mrb[253].mxu0 }
 0x58e   : > { %v16154_v55 = vadd.f32 %v11053_v8, %v11052_v12  ;;  %v11055_v62 = vpop.f32.mrb[254].mxu0  ;;  %v11098_v36 = vpop.f32.mrb[240].mxu1  ;;  %v13272_v12 = vld [vmem:[#allocation5 + $0x4f0] ss:$8 sps:$4 sm:$0xff]  }
 0x58f   : > { %v11056_v0 = vpop.f32.mrb[255].mxu0  ;;  %v11099_v42 = vpop.f32.mrb[241].mxu1 }
 0x590   : > { %19444 = vst [vmem:[#allocation17_spill] sm:$0xff] %v16154_v55  ;;  %v16156_v1 = vadd.f32 %v11056_v0, %v11055_v62  ;;  %v16158_v39 = vadd.f32 %v11099_v42, %v11098_v36  ;;  %v11101_v6 = vpop.f32.mrb[242].mxu1  ;;  %v13273_v62 = vld [vmem:[#allocation5 + $0x604] ss:$8 sps:$4 sm:$0xff]  }
 0x591   : > { %6258 = vmatmul.mubr.bf16.gmra.mrb[104].mxu0 %v13270_v24  ;;  %v11102_v27 = vpop.f32.mrb[243].mxu1  ;;  %v13275_v0 = vld [vmem:[#allocation5 + $0x5c4] ss:$8 sps:$4 sm:$0xff]  }
 0x592   : > { %19445 = vst [vmem:[#allocation24_spill] sm:$0xff] %v16156_v1  ;;  %19446 = vst [vmem:[#allocation19_spill] sm:$0xff] %v16158_v39  ;;  %6265 = vmatprep.mubr.bf16.mxu0 %v13271_v35  ;;  %v16162_v50 = vadd.f32 %v11102_v27, %v11101_v6  ;;  %v13287_v1 = vld [vmem:[%s13948_s28 + $0xd8] sm:$0xff]  }
 0x593   : > { %6121 = vmatmul.mubr.bf16.gmra.mrb[92].mxu1 %v13272_v12  ;;  %v13274_v12 = vld [vmem:[#allocation5 + $0x5b0] ss:$8 sps:$4 sm:$0xff]  }
 0x594   : > { %19447 = vst [vmem:[#allocation26_spill] sm:$0xff] %v16162_v50  ;;  %v11186_v8 = vpop.f32.mrb[0].mxu0  ;;  %6354 = vmatprep.mubr.bf16.mxu1 %v13273_v62 }
 0x595   : > { %v11187_v36 = vpop.f32.mrb[1].mxu0 }
 0x596   : > { %v16166_v42 = vadd.f32 %v11187_v36, %v11186_v8  ;;  %v11189_v24 = vpop.f32.mrb[2].mxu0  ;;  %v11104_v5 = vpop.f32.mrb[244].mxu1  ;;  %v13276_v36 = vld [vmem:[#allocation5 + $0x600] ss:$8 sps:$4 sm:$0xff]  }
 0x597   : > { %v11190_v31 = vpop.f32.mrb[3].mxu0  ;;  %v11105_v35 = vpop.f32.mrb[245].mxu1 }
 0x598   : > { %19448 = vst [vmem:[#allocation21_spill] sm:$0xff] %v16166_v42  ;;  %v16168_v22 = vadd.f32 %v11190_v31, %v11189_v24  ;;  %v16170_v6 = vadd.f32 %v11105_v35, %v11104_v5  ;;  %v11107_v27 = vpop.f32.mrb[246].mxu1  ;;  %v13277_v5 = vld [vmem:[%s13948_s28 + $0x80] sm:$0xff]   ;;  %v13278_v24 = vld [vmem:[#allocation5 + $0x614] ss:$8 sps:$4 sm:$0xff]  }
 0x599   : > { %6266 = vmatmul.mubr.bf16.gmra.mrb[108].mxu0 %v13274_v12  ;;  %v11108_v48 = vpop.f32.mrb[247].mxu1  ;;  %v13279_v12 = vld [vmem:[%s13948_s28 + $0xc8] sm:$0xff]  }
 0x59a   : > { %19449 = vst [vmem:[#allocation28_spill] sm:$0xff] %v16168_v22  ;;  %19450 = vst [vmem:[#allocation23_spill] sm:$0xff] %v16170_v6  ;;  %6273 = vmatprep.mubr.bf16.mxu0 %v13275_v0  ;;  %v16174_v62 = vadd.f32 %v11108_v48, %v11107_v27  ;;  %v13280_v6 = vld [vmem:[#allocation5 + $0x5c0] ss:$8 sps:$4 sm:$0xff]  }
 0x59b   : > { %6355 = vmatmul.mubr.bf16.vlgmr.msra.gmra.mrb[96].mxu1 %v13276_v36 }
 0x59c   : > { %19451 = vst [vmem:[#allocation30_spill] sm:$0xff] %v16174_v62  ;;  %v11192_v39 = vpop.f32.mrb[4].mxu0  ;;  %11731 = vmatpush3.bf16.msra.mxu1 %v13277_v5  ;;  %6362 = vmatprep.mubr.bf16.mxu1 %v13278_v24  ;;  %v13281_v5 = vld [vmem:[%s13948_s28 + $0x88] sm:$0xff]   ;;  %v13282_v62 = vld [vmem:[#allocation5 + $0x5d4] ss:$8 sps:$4 sm:$0xff]  }
 0x59d   : > { %v11193_v35 = vpop.f32.mrb[5].mxu0  ;;  %11732 = vmatprep.subr.bf16.mxu1 %v13279_v12 }
 0x59e   : > { %v16180_v0 = vadd.f32 %v11193_v35, %v11192_v39  ;;  %v11195_v8 = vpop.f32.mrb[6].mxu0  ;;  %v11110_v48 = vpop.f32.mrb[248].mxu1  ;;  %v13283_v39 = vld [vmem:[%s13948_s28 + $0xd0] sm:$0xff]  }
 0x59f   : > { %v11196_v27 = vpop.f32.mrb[7].mxu0  ;;  %v11111_v50 = vpop.f32.mrb[249].mxu1 }
 0x5a0   : > { %19452 = vst [vmem:[#allocation25_spill] sm:$0xff] %v16180_v0  ;;  %v16182_v36 = vadd.f32 %v11196_v27, %v11195_v8  ;;  %v16184_v55 = vadd.f32 %v11111_v50, %v11110_v48  ;;  %v11113_v31 = vpop.f32.mrb[250].mxu1  ;;  %11733 = vmatpush3.bf16.msra.mxu1 %v13281_v5  ;;  %v13284_v8 = vld [vmem:[#allocation5 + $0x610] ss:$8 sps:$4 sm:$0xff]   ;;  %v13285_v48 = vld [vmem:[#allocation5 + $0x624] ss:$8 sps:$4 sm:$0xff]  }
 0x5a1   : > { %6274 = vmatmul.mubr.bf16.gmra.mrb[112].mxu0 %v13280_v6  ;;  %v11114_v24 = vpop.f32.mrb[251].mxu1  ;;  %11734 = vmatprep.subr.bf16.mxu1 %v13283_v39  ;;  %v13286_v27 = vld [vmem:[%s13948_s28 + $0x90] sm:$0xff]  }
 0x5a2   : > { %19453 = vst [vmem:[#allocation32_spill] sm:$0xff] %v16182_v36  ;;  %19454 = vst [vmem:[#allocation27_spill] sm:$0xff] %v16184_v55  ;;  %6281 = vmatprep.mubr.bf16.mxu0 %v13282_v62  ;;  %v16190_v12 = vadd.f32 %v11114_v24, %v11113_v31  ;;  %v13288_v55 = vld [vmem:[#allocation5 + $0x5d0] ss:$8 sps:$4 sm:$0xff]   ;;  %v13295_v36 = vld [vmem:[%s13948_s28 + $0xe8] sm:$0xff]  }
 0x5a3   : > { %6363 = vmatmul.mubr.bf16.gmra.mrb[100].mxu1 %v13284_v8 }
 0x5a4   : > { %19455 = vst [vmem:[#allocation34_spill] sm:$0xff] %v16190_v12  ;;  %v11198_v50 = vpop.f32.mrb[8].mxu0  ;;  %6370 = vmatprep.mubr.bf16.mxu1 %v13285_v48  ;;  %11735 = vmatpush3.bf16.msra.mxu1 %v13286_v27  ;;  %v13289_v48 = vld [vmem:[%s13948_s28 + $0x98] sm:$0xff]  }
 0x5a5   : > { %v11199_v62 = vpop.f32.mrb[9].mxu0  ;;  %11736 = vmatprep.subr.bf16.mxu1 %v13287_v1 }
 0x5a6   : > { %v16195_v5 = vadd.f32 %v11199_v62, %v11198_v50  ;;  %v11201_v39 = vpop.f32.mrb[10].mxu0  ;;  %v11116_v31 = vpop.f32.mrb[252].mxu1  ;;  %v13290_v50 = vld [vmem:[#allocation5 + $0x5e4] ss:$8 sps:$4 sm:$0xff]  }
 0x5a7   : > { %v11202_v24 = vpop.f32.mrb[11].mxu0  ;;  %v11117_v35 = vpop.f32.mrb[253].mxu1  ;;  %v13291_v62 = vld [vmem:[%s13948_s28 + $0xe0] sm:$0xff]  }
 0x5a8   : > { %19456 = vst [vmem:[#allocation29_spill] sm:$0xff] %v16195_v5  ;;  %v16198_v8 = vadd.f32 %v11202_v24, %v11201_v39  ;;  %v16200_v0 = vadd.f32 %v11117_v35, %v11116_v31  ;;  %v11119_v6 = vpop.f32.mrb[254].mxu1  ;;  %11737 = vmatpush3.bf16.msra.mxu1 %v13289_v48  ;;  %v13292_v39 = vld [vmem:[#allocation5 + $0x620] ss:$8 sps:$4 sm:$0xff]   ;;  %v13293_v31 = vld [vmem:[#allocation5 + $0x634] ss:$8 sps:$4 sm:$0xff]  }
 0x5a9   : > { %6282 = vmatmul.mubr.bf16.gmra.mrb[116].mxu0 %v13288_v55  ;;  %v11120_v27 = vpop.f32.mrb[255].mxu1  ;;  %11738 = vmatprep.subr.bf16.mxu1 %v13291_v62  ;;  %v13294_v48 = vld [vmem:[%s13948_s28 + $0xa0] sm:$0xff]  }
 0x5aa   : > { %19457 = vst [vmem:[#allocation36_spill] sm:$0xff] %v16198_v8  ;;  %19458 = vst [vmem:[#allocation31_spill] sm:$0xff] %v16200_v0  ;;  %6289 = vmatprep.mubr.bf16.mxu0 %v13290_v50  ;;  %v16206_v12 = vadd.f32 %v11120_v27, %v11119_v6  ;;  %v13296_v0 = vld [vmem:[#allocation5 + $0x5e0] ss:$8 sps:$4 sm:$0xff]   ;;  %v13303_v8 = vld [vmem:[%s13948_s28 + $0xf8] sm:$0xff]  }
 0x5ab   : > { %6371 = vmatmul.mubr.bf16.gmra.mrb[104].mxu1 %v13292_v39 }
 0x5ac   : > { %19459 = vst [vmem:[#allocation38_spill] sm:$0xff] %v16206_v12  ;;  %v11204_v35 = vpop.f32.mrb[12].mxu0  ;;  %6378 = vmatprep.mubr.bf16.mxu1 %v13293_v31  ;;  %11739 = vmatpush3.bf16.msra.mxu1 %v13294_v48  ;;  %v13297_v31 = vld [vmem:[%s13948_s28 + $0xa8] sm:$0xff]  }
 0x5ad   : > { %v11205_v24 = vpop.f32.mrb[13].mxu0  ;;  %11740 = vmatprep.subr.bf16.mxu1 %v13295_v36 }
 0x5ae   : > { %v16211_v50 = vadd.f32 %v11205_v24, %v11204_v35  ;;  %v11207_v62 = vpop.f32.mrb[14].mxu0  ;;  %v11122_v6 = vpop.f32.mrb[0].mxu1  ;;  %v13298_v35 = vld [vmem:[#allocation5 + $0x5f4] ss:$8 sps:$4 sm:$0xff]  }
 0x5af   : > { %v11208_v27 = vpop.f32.mrb[15].mxu0  ;;  %v11123_v1 = vpop.f32.mrb[1].mxu1  ;;  %v13299_v24 = vld [vmem:[%s13948_s28 + $0xf0] sm:$0xff]  }
 0x5b0   : > { %19460 = vst [vmem:[#allocation33_spill] sm:$0xff] %v16211_v50  ;;  %v16214_v39 = vadd.f32 %v11208_v27, %v11207_v62  ;;  %v16216_v5 = vadd.f32 %v11123_v1, %v11122_v6  ;;  %v11125_v55 = vpop.f32.mrb[2].mxu1  ;;  %11741 = vmatpush3.bf16.msra.mxu1 %v13297_v31  ;;  %v13300_v62 = vld [vmem:[#allocation5 + $0x630] ss:$8 sps:$4 sm:$0xff]   ;;  %v13301_v6 = vld [vmem:[#allocation5 + $0x644] ss:$8 sps:$4 sm:$0xff]  }
 0x5b1   : > { %6290 = vmatmul.mubr.bf16.gmra.mrb[120].mxu0 %v13296_v0  ;;  %v11126_v48 = vpop.f32.mrb[3].mxu1  ;;  %11742 = vmatprep.subr.bf16.mxu1 %v13299_v24  ;;  %v13302_v31 = vld [vmem:[%s13948_s28 + $0xb0] sm:$0xff]  }
 0x5b2   : > { %19461 = vst [vmem:[#allocation40_spill] sm:$0xff] %v16214_v39  ;;  %19462 = vst [vmem:[#allocation35_spill] sm:$0xff] %v16216_v5  ;;  %6297 = vmatprep.mubr.bf16.mxu0 %v13298_v35  ;;  %v16222_v12 = vadd.f32 %v11126_v48, %v11125_v55  ;;  %v13304_v0 = vld [vmem:[#allocation5 + $0x5f0] ss:$8 sps:$4 sm:$0xff]  }
 0x5b3   : > { %6379 = vmatmul.mubr.bf16.gmra.mrb[108].mxu1 %v13300_v62 }
 0x5b4   : > { %19463 = vst [vmem:[#allocation39_spill] sm:$0xff] %v16222_v12  ;;  %v11210_v1 = vpop.f32.mrb[16].mxu0  ;;  %6386 = vmatprep.mubr.bf16.mxu1 %v13301_v6  ;;  %11743 = vmatpush3.bf16.msra.mxu1 %v13302_v31  ;;  %v13305_v6 = vld [vmem:[%s13948_s28 + $0xb8] sm:$0xff]   ;;  %v13306_v12 = vld [vmem:[#allocation5 + $0x704] ss:$8 sps:$4 sm:$0xff]  }
 0x5b5   : > { %v11211_v27 = vpop.f32.mrb[17].mxu0  ;;  %11744 = vmatprep.subr.bf16.mxu1 %v13303_v8  ;;  %v13308_v31 = vld [vmem:[#allocation5 + $0x640] ss:$8 sps:$4 sm:$0xff]  }
 0x5b6   : > { %v16227_v35 = vadd.f32 %v11211_v27, %v11210_v1  ;;  %v11213_v24 = vpop.f32.mrb[18].mxu0  ;;  %v11128_v36 = vpop.f32.mrb[4].mxu1  ;;  %v13307_v1 = vld [vmem:[#allocation7 + $0xc0] sm:$0xff]  }
 0x5b7   : > { %v11214_v55 = vpop.f32.mrb[19].mxu0  ;;  %v11129_v48 = vpop.f32.mrb[5].mxu1 }
 0x5b8   : > { %19464 = vst [vmem:[#allocation37_spill] sm:$0xff] %v16227_v35  ;;  %v16230_v50 = vadd.f32 %v11214_v55, %v11213_v24  ;;  %v16232_v62 = vadd.f32 %v11129_v48, %v11128_v36  ;;  %v11131_v39 = vpop.f32.mrb[6].mxu1  ;;  %11745 = vmatpush3.bf16.msra.mxu1 %v13305_v6  ;;  %v13309_v55 = vld [vmem:[#allocation5 + $0x654] ss:$8 sps:$4 sm:$0xff]   ;;  %v13312_v36 = vld [vmem:[#allocation7] sm:$0xff]  }
 0x5b9   : > { %6298 = vmatmul.mubr.bf16.gmra.mrb[124].mxu0 %v13304_v0  ;;  %v11132_v5 = vpop.f32.mrb[7].mxu1  ;;  %11954 = vmatprep.subr.bf16.mxu1 %v13307_v1  ;;  %v13311_v35 = vld [vmem:[#allocation5 + $0x714] ss:$8 sps:$4 sm:$0xff]  }
 0x5ba   : > { %19465 = vst [vmem:[#allocation102_spill] sm:$0xff] %v16230_v50  ;;  %19466 = vst [vmem:[#allocation103_spill] sm:$0xff] %v16232_v62  ;;  %6531 = vmatprep.mubr.bf16.mxu0 %v13306_v12  ;;  %v16237_v27 = vadd.f32 %v11132_v5, %v11131_v39  ;;  %v13310_v39 = vld [vmem:[#allocation5 + $0x700] ss:$8 sps:$4 sm:$0xff]   ;;  %v13314_v62 = vld [vmem:[#allocation5 + $0x650] ss:$8 sps:$4 sm:$0xff]  }
 0x5bb   : > { %6387 = vmatmul.mubr.bf16.gmra.mrb[112].mxu1 %v13308_v31 }
 0x5bc   : > { %19467 = vst [vmem:[#allocation101_spill] sm:$0xff] %v16237_v27  ;;  %v11216_v24 = vpop.f32.mrb[20].mxu0  ;;  %6394 = vmatprep.mubr.bf16.mxu1 %v13309_v55 }
 0x5bd   : > { %v11217_v0 = vpop.f32.mrb[21].mxu0 }
 0x5be   : > { %v16241_v48 = vadd.f32 %v11217_v0, %v11216_v24  ;;  %v11219_v6 = vpop.f32.mrb[22].mxu0  ;;  %v11134_v12 = vpop.f32.mrb[8].mxu1  ;;  %v13313_v0 = vld [vmem:[#allocation7 + $0x48] sm:$0xff]  }
 0x5bf   : > { %v11220_v42 = vpop.f32.mrb[23].mxu0  ;;  %v11135_v1 = vpop.f32.mrb[9].mxu1 }
 0x5c0   : > { %19468 = vst [vmem:[#allocation42_spill] sm:$0xff] %v16241_v48  ;;  %v16243_v22 = vadd.f32 %v11220_v42, %v11219_v6  ;;  %v16245_v8 = vadd.f32 %v11135_v1, %v11134_v12  ;;  %v11137_v5 = vpop.f32.mrb[10].mxu1  ;;  %v13315_v12 = vld [vmem:[#allocation5 + $0x664] ss:$8 sps:$4 sm:$0xff]  }
 0x5c1   : > { %6532 = vmatmul.mubr.bf16.vlgmr.msra.gmra.mrb[128].mxu0 %v13310_v39  ;;  %v11138_v31 = vpop.f32.mrb[11].mxu1 }
 0x5c2   : > { %19469 = vst [vmem:[#allocation107_spill] sm:$0xff] %v16243_v22  ;;  %19470 = vst [vmem:[#allocation44_spill] sm:$0xff] %v16245_v8  ;;  %6539 = vmatprep.mubr.bf16.mxu0 %v13311_v35  ;;  %11843 = vmatpush3.bf16.msra.mxu0 %v13312_v36  ;;  %v16249_v55 = vadd.f32 %v11138_v31, %v11137_v5  ;;  %v13316_v36 = vld [vmem:[#allocation7 + $0x8] sm:$0xff]   ;;  %v13317_v5 = vld [vmem:[#allocation7 + $0x50] sm:$0xff]  }
 0x5c3   : > { %11844 = vmatprep.subr.bf16.mxu0 %v13313_v0  ;;  %6395 = vmatmul.mubr.bf16.gmra.mrb[116].mxu1 %v13314_v62  ;;  %v13318_v22 = vld [vmem:[#allocation5 + $0x710] ss:$8 sps:$4 sm:$0xff]  }
 0x5c4   : > { %19471 = vst [vmem:[#allocation105_spill] sm:$0xff] %v16249_v55  ;;  %v11222_v42 = vpop.f32.mrb[24].mxu0  ;;  %6402 = vmatprep.mubr.bf16.mxu1 %v13315_v12  ;;  %v13319_v12 = vld [vmem:[#allocation5 + $0x724] ss:$8 sps:$4 sm:$0xff]   ;;  %v13321_v8 = vld [vmem:[#allocation7 + $0x58] sm:$0xff]  }
 0x5c5   : > { %v11223_v1 = vpop.f32.mrb[25].mxu0 }
 0x5c6   : > { %v16253_v39 = vadd.f32 %v11223_v1, %v11222_v42  ;;  %v11225_v35 = vpop.f32.mrb[26].mxu0  ;;  %11845 = vmatpush3.bf16.msra.mxu0 %v13316_v36  ;;  %v11140_v27 = vpop.f32.mrb[12].mxu1  ;;  %v13320_v42 = vld [vmem:[#allocation7 + $0x10] sm:$0xff]  }
 0x5c7   : > { %v11226_v24 = vpop.f32.mrb[27].mxu0  ;;  %11846 = vmatprep.subr.bf16.mxu0 %v13317_v5  ;;  %v11141_v31 = vpop.f32.mrb[13].mxu1  ;;  %v13322_v5 = vld [vmem:[#allocation5 + $0x660] ss:$8 sps:$4 sm:$0xff]  }
 0x5c8   : > { %19472 = vst [vmem:[#allocation50_spill] sm:$0xff] %v16253_v39  ;;  %v16255_v0 = vadd.f32 %v11226_v24, %v11225_v35  ;;  %v16257_v62 = vadd.f32 %v11141_v31, %v11140_v27  ;;  %v11143_v48 = vpop.f32.mrb[14].mxu1  ;;  %v13323_v35 = vld [vmem:[#allocation5 + $0x674] ss:$8 sps:$4 sm:$0xff]  }
 0x5c9   : > { %6540 = vmatmul.mubr.bf16.gmra.mrb[132].mxu0 %v13318_v22  ;;  %v11144_v6 = vpop.f32.mrb[15].mxu1 }
 0x5ca   : > { %19473 = vst [vmem:[#allocation48_spill] sm:$0xff] %v16255_v0  ;;  %19474 = vst [vmem:[#allocation104_spill] sm:$0xff] %v16257_v62  ;;  %6547 = vmatprep.mubr.bf16.mxu0 %v13319_v12  ;;  %11847 = vmatpush3.bf16.msra.mxu0 %v13320_v42  ;;  %v16261_v36 = vadd.f32 %v11144_v6, %v11143_v48  ;;  %v13324_v42 = vld [vmem:[#allocation7 + $0x18] sm:$0xff]   ;;  %v13325_v48 = vld [vmem:[#allocation7 + $0x60] sm:$0xff]  }
 0x5cb   : > { %11848 = vmatprep.subr.bf16.mxu0 %v13321_v8  ;;  %6403 = vmatmul.mubr.bf16.gmra.mrb[120].mxu1 %v13322_v5  ;;  %v13326_v0 = vld [vmem:[#allocation5 + $0x720] ss:$8 sps:$4 sm:$0xff]  }
 0x5cc   : > { %19475 = vst [vmem:[#allocation41_spill] sm:$0xff] %v16261_v36  ;;  %v11228_v24 = vpop.f32.mrb[28].mxu0  ;;  %6410 = vmatprep.mubr.bf16.mxu1 %v13323_v35  ;;  %v13327_v35 = vld [vmem:[#allocation5 + $0x734] ss:$8 sps:$4 sm:$0xff]   ;;  %v13329_v62 = vld [vmem:[#allocation7 + $0x68] sm:$0xff]  }
 0x5cd   : > { %v11229_v22 = vpop.f32.mrb[29].mxu0 }
 0x5ce   : > { %v16265_v31 = vadd.f32 %v11229_v22, %v11228_v24  ;;  %v11231_v12 = vpop.f32.mrb[30].mxu0  ;;  %11849 = vmatpush3.bf16.msra.mxu0 %v13324_v42  ;;  %v11146_v55 = vpop.f32.mrb[16].mxu1  ;;  %v13328_v24 = vld [vmem:[#allocation7 + $0x20] sm:$0xff]  }
 0x5cf   : > { %v11232_v1 = vpop.f32.mrb[31].mxu0  ;;  %11850 = vmatprep.subr.bf16.mxu0 %v13325_v48  ;;  %v11147_v6 = vpop.f32.mrb[17].mxu1  ;;  %v13330_v48 = vld [vmem:[#allocation5 + $0x670] ss:$8 sps:$4 sm:$0xff]  }
 0x5d0   : > { %19476 = vst [vmem:[#allocation51_spill] sm:$0xff] %v16265_v31  ;;  %v16267_v8 = vadd.f32 %v11232_v1, %v11231_v12  ;;  %v16269_v5 = vadd.f32 %v11147_v6, %v11146_v55  ;;  %v11149_v39 = vpop.f32.mrb[18].mxu1  ;;  %v13331_v12 = vld [vmem:[#allocation5 + $0x684] ss:$8 sps:$4 sm:$0xff]  }
 0x5d1   : > { %6548 = vmatmul.mubr.bf16.gmra.mrb[136].mxu0 %v13326_v0  ;;  %v11150_v27 = vpop.f32.mrb[19].mxu1 }
 0x5d2   : > { %19477 = vst [vmem:[#allocation112_spill] sm:$0xff] %v16267_v8  ;;  %19478 = vst [vmem:[#allocation54_spill] sm:$0xff] %v16269_v5  ;;  %6555 = vmatprep.mubr.bf16.mxu0 %v13327_v35  ;;  %11851 = vmatpush3.bf16.msra.mxu0 %v13328_v24  ;;  %v16273_v42 = vadd.f32 %v11150_v27, %v11149_v39  ;;  %v13332_v24 = vld [vmem:[#allocation7 + $0x28] sm:$0xff]   ;;  %v13333_v39 = vld [vmem:[#allocation7 + $0x70] sm:$0xff]  }
 0x5d3   : > { %11852 = vmatprep.subr.bf16.mxu0 %v13329_v62  ;;  %6411 = vmatmul.mubr.bf16.gmra.mrb[124].mxu1 %v13330_v48  ;;  %v13334_v8 = vld [vmem:[#allocation5 + $0x730] ss:$8 sps:$4 sm:$0xff]  }
 0x5d4   : > { %19479 = vst [vmem:[#allocation46_spill] sm:$0xff] %v16273_v42  ;;  %v11234_v1 = vpop.f32.mrb[32].mxu0  ;;  %6418 = vmatprep.mubr.bf16.mxu1 %v13331_v12  ;;  %v13335_v12 = vld [vmem:[#allocation5 + $0x744] ss:$8 sps:$4 sm:$0xff]   ;;  %v13337_v5 = vld [vmem:[#allocation7 + $0x78] sm:$0xff]  }
 0x5d5   : > { %v11235_v0 = vpop.f32.mrb[33].mxu0 }
 0x5d6   : > { %v16277_v6 = vadd.f32 %v11235_v0, %v11234_v1  ;;  %v11237_v35 = vpop.f32.mrb[34].mxu0  ;;  %11853 = vmatpush3.bf16.msra.mxu0 %v13332_v24  ;;  %v11152_v36 = vpop.f32.mrb[20].mxu1  ;;  %v13336_v1 = vld [vmem:[#allocation7 + $0x30] sm:$0xff]  }
 0x5d7   : > { %v11238_v22 = vpop.f32.mrb[35].mxu0  ;;  %11854 = vmatprep.subr.bf16.mxu0 %v13333_v39  ;;  %v11153_v27 = vpop.f32.mrb[21].mxu1  ;;  %v13338_v39 = vld [vmem:[#allocation5 + $0x680] ss:$8 sps:$4 sm:$0xff]  }
 0x5d8   : > { %19480 = vst [vmem:[#allocation106_spill] sm:$0xff] %v16277_v6  ;;  %v16279_v62 = vadd.f32 %v11238_v22, %v11237_v35  ;;  %v16281_v48 = vadd.f32 %v11153_v27, %v11152_v36  ;;  %v11155_v31 = vpop.f32.mrb[22].mxu1  ;;  %v13339_v35 = vld [vmem:[#allocation5 + $0x694] ss:$8 sps:$4 sm:$0xff]  }
 0x5d9   : > { %6556 = vmatmul.mubr.bf16.gmra.mrb[140].mxu0 %v13334_v8  ;;  %v11156_v55 = vpop.f32.mrb[23].mxu1 }
 0x5da   : > { %19481 = vst [vmem:[#allocation43_spill] sm:$0xff] %v16279_v62  ;;  %19482 = vst [vmem:[#allocation114_spill] sm:$0xff] %v16281_v48  ;;  %6563 = vmatprep.mubr.bf16.mxu0 %v13335_v12  ;;  %11855 = vmatpush3.bf16.msra.mxu0 %v13336_v1  ;;  %v16285_v24 = vadd.f32 %v11156_v55, %v11155_v31  ;;  %v13340_v1 = vld [vmem:[#allocation7 + $0x38] sm:$0xff]   ;;  %v13341_v31 = vld [vmem:[#allocation7 + $0x140] sm:$0xff]  }
 0x5db   : > { %11856 = vmatprep.subr.bf16.mxu0 %v13337_v5  ;;  %6419 = vmatmul.mubr.bf16.gmra.mrb[128].mxu1 %v13338_v39  ;;  %v13342_v62 = vld [vmem:[#allocation5 + $0x740] ss:$8 sps:$4 sm:$0xff]  }
 0x5dc   : > { %19483 = vst [vmem:[#allocation111_spill] sm:$0xff] %v16285_v24  ;;  %v11240_v22 = vpop.f32.mrb[36].mxu0  ;;  %6426 = vmatprep.mubr.bf16.mxu1 %v13339_v35  ;;  %v13343_v35 = vld [vmem:[#allocation5 + $0x754] ss:$8 sps:$4 sm:$0xff]  }
 0x5dd   : > { %v11241_v8 = vpop.f32.mrb[37].mxu0 }
 0x5de   : > { %v16289_v27 = vadd.f32 %v11241_v8, %v11240_v22  ;;  %v11243_v12 = vpop.f32.mrb[38].mxu0  ;;  %11857 = vmatpush3.bf16.msra.mxu0 %v13340_v1  ;;  %v11158_v42 = vpop.f32.mrb[24].mxu1  ;;  %v13344_v1 = vld [vmem:[#allocation5 + $0x690] ss:$8 sps:$4 sm:$0xff]  }
 0x5df   : > { %v11244_v0 = vpop.f32.mrb[39].mxu0  ;;  %12066 = vmatprep.subr.bf16.mxu0 %v13341_v31  ;;  %v11159_v55 = vpop.f32.mrb[25].mxu1 }
 0x5e0   : > { %19484 = vst [vmem:[#allocation109_spill] sm:$0xff] %v16289_v27  ;;  %v16291_v5 = vadd.f32 %v11244_v0, %v11243_v12  ;;  %v16293_v39 = vadd.f32 %v11159_v55, %v11158_v42  ;;  %v11161_v6 = vpop.f32.mrb[26].mxu1  ;;  %v13345_v12 = vld [vmem:[#allocation5 + $0x6a4] ss:$8 sps:$4 sm:$0xff]  }
 0x5e1   : > { %6564 = vmatmul.mubr.bf16.gmra.mrb[144].mxu0 %v13342_v62  ;;  %v11162_v36 = vpop.f32.mrb[27].mxu1  ;;  %v13347_v27 = vld [vmem:[#allocation5 + $0x764] ss:$8 sps:$4 sm:$0xff]  }
 0x5e2   : > { %19485 = vst [vmem:[#allocation47_spill] sm:$0xff] %v16291_v5  ;;  %19486 = vst [vmem:[#allocation45_spill] sm:$0xff] %v16293_v39  ;;  %6571 = vmatprep.mubr.bf16.mxu0 %v13343_v35  ;;  %v16297_v8 = vadd.f32 %v11162_v36, %v11161_v6  ;;  %v13346_v36 = vld [vmem:[#allocation5 + $0x750] ss:$8 sps:$4 sm:$0xff]  }
 0x5e3   : > { %6427 = vmatmul.mubr.bf16.gmra.mrb[132].mxu1 %v13344_v1 }
 0x5e4   : > { %19487 = vst [vmem:[#allocation110_spill] sm:$0xff] %v16297_v8  ;;  %v11246_v48 = vpop.f32.mrb[40].mxu0  ;;  %6434 = vmatprep.mubr.bf16.mxu1 %v13345_v12 }
 0x5e5   : > { %v11247_v42 = vpop.f32.mrb[41].mxu0 }
 0x5e6   : > { %v16301_v31 = vadd.f32 %v11247_v42, %v11246_v48  ;;  %v11249_v62 = vpop.f32.mrb[42].mxu0  ;;  %v11164_v55 = vpop.f32.mrb[28].mxu1  ;;  %v13348_v48 = vld [vmem:[#allocation5 + $0x6a0] ss:$8 sps:$4 sm:$0xff]  }
 0x5e7   : > { %v11250_v24 = vpop.f32.mrb[43].mxu0  ;;  %v11165_v35 = vpop.f32.mrb[29].mxu1 }
 0x5e8   : > { %19488 = vst [vmem:[#allocation108_spill] sm:$0xff] %v16301_v31  ;;  %v16303_v50 = vadd.f32 %v11250_v24, %v11249_v62  ;;  %v16305_v22 = vadd.f32 %v11165_v35, %v11164_v55  ;;  %v11167_v6 = vpop.f32.mrb[30].mxu1  ;;  %v13349_v62 = vld [vmem:[#allocation5 + $0x6b4] ss:$8 sps:$4 sm:$0xff]  }
 0x5e9   : > { %6572 = vmatmul.mubr.bf16.gmra.mrb[148].mxu0 %v13346_v36  ;;  %v11168_v1 = vpop.f32.mrb[31].mxu1  ;;  %v13351_v31 = vld [vmem:[#allocation5 + $0x774] ss:$8 sps:$4 sm:$0xff]  }
 0x5ea   : > { %19489 = vst [vmem:[#allocation52_spill] sm:$0xff] %v16303_v50  ;;  %19490 = vst [vmem:[#allocation49_spill] sm:$0xff] %v16305_v22  ;;  %6579 = vmatprep.mubr.bf16.mxu0 %v13347_v27  ;;  %v16309_v0 = vadd.f32 %v11168_v1, %v11167_v6  ;;  %v13350_v1 = vld [vmem:[#allocation5 + $0x760] ss:$8 sps:$4 sm:$0xff]  }
 0x5eb   : > { %6435 = vmatmul.mubr.bf16.gmra.mrb[136].mxu1 %v13348_v48 }
 0x5ec   : > { %19491 = vst [vmem:[#allocation56_spill] sm:$0xff] %v16309_v0  ;;  %v11252_v42 = vpop.f32.mrb[44].mxu0  ;;  %6442 = vmatprep.mubr.bf16.mxu1 %v13349_v62 }
 0x5ed   : > { %v11253_v55 = vpop.f32.mrb[45].mxu0 }
 0x5ee   : > { %v16313_v35 = vadd.f32 %v11253_v55, %v11252_v42  ;;  %v11255_v36 = vpop.f32.mrb[46].mxu0  ;;  %v11298_v39 = vpop.f32.mrb[32].mxu1  ;;  %v13352_v42 = vld [vmem:[#allocation5 + $0x6b0] ss:$8 sps:$4 sm:$0xff]  }
 0x5ef   : > { %v11256_v8 = vpop.f32.mrb[47].mxu0  ;;  %v11299_v27 = vpop.f32.mrb[33].mxu1 }
 0x5f0   : > { %19492 = vst [vmem:[#allocation55_spill] sm:$0xff] %v16313_v35  ;;  %v16315_v5 = vadd.f32 %v11256_v8, %v11255_v36  ;;  %v16317_v12 = vadd.f32 %v11299_v27, %v11298_v39  ;;  %v11301_v6 = vpop.f32.mrb[34].mxu1  ;;  %v13353_v36 = vld [vmem:[#allocation5 + $0x6c4] ss:$8 sps:$4 sm:$0xff]  }
 0x5f1   : > { %6580 = vmatmul.mubr.bf16.gmra.mrb[152].mxu0 %v13350_v1  ;;  %v11302_v48 = vpop.f32.mrb[35].mxu1  ;;  %v13355_v35 = vld [vmem:[#allocation5 + $0x784] ss:$8 sps:$4 sm:$0xff]  }
 0x5f2   : > { %19493 = vst [vmem:[#allocation53_spill] sm:$0xff] %v16315_v5  ;;  %19494 = vst [vmem:[#allocation115_spill] sm:$0xff] %v16317_v12  ;;  %6587 = vmatprep.mubr.bf16.mxu0 %v13351_v31  ;;  %v16321_v24 = vadd.f32 %v11302_v48, %v11301_v6  ;;  %v13354_v48 = vld [vmem:[#allocation5 + $0x770] ss:$8 sps:$4 sm:$0xff]  }
 0x5f3   : > { %6443 = vmatmul.mubr.bf16.gmra.mrb[140].mxu1 %v13352_v42 }
 0x5f4   : > { %19495 = vst [vmem:[#allocation123_spill] sm:$0xff] %v16321_v24  ;;  %v11258_v55 = vpop.f32.mrb[48].mxu0  ;;  %6450 = vmatprep.mubr.bf16.mxu1 %v13353_v36 }
 0x5f5   : > { %v11259_v39 = vpop.f32.mrb[49].mxu0 }
 0x5f6   : > { %v16325_v27 = vadd.f32 %v11259_v39, %v11258_v55  ;;  %v11261_v1 = vpop.f32.mrb[50].mxu0  ;;  %v11304_v22 = vpop.f32.mrb[36].mxu1  ;;  %v13356_v55 = vld [vmem:[#allocation5 + $0x6c0] ss:$8 sps:$4 sm:$0xff]  }
 0x5f7   : > { %v11262_v0 = vpop.f32.mrb[51].mxu0  ;;  %v11305_v31 = vpop.f32.mrb[37].mxu1 }
 0x5f8   : > { %19496 = vst [vmem:[#allocation124_spill] sm:$0xff] %v16325_v27  ;;  %v16327_v50 = vadd.f32 %v11262_v0, %v11261_v1  ;;  %v16329_v62 = vadd.f32 %v11305_v31, %v11304_v22  ;;  %v11307_v6 = vpop.f32.mrb[38].mxu1  ;;  %v13357_v1 = vld [vmem:[#allocation5 + $0x6d4] ss:$8 sps:$4 sm:$0xff]  }
 0x5f9   : > { %6588 = vmatmul.mubr.bf16.gmra.mrb[156].mxu0 %v13354_v48  ;;  %v11308_v42 = vpop.f32.mrb[39].mxu1  ;;  %v13359_v27 = vld [vmem:[#allocation5 + $0x794] ss:$8 sps:$4 sm:$0xff]  }
 0x5fa   : > { %19497 = vst [vmem:[#allocation125_spill] sm:$0xff] %v16327_v50  ;;  %19498 = vst [vmem:[#allocation126_spill] sm:$0xff] %v16329_v62  ;;  %6595 = vmatprep.mubr.bf16.mxu0 %v13355_v35  ;;  %v16333_v8 = vadd.f32 %v11308_v42, %v11307_v6  ;;  %v13358_v42 = vld [vmem:[#allocation5 + $0x780] ss:$8 sps:$4 sm:$0xff]  }
 0x5fb   : > { %6451 = vmatmul.mubr.bf16.gmra.mrb[144].mxu1 %v13356_v55 }
 0x5fc   : > { %19499 = vst [vmem:[#allocation127_spill] sm:$0xff] %v16333_v8  ;;  %v11264_v39 = vpop.f32.mrb[52].mxu0  ;;  %6458 = vmatprep.mubr.bf16.mxu1 %v13357_v1 }
 0x5fd   : > { %v11265_v22 = vpop.f32.mrb[53].mxu0 }
 0x5fe   : > { %v16337_v31 = vadd.f32 %v11265_v22, %v11264_v39  ;;  %v11267_v48 = vpop.f32.mrb[54].mxu0  ;;  %v11310_v5 = vpop.f32.mrb[40].mxu1  ;;  %v13360_v39 = vld [vmem:[#allocation5 + $0x6d0] ss:$8 sps:$4 sm:$0xff]  }
 0x5ff   : > { %v11268_v12 = vpop.f32.mrb[55].mxu0  ;;  %v11311_v35 = vpop.f32.mrb[41].mxu1 }
 0x600   : > { %19500 = vst [vmem:[#allocation128_spill] sm:$0xff] %v16337_v31  ;;  %v16339_v24 = vadd.f32 %v11268_v12, %v11267_v48  ;;  %v16341_v36 = vadd.f32 %v11311_v35, %v11310_v5  ;;  %v11313_v6 = vpop.f32.mrb[42].mxu1  ;;  %v13361_v48 = vld [vmem:[#allocation5 + $0x6e4] ss:$8 sps:$4 sm:$0xff]  }
 0x601   : > { %6596 = vmatmul.mubr.bf16.gmra.mrb[160].mxu0 %v13358_v42  ;;  %v11314_v55 = vpop.f32.mrb[43].mxu1  ;;  %v13363_v31 = vld [vmem:[#allocation5 + $0x7a4] ss:$8 sps:$4 sm:$0xff]  }
 0x602   : > { %19501 = vst [vmem:[#allocation129_spill] sm:$0xff] %v16339_v24  ;;  %19502 = vst [vmem:[#allocation130_spill] sm:$0xff] %v16341_v36  ;;  %6603 = vmatprep.mubr.bf16.mxu0 %v13359_v27  ;;  %v16345_v0 = vadd.f32 %v11314_v55, %v11313_v6  ;;  %v13362_v55 = vld [vmem:[#allocation5 + $0x790] ss:$8 sps:$4 sm:$0xff]  }
 0x603   : > { %6459 = vmatmul.mubr.bf16.gmra.mrb[148].mxu1 %v13360_v39 }
 0x604   : > { %19503 = vst [vmem:[#allocation131_spill] sm:$0xff] %v16345_v0  ;;  %v11270_v22 = vpop.f32.mrb[56].mxu0  ;;  %6466 = vmatprep.mubr.bf16.mxu1 %v13361_v48 }
 0x605   : > { %v11271_v5 = vpop.f32.mrb[57].mxu0 }
 0x606   : > { %v16349_v35 = vadd.f32 %v11271_v5, %v11270_v22  ;;  %v11273_v42 = vpop.f32.mrb[58].mxu0  ;;  %v11316_v50 = vpop.f32.mrb[44].mxu1  ;;  %v13364_v22 = vld [vmem:[#allocation5 + $0x6e0] ss:$8 sps:$4 sm:$0xff]  }
 0x607   : > { %v11274_v62 = vpop.f32.mrb[59].mxu0  ;;  %v11317_v27 = vpop.f32.mrb[45].mxu1 }
 0x608   : > { %19504 = vst [vmem:[#allocation132_spill] sm:$0xff] %v16349_v35  ;;  %v16351_v8 = vadd.f32 %v11274_v62, %v11273_v42  ;;  %v16353_v1 = vadd.f32 %v11317_v27, %v11316_v50  ;;  %v11319_v6 = vpop.f32.mrb[46].mxu1  ;;  %v13365_v42 = vld [vmem:[#allocation5 + $0x6f4] ss:$8 sps:$4 sm:$0xff]  }
 0x609   : > { %6604 = vmatmul.mubr.bf16.gmra.mrb[164].mxu0 %v13362_v55  ;;  %v11320_v39 = vpop.f32.mrb[47].mxu1  ;;  %v13367_v35 = vld [vmem:[#allocation5 + $0x7b4] ss:$8 sps:$4 sm:$0xff]  }
 0x60a   : > { %19505 = vst [vmem:[#allocation133_spill] sm:$0xff] %v16351_v8  ;;  %19506 = vst [vmem:[#allocation134_spill] sm:$0xff] %v16353_v1  ;;  %6611 = vmatprep.mubr.bf16.mxu0 %v13363_v31  ;;  %v16357_v12 = vadd.f32 %v11320_v39, %v11319_v6  ;;  %v13366_v39 = vld [vmem:[#allocation5 + $0x7a0] ss:$8 sps:$4 sm:$0xff]  }
 0x60b   : > { %6467 = vmatmul.mubr.bf16.gmra.mrb[152].mxu1 %v13364_v22 }
 0x60c   : > { %19507 = vst [vmem:[#allocation135_spill] sm:$0xff] %v16357_v12  ;;  %v11276_v5 = vpop.f32.mrb[60].mxu0  ;;  %6474 = vmatprep.mubr.bf16.mxu1 %v13365_v42 }
 0x60d   : > { %v11277_v50 = vpop.f32.mrb[61].mxu0 }
 0x60e   : > { %v16361_v27 = vadd.f32 %v11277_v50, %v11276_v5  ;;  %v11279_v55 = vpop.f32.mrb[62].mxu0  ;;  %v11322_v24 = vpop.f32.mrb[48].mxu1  ;;  %v13368_v5 = vld [vmem:[#allocation5 + $0x6f0] ss:$8 sps:$4 sm:$0xff]  }
 0x60f   : > { %v11280_v36 = vpop.f32.mrb[63].mxu0  ;;  %v11323_v31 = vpop.f32.mrb[49].mxu1 }
 0x610   : > { %19508 = vst [vmem:[#allocation136_spill] sm:$0xff] %v16361_v27  ;;  %v16363_v0 = vadd.f32 %v11280_v36, %v11279_v55  ;;  %v16365_v48 = vadd.f32 %v11323_v31, %v11322_v24  ;;  %v11325_v6 = vpop.f32.mrb[50].mxu1  ;;  %v13369_v55 = vld [vmem:[#allocation5 + $0x804] ss:$8 sps:$4 sm:$0xff]  }
 0x611   : > { %6612 = vmatmul.mubr.bf16.gmra.mrb[168].mxu0 %v13366_v39  ;;  %v11326_v22 = vpop.f32.mrb[51].mxu1  ;;  %v13371_v27 = vld [vmem:[#allocation5 + $0x7c4] ss:$8 sps:$4 sm:$0xff]  }
 0x612   : > { %19509 = vst [vmem:[#allocation137_spill] sm:$0xff] %v16363_v0  ;;  %19510 = vst [vmem:[#allocation138_spill] sm:$0xff] %v16365_v48  ;;  %6619 = vmatprep.mubr.bf16.mxu0 %v13367_v35  ;;  %v16369_v62 = vadd.f32 %v11326_v22, %v11325_v6  ;;  %v13370_v22 = vld [vmem:[#allocation5 + $0x7b0] ss:$8 sps:$4 sm:$0xff]  }
 0x613   : > { %6475 = vmatmul.mubr.bf16.gmra.mrb[156].mxu1 %v13368_v5 }
 0x614   : > { %19511 = vst [vmem:[#allocation139_spill] sm:$0xff] %v16369_v62  ;;  %v11410_v50 = vpop.f32.mrb[64].mxu0  ;;  %6708 = vmatprep.mubr.bf16.mxu1 %v13369_v55 }
 0x615   : > { %v11411_v24 = vpop.f32.mrb[65].mxu0 }
 0x616   : > { %v16373_v31 = vadd.f32 %v11411_v24, %v11410_v50  ;;  %v11413_v39 = vpop.f32.mrb[66].mxu0  ;;  %v11328_v8 = vpop.f32.mrb[52].mxu1  ;;  %v13372_v50 = vld [vmem:[#allocation5 + $0x800] ss:$8 sps:$4 sm:$0xff]  }
 0x617   : > { %v11414_v1 = vpop.f32.mrb[67].mxu0  ;;  %v11329_v35 = vpop.f32.mrb[53].mxu1 }
 0x618   : > { %19512 = vst [vmem:[#allocation140_spill] sm:$0xff] %v16373_v31  ;;  %v16375_v12 = vadd.f32 %v11414_v1, %v11413_v39  ;;  %v16377_v42 = vadd.f32 %v11329_v35, %v11328_v8  ;;  %v11331_v6 = vpop.f32.mrb[54].mxu1  ;;  %v13373_v39 = vld [vmem:[#allocation7 + $0x80] sm:$0xff]   ;;  %v13374_v8 = vld [vmem:[#allocation5 + $0x814] ss:$8 sps:$4 sm:$0xff]   ;;  %v13377_v1 = vld [vmem:[#allocation7 + $0x88] sm:$0xff]  }
 0x619   : > { %6620 = vmatmul.mubr.bf16.gmra.mrb[172].mxu0 %v13370_v22  ;;  %v11332_v5 = vpop.f32.mrb[55].mxu1  ;;  %v13375_v22 = vld [vmem:[#allocation7 + $0xc8] sm:$0xff]  }
 0x61a   : > { %19513 = vst [vmem:[#allocation141_spill] sm:$0xff] %v16377_v42  ;;  %6627 = vmatprep.mubr.bf16.mxu0 %v13371_v27  ;;  %v16381_v36 = vadd.f32 %v11332_v5, %v11331_v6  ;;  %v13376_v31 = vld [vmem:[#allocation5 + $0x7c0] ss:$8 sps:$4 sm:$0xff]   ;;  %v13379_v42 = vld [vmem:[#allocation7 + $0xd0] sm:$0xff]  }
 0x61b   : > { %6709 = vmatmul.mubr.bf16.vlgmr.msra.gmra.mrb[160].mxu1 %v13372_v50 }
 0x61c   : > { %19514 = vst [vmem:[#allocation142_spill] sm:$0xff] %v16381_v36  ;;  %v11416_v24 = vpop.f32.mrb[68].mxu0  ;;  %11955 = vmatpush3.bf16.msra.mxu1 %v13373_v39  ;;  %6716 = vmatprep.mubr.bf16.mxu1 %v13374_v8  ;;  %v13378_v8 = vld [vmem:[#allocation5 + $0x7d4] ss:$8 sps:$4 sm:$0xff]  }
 0x61d   : > { %v11417_v35 = vpop.f32.mrb[69].mxu0  ;;  %11956 = vmatprep.subr.bf16.mxu1 %v13375_v22  ;;  %v13380_v22 = vld [vmem:[#allocation5 + $0x810] ss:$8 sps:$4 sm:$0xff]  }
 0x61e   : > { %v16385_v0 = vadd.f32 %v11417_v35, %v11416_v24  ;;  %v11419_v27 = vpop.f32.mrb[70].mxu0  ;;  %v11334_v48 = vpop.f32.mrb[56].mxu1 }
 0x61f   : > { %v11420_v55 = vpop.f32.mrb[71].mxu0  ;;  %v11335_v6 = vpop.f32.mrb[57].mxu1 }
 0x620   : > { %19515 = vst [vmem:[#allocation143_spill] sm:$0xff] %v16385_v0  ;;  %v16387_v5 = vadd.f32 %v11420_v55, %v11419_v27  ;;  %v16389_v50 = vadd.f32 %v11335_v6, %v11334_v48  ;;  %v11337_v62 = vpop.f32.mrb[58].mxu1  ;;  %11957 = vmatpush3.bf16.msra.mxu1 %v13377_v1  ;;  %v13381_v27 = vld [vmem:[#allocation5 + $0x824] ss:$8 sps:$4 sm:$0xff]   ;;  %v13385_v48 = vld [vmem:[#allocation7 + $0x98] sm:$0xff]  }
 0x621   : > { %6628 = vmatmul.mubr.bf16.gmra.mrb[176].mxu0 %v13376_v31  ;;  %v11338_v39 = vpop.f32.mrb[59].mxu1  ;;  %11958 = vmatprep.subr.bf16.mxu1 %v13379_v42  ;;  %v13382_v31 = vld [vmem:[#allocation7 + $0x90] sm:$0xff]   ;;  %v13383_v42 = vld [vmem:[#allocation7 + $0xd8] sm:$0xff]  }
 0x622   : > { %19516 = vst [vmem:[#allocation144_spill] sm:$0xff] %v16387_v5  ;;  %19517 = vst [vmem:[#allocation145_spill] sm:$0xff] %v16389_v50  ;;  %6635 = vmatprep.mubr.bf16.mxu0 %v13378_v8  ;;  %v16393_v35 = vadd.f32 %v11338_v39, %v11337_v62  ;;  %v13384_v5 = vld [vmem:[#allocation5 + $0x7d0] ss:$8 sps:$4 sm:$0xff]   ;;  %v13388_v50 = vld [vmem:[#allocation5 + $0x820] ss:$8 sps:$4 sm:$0xff]  }
 0x623   : > { %6717 = vmatmul.mubr.bf16.gmra.mrb[164].mxu1 %v13380_v22 }
 0x624   : > { %19518 = vst [vmem:[#allocation146_spill] sm:$0xff] %v16393_v35  ;;  %v11422_v55 = vpop.f32.mrb[72].mxu0  ;;  %6724 = vmatprep.mubr.bf16.mxu1 %v13381_v27  ;;  %11959 = vmatpush3.bf16.msra.mxu1 %v13382_v31  ;;  %v13386_v31 = vld [vmem:[#allocation5 + $0x7e4] ss:$8 sps:$4 sm:$0xff]  }
 0x625   : > { %v11423_v1 = vpop.f32.mrb[73].mxu0  ;;  %11960 = vmatprep.subr.bf16.mxu1 %v13383_v42 }
 0x626   : > { %v16397_v6 = vadd.f32 %v11423_v1, %v11422_v55  ;;  %v11425_v8 = vpop.f32.mrb[74].mxu0  ;;  %v11340_v36 = vpop.f32.mrb[60].mxu1  ;;  %v13387_v55 = vld [vmem:[#allocation7 + $0xe0] sm:$0xff]  }
 0x627   : > { %v11426_v24 = vpop.f32.mrb[75].mxu0  ;;  %v11341_v62 = vpop.f32.mrb[61].mxu1 }
 0x628   : > { %19519 = vst [vmem:[#allocation147_spill] sm:$0xff] %v16397_v6  ;;  %v16399_v39 = vadd.f32 %v11426_v24, %v11425_v8  ;;  %v16401_v22 = vadd.f32 %v11341_v62, %v11340_v36  ;;  %v11343_v0 = vpop.f32.mrb[62].mxu1  ;;  %11961 = vmatpush3.bf16.msra.mxu1 %v13385_v48  ;;  %v13389_v8 = vld [vmem:[#allocation5 + $0x834] ss:$8 sps:$4 sm:$0xff]   ;;  %v13390_v48 = vld [vmem:[#allocation7 + $0xa0] sm:$0xff]   ;;  %v13393_v36 = vld [vmem:[#allocation7 + $0xa8] sm:$0xff]  }
 0x629   : > { %6636 = vmatmul.mubr.bf16.gmra.mrb[180].mxu0 %v13384_v5  ;;  %v11344_v27 = vpop.f32.mrb[63].mxu1  ;;  %11962 = vmatprep.subr.bf16.mxu1 %v13387_v55  ;;  %v13391_v55 = vld [vmem:[#allocation7 + $0xe8] sm:$0xff]  }
 0x62a   : > { %19520 = vst [vmem:[#allocation148_spill] sm:$0xff] %v16399_v39  ;;  %19521 = vst [vmem:[#allocation149_spill] sm:$0xff] %v16401_v22  ;;  %6643 = vmatprep.mubr.bf16.mxu0 %v13386_v31  ;;  %v16405_v42 = vadd.f32 %v11344_v27, %v11343_v0  ;;  %v13392_v39 = vld [vmem:[#allocation5 + $0x7e0] ss:$8 sps:$4 sm:$0xff]   ;;  %v13394_v22 = vld [vmem:[#allocation5 + $0x7f4] ss:$8 sps:$4 sm:$0xff]  }
 0x62b   : > { %6725 = vmatmul.mubr.bf16.gmra.mrb[168].mxu1 %v13388_v50 }
 0x62c   : > { %19522 = vst [vmem:[#allocation150_spill] sm:$0xff] %v16405_v42  ;;  %v11428_v24 = vpop.f32.mrb[76].mxu0  ;;  %6732 = vmatprep.mubr.bf16.mxu1 %v13389_v8  ;;  %11963 = vmatpush3.bf16.msra.mxu1 %v13390_v48 }
 0x62d   : > { %v11429_v5 = vpop.f32.mrb[77].mxu0  ;;  %11964 = vmatprep.subr.bf16.mxu1 %v13391_v55  ;;  %v13396_v55 = vld [vmem:[#allocation5 + $0x830] ss:$8 sps:$4 sm:$0xff]  }
 0x62e   : > { %v16409_v62 = vadd.f32 %v11429_v5, %v11428_v24  ;;  %v11431_v31 = vpop.f32.mrb[78].mxu0  ;;  %v11346_v35 = vpop.f32.mrb[64].mxu1  ;;  %v13395_v24 = vld [vmem:[#allocation7 + $0xf0] sm:$0xff]  }
 0x62f   : > { %v11432_v1 = vpop.f32.mrb[79].mxu0  ;;  %v11347_v0 = vpop.f32.mrb[65].mxu1 }
 0x630   : > { %19523 = vst [vmem:[#allocation151_spill] sm:$0xff] %v16409_v62  ;;  %v16411_v27 = vadd.f32 %v11432_v1, %v11431_v31  ;;  %v16413_v50 = vadd.f32 %v11347_v0, %v11346_v35  ;;  %v11349_v6 = vpop.f32.mrb[66].mxu1  ;;  %11965 = vmatpush3.bf16.msra.mxu1 %v13393_v36  ;;  %v13397_v31 = vld [vmem:[#allocation5 + $0x844] ss:$8 sps:$4 sm:$0xff]   ;;  %v13398_v36 = vld [vmem:[#allocation7 + $0xb0] sm:$0xff]   ;;  %v13401_v35 = vld [vmem:[#allocation7 + $0xb8] sm:$0xff]  }
 0x631   : > { %6644 = vmatmul.mubr.bf16.gmra.mrb[184].mxu0 %v13392_v39  ;;  %v11350_v8 = vpop.f32.mrb[67].mxu1  ;;  %11966 = vmatprep.subr.bf16.mxu1 %v13395_v24  ;;  %v13399_v24 = vld [vmem:[#allocation7 + $0xf8] sm:$0xff]  }
 0x632   : > { %19524 = vst [vmem:[#allocation152_spill] sm:$0xff] %v16411_v27  ;;  %19525 = vst [vmem:[#allocation153_spill] sm:$0xff] %v16413_v50  ;;  %6651 = vmatprep.mubr.bf16.mxu0 %v13394_v22  ;;  %v16417_v48 = vadd.f32 %v11350_v8, %v11349_v6  ;;  %v13400_v27 = vld [vmem:[#allocation5 + $0x7f0] ss:$8 sps:$4 sm:$0xff]  }
 0x633   : > { %6733 = vmatmul.mubr.bf16.gmra.mrb[172].mxu1 %v13396_v55 }
 0x634   : > { %v11434_v1 = vpop.f32.mrb[80].mxu0  ;;  %6740 = vmatprep.mubr.bf16.mxu1 %v13397_v31  ;;  %11967 = vmatpush3.bf16.msra.mxu1 %v13398_v36 }
 0x635   : > { %v11435_v39 = vpop.f32.mrb[81].mxu0  ;;  %11968 = vmatprep.subr.bf16.mxu1 %v13399_v24 }
 0x636   : > { %v16421_v0 = vadd.f32 %v11435_v39, %v11434_v1  ;;  %v11437_v22 = vpop.f32.mrb[82].mxu0  ;;  %v11352_v42 = vpop.f32.mrb[68].mxu1  ;;  %v19526_v1 = vpack.c.bf16 %v15945_v4, %v15943_v25  ;;  %v13402_v39 = vld [vmem:[#allocation7 + $0x1c0] sm:$0xff]  }
 0x637   : > { %v11438_v5 = vpop.f32.mrb[83].mxu0  ;;  %v11353_v6 = vpop.f32.mrb[69].mxu1 }
 0x638   : > { %v16423_v8 = vadd.f32 %v11438_v5, %v11437_v22  ;;  %v16425_v55 = vadd.f32 %v11353_v6, %v11352_v42  ;;  %v11355_v62 = vpop.f32.mrb[70].mxu1  ;;  %11969 = vmatpush3.bf16.msra.mxu1 %v13401_v35  ;;  %v13403_v5 = vld [vmem:[#allocation5 + $0x840] ss:$8 sps:$4 sm:$0xff]   ;;  %v13404_v22 = vld [vmem:[#allocation5 + $0x854] ss:$8 sps:$4 sm:$0xff]  }
 0x639   : > { %6652 = vmatmul.mubr.bf16.gmra.mrb[188].mxu0 %v13400_v27  ;;  %v11356_v31 = vpop.f32.mrb[71].mxu1  ;;  %12178 = vmatprep.subr.bf16.mxu1 %v13402_v39 }
 0x63a   : > { %6885 = vmatprep.mubr.bf16.mxu0 %v19526_v1  ;;  %v16432_v24 = vadd.f32 %v11356_v31, %v11355_v62  ;;  %v19527_v31 = vpack.c.bf16 %v15880_v32, %v15874_v28  ;;  %v13408_v32 = vld [vmem:[#allocation5 + $0x864] ss:$8 sps:$4 sm:$0xff]   ;;  %v19529_v28 = vpack.c.bf16 %v15894_v3, %v15888_v57  ;;  %v13414_v3 = vld [vmem:[#allocation5 + $0x874] ss:$8 sps:$4 sm:$0xff]   ;;  %v19531_v57 = vpack.c.bf16 %v15908_v15, %v15902_v38 }
 0x63b   : > { %6741 = vmatmul.mubr.bf16.gmra.mrb[176].mxu1 %v13403_v5  ;;  %v13420_v15 = vld [vmem:[#allocation5 + $0x884] ss:$8 sps:$4 sm:$0xff]   ;;  %v19534_v38 = vpack.c.bf16 %v15922_v20, %v15916_v61  ;;  %v13426_v20 = vld [vmem:[#allocation5 + $0x894] ss:$8 sps:$4 sm:$0xff]  }
 0x63c   : > { %v11440_v42 = vpop.f32.mrb[84].mxu0  ;;  %6748 = vmatprep.mubr.bf16.mxu1 %v13404_v22  ;;  %v19528_v22 = vpack.c.bf16 %v15959_v21, %v15957_v58 }
 0x63d   : > { %v11441_v35 = vpop.f32.mrb[85].mxu0 }
 0x63e   : > { %v16436_v6 = vadd.f32 %v11441_v35, %v11440_v42  ;;  %v11443_v25 = vpop.f32.mrb[86].mxu0  ;;  %v11358_v4 = vpop.f32.mrb[72].mxu1  ;;  %v13405_v42 = vld [vmem:[#allocation7 + $0x100] sm:$0xff]  }
 0x63f   : > { %v11444_v1 = vpop.f32.mrb[87].mxu0  ;;  %v11359_v39 = vpop.f32.mrb[73].mxu1 }
 0x640   : > { %v16438_v50 = vadd.f32 %v11444_v1, %v11443_v25  ;;  %v16440_v36 = vadd.f32 %v11359_v39, %v11358_v4  ;;  %v11361_v62 = vpop.f32.mrb[74].mxu1  ;;  %v13406_v25 = vld [vmem:[#allocation7 + $0x148] sm:$0xff]   ;;  %v13407_v4 = vld [vmem:[#allocation5 + $0x850] ss:$8 sps:$4 sm:$0xff]  }
 0x641   : > { %6886 = vmatmul.mubr.bf16.vlgmr.msra.gmra.mrb[192].mxu0 %v19527_v31  ;;  %v11362_v5 = vpop.f32.mrb[75].mxu1  ;;  %v13409_v31 = vld [vmem:[#allocation7 + $0x108] sm:$0xff]  }
 0x642   : > { %6893 = vmatprep.mubr.bf16.mxu0 %v19528_v22  ;;  %12067 = vmatpush3.bf16.msra.mxu0 %v13405_v42  ;;  %v16450_v27 = vadd.f32 %v11362_v5, %v11361_v62  ;;  %v13410_v62 = vld [vmem:[#allocation7 + $0x150] sm:$0xff]  }
 0x643   : > { %12068 = vmatprep.subr.bf16.mxu0 %v13406_v25  ;;  %6749 = vmatmul.mubr.bf16.gmra.mrb[180].mxu1 %v13407_v4 }
 0x644   : > { %v11446_v1 = vpop.f32.mrb[88].mxu0  ;;  %6756 = vmatprep.mubr.bf16.mxu1 %v13408_v32 }
 0x645   : > { %v11447_v39 = vpop.f32.mrb[89].mxu0 }
 0x646   : > { %v16454_v58 = vadd.f32 %v11447_v39, %v11446_v1  ;;  %v11449_v21 = vpop.f32.mrb[90].mxu0  ;;  %12069 = vmatpush3.bf16.msra.mxu0 %v13409_v31  ;;  %v11364_v22 = vpop.f32.mrb[76].mxu1  ;;  %v19530_v1 = vpack.c.bf16 %v15975_v51, %v15972_v47  ;;  %v13411_v39 = vld [vmem:[#allocation7 + $0x110] sm:$0xff]  }
 0x647   : > { %v11450_v42 = vpop.f32.mrb[91].mxu0  ;;  %12070 = vmatprep.subr.bf16.mxu0 %v13410_v62  ;;  %v11365_v5 = vpop.f32.mrb[77].mxu1 }
 0x648   : > { %v16456_v25 = vadd.f32 %v11450_v42, %v11449_v21  ;;  %v16458_v4 = vadd.f32 %v11365_v5, %v11364_v22  ;;  %v11367_v35 = vpop.f32.mrb[78].mxu1  ;;  %v13412_v21 = vld [vmem:[#allocation7 + $0x158] sm:$0xff]   ;;  %v13413_v22 = vld [vmem:[#allocation5 + $0x860] ss:$8 sps:$4 sm:$0xff]  }
 0x649   : > { %6894 = vmatmul.mubr.bf16.gmra.mrb[196].mxu0 %v19529_v28  ;;  %v11368_v32 = vpop.f32.mrb[79].mxu1  ;;  %v13415_v5 = vld [vmem:[#allocation7 + $0x118] sm:$0xff]  }
 0x64a   : > { %6901 = vmatprep.mubr.bf16.mxu0 %v19530_v1  ;;  %12071 = vmatpush3.bf16.msra.mxu0 %v13411_v39  ;;  %v16468_v62 = vadd.f32 %v11368_v32, %v11367_v35  ;;  %v13416_v35 = vld [vmem:[#allocation7 + $0x160] sm:$0xff]  }
 0x64b   : > { %12072 = vmatprep.subr.bf16.mxu0 %v13412_v21  ;;  %6757 = vmatmul.mubr.bf16.gmra.mrb[184].mxu1 %v13413_v22 }
 0x64c   : > { %v11452_v42 = vpop.f32.mrb[92].mxu0  ;;  %6764 = vmatprep.mubr.bf16.mxu1 %v13414_v3 }
 0x64d   : > { %v11453_v28 = vpop.f32.mrb[93].mxu0 }
 0x64e   : > { %v16472_v47 = vadd.f32 %v11453_v28, %v11452_v42  ;;  %v11455_v51 = vpop.f32.mrb[94].mxu0  ;;  %12073 = vmatpush3.bf16.msra.mxu0 %v13415_v5  ;;  %v11370_v1 = vpop.f32.mrb[80].mxu1  ;;  %v19532_v42 = vpack.c.bf16 %v15991_v17, %v15988_v40  ;;  %v13417_v28 = vld [vmem:[#allocation7 + $0x120] sm:$0xff]  }
 0x64f   : > { %v11456_v39 = vpop.f32.mrb[95].mxu0  ;;  %12074 = vmatprep.subr.bf16.mxu0 %v13416_v35  ;;  %v11371_v32 = vpop.f32.mrb[81].mxu1 }
 0x650   : > { %v16474_v21 = vadd.f32 %v11456_v39, %v11455_v51  ;;  %v16476_v22 = vadd.f32 %v11371_v32, %v11370_v1  ;;  %v11373_v31 = vpop.f32.mrb[82].mxu1  ;;  %v13418_v51 = vld [vmem:[#allocation7 + $0x168] sm:$0xff]   ;;  %v13419_v1 = vld [vmem:[#allocation5 + $0x870] ss:$8 sps:$4 sm:$0xff]  }
 0x651   : > { %6902 = vmatmul.mubr.bf16.gmra.mrb[200].mxu0 %v19531_v57  ;;  %v11374_v3 = vpop.f32.mrb[83].mxu1  ;;  %v13421_v32 = vld [vmem:[#allocation7 + $0x128] sm:$0xff]  }
 0x652   : > { %6909 = vmatprep.mubr.bf16.mxu0 %v19532_v42  ;;  %12075 = vmatpush3.bf16.msra.mxu0 %v13417_v28  ;;  %v16486_v35 = vadd.f32 %v11374_v3, %v11373_v31  ;;  %v13422_v31 = vld [vmem:[#allocation7 + $0x170] sm:$0xff]  }
 0x653   : > { %12076 = vmatprep.subr.bf16.mxu0 %v13418_v51  ;;  %6765 = vmatmul.mubr.bf16.gmra.mrb[188].mxu1 %v13419_v1 }
 0x654   : > { %v11458_v39 = vpop.f32.mrb[96].mxu0  ;;  %6772 = vmatprep.mubr.bf16.mxu1 %v13420_v15 }
 0x655   : > { %v11459_v57 = vpop.f32.mrb[97].mxu0 }
 0x656   : > { %v16490_v40 = vadd.f32 %v11459_v57, %v11458_v39  ;;  %v11461_v17 = vpop.f32.mrb[98].mxu0  ;;  %12077 = vmatpush3.bf16.msra.mxu0 %v13421_v32  ;;  %v11376_v42 = vpop.f32.mrb[84].mxu1  ;;  %v19535_v39 = vpack.c.bf16 %v16007_v11, %v16004_v54  ;;  %v13423_v32 = vld [vmem:[#allocation7 + $0x130] sm:$0xff]  }
 0x657   : > { %v11462_v28 = vpop.f32.mrb[99].mxu0  ;;  %12078 = vmatprep.subr.bf16.mxu0 %v13422_v31  ;;  %v11377_v3 = vpop.f32.mrb[85].mxu1 }
 0x658   : > { %v16492_v51 = vadd.f32 %v11462_v28, %v11461_v17  ;;  %v16494_v1 = vadd.f32 %v11377_v3, %v11376_v42  ;;  %v11379_v5 = vpop.f32.mrb[86].mxu1  ;;  %v13424_v17 = vld [vmem:[#allocation7 + $0x178] sm:$0xff]   ;;  %v13425_v42 = vld [vmem:[#allocation5 + $0x880] ss:$8 sps:$4 sm:$0xff]  }
 0x659   : > { %6910 = vmatmul.mubr.bf16.gmra.mrb[204].mxu0 %v19534_v38  ;;  %v11380_v15 = vpop.f32.mrb[87].mxu1  ;;  %v13427_v3 = vld [vmem:[#allocation7 + $0x138] sm:$0xff]  }
 0x65a   : > { %19533 = vst [vmem:[#allocation154_spill] sm:$0xff] %v16494_v1  ;;  %6917 = vmatprep.mubr.bf16.mxu0 %v19535_v39  ;;  %12079 = vmatpush3.bf16.msra.mxu0 %v13423_v32  ;;  %v16504_v31 = vadd.f32 %v11380_v15, %v11379_v5  ;;  %v16510_v5 = vld [vmem:[#allocation7 + $0x200] sm:$0xff]   ;;  %v13429_v1 = vld [vmem:[#allocation5 + $0x890] ss:$8 sps:$4 sm:$0xff]  }
 0x65b   : > { %12080 = vmatprep.subr.bf16.mxu0 %v13424_v17  ;;  %6773 = vmatmul.mubr.bf16.gmra.mrb[192].mxu1 %v13425_v42 }
 0x65c   : > { %v11464_v28 = vpop.f32.mrb[100].mxu0  ;;  %6780 = vmatprep.mubr.bf16.mxu1 %v13426_v20  ;;  %v19537_v20 = vpack.c.bf16 %v15936_v23, %v15930_v44 }
 0x65d   : > { %v11465_v38 = vpop.f32.mrb[101].mxu0 }
 0x65e   : > { %v16508_v11 = vadd.f32 %v11465_v38, %v11464_v28  ;;  %v11467_v54 = vpop.f32.mrb[102].mxu0  ;;  %12081 = vmatpush3.bf16.msra.mxu0 %v13427_v3  ;;  %v11382_v39 = vpop.f32.mrb[88].mxu1  ;;  %v19538_v38 = vpack.c.bf16 %v16021_v34, %v16019_v49 }
 0x65f   : > { %v11468_v32 = vpop.f32.mrb[103].mxu0  ;;  %12362 = vmatprep.subr.bf16.mxu0 %v16510_v5  ;;  %v11383_v15 = vpop.f32.mrb[89].mxu1 }
 0x660   : > { %v16513_v17 = vadd.f32 %v11468_v32, %v11467_v54  ;;  %v16515_v42 = vadd.f32 %v11383_v15, %v11382_v39  ;;  %v11385_v61 = vpop.f32.mrb[90].mxu1  ;;  %v13430_v32 = vld [vmem:[#allocation5 + $0x8a4] ss:$8 sps:$4 sm:$0xff]   ;;  %v13431_v39 = vld [vmem:[#allocation5 + $0x8a0] ss:$8 sps:$4 sm:$0xff]  }
 0x661   : > { %6918 = vmatmul.mubr.bf16.gmra.mrb[208].mxu0 %v19537_v20  ;;  %v11386_v28 = vpop.f32.mrb[91].mxu1 }
 0x662   : > { %19536 = vst [vmem:[#allocation155_spill] sm:$0xff] %v16515_v42  ;;  %6925 = vmatprep.mubr.bf16.mxu0 %v19538_v38  ;;  %v16525_v57 = vadd.f32 %v11386_v28, %v11385_v61 }
 0x663   : > { %6781 = vmatmul.mubr.bf16.gmra.mrb[196].mxu1 %v13429_v1  ;;  %v19541_v1 = vpack.c.bf16 %v15951_v19, %v15947_v2 }
 0x664   : > { %19539 = vst [vmem:[#allocation156_spill] sm:$0xff] %v16525_v57  ;;  %v11470_v54 = vpop.f32.mrb[104].mxu0  ;;  %6788 = vmatprep.mubr.bf16.mxu1 %v13430_v32  ;;  %v19542_v32 = vpack.c.bf16 %v16037_v29, %v16033_v7  ;;  %v13453_v57 = vld [vmem:[#allocation7 + $0x1f0] sm:$0xff]  }
 0x665   : > { %v11471_v44 = vpop.f32.mrb[105].mxu0 }
 0x666   : > { %v16529_v23 = vadd.f32 %v11471_v44, %v11470_v54  ;;  %v11473_v15 = vpop.f32.mrb[106].mxu0  ;;  %v11388_v20 = vpop.f32.mrb[92].mxu1 }
 0x667   : > { %v11474_v34 = vpop.f32.mrb[107].mxu0  ;;  %v11389_v49 = vpop.f32.mrb[93].mxu1 }
 0x668   : > { %v16531_v38 = vadd.f32 %v11474_v34, %v11473_v15  ;;  %v16533_v3 = vadd.f32 %v11389_v49, %v11388_v20  ;;  %v11391_v61 = vpop.f32.mrb[94].mxu1  ;;  %v13432_v34 = vld [vmem:[#allocation5 + $0x8b4] ss:$8 sps:$4 sm:$0xff]   ;;  %v13433_v20 = vld [vmem:[#allocation5 + $0x8b0] ss:$8 sps:$4 sm:$0xff]  }
 0x669   : > { %6926 = vmatmul.mubr.bf16.gmra.mrb[212].mxu0 %v19541_v1  ;;  %v11392_v28 = vpop.f32.mrb[95].mxu1 }
 0x66a   : > { %19540 = vst [vmem:[#allocation157_spill] sm:$0xff] %v16533_v3  ;;  %6933 = vmatprep.mubr.bf16.mxu0 %v19542_v32  ;;  %v16543_v44 = vadd.f32 %v11392_v28, %v11391_v61 }
 0x66b   : > { %6789 = vmatmul.mubr.bf16.gmra.mrb[200].mxu1 %v13431_v39  ;;  %v19544_v39 = vpack.c.bf16 %v15967_v37, %v15961_v46 }
 0x66c   : > { %19543 = vst [vmem:[#allocation158_spill] sm:$0xff] %v16543_v44  ;;  %v11476_v15 = vpop.f32.mrb[108].mxu0  ;;  %6796 = vmatprep.mubr.bf16.mxu1 %v13432_v34  ;;  %v19545_v34 = vpack.c.bf16 %v16053_v14, %v16049_v41  ;;  %v19566_v44 = vld [vmem:[#allocation88_spill] sm:$0xff] }
 0x66d   : > { %v11477_v2 = vpop.f32.mrb[109].mxu0 }
 0x66e   : > { %v16547_v19 = vadd.f32 %v11477_v2, %v11476_v15  ;;  %v11479_v49 = vpop.f32.mrb[110].mxu0  ;;  %v11522_v1 = vpop.f32.mrb[96].mxu1 }
 0x66f   : > { %v11480_v7 = vpop.f32.mrb[111].mxu0  ;;  %v11523_v29 = vpop.f32.mrb[97].mxu1 }
 0x670   : > { %v16549_v32 = vadd.f32 %v11480_v7, %v11479_v49  ;;  %v16551_v54 = vadd.f32 %v11523_v29, %v11522_v1  ;;  %v11525_v61 = vpop.f32.mrb[98].mxu1  ;;  %v13434_v7 = vld [vmem:[#allocation5 + $0x8c4] ss:$8 sps:$4 sm:$0xff]   ;;  %v13435_v1 = vld [vmem:[#allocation5 + $0x8c0] ss:$8 sps:$4 sm:$0xff]  }
 0x671   : > { %6934 = vmatmul.mubr.bf16.gmra.mrb[216].mxu0 %v19544_v39  ;;  %v11526_v28 = vpop.f32.mrb[99].mxu1 }
 0x672   : > { %6941 = vmatprep.mubr.bf16.mxu0 %v19545_v34  ;;  %v16561_v2 = vadd.f32 %v11526_v28, %v11525_v61 }
 0x673   : > { %6797 = vmatmul.mubr.bf16.gmra.mrb[204].mxu1 %v13433_v20  ;;  %v19546_v20 = vpack.c.bf16 %v15983_v53, %v15977_v52 }
 0x674   : > { %v11482_v49 = vpop.f32.mrb[112].mxu0  ;;  %6804 = vmatprep.mubr.bf16.mxu1 %v13434_v7  ;;  %v19547_v7 = vpack.c.bf16 %v16069_v30, %v16065_v9 }
 0x675   : > { %v11483_v46 = vpop.f32.mrb[113].mxu0 }
 0x676   : > { %v16565_v37 = vadd.f32 %v11483_v46, %v11482_v49  ;;  %v11485_v29 = vpop.f32.mrb[114].mxu0  ;;  %v11528_v39 = vpop.f32.mrb[100].mxu1 }
 0x677   : > { %v11486_v41 = vpop.f32.mrb[115].mxu0  ;;  %v11529_v14 = vpop.f32.mrb[101].mxu1 }
 0x678   : > { %v16567_v34 = vadd.f32 %v11486_v41, %v11485_v29  ;;  %v16569_v15 = vadd.f32 %v11529_v14, %v11528_v39  ;;  %v11531_v61 = vpop.f32.mrb[102].mxu1  ;;  %v13436_v41 = vld [vmem:[#allocation5 + $0x8d4] ss:$8 sps:$4 sm:$0xff]   ;;  %v13437_v39 = vld [vmem:[#allocation5 + $0x8d0] ss:$8 sps:$4 sm:$0xff]  }
 0x679   : > { %6942 = vmatmul.mubr.bf16.gmra.mrb[220].mxu0 %v19546_v20  ;;  %v11532_v28 = vpop.f32.mrb[103].mxu1 }
 0x67a   : > { %6949 = vmatprep.mubr.bf16.mxu0 %v19547_v7  ;;  %v16579_v46 = vadd.f32 %v11532_v28, %v11531_v61 }
 0x67b   : > { %6805 = vmatmul.mubr.bf16.gmra.mrb[208].mxu1 %v13435_v1  ;;  %v19549_v1 = vpack.c.bf16 %v15999_v45, %v15993_v59 }
 0x67c   : > { %v11488_v29 = vpop.f32.mrb[116].mxu0  ;;  %6812 = vmatprep.mubr.bf16.mxu1 %v13436_v41  ;;  %v19550_v41 = vpack.c.bf16 %v16084_v13, %v16081_v33 }
 0x67d   : > { %v11489_v52 = vpop.f32.mrb[117].mxu0 }
 0x67e   : > { %v16583_v53 = vadd.f32 %v11489_v52, %v11488_v29  ;;  %v11491_v14 = vpop.f32.mrb[118].mxu0  ;;  %v11534_v20 = vpop.f32.mrb[104].mxu1 }
 0x67f   : > { %v11492_v9 = vpop.f32.mrb[119].mxu0  ;;  %v11535_v30 = vpop.f32.mrb[105].mxu1 }
 0x680   : > { %v16585_v7 = vadd.f32 %v11492_v9, %v11491_v14  ;;  %v16587_v49 = vadd.f32 %v11535_v30, %v11534_v20  ;;  %v11537_v61 = vpop.f32.mrb[106].mxu1  ;;  %v13438_v9 = vld [vmem:[#allocation5 + $0x8e4] ss:$8 sps:$4 sm:$0xff]   ;;  %v13439_v20 = vld [vmem:[#allocation5 + $0x8e0] ss:$8 sps:$4 sm:$0xff]  }
 0x681   : > { %6950 = vmatmul.mubr.bf16.gmra.mrb[224].mxu0 %v19549_v1  ;;  %v11538_v28 = vpop.f32.mrb[107].mxu1 }
 0x682   : > { %19548 = vst [vmem:[#allocation159_spill] sm:$0xff] %v16587_v49  ;;  %6957 = vmatprep.mubr.bf16.mxu0 %v19550_v41  ;;  %v16597_v52 = vadd.f32 %v11538_v28, %v11537_v61 }
 0x683   : > { %6813 = vmatmul.mubr.bf16.gmra.mrb[212].mxu1 %v13437_v39  ;;  %v19552_v39 = vpack.c.bf16 %v16015_v43, %v16009_v18 }
 0x684   : > { %v11494_v14 = vpop.f32.mrb[120].mxu0  ;;  %6820 = vmatprep.mubr.bf16.mxu1 %v13438_v9  ;;  %v19553_v9 = vpack.c.bf16 %v16096_v10, %v16094_v26 }
 0x685   : > { %v11495_v59 = vpop.f32.mrb[121].mxu0 }
 0x686   : > { %v16601_v45 = vadd.f32 %v11495_v59, %v11494_v14  ;;  %v11497_v30 = vpop.f32.mrb[122].mxu0  ;;  %v11540_v1 = vpop.f32.mrb[108].mxu1 }
 0x687   : > { %v11498_v33 = vpop.f32.mrb[123].mxu0  ;;  %v11541_v13 = vpop.f32.mrb[109].mxu1 }
 0x688   : > { %v16603_v41 = vadd.f32 %v11498_v33, %v11497_v30  ;;  %v16605_v29 = vadd.f32 %v11541_v13, %v11540_v1  ;;  %v11543_v61 = vpop.f32.mrb[110].mxu1  ;;  %v13440_v33 = vld [vmem:[#allocation5 + $0x8f4] ss:$8 sps:$4 sm:$0xff]   ;;  %v13441_v1 = vld [vmem:[#allocation5 + $0x8f0] ss:$8 sps:$4 sm:$0xff]  }
 0x689   : > { %6958 = vmatmul.mubr.bf16.gmra.mrb[228].mxu0 %v19552_v39  ;;  %v11544_v28 = vpop.f32.mrb[111].mxu1 }
 0x68a   : > { %19551 = vst [vmem:[#allocation160_spill] sm:$0xff] %v16605_v29  ;;  %6965 = vmatprep.mubr.bf16.mxu0 %v19553_v9  ;;  %v16615_v59 = vadd.f32 %v11544_v28, %v11543_v61 }
 0x68b   : > { %6821 = vmatmul.mubr.bf16.gmra.mrb[216].mxu1 %v13439_v20  ;;  %v19558_v20 = vpack.c.bf16 %v16028_v63, %v16023_v56 }
 0x68c   : > { %19554 = vst [vmem:[#allocation161_spill] sm:$0xff] %v16615_v59  ;;  %v11500_v30 = vpop.f32.mrb[124].mxu0  ;;  %6828 = vmatprep.mubr.bf16.mxu1 %v13440_v33  ;;  %v19559_v33 = vpack.c.bf16 %v16108_v60, %v16106_v16  ;;  %v13445_v59 = vld [vmem:[#allocation7 + $0x1d0] sm:$0xff]  }
 0x68d   : > { %v11501_v43 = vpop.f32.mrb[125].mxu0 }
 0x68e   : > { %v16619_v18 = vadd.f32 %v11501_v43, %v11500_v30  ;;  %v11503_v13 = vpop.f32.mrb[126].mxu0  ;;  %v11546_v39 = vpop.f32.mrb[112].mxu1 }
 0x68f   : > { %v11504_v10 = vpop.f32.mrb[127].mxu0  ;;  %v11547_v26 = vpop.f32.mrb[113].mxu1 }
 0x690   : > { %19555 = vst [vmem:[#allocation162_spill] sm:$0xff] %v16619_v18  ;;  %v16621_v9 = vadd.f32 %v11504_v10, %v11503_v13  ;;  %v16623_v14 = vadd.f32 %v11547_v26, %v11546_v39  ;;  %v11549_v61 = vpop.f32.mrb[114].mxu1  ;;  %v19561_v10 = vld [vmem:[#allocation28_spill] sm:$0xff]  ;;  %v19562_v26 = vld [vmem:[#allocation21_spill] sm:$0xff] }
 0x691   : > { %6966 = vmatmul.mubr.bf16.gmra.mrb[232].mxu0 %v19558_v20  ;;  %v11550_v28 = vpop.f32.mrb[115].mxu1  ;;  %v19563_v56 = vpack.c.bf16 %v19561_v10, %v19562_v26  ;;  %v19569_v10 = vld [vmem:[#allocation100_spill] sm:$0xff] }
 0x692   : > { %19556 = vst [vmem:[#allocation163_spill] sm:$0xff] %v16621_v9  ;;  %19557 = vst [vmem:[#allocation164_spill] sm:$0xff] %v16623_v14  ;;  %6973 = vmatprep.mubr.bf16.mxu0 %v19559_v33  ;;  %v16633_v43 = vadd.f32 %v11550_v28, %v11549_v61  ;;  %v19565_v28 = vld [vmem:[#allocation86_spill] sm:$0xff]  ;;  %v13449_v9 = vld [vmem:[#allocation7 + $0x1e0] sm:$0xff]  }
 0x693   : > { %6829 = vmatmul.mubr.bf16.gmra.mrb[220].mxu1 %v13441_v1  ;;  %v19567_v29 = vpack.c.bf16 %v19565_v28, %v19566_v44  ;;  %v19568_v14 = vld [vmem:[#allocation98_spill] sm:$0xff]  ;;  %v19575_v44 = vld [vmem:[#allocation32_spill] sm:$0xff] }
 0x694   : > { %19560 = vst [vmem:[#allocation165_spill] sm:$0xff] %v16633_v43  ;;  %v11634_v13 = vpop.f32.mrb[128].mxu0  ;;  %7046 = vmatprep.mubr.bf16.mxu1 %v19563_v56  ;;  %v19570_v26 = vpack.c.bf16 %v19568_v14, %v19569_v10  ;;  %v13442_v43 = vld [vmem:[#allocation7 + $0x180] sm:$0xff]   ;;  %v13443_v10 = vld [vmem:[#allocation7 + $0x1c8] sm:$0xff]  }
 0x695   : > { %v11635_v63 = vpop.f32.mrb[129].mxu0 }
 0x696   : > { %v16640_v20 = vadd.f32 %v11635_v63, %v11634_v13  ;;  %v11637_v60 = vpop.f32.mrb[130].mxu0  ;;  %v11552_v16 = vpop.f32.mrb[116].mxu1  ;;  %v19572_v63 = vld [vmem:[#allocation93_spill] sm:$0xff] }
 0x697   : > { %v11638_v33 = vpop.f32.mrb[131].mxu0  ;;  %v11553_v3 = vpop.f32.mrb[117].mxu1 }
 0x698   : > { %v16642_v30 = vadd.f32 %v11638_v33, %v11637_v60  ;;  %v16644_v61 = vadd.f32 %v11553_v3, %v11552_v16  ;;  %v11555_v1 = vpop.f32.mrb[118].mxu1  ;;  %v19573_v60 = vld [vmem:[#allocation95_spill] sm:$0xff] }
 0x699   : > { %6974 = vmatmul.mubr.bf16.gmra.mrb[236].mxu0 %v19567_v29  ;;  %v11556_v39 = vpop.f32.mrb[119].mxu1  ;;  %v19574_v33 = vpack.c.bf16 %v19572_v63, %v19573_v60  ;;  %v19576_v29 = vld [vmem:[#allocation25_spill] sm:$0xff] }
 0x69a   : > { %19564 = vst [vmem:[#allocation28_spill] sm:$0xff] %v16644_v61  ;;  %6981 = vmatprep.mubr.bf16.mxu0 %v19570_v26  ;;  %v16654_v56 = vadd.f32 %v11556_v39, %v11555_v1  ;;  %v19577_v28 = vpack.c.bf16 %v19575_v44, %v19576_v29  ;;  %v19579_v61 = vld [vmem:[#allocation85_spill] sm:$0xff] }
 0x69b   : > { %7047 = vmatmul.mubr.bf16.vlgmr.msra.gmra.mrb[224].mxu1 %v19574_v33  ;;  %v13444_v29 = vld [vmem:[#allocation7 + $0x188] sm:$0xff]  }
 0x69c   : > { %19571 = vst [vmem:[#allocation21_spill] sm:$0xff] %v16654_v56  ;;  %v11640_v3 = vpop.f32.mrb[132].mxu0  ;;  %7054 = vmatprep.mubr.bf16.mxu1 %v19577_v28  ;;  %12179 = vmatpush3.bf16.msra.mxu1 %v13442_v43  ;;  %v19580_v56 = vld [vmem:[#allocation87_spill] sm:$0xff]  ;;  %v19582_v28 = vld [vmem:[#allocation121_spill] sm:$0xff] }
 0x69d   : > { %v11641_v14 = vpop.f32.mrb[133].mxu0  ;;  %12180 = vmatprep.subr.bf16.mxu1 %v13443_v10  ;;  %v19581_v44 = vpack.c.bf16 %v19579_v61, %v19580_v56  ;;  %v19583_v10 = vld [vmem:[#allocation97_spill] sm:$0xff] }
 0x69e   : > { %v16664_v26 = vadd.f32 %v11641_v14, %v11640_v3  ;;  %v11643_v39 = vpop.f32.mrb[134].mxu0  ;;  %v11558_v1 = vpop.f32.mrb[120].mxu1  ;;  %v19584_v3 = vpack.c.bf16 %v19582_v28, %v19583_v10  ;;  %v13446_v28 = vld [vmem:[#allocation7 + $0x190] sm:$0xff]  }
 0x69f   : > { %v11644_v13 = vpop.f32.mrb[135].mxu0  ;;  %v11559_v63 = vpop.f32.mrb[121].mxu1 }
 0x6a0   : > { %v16666_v60 = vadd.f32 %v11644_v13, %v11643_v39  ;;  %v16668_v33 = vadd.f32 %v11559_v63, %v11558_v1  ;;  %v11561_v16 = vpop.f32.mrb[122].mxu1  ;;  %12181 = vmatpush3.bf16.msra.mxu1 %v13444_v29  ;;  %v19586_v39 = vld [vmem:[#allocation99_spill] sm:$0xff]  ;;  %v19587_v1 = vld [vmem:[#allocation120_spill] sm:$0xff]  ;;  %v19590_v29 = vld [vmem:[#allocation29_spill] sm:$0xff] }
 0x6a1   : > { %6982 = vmatmul.mubr.bf16.gmra.mrb[240].mxu0 %v19581_v44  ;;  %v11562_v43 = vpop.f32.mrb[123].mxu1  ;;  %12182 = vmatprep.subr.bf16.mxu1 %v13445_v59  ;;  %v19588_v63 = vpack.c.bf16 %v19586_v39, %v19587_v1  ;;  %v19589_v44 = vld [vmem:[#allocation36_spill] sm:$0xff] }
 0x6a2   : > { %19578 = vst [vmem:[#allocation86_spill] sm:$0xff] %v16668_v33  ;;  %6989 = vmatprep.mubr.bf16.mxu0 %v19584_v3  ;;  %v16678_v13 = vadd.f32 %v11562_v43, %v11561_v16  ;;  %v19591_v18 = vpack.c.bf16 %v19589_v44, %v19590_v29  ;;  %v13447_v16 = vld [vmem:[#allocation7 + $0x1d8] sm:$0xff]  }
 0x6a3   : > { %7055 = vmatmul.mubr.bf16.gmra.mrb[228].mxu1 %v19588_v63  ;;  %v19593_v33 = vld [vmem:[#allocation90_spill] sm:$0xff] }
 0x6a4   : > { %19585 = vst [vmem:[#allocation88_spill] sm:$0xff] %v16678_v13  ;;  %v11646_v61 = vpop.f32.mrb[136].mxu0  ;;  %7062 = vmatprep.mubr.bf16.mxu1 %v19591_v18  ;;  %12183 = vmatpush3.bf16.msra.mxu1 %v13446_v28  ;;  %v19594_v13 = vld [vmem:[#allocation92_spill] sm:$0xff]  ;;  %v13448_v18 = vld [vmem:[#allocation7 + $0x198] sm:$0xff]  }
 0x6a5   : > { %v11647_v10 = vpop.f32.mrb[137].mxu0  ;;  %12184 = vmatprep.subr.bf16.mxu1 %v13447_v16  ;;  %v19595_v44 = vpack.c.bf16 %v19593_v33, %v19594_v13  ;;  %v19597_v28 = vld [vmem:[#allocation20_spill] sm:$0xff] }
 0x6a6   : > { %v16688_v3 = vadd.f32 %v11647_v10, %v11646_v61  ;;  %v11649_v59 = vpop.f32.mrb[138].mxu0  ;;  %v11564_v43 = vpop.f32.mrb[124].mxu1  ;;  %v19596_v61 = vld [vmem:[#allocation18_spill] sm:$0xff] }
 0x6a7   : > { %v11650_v14 = vpop.f32.mrb[139].mxu0  ;;  %v11565_v39 = vpop.f32.mrb[125].mxu1  ;;  %v19598_v10 = vpack.c.bf16 %v19596_v61, %v19597_v28  ;;  %v13450_v28 = vld [vmem:[#allocation7 + $0x1a0] sm:$0xff]  }
 0x6a8   : > { %v16690_v1 = vadd.f32 %v11650_v14, %v11649_v59  ;;  %v16692_v63 = vadd.f32 %v11565_v39, %v11564_v43  ;;  %v11567_v56 = vpop.f32.mrb[126].mxu1  ;;  %12185 = vmatpush3.bf16.msra.mxu1 %v13448_v18  ;;  %v19600_v59 = vld [vmem:[#allocation122_spill] sm:$0xff]  ;;  %v19601_v43 = vld [vmem:[#allocation119_spill] sm:$0xff]  ;;  %v19604_v18 = vld [vmem:[#allocation33_spill] sm:$0xff] }
 0x6a9   : > { %6990 = vmatmul.mubr.bf16.gmra.mrb[244].mxu0 %v19595_v44  ;;  %v11568_v29 = vpop.f32.mrb[127].mxu1  ;;  %12186 = vmatprep.subr.bf16.mxu1 %v13449_v9  ;;  %v19602_v39 = vpack.c.bf16 %v19600_v59, %v19601_v43  ;;  %v19603_v44 = vld [vmem:[#allocation40_spill] sm:$0xff] }
 0x6aa   : > { %19592 = vst [vmem:[#allocation98_spill] sm:$0xff] %v16692_v63  ;;  %6997 = vmatprep.mubr.bf16.mxu0 %v19598_v10  ;;  %v16702_v14 = vadd.f32 %v11568_v29, %v11567_v56  ;;  %v19605_v42 = vpack.c.bf16 %v19603_v44, %v19604_v18  ;;  %v13451_v56 = vld [vmem:[#allocation7 + $0x1e8] sm:$0xff]  }
 0x6ab   : > { %7063 = vmatmul.mubr.bf16.gmra.mrb[232].mxu1 %v19602_v39  ;;  %v19608_v63 = vld [vmem:[#allocation89_spill] sm:$0xff] }
 0x6ac   : > { %19599 = vst [vmem:[#allocation100_spill] sm:$0xff] %v16702_v14  ;;  %v11652_v33 = vpop.f32.mrb[140].mxu0  ;;  %7070 = vmatprep.mubr.bf16.mxu1 %v19605_v42  ;;  %12187 = vmatpush3.bf16.msra.mxu1 %v13450_v28  ;;  %v19609_v14 = vld [vmem:[#allocation91_spill] sm:$0xff]  ;;  %v13452_v42 = vld [vmem:[#allocation7 + $0x1a8] sm:$0xff]  }
 0x6ad   : > { %v11653_v61 = vpop.f32.mrb[141].mxu0  ;;  %12188 = vmatprep.subr.bf16.mxu1 %v13451_v56  ;;  %v19610_v44 = vpack.c.bf16 %v19608_v63, %v19609_v14 }
 0x6ae   : > { %v16712_v10 = vadd.f32 %v11653_v61, %v11652_v33  ;;  %v11655_v9 = vpop.f32.mrb[142].mxu0  ;;  %v11570_v29 = vpop.f32.mrb[128].mxu1  ;;  %v19611_v33 = vld [vmem:[#allocation24_spill] sm:$0xff]  ;;  %v19612_v61 = vld [vmem:[#allocation17_spill] sm:$0xff] }
 0x6af   : > { %v11656_v16 = vpop.f32.mrb[143].mxu0  ;;  %v11571_v59 = vpop.f32.mrb[129].mxu1  ;;  %v19613_v28 = vpack.c.bf16 %v19611_v33, %v19612_v61  ;;  %v13454_v61 = vld [vmem:[#allocation7 + $0x1b0] sm:$0xff]  }
 0x6b0   : > { %19606 = vst [vmem:[#allocation93_spill] sm:$0xff] %v16712_v10  ;;  %v16714_v43 = vadd.f32 %v11656_v16, %v11655_v9  ;;  %v16716_v39 = vadd.f32 %v11571_v59, %v11570_v29  ;;  %v11573_v13 = vpop.f32.mrb[130].mxu1  ;;  %12189 = vmatpush3.bf16.msra.mxu1 %v13452_v42  ;;  %v19615_v9 = vld [vmem:[#allocation22_spill] sm:$0xff]  ;;  %v19616_v29 = vld [vmem:[#allocation16_spill] sm:$0xff]  ;;  %v19619_v42 = vld [vmem:[#allocation37_spill] sm:$0xff] }
 0x6b1   : > { %6998 = vmatmul.mubr.bf16.gmra.mrb[248].mxu0 %v19610_v44  ;;  %v11574_v18 = vpop.f32.mrb[131].mxu1  ;;  %12190 = vmatprep.subr.bf16.mxu1 %v13453_v57  ;;  %v19617_v59 = vpack.c.bf16 %v19615_v9, %v19616_v29  ;;  %v19618_v44 = vld [vmem:[#allocation102_spill] sm:$0xff] }
 0x6b2   : > { %19607 = vst [vmem:[#allocation95_spill] sm:$0xff] %v16716_v39  ;;  %7005 = vmatprep.mubr.bf16.mxu0 %v19613_v28  ;;  %v16726_v16 = vadd.f32 %v11574_v18, %v11573_v13  ;;  %v19620_v49 = vpack.c.bf16 %v19618_v44, %v19619_v42  ;;  %v13455_v13 = vld [vmem:[#allocation7 + $0x1f8] sm:$0xff]  }
 0x6b3   : > { %7071 = vmatmul.mubr.bf16.gmra.mrb[236].mxu1 %v19617_v59  ;;  %v19624_v39 = vld [vmem:[#allocation94_spill] sm:$0xff] }
 0x6b4   : > { %19614 = vst [vmem:[#allocation32_spill] sm:$0xff] %v16726_v16  ;;  %v11658_v63 = vpop.f32.mrb[144].mxu0  ;;  %7078 = vmatprep.mubr.bf16.mxu1 %v19620_v49  ;;  %12191 = vmatpush3.bf16.msra.mxu1 %v13454_v61  ;;  %v19625_v16 = vld [vmem:[#allocation96_spill] sm:$0xff]  ;;  %v13456_v49 = vld [vmem:[#allocation7 + $0x1b8] sm:$0xff]  }
 0x6b5   : > { %v11659_v33 = vpop.f32.mrb[145].mxu0  ;;  %12192 = vmatprep.subr.bf16.mxu1 %v13455_v13  ;;  %v19626_v44 = vpack.c.bf16 %v19624_v39, %v19625_v16  ;;  %v19633_v16 = vld [vmem:[#allocation107_spill] sm:$0xff] }
 0x6b6   : > { %v16736_v28 = vadd.f32 %v11659_v33, %v11658_v63  ;;  %v11661_v57 = vpop.f32.mrb[146].mxu0  ;;  %v11576_v18 = vpop.f32.mrb[132].mxu1  ;;  %v19627_v63 = vld [vmem:[#allocation140_spill] sm:$0xff] }
 0x6b7   : > { %v11662_v56 = vpop.f32.mrb[147].mxu0  ;;  %v11577_v9 = vpop.f32.mrb[133].mxu1  ;;  %v19628_v33 = vpack.c.bf16 %v16375_v12, %v19627_v63 }
 0x6b8   : > { %19621 = vst [vmem:[#allocation25_spill] sm:$0xff] %v16736_v28  ;;  %v16738_v29 = vadd.f32 %v11662_v56, %v11661_v57  ;;  %v16740_v59 = vadd.f32 %v11577_v9, %v11576_v18  ;;  %v11579_v14 = vpop.f32.mrb[134].mxu1  ;;  %12193 = vmatpush3.bf16.msra.mxu1 %v13456_v49  ;;  %v19630_v56 = vld [vmem:[#allocation26_spill] sm:$0xff]  ;;  %v19631_v57 = vld [vmem:[#allocation19_spill] sm:$0xff] }
 0x6b9   : > { %7006 = vmatmul.mubr.bf16.gmra.mrb[252].mxu0 %v19626_v44  ;;  %v11580_v42 = vpop.f32.mrb[135].mxu1  ;;  %v19632_v18 = vpack.c.bf16 %v19630_v56, %v19631_v57  ;;  %v19634_v44 = vld [vmem:[#allocation42_spill] sm:$0xff]  ;;  %v19638_v57 = vld [vmem:[#allocation123_spill] sm:$0xff] }
 0x6ba   : > { %19622 = vst [vmem:[#allocation85_spill] sm:$0xff] %v16738_v29  ;;  %19623 = vst [vmem:[#allocation87_spill] sm:$0xff] %v16740_v59  ;;  %7207 = vmatprep.mubr.bf16.mxu0 %v19628_v33  ;;  %v16750_v13 = vadd.f32 %v11580_v42, %v11579_v14  ;;  %v19635_v49 = vpack.c.bf16 %v19633_v16, %v19634_v44  ;;  %v19641_v59 = vld [vmem:[#allocation144_spill] sm:$0xff]  ;;  %v19642_v16 = vld [vmem:[#allocation143_spill] sm:$0xff] }
 0x6bb   : > { %7079 = vmatmul.mubr.bf16.gmra.mrb[240].mxu1 %v19632_v18  ;;  %v19639_v18 = vld [vmem:[#allocation115_spill] sm:$0xff]  ;;  %v19643_v44 = vpack.c.bf16 %v19641_v59, %v19642_v16  ;;  %v19649_v59 = vld [vmem:[#allocation50_spill] sm:$0xff] }
 0x6bc   : > { %19629 = vst [vmem:[#allocation121_spill] sm:$0xff] %v16750_v13  ;;  %v11664_v9 = vpop.f32.mrb[148].mxu0  ;;  %7086 = vmatprep.mubr.bf16.mxu1 %v19635_v49  ;;  %v19640_v29 = vpack.c.bf16 %v19638_v57, %v19639_v18  ;;  %v19645_v49 = vld [vmem:[#allocation30_spill] sm:$0xff]  ;;  %v19648_v57 = vld [vmem:[#allocation48_spill] sm:$0xff] }
 0x6bd   : > { %v11665_v10 = vpop.f32.mrb[149].mxu0  ;;  %v19650_v18 = vpack.c.bf16 %v19648_v57, %v19649_v59  ;;  %v19657_v59 = vld [vmem:[#allocation148_spill] sm:$0xff] }
 0x6be   : > { %v16760_v12 = vadd.f32 %v11665_v10, %v11664_v9  ;;  %v11667_v63 = vpop.f32.mrb[150].mxu0  ;;  %v11582_v33 = vpop.f32.mrb[136].mxu1  ;;  %v13458_v10 = vld [vmem:[#allocation7 + $0x210] sm:$0xff]  }
 0x6bf   : > { %v11668_v61 = vpop.f32.mrb[151].mxu0  ;;  %v11583_v14 = vpop.f32.mrb[137].mxu1 }
 0x6c0   : > { %19636 = vst [vmem:[#allocation97_spill] sm:$0xff] %v16760_v12  ;;  %v16762_v42 = vadd.f32 %v11668_v61, %v11667_v63  ;;  %v16764_v28 = vadd.f32 %v11583_v14, %v11582_v33  ;;  %v11585_v56 = vpop.f32.mrb[138].mxu1  ;;  %v13457_v61 = vld [vmem:[#allocation7 + $0x208] sm:$0xff]   ;;  %v19646_v63 = vld [vmem:[#allocation23_spill] sm:$0xff] }
 0x6c1   : > { %7208 = vmatmul.mubr.bf16.vlgmr.msra.gmra.mrb[0].mxu0 %v19640_v29  ;;  %v11586_v39 = vpop.f32.mrb[139].mxu1  ;;  %v19647_v33 = vpack.c.bf16 %v19645_v49, %v19646_v63  ;;  %v19654_v29 = vld [vmem:[#allocation127_spill] sm:$0xff] }
 0x6c2   : > { %19637 = vst [vmem:[#allocation99_spill] sm:$0xff] %v16764_v28  ;;  %7215 = vmatprep.mubr.bf16.mxu0 %v19643_v44  ;;  %12363 = vmatpush3.bf16.msra.mxu0 %v16510_v5  ;;  %v16775_v9 = vadd.f32 %v11586_v39, %v11585_v56  ;;  %v19655_v28 = vld [vmem:[#allocation126_spill] sm:$0xff] }
 0x6c3   : > { %12364 = vmatprep.subr.bf16.mxu0 %v13457_v61  ;;  %7087 = vmatmul.mubr.bf16.gmra.mrb[244].mxu1 %v19647_v33 }
 0x6c4   : > { %19644 = vst [vmem:[#allocation120_spill] sm:$0xff] %v16775_v9  ;;  %v11670_v14 = vpop.f32.mrb[152].mxu0  ;;  %7094 = vmatprep.mubr.bf16.mxu1 %v19650_v18  ;;  %v19656_v9 = vpack.c.bf16 %v19654_v29, %v19655_v28  ;;  %v19665_v29 = vld [vmem:[#allocation51_spill] sm:$0xff] }
 0x6c5   : > { %v11671_v16 = vpop.f32.mrb[153].mxu0  ;;  %v19669_v28 = vld [vmem:[#allocation131_spill] sm:$0xff] }
 0x6c6   : > { %v16785_v44 = vadd.f32 %v11671_v16, %v11670_v14  ;;  %v11673_v5 = vpop.f32.mrb[154].mxu0  ;;  %12365 = vmatpush3.bf16.msra.mxu0 %v13457_v61  ;;  %v11588_v39 = vpop.f32.mrb[140].mxu1  ;;  %v19658_v14 = vld [vmem:[#allocation147_spill] sm:$0xff] }
 0x6c7   : > { %v11674_v56 = vpop.f32.mrb[155].mxu0  ;;  %12366 = vmatprep.subr.bf16.mxu0 %v13458_v10  ;;  %v11589_v13 = vpop.f32.mrb[141].mxu1  ;;  %v19659_v18 = vpack.c.bf16 %v19657_v59, %v19658_v14  ;;  %v13460_v61 = vld [vmem:[#allocation7 + $0x220] sm:$0xff]  }
 0x6c8   : > { %19651 = vst [vmem:[#allocation36_spill] sm:$0xff] %v16785_v44  ;;  %v16787_v49 = vadd.f32 %v11674_v56, %v11673_v5  ;;  %v16789_v63 = vadd.f32 %v11589_v13, %v11588_v39  ;;  %v11591_v33 = vpop.f32.mrb[142].mxu1  ;;  %v13459_v5 = vld [vmem:[#allocation7 + $0x218] sm:$0xff]  }
 0x6c9   : > { %7216 = vmatmul.mubr.bf16.gmra.mrb[4].mxu0 %v19656_v9  ;;  %v11592_v57 = vpop.f32.mrb[143].mxu1  ;;  %v19661_v13 = vld [vmem:[#allocation34_spill] sm:$0xff]  ;;  %v19662_v39 = vld [vmem:[#allocation27_spill] sm:$0xff]  ;;  %v19664_v9 = vld [vmem:[#allocation112_spill] sm:$0xff] }
 0x6ca   : > { %19652 = vst [vmem:[#allocation29_spill] sm:$0xff] %v16787_v49  ;;  %19653 = vst [vmem:[#allocation90_spill] sm:$0xff] %v16789_v63  ;;  %7223 = vmatprep.mubr.bf16.mxu0 %v19659_v18  ;;  %12367 = vmatpush3.bf16.msra.mxu0 %v13458_v10  ;;  %v16799_v16 = vadd.f32 %v11592_v57, %v11591_v33  ;;  %v19663_v56 = vpack.c.bf16 %v19661_v13, %v19662_v39  ;;  %v19670_v63 = vld [vmem:[#allocation130_spill] sm:$0xff] }
 0x6cb   : > { %12368 = vmatprep.subr.bf16.mxu0 %v13459_v5  ;;  %v19666_v59 = vpack.c.bf16 %v19664_v9, %v19665_v29  ;;  %v19672_v29 = vld [vmem:[#allocation152_spill] sm:$0xff] }
 0x6cc   : > { %19660 = vst [vmem:[#allocation92_spill] sm:$0xff] %v16799_v16  ;;  %7095 = vmatmul.mubr.bf16.gmra.mrb[248].mxu1 %v19663_v56  ;;  %v11676_v12 = vpop.f32.mrb[156].mxu0  ;;  %v19671_v16 = vpack.c.bf16 %v19669_v28, %v19670_v63  ;;  %v19680_v28 = vld [vmem:[#allocation106_spill] sm:$0xff]  ;;  %v19684_v63 = vld [vmem:[#allocation135_spill] sm:$0xff] }
 0x6cd   : > { %7102 = vmatprep.mubr.bf16.mxu1 %v19666_v59  ;;  %v11677_v14 = vpop.f32.mrb[157].mxu0 }
 0x6ce   : > { %v16809_v18 = vadd.f32 %v11677_v14, %v11676_v12  ;;  %v11679_v10 = vpop.f32.mrb[158].mxu0  ;;  %12369 = vmatpush3.bf16.msra.mxu0 %v13459_v5  ;;  %v11594_v33 = vpop.f32.mrb[144].mxu1  ;;  %v19673_v12 = vld [vmem:[#allocation151_spill] sm:$0xff]  ;;  %v13462_v5 = vld [vmem:[#allocation7 + $0x230] sm:$0xff]  }
 0x6cf   : > { %v11680_v57 = vpop.f32.mrb[159].mxu0  ;;  %12370 = vmatprep.subr.bf16.mxu0 %v13460_v61  ;;  %v11595_v44 = vpop.f32.mrb[145].mxu1  ;;  %v19674_v59 = vpack.c.bf16 %v19672_v29, %v19673_v12 }
 0x6d0   : > { %19667 = vst [vmem:[#allocation18_spill] sm:$0xff] %v16809_v18  ;;  %v16811_v13 = vadd.f32 %v11680_v57, %v11679_v10  ;;  %v16813_v39 = vadd.f32 %v11595_v44, %v11594_v33  ;;  %v11597_v56 = vpop.f32.mrb[146].mxu1  ;;  %v13461_v10 = vld [vmem:[#allocation7 + $0x228] sm:$0xff]   ;;  %v19676_v44 = vld [vmem:[#allocation38_spill] sm:$0xff]  ;;  %v19677_v33 = vld [vmem:[#allocation31_spill] sm:$0xff] }
 0x6d1   : > { %7224 = vmatmul.mubr.bf16.gmra.mrb[8].mxu0 %v19671_v16  ;;  %v11598_v9 = vpop.f32.mrb[147].mxu1  ;;  %v19678_v57 = vpack.c.bf16 %v19676_v44, %v19677_v33  ;;  %v19679_v16 = vld [vmem:[#allocation43_spill] sm:$0xff] }
 0x6d2   : > { %19668 = vst [vmem:[#allocation20_spill] sm:$0xff] %v16813_v39  ;;  %7231 = vmatprep.mubr.bf16.mxu0 %v19674_v59  ;;  %12371 = vmatpush3.bf16.msra.mxu0 %v13460_v61  ;;  %v16823_v14 = vadd.f32 %v11598_v9, %v11597_v56  ;;  %v19681_v29 = vpack.c.bf16 %v19679_v16, %v19680_v28  ;;  %v19685_v39 = vld [vmem:[#allocation134_spill] sm:$0xff] }
 0x6d3   : > { %12372 = vmatprep.subr.bf16.mxu0 %v13461_v10 }
 0x6d4   : > { %19675 = vst [vmem:[#allocation122_spill] sm:$0xff] %v16823_v14  ;;  %7103 = vmatmul.mubr.bf16.gmra.mrb[252].mxu1 %v19678_v57  ;;  %v11682_v49 = vpop.f32.mrb[160].mxu0  ;;  %v19686_v14 = vpack.c.bf16 %v19684_v63, %v19685_v39  ;;  %v19693_v63 = vld [vmem:[#allocation109_spill] sm:$0xff] }
 0x6d5   : > { %7110 = vmatprep.mubr.bf16.mxu1 %v19681_v29  ;;  %v11683_v12 = vpop.f32.mrb[161].mxu0  ;;  %v13463_v29 = vld [vmem:[#allocation7 + $0x238] sm:$0xff]  }
 0x6d6   : > { %v16833_v59 = vadd.f32 %v11683_v12, %v11682_v49  ;;  %v11685_v61 = vpop.f32.mrb[162].mxu0  ;;  %12373 = vmatpush3.bf16.msra.mxu0 %v13461_v10  ;;  %v11600_v56 = vpop.f32.mrb[148].mxu1  ;;  %v19687_v49 = vpack.c.bf16 %v16423_v8, %v16421_v0  ;;  %v19690_v12 = vld [vmem:[#allocation35_spill] sm:$0xff] }
 0x6d7   : > { %v11686_v9 = vpop.f32.mrb[163].mxu0  ;;  %12374 = vmatprep.subr.bf16.mxu0 %v13462_v5  ;;  %v11601_v18 = vpop.f32.mrb[149].mxu1 }
 0x6d8   : > { %19682 = vst [vmem:[#allocation119_spill] sm:$0xff] %v16833_v59  ;;  %v16835_v44 = vadd.f32 %v11686_v9, %v11685_v61  ;;  %v16837_v33 = vadd.f32 %v11601_v18, %v11600_v56  ;;  %v11603_v57 = vpop.f32.mrb[150].mxu1  ;;  %v19689_v18 = vld [vmem:[#allocation39_spill] sm:$0xff]  ;;  %v19697_v59 = vld [vmem:[#allocation138_spill] sm:$0xff] }
 0x6d9   : > { %7232 = vmatmul.mubr.bf16.gmra.mrb[12].mxu0 %v19686_v14  ;;  %v11604_v16 = vpop.f32.mrb[151].mxu1  ;;  %v19691_v61 = vpack.c.bf16 %v19689_v18, %v19690_v12  ;;  %v19692_v14 = vld [vmem:[#allocation47_spill] sm:$0xff] }
 0x6da   : > { %19683 = vst [vmem:[#allocation40_spill] sm:$0xff] %v16837_v33  ;;  %7239 = vmatprep.mubr.bf16.mxu0 %v19687_v49  ;;  %12375 = vmatpush3.bf16.msra.mxu0 %v13462_v5  ;;  %v16847_v28 = vadd.f32 %v11604_v16, %v11603_v57  ;;  %v19694_v0 = vpack.c.bf16 %v19692_v14, %v19693_v63  ;;  %v19701_v63 = vld [vmem:[#allocation101_spill] sm:$0xff] }
 0x6db   : > { %12376 = vmatprep.subr.bf16.mxu0 %v13463_v29  ;;  %v19699_v14 = vpack.c.bf16 %v16438_v50, %v16436_v6 }
 0x6dc   : > { %19688 = vst [vmem:[#allocation33_spill] sm:$0xff] %v16847_v28  ;;  %7111 = vmatmul.mubr.bf16.gmra.mrb[0].mxu1 %v19691_v61  ;;  %v11688_v56 = vpop.f32.mrb[164].mxu0  ;;  %v19696_v61 = vld [vmem:[#allocation139_spill] sm:$0xff] }
 0x6dd   : > { %7118 = vmatprep.mubr.bf16.mxu1 %v19694_v0  ;;  %v11689_v8 = vpop.f32.mrb[165].mxu0  ;;  %v19698_v39 = vpack.c.bf16 %v19696_v61, %v19697_v59  ;;  %v19702_v0 = vld [vmem:[#allocation103_spill] sm:$0xff]  ;;  %v19704_v59 = vld [vmem:[#allocation52_spill] sm:$0xff] }
 0x6de   : > { %v16857_v9 = vadd.f32 %v11689_v8, %v11688_v56  ;;  %v11691_v5 = vpop.f32.mrb[166].mxu0  ;;  %12377 = vmatpush3.bf16.msra.mxu0 %v13463_v29  ;;  %v11606_v57 = vpop.f32.mrb[152].mxu1  ;;  %v19703_v8 = vpack.c.bf16 %v19701_v63, %v19702_v0  ;;  %v19708_v0 = vld [vmem:[#allocation142_spill] sm:$0xff] }
 0x6df   : > { %v11692_v16 = vpop.f32.mrb[167].mxu0  ;;  %v11607_v49 = vpop.f32.mrb[153].mxu1 }
 0x6e0   : > { %v16859_v10 = vadd.f32 %v11692_v16, %v11691_v5  ;;  %v16861_v18 = vadd.f32 %v11607_v49, %v11606_v57  ;;  %v11609_v12 = vpop.f32.mrb[154].mxu1 }
 0x6e1   : > { %7240 = vmatmul.mubr.bf16.gmra.mrb[16].mxu0 %v19698_v39  ;;  %v11610_v33 = vpop.f32.mrb[155].mxu1  ;;  %v19705_v39 = vld [vmem:[#allocation108_spill] sm:$0xff] }
 0x6e2   : > { %19695 = vst [vmem:[#allocation89_spill] sm:$0xff] %v16861_v18  ;;  %7247 = vmatprep.mubr.bf16.mxu0 %v19699_v14  ;;  %v16871_v56 = vadd.f32 %v11610_v33, %v11609_v12  ;;  %v19706_v16 = vpack.c.bf16 %v19704_v59, %v19705_v39  ;;  %v19711_v59 = vpack.c.bf16 %v16456_v25, %v16454_v58 }
 0x6e4   : > { %19700 = vst [vmem:[#allocation91_spill] sm:$0xff] %v16871_v56  ;;  %7119 = vmatmul.mubr.bf16.gmra.mrb[4].mxu1 %v19703_v8  ;;  %v11694_v5 = vpop.f32.mrb[168].mxu0  ;;  %v19709_v8 = vld [vmem:[#allocation141_spill] sm:$0xff] }
 0x6e5   : > { %7126 = vmatprep.mubr.bf16.mxu1 %v19706_v16  ;;  %v11695_v49 = vpop.f32.mrb[169].mxu0  ;;  %v19710_v28 = vpack.c.bf16 %v19708_v0, %v19709_v8  ;;  %v19713_v16 = vld [vmem:[#allocation105_spill] sm:$0xff] }
 0x6e6   : > { %v16881_v50 = vadd.f32 %v11695_v49, %v11694_v5  ;;  %v11697_v6 = vpop.f32.mrb[170].mxu0  ;;  %v11612_v61 = vpop.f32.mrb[156].mxu1  ;;  %v19714_v49 = vld [vmem:[#allocation44_spill] sm:$0xff] }
 0x6e7   : > { %v11698_v14 = vpop.f32.mrb[171].mxu0  ;;  %v11613_v33 = vpop.f32.mrb[157].mxu1 }
 0x6e8   : > { %v16883_v12 = vadd.f32 %v11698_v14, %v11697_v6  ;;  %v16885_v29 = vadd.f32 %v11613_v33, %v11612_v61  ;;  %v11615_v63 = vpop.f32.mrb[158].mxu1  ;;  %v19715_v6 = vpack.c.bf16 %v19713_v16, %v19714_v49  ;;  %v19716_v33 = vld [vmem:[#allocation53_spill] sm:$0xff]  ;;  %v19719_v49 = vld [vmem:[#allocation146_spill] sm:$0xff] }
 0x6e9   : > { %7248 = vmatmul.mubr.bf16.gmra.mrb[20].mxu0 %v19710_v28  ;;  %v11616_v57 = vpop.f32.mrb[159].mxu1  ;;  %v19717_v28 = vld [vmem:[#allocation55_spill] sm:$0xff] }
 0x6ea   : > { %19707 = vst [vmem:[#allocation24_spill] sm:$0xff] %v16885_v29  ;;  %7255 = vmatprep.mubr.bf16.mxu0 %v19711_v59  ;;  %v16895_v39 = vadd.f32 %v11616_v57, %v11615_v63  ;;  %v19718_v0 = vpack.c.bf16 %v19716_v33, %v19717_v28  ;;  %v19722_v33 = vpack.c.bf16 %v16474_v21, %v16472_v47 }
 0x6ec   : > { %19712 = vst [vmem:[#allocation17_spill] sm:$0xff] %v16895_v39  ;;  %7127 = vmatmul.mubr.bf16.gmra.mrb[8].mxu1 %v19715_v6  ;;  %v11700_v61 = vpop.f32.mrb[172].mxu0  ;;  %v19720_v6 = vld [vmem:[#allocation145_spill] sm:$0xff] }
 0x6ed   : > { %7134 = vmatprep.mubr.bf16.mxu1 %v19718_v0  ;;  %v11701_v8 = vpop.f32.mrb[173].mxu0  ;;  %v19721_v56 = vpack.c.bf16 %v19719_v49, %v19720_v6  ;;  %v19723_v0 = vld [vmem:[#allocation41_spill] sm:$0xff] }
 0x6ee   : > { %v16905_v58 = vadd.f32 %v11701_v8, %v11700_v61  ;;  %v11703_v25 = vpop.f32.mrb[174].mxu0  ;;  %v11746_v59 = vpop.f32.mrb[160].mxu1 }
 0x6ef   : > { %v11704_v5 = vpop.f32.mrb[175].mxu0  ;;  %v11747_v57 = vpop.f32.mrb[161].mxu1 }
 0x6f0   : > { %v16907_v63 = vadd.f32 %v11704_v5, %v11703_v25  ;;  %v16909_v18 = vadd.f32 %v11747_v57, %v11746_v59  ;;  %v11749_v16 = vpop.f32.mrb[162].mxu1  ;;  %v19724_v5 = vld [vmem:[#allocation104_spill] sm:$0xff]  ;;  %v19726_v57 = vld [vmem:[#allocation125_spill] sm:$0xff] }
 0x6f1   : > { %7256 = vmatmul.mubr.bf16.gmra.mrb[24].mxu0 %v19721_v56  ;;  %v11750_v14 = vpop.f32.mrb[163].mxu1  ;;  %v19725_v8 = vpack.c.bf16 %v19723_v0, %v19724_v5  ;;  %v19727_v56 = vld [vmem:[#allocation124_spill] sm:$0xff]  ;;  %v19730_v5 = vld [vmem:[#allocation150_spill] sm:$0xff] }
 0x6f2   : > { %7263 = vmatprep.mubr.bf16.mxu0 %v19722_v33  ;;  %v16919_v28 = vadd.f32 %v11750_v14, %v11749_v16  ;;  %v19728_v49 = vpack.c.bf16 %v19726_v57, %v19727_v56  ;;  %v19733_v57 = vpack.c.bf16 %v16492_v51, %v16490_v40 }
 0x6f4   : > { %7135 = vmatmul.mubr.bf16.gmra.mrb[12].mxu1 %v19725_v8  ;;  %v11706_v25 = vpop.f32.mrb[176].mxu0  ;;  %v19731_v8 = vld [vmem:[#allocation149_spill] sm:$0xff] }
 0x6f5   : > { %7142 = vmatprep.mubr.bf16.mxu1 %v19728_v49  ;;  %v11707_v6 = vpop.f32.mrb[177].mxu0  ;;  %v19732_v39 = vpack.c.bf16 %v19730_v5, %v19731_v8  ;;  %v19734_v49 = vld [vmem:[#allocation46_spill] sm:$0xff] }
 0x6f6   : > { %v16929_v47 = vadd.f32 %v11707_v6, %v11706_v25  ;;  %v11709_v21 = vpop.f32.mrb[178].mxu0  ;;  %v11752_v33 = vpop.f32.mrb[164].mxu1 }
 0x6f7   : > { %v11710_v61 = vpop.f32.mrb[179].mxu0  ;;  %v11753_v14 = vpop.f32.mrb[165].mxu1 }
 0x6f8   : > { %19729 = vst [vmem:[#allocation22_spill] sm:$0xff] %v16929_v47  ;;  %v16931_v16 = vadd.f32 %v11710_v61, %v11709_v21  ;;  %v16933_v29 = vadd.f32 %v11753_v14, %v11752_v33  ;;  %v11755_v0 = vpop.f32.mrb[166].mxu1  ;;  %v19735_v61 = vld [vmem:[#allocation54_spill] sm:$0xff]  ;;  %v19737_v14 = vld [vmem:[#allocation129_spill] sm:$0xff] }
 0x6f9   : > { %7264 = vmatmul.mubr.bf16.gmra.mrb[28].mxu0 %v19732_v39  ;;  %v11756_v59 = vpop.f32.mrb[167].mxu1  ;;  %v19736_v6 = vpack.c.bf16 %v19734_v49, %v19735_v61  ;;  %v19738_v39 = vld [vmem:[#allocation128_spill] sm:$0xff]  ;;  %v19741_v61 = vld [vmem:[#allocation153_spill] sm:$0xff] }
 0x6fa   : > { %7271 = vmatprep.mubr.bf16.mxu0 %v19733_v57  ;;  %v16943_v56 = vadd.f32 %v11756_v59, %v11755_v0  ;;  %v19739_v5 = vpack.c.bf16 %v19737_v14, %v19738_v39  ;;  %v19743_v14 = vpack.c.bf16 %v16513_v17, %v16508_v11 }
 0x6fc   : > { %7143 = vmatmul.mubr.bf16.gmra.mrb[16].mxu1 %v19736_v6  ;;  %v11712_v21 = vpop.f32.mrb[180].mxu0  ;;  %v19742_v6 = vpack.c.bf16 %v16417_v48, %v19741_v61  ;;  %v19747_v48 = vld [vmem:[#allocation133_spill] sm:$0xff] }
 0x6fd   : > { %7150 = vmatprep.mubr.bf16.mxu1 %v19739_v5  ;;  %v11713_v8 = vpop.f32.mrb[181].mxu0  ;;  %v19744_v5 = vld [vmem:[#allocation111_spill] sm:$0xff] }
 0x6fe   : > { %v16953_v40 = vadd.f32 %v11713_v8, %v11712_v21  ;;  %v11715_v51 = vpop.f32.mrb[182].mxu0  ;;  %v11758_v57 = vpop.f32.mrb[168].mxu1 }
 0x6ff   : > { %v11716_v25 = vpop.f32.mrb[183].mxu0  ;;  %v11759_v59 = vpop.f32.mrb[169].mxu1 }
 0x700   : > { %19740 = vst [vmem:[#allocation16_spill] sm:$0xff] %v16953_v40  ;;  %v16955_v0 = vadd.f32 %v11716_v25, %v11715_v51  ;;  %v16957_v47 = vadd.f32 %v11759_v59, %v11758_v57  ;;  %v11761_v49 = vpop.f32.mrb[170].mxu1  ;;  %v19745_v25 = vld [vmem:[#allocation114_spill] sm:$0xff]  ;;  %v19748_v59 = vld [vmem:[#allocation132_spill] sm:$0xff] }
 0x701   : > { %7272 = vmatmul.mubr.bf16.gmra.mrb[32].mxu0 %v19742_v6  ;;  %v11762_v33 = vpop.f32.mrb[171].mxu1  ;;  %v19746_v8 = vpack.c.bf16 %v19744_v5, %v19745_v25  ;;  %v19749_v61 = vpack.c.bf16 %v19747_v48, %v19748_v59  ;;  %v19750_v25 = vpack.c.bf16 %v16432_v24, %v16425_v55  ;;  %v19751_v48 = vpack.c.bf16 %v16531_v38, %v16529_v23  ;;  %v19755_v55 = vld [vmem:[#allocation137_spill] sm:$0xff]  ;;  %v19756_v24 = vld [vmem:[#allocation136_spill] sm:$0xff] }
 0x702   : > { %7279 = vmatprep.mubr.bf16.mxu0 %v19743_v14  ;;  %v16967_v39 = vadd.f32 %v11762_v33, %v11761_v49 }
 0x704   : > { %7151 = vmatmul.mubr.bf16.gmra.mrb[20].mxu1 %v19746_v8  ;;  %v11718_v51 = vpop.f32.mrb[184].mxu0 }
 0x705   : > { %7158 = vmatprep.mubr.bf16.mxu1 %v19749_v61  ;;  %v11719_v6 = vpop.f32.mrb[185].mxu0  ;;  %v19752_v61 = vld [vmem:[#allocation110_spill] sm:$0xff] }
 0x706   : > { %v16977_v11 = vadd.f32 %v11719_v6, %v11718_v51  ;;  %v11721_v17 = vpop.f32.mrb[186].mxu0  ;;  %v11764_v14 = vpop.f32.mrb[172].mxu1 }
 0x707   : > { %v11722_v21 = vpop.f32.mrb[187].mxu0  ;;  %v11765_v33 = vpop.f32.mrb[173].mxu1 }
 0x708   : > { %v16979_v49 = vadd.f32 %v11722_v21, %v11721_v17  ;;  %v16981_v40 = vadd.f32 %v11765_v33, %v11764_v14  ;;  %v11767_v5 = vpop.f32.mrb[174].mxu1  ;;  %v19753_v21 = vld [vmem:[#allocation45_spill] sm:$0xff]  ;;  %v19757_v33 = vpack.c.bf16 %v19755_v55, %v19756_v24  ;;  %v19759_v55 = vpack.c.bf16 %v16549_v32, %v16547_v19 }
 0x709   : > { %7280 = vmatmul.mubr.bf16.gmra.mrb[36].mxu0 %v19750_v25  ;;  %v11768_v8 = vpop.f32.mrb[175].mxu1  ;;  %v19754_v6 = vpack.c.bf16 %v19752_v61, %v19753_v21  ;;  %v19758_v21 = vpack.c.bf16 %v16450_v27, %v16440_v36  ;;  %v19763_v27 = vpack.c.bf16 %v16642_v30, %v16640_v20  ;;  %v19765_v30 = vpack.c.bf16 %v16567_v34, %v16565_v37 }
 0x70a   : > { %7287 = vmatprep.mubr.bf16.mxu0 %v19751_v48  ;;  %v16991_v59 = vadd.f32 %v11768_v8, %v11767_v5 }
 0x70c   : > { %7159 = vmatmul.mubr.bf16.gmra.mrb[24].mxu1 %v19754_v6  ;;  %v11724_v17 = vpop.f32.mrb[188].mxu0  ;;  %v6840_v14 = vpack.c.bf16 %v16991_v59, %v16981_v40 }
 0x70d   : > { %7166 = vmatprep.mubr.bf16.mxu1 %v19757_v33  ;;  %v11725_v25 = vpop.f32.mrb[189].mxu0 }
 0x70e   : > { %v17001_v23 = vadd.f32 %v11725_v25, %v11724_v17  ;;  %v11727_v38 = vpop.f32.mrb[190].mxu0  ;;  %v11770_v48 = vpop.f32.mrb[176].mxu1  ;;  %v19761_v25 = vld [vmem:[#allocation49_spill] sm:$0xff] }
 0x70f   : > { %v11728_v51 = vpop.f32.mrb[191].mxu0  ;;  %v11771_v5 = vpop.f32.mrb[177].mxu1 }
 0x710   : > { %v17003_v8 = vadd.f32 %v11728_v51, %v11727_v38  ;;  %v17005_v57 = vadd.f32 %v11771_v5, %v11770_v48  ;;  %v11773_v61 = vpop.f32.mrb[178].mxu1  ;;  %v19760_v51 = vld [vmem:[#allocation56_spill] sm:$0xff] }
 0x711   : > { %7288 = vmatmul.mubr.bf16.gmra.mrb[40].mxu0 %v19758_v21  ;;  %v11774_v6 = vpop.f32.mrb[179].mxu1  ;;  %v19762_v38 = vpack.c.bf16 %v19760_v51, %v19761_v25  ;;  %v19764_v25 = vpack.c.bf16 %v16468_v62, %v16458_v4  ;;  %v19767_v4 = vpack.c.bf16 %v16666_v60, %v16664_v26  ;;  %v19769_v26 = vpack.c.bf16 %v16585_v7, %v16583_v53 }
 0x712   : > { %7295 = vmatprep.mubr.bf16.mxu0 %v19759_v55  ;;  %v17015_v24 = vadd.f32 %v11774_v6, %v11773_v61 }
 0x714   : > { %v11858_v33 = vpop.f32.mrb[192].mxu0  ;;  %7167 = vmatmul.mubr.bf16.gmra.mrb[28].mxu1 %v19762_v38  ;;  %v6841_v48 = vpack.c.bf16 %v17015_v24, %v17005_v57 }
 0x715   : > { %v11859_v36 = vpop.f32.mrb[193].mxu0  ;;  %7368 = vmatprep.mubr.bf16.mxu1 %v19763_v27 }
 0x716   : > { %v17025_v19 = vadd.f32 %v11859_v36, %v11858_v33  ;;  %v11861_v32 = vpop.f32.mrb[194].mxu0  ;;  %v11776_v5 = vpop.f32.mrb[180].mxu1  ;;  %v19766_v36 = vpack.c.bf16 %v16561_v2, %v16551_v54  ;;  %v19768_v2 = vpack.c.bf16 %v16486_v35, %v16476_v22  ;;  %v19771_v22 = vpack.c.bf16 %v16690_v1, %v16688_v3 }
 0x717   : > { %v11862_v21 = vpop.f32.mrb[195].mxu0  ;;  %v11777_v6 = vpop.f32.mrb[181].mxu1  ;;  %v19774_v3 = vpack.c.bf16 %v16603_v41, %v16601_v45 }
 0x718   : > { %v17027_v61 = vadd.f32 %v11862_v21, %v11861_v32  ;;  %v17029_v55 = vadd.f32 %v11777_v6, %v11776_v5  ;;  %v11779_v51 = vpop.f32.mrb[182].mxu1 }
 0x719   : > { %7296 = vmatmul.mubr.bf16.gmra.mrb[44].mxu0 %v19764_v25  ;;  %v11780_v38 = vpop.f32.mrb[183].mxu1 }
 0x71a   : > { %7303 = vmatprep.mubr.bf16.mxu0 %v19765_v30  ;;  %v17037_v20 = vadd.f32 %v11780_v38, %v11779_v51  ;;  %v19770_v30 = vpack.c.bf16 %v16579_v46, %v16569_v15  ;;  %v19772_v46 = vld [vmem:[#allocation154_spill] sm:$0xff] }
 0x71c   : > { %v11864_v33 = vpop.f32.mrb[196].mxu0  ;;  %7369 = vmatmul.mubr.bf16.vlgmr.msra.gmra.mrb[32].mxu1 %v19766_v36  ;;  %v6842_v27 = vpack.c.bf16 %v17037_v20, %v17029_v55 }
 0x71d   : > { %v11865_v32 = vpop.f32.mrb[197].mxu0  ;;  %7376 = vmatprep.mubr.bf16.mxu1 %v19767_v4 }
 0x71e   : > { %v17047_v62 = vadd.f32 %v11865_v32, %v11864_v33  ;;  %v11867_v5 = vpop.f32.mrb[198].mxu0  ;;  %v11782_v37 = vpop.f32.mrb[184].mxu1 }
 0x71f   : > { %v11868_v34 = vpop.f32.mrb[199].mxu0  ;;  %v11783_v6 = vpop.f32.mrb[185].mxu1 }
 0x720   : > { %v17049_v21 = vadd.f32 %v11868_v34, %v11867_v5  ;;  %v17051_v51 = vadd.f32 %v11783_v6, %v11782_v37  ;;  %v11785_v54 = vpop.f32.mrb[186].mxu1  ;;  %v19773_v34 = vpack.c.bf16 %v16504_v31, %v19772_v46 }
 0x721   : > { %7304 = vmatmul.mubr.bf16.gmra.mrb[48].mxu0 %v19768_v2  ;;  %v11786_v25 = vpop.f32.mrb[187].mxu1  ;;  %v19775_v2 = vld [vmem:[#allocation159_spill] sm:$0xff] }
 0x722   : > { %7311 = vmatprep.mubr.bf16.mxu0 %v19769_v26  ;;  %v17059_v60 = vadd.f32 %v11786_v25, %v11785_v54  ;;  %v19776_v25 = vpack.c.bf16 %v16597_v52, %v19775_v2 }
 0x724   : > { %v11870_v38 = vpop.f32.mrb[200].mxu0  ;;  %7377 = vmatmul.mubr.bf16.gmra.mrb[36].mxu1 %v19770_v30  ;;  %v6843_v33 = vpack.c.bf16 %v17059_v60, %v17051_v51  ;;  %v19777_v30 = vld [vmem:[#allocation93_spill] sm:$0xff] }
 0x725   : > { %v11871_v36 = vpop.f32.mrb[201].mxu0  ;;  %7384 = vmatprep.mubr.bf16.mxu1 %v19771_v22  ;;  %v19778_v31 = vpack.c.bf16 %v16714_v43, %v19777_v30 }
 0x726   : > { %v17069_v35 = vadd.f32 %v11871_v36, %v11870_v38  ;;  %v11873_v32 = vpop.f32.mrb[202].mxu0  ;;  %v11788_v53 = vpop.f32.mrb[188].mxu1 }
 0x727   : > { %v11874_v7 = vpop.f32.mrb[203].mxu0  ;;  %v11789_v5 = vpop.f32.mrb[189].mxu1 }
 0x728   : > { %v17071_v4 = vadd.f32 %v11874_v7, %v11873_v32  ;;  %v17073_v37 = vadd.f32 %v11789_v5, %v11788_v53  ;;  %v11791_v15 = vpop.f32.mrb[190].mxu1  ;;  %v19779_v5 = vld [vmem:[#allocation156_spill] sm:$0xff] }
 0x729   : > { %7312 = vmatmul.mubr.bf16.gmra.mrb[52].mxu0 %v19773_v34  ;;  %v11792_v6 = vpop.f32.mrb[191].mxu1 }
 0x72a   : > { %7319 = vmatprep.mubr.bf16.mxu0 %v19774_v3  ;;  %v17081_v1 = vadd.f32 %v11792_v6, %v11791_v15  ;;  %v19780_v15 = vld [vmem:[#allocation155_spill] sm:$0xff]  ;;  %v19783_v3 = vld [vmem:[#allocation162_spill] sm:$0xff] }
 0x72b   : > { %v19781_v46 = vpack.c.bf16 %v19779_v5, %v19780_v15  ;;  %v19782_v6 = vld [vmem:[#allocation163_spill] sm:$0xff] }
 0x72c   : > { %v11876_v54 = vpop.f32.mrb[204].mxu0  ;;  %7385 = vmatmul.mubr.bf16.gmra.mrb[40].mxu1 %v19776_v25  ;;  %v6844_v26 = vpack.c.bf16 %v17081_v1, %v17073_v37  ;;  %v19784_v43 = vpack.c.bf16 %v19782_v6, %v19783_v3  ;;  %v19785_v25 = vld [vmem:[#allocation161_spill] sm:$0xff] }
 0x72d   : > { %v11877_v38 = vpop.f32.mrb[205].mxu0  ;;  %7392 = vmatprep.mubr.bf16.mxu1 %v19778_v31 }
 0x72e   : > { %v17091_v36 = vadd.f32 %v11877_v38, %v11876_v54  ;;  %v11879_v22 = vpop.f32.mrb[206].mxu0  ;;  %v11794_v45 = vpop.f32.mrb[192].mxu1  ;;  %v19786_v38 = vld [vmem:[#allocation160_spill] sm:$0xff] }
 0x72f   : > { %v11880_v41 = vpop.f32.mrb[207].mxu0  ;;  %v11795_v53 = vpop.f32.mrb[193].mxu1  ;;  %v19787_v30 = vpack.c.bf16 %v19785_v25, %v19786_v38  ;;  %v19791_v25 = vld [vmem:[#allocation158_spill] sm:$0xff]  ;;  %v19792_v38 = vld [vmem:[#allocation157_spill] sm:$0xff] }
 0x730   : > { %v17093_v32 = vadd.f32 %v11880_v41, %v11879_v22  ;;  %v17095_v7 = vadd.f32 %v11795_v53, %v11794_v45  ;;  %v11797_v52 = vpop.f32.mrb[194].mxu1  ;;  %v19788_v45 = vld [vmem:[#allocation85_spill] sm:$0xff] }
 0x731   : > { %7320 = vmatmul.mubr.bf16.gmra.mrb[56].mxu0 %v19781_v46  ;;  %v11798_v34 = vpop.f32.mrb[195].mxu1  ;;  %v19789_v41 = vld [vmem:[#allocation25_spill] sm:$0xff] }
 0x732   : > { %7327 = vmatprep.mubr.bf16.mxu0 %v19784_v43  ;;  %v17103_v54 = vadd.f32 %v11798_v34, %v11797_v52  ;;  %v19790_v53 = vpack.c.bf16 %v19788_v45, %v19789_v41  ;;  %v19794_v45 = vpack.c.bf16 %v16919_v28, %v16909_v18  ;;  %v19795_v41 = vld [vmem:[#allocation165_spill] sm:$0xff] }
 0x734   : > { %v11882_v2 = vpop.f32.mrb[208].mxu0  ;;  %7393 = vmatmul.mubr.bf16.gmra.mrb[44].mxu1 %v19787_v30  ;;  %v6845_v31 = vpack.c.bf16 %v17103_v54, %v17095_v7  ;;  %v19793_v30 = vpack.c.bf16 %v19791_v25, %v19792_v38 }
 0x735   : > { %v11883_v22 = vpop.f32.mrb[209].mxu0  ;;  %7400 = vmatprep.mubr.bf16.mxu1 %v19790_v53  ;;  %v19796_v53 = vld [vmem:[#allocation164_spill] sm:$0xff] }
 0x736   : > { %v17113_v5 = vadd.f32 %v11883_v22, %v11882_v2  ;;  %v11885_v15 = vpop.f32.mrb[210].mxu0  ;;  %v11800_v46 = vpop.f32.mrb[196].mxu1 }
 0x737   : > { %v11886_v6 = vpop.f32.mrb[211].mxu0  ;;  %v11801_v34 = vpop.f32.mrb[197].mxu1 }
 0x738   : > { %v17115_v52 = vadd.f32 %v11886_v6, %v11885_v15  ;;  %v17117_v3 = vadd.f32 %v11801_v34, %v11800_v46  ;;  %v11803_v43 = vpop.f32.mrb[198].mxu1  ;;  %v19797_v15 = vpack.c.bf16 %v19795_v41, %v19796_v53  ;;  %v19798_v34 = vld [vmem:[#allocation97_spill] sm:$0xff]  ;;  %v19800_v53 = vpack.c.bf16 %v16943_v56, %v16933_v29  ;;  %v19806_v46 = vld [vmem:[#allocation36_spill] sm:$0xff] }
 0x739   : > { %7328 = vmatmul.mubr.bf16.gmra.mrb[60].mxu0 %v19793_v30  ;;  %v11804_v17 = vpop.f32.mrb[199].mxu1  ;;  %v19799_v25 = vpack.c.bf16 %v16762_v42, %v19798_v34  ;;  %v19801_v42 = vpack.c.bf16 %v16967_v39, %v16957_v47  ;;  %v19802_v34 = vld [vmem:[#allocation21_spill] sm:$0xff] }
 0x73a   : > { %12378 = vmatprep.mubr.bf16.mxu0 %v19794_v45  ;;  %v17125_v2 = vadd.f32 %v11804_v17, %v11803_v43 }
 0x73c   : > { %v11888_v22 = vpop.f32.mrb[212].mxu0  ;;  %7401 = vmatmul.mubr.bf16.gmra.mrb[48].mxu1 %v19797_v15 }
 0x73d   : > { %v11889_v6 = vpop.f32.mrb[213].mxu0  ;;  %7408 = vmatprep.mubr.bf16.mxu1 %v19799_v25  ;;  %v19803_v25 = vld [vmem:[#allocation28_spill] sm:$0xff] }
 0x73e   : > { %v17135_v38 = vadd.f32 %v11889_v6, %v11888_v22  ;;  %v11891_v30 = vpop.f32.mrb[214].mxu0  ;;  %v11806_v18 = vpop.f32.mrb[200].mxu1 }
 0x73f   : > { %v11892_v28 = vpop.f32.mrb[215].mxu0  ;;  %v11807_v43 = vpop.f32.mrb[201].mxu1 }
 0x740   : > { %v17137_v17 = vadd.f32 %v11892_v28, %v11891_v30  ;;  %v17139_v45 = vadd.f32 %v11807_v43, %v11806_v18  ;;  %v11809_v41 = vpop.f32.mrb[202].mxu1  ;;  %v19804_v30 = vpack.c.bf16 %v19802_v34, %v19803_v25  ;;  %v19805_v43 = vld [vmem:[#allocation29_spill] sm:$0xff] }
 0x741   : > { %12379 = vmatmul.mubr.bf16.vlgmr.msra.gmra.mrb[64].mxu0 %v19800_v53  ;;  %v11810_v15 = vpop.f32.mrb[203].mxu1  ;;  %v19807_v29 = vpack.c.bf16 %v19805_v43, %v19806_v46 }
 0x742   : > { %12382 = vmatprep.mubr.bf16.mxu0 %v19801_v42  ;;  %v17147_v22 = vadd.f32 %v11810_v15, %v11809_v41 }
 0x744   : > { %v11894_v6 = vpop.f32.mrb[216].mxu0  ;;  %7409 = vmatmul.mubr.bf16.gmra.mrb[52].mxu1 %v19804_v30  ;;  %v6847_v18 = vpack.c.bf16 %v17147_v22, %v17139_v45  ;;  %v19808_v30 = vld [vmem:[#allocation88_spill] sm:$0xff] }
 0x745   : > { %v11895_v28 = vpop.f32.mrb[217].mxu0  ;;  %7416 = vmatprep.mubr.bf16.mxu1 %v19807_v29 }
 0x746   : > { %v17157_v56 = vadd.f32 %v11895_v28, %v11894_v6  ;;  %v11897_v53 = vpop.f32.mrb[218].mxu0  ;;  %v11812_v47 = vpop.f32.mrb[204].mxu1  ;;  %v19809_v28 = vld [vmem:[#allocation86_spill] sm:$0xff] }
 0x747   : > { %v11898_v39 = vpop.f32.mrb[219].mxu0  ;;  %v11813_v15 = vpop.f32.mrb[205].mxu1  ;;  %v19810_v43 = vpack.c.bf16 %v19808_v30, %v19809_v28 }
 0x748   : > { %v17159_v41 = vadd.f32 %v11898_v39, %v11897_v53  ;;  %v17161_v42 = vadd.f32 %v11813_v15, %v11812_v47  ;;  %v11815_v34 = vpop.f32.mrb[206].mxu1  ;;  %v19811_v47 = vld [vmem:[#allocation18_spill] sm:$0xff] }
 0x749   : > { %12383 = vmatmul.mubr.bf16.gmra.mrb[68].mxu0 %v6840_v14  ;;  %v11816_v25 = vpop.f32.mrb[207].mxu1  ;;  %v19812_v40 = vpack.c.bf16 %v16811_v13, %v19811_v47 }
 0x74a   : > { %12386 = vmatprep.mubr.bf16.mxu0 %v6841_v48  ;;  %v17169_v46 = vadd.f32 %v11816_v25, %v11815_v34 }
 0x74c   : > { %v11900_v6 = vpop.f32.mrb[220].mxu0  ;;  %7417 = vmatmul.mubr.bf16.gmra.mrb[56].mxu1 %v19810_v43  ;;  %v6848_v29 = vpack.c.bf16 %v17169_v46, %v17161_v42  ;;  %v19813_v46 = vld [vmem:[#allocation100_spill] sm:$0xff] }
 0x74d   : > { %v11901_v53 = vpop.f32.mrb[221].mxu0  ;;  %7424 = vmatprep.mubr.bf16.mxu1 %v19812_v40 }
 0x74e   : > { %v17179_v59 = vadd.f32 %v11901_v53, %v11900_v6  ;;  %v11903_v14 = vpop.f32.mrb[222].mxu0  ;;  %v11818_v57 = vpop.f32.mrb[208].mxu1  ;;  %v19814_v6 = vld [vmem:[#allocation98_spill] sm:$0xff]  ;;  %v19816_v53 = vld [vmem:[#allocation119_spill] sm:$0xff] }
 0x74f   : > { %v11904_v24 = vpop.f32.mrb[223].mxu0  ;;  %v11819_v39 = vpop.f32.mrb[209].mxu1  ;;  %v19815_v30 = vpack.c.bf16 %v19813_v46, %v19814_v6  ;;  %v19817_v47 = vpack.c.bf16 %v16835_v44, %v19816_v53  ;;  %v19823_v53 = vld [vmem:[#allocation121_spill] sm:$0xff] }
 0x750   : > { %v17181_v48 = vadd.f32 %v11904_v24, %v11903_v14  ;;  %v11820_v15 = vadd.f32 %v11819_v39, %v11818_v57  ;;  %v11821_v34 = vpop.f32.mrb[210].mxu1  ;;  %v19818_v39 = vld [vmem:[#allocation32_spill] sm:$0xff] }
 0x751   : > { %12387 = vmatmul.mubr.bf16.gmra.mrb[72].mxu0 %v6842_v27  ;;  %v11822_v42 = vpop.f32.mrb[211].mxu1 }
 0x752   : > { %12390 = vmatprep.mubr.bf16.mxu0 %v6843_v33  ;;  %v11823_v13 = vadd.f32 %v11822_v42, %v11821_v34 }
 0x754   : > { %v11906_v25 = vpop.f32.mrb[224].mxu0  ;;  %7425 = vmatmul.mubr.bf16.gmra.mrb[60].mxu1 %v19815_v30  ;;  %v6849_v28 = vpack.c.bf16 %v11823_v13, %v11820_v15  ;;  %v19819_v15 = vld [vmem:[#allocation95_spill] sm:$0xff]  ;;  %v19822_v30 = vpack.c.bf16 %v17125_v2, %v17117_v3 }
 0x755   : > { %v11907_v43 = vpop.f32.mrb[225].mxu0  ;;  %7432 = vmatprep.mubr.bf16.mxu1 %v19817_v47  ;;  %v19820_v34 = vpack.c.bf16 %v19818_v39, %v19819_v15  ;;  %v19824_v47 = vld [vmem:[#allocation87_spill] sm:$0xff]  ;;  %v19827_v15 = vld [vmem:[#allocation120_spill] sm:$0xff] }
 0x756   : > { %v17195_v40 = vadd.f32 %v11907_v43, %v11906_v25  ;;  %v11909_v55 = vpop.f32.mrb[226].mxu0  ;;  %v11824_v20 = vpop.f32.mrb[212].mxu1  ;;  %v19821_v25 = vpack.c.bf16 %v16859_v10, %v16857_v9 }
 0x757   : > { %v11910_v27 = vpop.f32.mrb[227].mxu0  ;;  %v11825_v51 = vpop.f32.mrb[213].mxu1 }
 0x758   : > { %v17197_v14 = vadd.f32 %v11910_v27, %v11909_v55  ;;  %v11826_v60 = vadd.f32 %v11825_v51, %v11824_v20  ;;  %v11827_v33 = vpop.f32.mrb[214].mxu1  ;;  %v19825_v55 = vpack.c.bf16 %v19823_v53, %v19824_v47  ;;  %v19826_v51 = vpack.c.bf16 %v16883_v12, %v16881_v50 }
 0x759   : > { %12391 = vmatmul.mubr.bf16.gmra.mrb[76].mxu0 %v6844_v26  ;;  %v11828_v57 = vpop.f32.mrb[215].mxu1 }
 0x75a   : > { %12394 = vmatprep.mubr.bf16.mxu0 %v6845_v31  ;;  %v11829_v44 = vadd.f32 %v11828_v57, %v11827_v33 }
 0x75c   : > { %v11912_v24 = vpop.f32.mrb[228].mxu0  ;;  %7433 = vmatmul.mubr.bf16.gmra.mrb[64].mxu1 %v19820_v34  ;;  %v6850_v42 = vpack.c.bf16 %v11829_v44, %v11826_v60  ;;  %v19828_v34 = vld [vmem:[#allocation99_spill] sm:$0xff] }
 0x75d   : > { %v11913_v13 = vpop.f32.mrb[229].mxu0  ;;  %7440 = vmatprep.mubr.bf16.mxu1 %v19821_v25  ;;  %v19830_v25 = vpack.c.bf16 %v16907_v63, %v16905_v58  ;;  %v19831_v58 = vld [vmem:[#allocation92_spill] sm:$0xff]  ;;  %v19832_v63 = vld [vmem:[#allocation90_spill] sm:$0xff] }
 0x75e   : > { %v17211_v46 = vadd.f32 %v11913_v13, %v11912_v24  ;;  %v11915_v37 = vpop.f32.mrb[230].mxu0  ;;  %v11830_v1 = vpop.f32.mrb[216].mxu1  ;;  %v19829_v13 = vpack.c.bf16 %v19827_v15, %v19828_v34  ;;  %v19833_v53 = vpack.c.bf16 %v19831_v58, %v19832_v63  ;;  %v19841_v58 = vld [vmem:[#allocation33_spill] sm:$0xff]  ;;  %v19842_v63 = vld [vmem:[#allocation40_spill] sm:$0xff] }
 0x75f   : > { %v11916_v26 = vpop.f32.mrb[231].mxu0  ;;  %v11831_v7 = vpop.f32.mrb[217].mxu1 }
 0x760   : > { %v17213_v6 = vadd.f32 %v11916_v26, %v11915_v37  ;;  %v11832_v54 = vadd.f32 %v11831_v7, %v11830_v1  ;;  %v11833_v31 = vpop.f32.mrb[218].mxu1 }
 0x761   : > { %12395 = vmatmul.mubr.bf16.gmra.mrb[80].mxu0 %v19822_v30  ;;  %v11834_v43 = vpop.f32.mrb[219].mxu1 }
 0x762   : > { %12398 = vmatprep.mubr.bf16.mxu0 %v6847_v18  ;;  %v11835_v10 = vadd.f32 %v11834_v43, %v11833_v31 }
 0x764   : > { %v11918_v9 = vpop.f32.mrb[232].mxu0  ;;  %7441 = vmatmul.mubr.bf16.gmra.mrb[68].mxu1 %v19825_v55  ;;  %v6851_v20 = vpack.c.bf16 %v11835_v10, %v11832_v54 }
 0x765   : > { %v11919_v27 = vpop.f32.mrb[233].mxu0  ;;  %7448 = vmatprep.mubr.bf16.mxu1 %v19826_v51 }
 0x766   : > { %v17227_v60 = vadd.f32 %v11919_v27, %v11918_v9  ;;  %v11921_v3 = vpop.f32.mrb[234].mxu0  ;;  %v11836_v2 = vpop.f32.mrb[220].mxu1  ;;  %v19834_v27 = vld [vmem:[#allocation22_spill] sm:$0xff] }
 0x767   : > { %v11922_v33 = vpop.f32.mrb[235].mxu0  ;;  %v11837_v45 = vpop.f32.mrb[221].mxu1  ;;  %v19835_v51 = vpack.c.bf16 %v16931_v16, %v19834_v27  ;;  %v19837_v16 = vld [vmem:[#allocation20_spill] sm:$0xff]  ;;  %v19844_v27 = vpack.c.bf16 %v16979_v49, %v16977_v11 }
 0x768   : > { %v17229_v57 = vadd.f32 %v11922_v33, %v11921_v3  ;;  %v11838_v22 = vadd.f32 %v11837_v45, %v11836_v2  ;;  %v11839_v18 = vpop.f32.mrb[222].mxu1 }
 0x769   : > { %12399 = vmatmul.mubr.bf16.gmra.mrb[84].mxu0 %v6848_v29  ;;  %v11840_v44 = vpop.f32.mrb[223].mxu1 }
 0x76a   : > { %12402 = vmatprep.mubr.bf16.mxu0 %v6849_v28  ;;  %v11841_v24 = vadd.f32 %v11840_v44, %v11839_v18 }
 0x76c   : > { %v11924_v39 = vpop.f32.mrb[236].mxu0  ;;  %7449 = vmatmul.mubr.bf16.gmra.mrb[72].mxu1 %v19829_v13  ;;  %v6852_v50 = vpack.c.bf16 %v11841_v24, %v11838_v22 }
 0x76d   : > { %v11925_v12 = vpop.f32.mrb[237].mxu0  ;;  %7456 = vmatprep.mubr.bf16.mxu1 %v19830_v25 }
 0x76e   : > { %v17237_v37 = vadd.f32 %v11925_v12, %v11924_v39  ;;  %v11927_v1 = vpop.f32.mrb[238].mxu0  ;;  %v11970_v7 = vpop.f32.mrb[224].mxu1  ;;  %v19836_v39 = vld [vmem:[#allocation122_spill] sm:$0xff]  ;;  %v19839_v12 = vld [vmem:[#allocation16_spill] sm:$0xff] }
 0x76f   : > { %v11928_v26 = vpop.f32.mrb[239].mxu0  ;;  %v11971_v28 = vpop.f32.mrb[225].mxu1  ;;  %v19838_v15 = vpack.c.bf16 %v19836_v39, %v19837_v16  ;;  %v19840_v25 = vpack.c.bf16 %v16955_v0, %v19839_v12  ;;  %v19843_v0 = vpack.c.bf16 %v19841_v58, %v19842_v63  ;;  %v19845_v39 = vld [vmem:[#allocation91_spill] sm:$0xff]  ;;  %v19846_v16 = vld [vmem:[#allocation89_spill] sm:$0xff]  ;;  %v19850_v58 = vld [vmem:[#allocation24_spill] sm:$0xff] }
 0x770   : > { %v17239_v29 = vadd.f32 %v11928_v26, %v11927_v1  ;;  %v11972_v54 = vadd.f32 %v11971_v28, %v11970_v7  ;;  %v11973_v31 = vpop.f32.mrb[226].mxu1  ;;  %v19847_v11 = vpack.c.bf16 %v19845_v39, %v19846_v16 }
 0x771   : > { %12403 = vmatmul.mubr.bf16.gmra.mrb[88].mxu0 %v6850_v42  ;;  %v11974_v30 = vpop.f32.mrb[227].mxu1 }
 0x772   : > { %12406 = vmatprep.mubr.bf16.mxu0 %v6851_v20  ;;  %v17242_v43 = vadd.f32 %v11972_v54, %v17025_v19  ;;  %v11975_v10 = vadd.f32 %v11974_v30, %v11973_v31 }
 0x774   : > { %v11930_v9 = vpop.f32.mrb[240].mxu0  ;;  %7457 = vmatmul.mubr.bf16.gmra.mrb[76].mxu1 %v19833_v53  ;;  %v17248_v47 = vadd.f32 %v11975_v10, %v17027_v61 }
 0x775   : > { %v11931_v55 = vpop.f32.mrb[241].mxu0  ;;  %7464 = vmatprep.mubr.bf16.mxu1 %v19835_v51 }
 0x776   : > { %v17253_v42 = vadd.f32 %v11931_v55, %v11930_v9  ;;  %v11933_v20 = vpop.f32.mrb[242].mxu0  ;;  %v11976_v19 = vpop.f32.mrb[228].mxu1 }
 0x777   : > { %v11934_v3 = vpop.f32.mrb[243].mxu0  ;;  %v11977_v33 = vpop.f32.mrb[229].mxu1 }
 0x778   : > { %v17255_v2 = vadd.f32 %v11934_v3, %v11933_v20  ;;  %v11978_v45 = vadd.f32 %v11977_v33, %v11976_v19  ;;  %v11979_v22 = vpop.f32.mrb[230].mxu1 }
 0x779   : > { %12407 = vmatmul.mubr.bf16.gmra.mrb[92].mxu0 %v6852_v50  ;;  %v11980_v18 = vpop.f32.mrb[231].mxu1 }
 0x77a   : > { %v17258_v61 = vadd.f32 %v11978_v45, %v17047_v62  ;;  %v11981_v44 = vadd.f32 %v11980_v18, %v11979_v22 }
 0x77c   : > { %v11936_v24 = vpop.f32.mrb[244].mxu0  ;;  %7465 = vmatmul.mubr.bf16.gmra.mrb[80].mxu1 %v19838_v15  ;;  %v17264_v34 = vadd.f32 %v11981_v44, %v17049_v21 }
 0x77d   : > { %v11937_v13 = vpop.f32.mrb[245].mxu0  ;;  %7472 = vmatprep.mubr.bf16.mxu1 %v19840_v25 }
 0x77e   : > { %v17269_v1 = vadd.f32 %v11937_v13, %v11936_v24  ;;  %v11939_v50 = vpop.f32.mrb[246].mxu0  ;;  %v11982_v62 = vpop.f32.mrb[232].mxu1  ;;  %v19848_v13 = vpack.c.bf16 %v17003_v8, %v17001_v23 }
 0x77f   : > { %v11940_v26 = vpop.f32.mrb[247].mxu0  ;;  %v11983_v28 = vpop.f32.mrb[233].mxu1 }
 0x780   : > { %v17271_v7 = vadd.f32 %v11940_v26, %v11939_v50  ;;  %v11984_v54 = vadd.f32 %v11983_v28, %v11982_v62  ;;  %v11985_v31 = vpop.f32.mrb[234].mxu1 }
 0x781   : > { %v11986_v30 = vpop.f32.mrb[235].mxu1 }
 0x782   : > { %v17274_v10 = vadd.f32 %v11984_v54, %v17069_v35  ;;  %v11987_v21 = vadd.f32 %v11986_v30, %v11985_v31 }
 0x784   : > { %v11942_v9 = vpop.f32.mrb[248].mxu0  ;;  %7473 = vmatmul.mubr.bf16.gmra.mrb[84].mxu1 %v19843_v0  ;;  %v17280_v53 = vadd.f32 %v11987_v21, %v17071_v4 }
 0x785   : > { %v11943_v55 = vpop.f32.mrb[249].mxu0  ;;  %7480 = vmatprep.mubr.bf16.mxu1 %v19844_v27 }
 0x786   : > { %v17285_v51 = vadd.f32 %v11943_v55, %v11942_v9  ;;  %v11945_v20 = vpop.f32.mrb[250].mxu0  ;;  %v11988_v35 = vpop.f32.mrb[236].mxu1  ;;  %v19849_v9 = vld [vmem:[#allocation17_spill] sm:$0xff] }
 0x787   : > { %v11946_v3 = vpop.f32.mrb[251].mxu0  ;;  %v11989_v33 = vpop.f32.mrb[237].mxu1  ;;  %v19851_v23 = vpack.c.bf16 %v19849_v9, %v19850_v58 }
 0x788   : > { %v17287_v19 = vadd.f32 %v11946_v3, %v11945_v20  ;;  %v11990_v45 = vadd.f32 %v11989_v33, %v11988_v35  ;;  %v11991_v22 = vpop.f32.mrb[238].mxu1 }
 0x789   : > { %v11992_v18 = vpop.f32.mrb[239].mxu1 }
 0x78a   : > { %v17290_v44 = vadd.f32 %v11990_v45, %v17091_v36  ;;  %v11993_v4 = vadd.f32 %v11992_v18, %v11991_v22 }
 0x78c   : > { %v11948_v24 = vpop.f32.mrb[252].mxu0  ;;  %7481 = vmatmul.mubr.bf16.gmra.mrb[88].mxu1 %v19847_v11  ;;  %v17296_v49 = vadd.f32 %v11993_v4, %v17093_v32 }
 0x78d   : > { %v11949_v15 = vpop.f32.mrb[253].mxu0  ;;  %7488 = vmatprep.mubr.bf16.mxu1 %v19848_v13 }
 0x78e   : > { %v17301_v12 = vadd.f32 %v11949_v15, %v11948_v24  ;;  %v11951_v25 = vpop.f32.mrb[254].mxu0  ;;  %v11994_v36 = vpop.f32.mrb[240].mxu1 }
 0x78f   : > { %v11952_v50 = vpop.f32.mrb[255].mxu0  ;;  %v11995_v62 = vpop.f32.mrb[241].mxu1 }
 0x790   : > { %v17303_v26 = vadd.f32 %v11952_v50, %v11951_v25  ;;  %v11996_v28 = vadd.f32 %v11995_v62, %v11994_v36  ;;  %v11997_v54 = vpop.f32.mrb[242].mxu1 }
 0x791   : > { %v11998_v31 = vpop.f32.mrb[243].mxu1 }
 0x792   : > { %v17306_v30 = vadd.f32 %v11996_v28, %v17113_v5  ;;  %v11999_v32 = vadd.f32 %v11998_v31, %v11997_v54 }
 0x794   : > { %v12082_v21 = vpop.f32.mrb[0].mxu0  ;;  %7489 = vmatmul.mubr.bf16.gmra.mrb[92].mxu1 %v19851_v23  ;;  %v17312_v8 = vadd.f32 %v11999_v32, %v17115_v52 }
 0x795   : > { %v12083_v63 = vpop.f32.mrb[1].mxu0 }
 0x796   : > { %v12084_v0 = vadd.f32 %v12083_v63, %v12082_v21  ;;  %v12085_v55 = vpop.f32.mrb[2].mxu0  ;;  %v12000_v27 = vpop.f32.mrb[244].mxu1 }
 0x797   : > { %v12086_v20 = vpop.f32.mrb[3].mxu0  ;;  %v12001_v5 = vpop.f32.mrb[245].mxu1 }
 0x798   : > { %v17315_v3 = vadd.f32 %v12084_v0, %v17242_v43  ;;  %v12087_v35 = vadd.f32 %v12086_v20, %v12085_v55  ;;  %v12002_v33 = vadd.f32 %v12001_v5, %v12000_v27  ;;  %v12003_v45 = vpop.f32.mrb[246].mxu1 }
 0x799   : > { %v12004_v18 = vpop.f32.mrb[247].mxu1 }
 0x79a   : > { %v17318_v22 = vadd.f32 %v12087_v35, %v17248_v47  ;;  %v17321_v4 = vadd.f32 %v12002_v33, %v17135_v38  ;;  %v12005_v52 = vadd.f32 %v12004_v18, %v12003_v45 }
 0x79c   : > { %v12088_v24 = vpop.f32.mrb[4].mxu0  ;;  %v17324_v39 = vadd.f32 %v12005_v52, %v17137_v17 }
 0x79d   : > { %v12089_v16 = vpop.f32.mrb[5].mxu0 }
 0x79e   : > { %v12090_v11 = vadd.f32 %v12089_v16, %v12088_v24  ;;  %v12091_v43 = vpop.f32.mrb[6].mxu0 }
 0x79f   : > { %v12006_v15 = vpop.f32.mrb[248].mxu1  ;;  %v12092_v13 = vpop.f32.mrb[7].mxu0 }
 0x7a0   : > { %v17327_v25 = vadd.f32 %v12090_v11, %v17258_v61  ;;  %v12093_v50 = vadd.f32 %v12092_v13, %v12091_v43  ;;  %v12007_v47 = vpop.f32.mrb[249].mxu1 }
 0x7a1   : > { %v12008_v36 = vadd.f32 %v12007_v47, %v12006_v15  ;;  %v12009_v62 = vpop.f32.mrb[250].mxu1 }
 0x7a2   : > { %v17330_v38 = vadd.f32 %v12093_v50, %v17264_v34  ;;  %v12010_v28 = vpop.f32.mrb[251].mxu1 }
 0x7a3   : > { %v17333_v54 = vadd.f32 %v12008_v36, %v17157_v56  ;;  %v12011_v17 = vadd.f32 %v12010_v28, %v12009_v62 }
 0x7a4   : > { %v12094_v31 = vpop.f32.mrb[8].mxu0 }
 0x7a5   : > { %v17336_v32 = vadd.f32 %v12011_v17, %v17159_v41  ;;  %v12095_v21 = vpop.f32.mrb[9].mxu0 }
 0x7a6   : > { %v12096_v9 = vadd.f32 %v12095_v21, %v12094_v31  ;;  %v12097_v61 = vpop.f32.mrb[10].mxu0 }
 0x7a7   : > { %v12012_v58 = vpop.f32.mrb[252].mxu1  ;;  %v12098_v23 = vpop.f32.mrb[11].mxu0 }
 0x7a8   : > { %v17339_v63 = vadd.f32 %v12096_v9, %v17274_v10  ;;  %v12099_v0 = vadd.f32 %v12098_v23, %v12097_v61  ;;  %v12013_v34 = vpop.f32.mrb[253].mxu1 }
 0x7a9   : > { %v12014_v55 = vadd.f32 %v12013_v34, %v12012_v58  ;;  %v12015_v27 = vpop.f32.mrb[254].mxu1  ;;  %v19852_v34 = vld [vmem:[#allocation113_spill] sm:$0xff] }
 0x7aa   : > { %v17342_v56 = vadd.f32 %v12099_v0, %v17280_v53  ;;  %v12016_v20 = vpop.f32.mrb[255].mxu1 }
 0x7ab   : > { %v17345_v35 = vadd.f32 %v12014_v55, %v17179_v59  ;;  %v12017_v41 = vadd.f32 %v12016_v20, %v12015_v27  ;;  %v19853_v55 = vld [vmem:[#allocation60_spill] sm:$0xff] }
 0x7ac   : > { %v12100_v5 = vpop.f32.mrb[12].mxu0  ;;  %v7660_v27 = vadd.f32 %v19853_v55, %v19852_v34 }
 0x7ad   : > { %v17348_v33 = vadd.f32 %v12017_v41, %v17181_v48  ;;  %v12101_v45 = vpop.f32.mrb[13].mxu0 }
 0x7ae   : > { %v12102_v18 = vadd.f32 %v12101_v45, %v12100_v5  ;;  %v12103_v10 = vpop.f32.mrb[14].mxu0  ;;  %v19854_v5 = vld [vmem:[#allocation58_spill] sm:$0xff] }
 0x7af   : > { %v12018_v52 = vpop.f32.mrb[0].mxu1  ;;  %v12104_v24 = vpop.f32.mrb[15].mxu0  ;;  %v7661_v45 = vadd.f32 %v7660_v27, %v19854_v5 }
 0x7b0   : > { %v17351_v16 = vadd.f32 %v12102_v18, %v17290_v44  ;;  %v12105_v11 = vadd.f32 %v12104_v24, %v12103_v10  ;;  %v12019_v53 = vpop.f32.mrb[1].mxu1 }
 0x7b1   : > { %v12020_v43 = vadd.f32 %v12019_v53, %v12018_v52  ;;  %v12021_v15 = vpop.f32.mrb[2].mxu1 }
 0x7b2   : > { %v17354_v59 = vadd.f32 %v12105_v11, %v17296_v49  ;;  %v12022_v13 = vpop.f32.mrb[3].mxu1 }
 0x7b3   : > { %v17357_v50 = vadd.f32 %v12020_v43, %v17195_v40  ;;  %v12023_v48 = vadd.f32 %v12022_v13, %v12021_v15  ;;  %v19855_v15 = vld [vmem:[#allocation117_spill] sm:$0xff] }
 0x7b4   : > { %v12106_v47 = vpop.f32.mrb[16].mxu0  ;;  %v7662_v13 = vadd.f32 %v7661_v45, %v19855_v15  ;;  %v19858_v45 = vld [vmem:[#allocation118_spill] sm:$0xff] }
 0x7b5   : > { %v17360_v36 = vadd.f32 %v12023_v48, %v17197_v14  ;;  %v12107_v62 = vpop.f32.mrb[17].mxu0 }
 0x7b6   : > { %v12108_v28 = vadd.f32 %v12107_v62, %v12106_v47  ;;  %v12109_v44 = vpop.f32.mrb[18].mxu0 }
 0x7b7   : > { %v12024_v17 = vpop.f32.mrb[4].mxu1  ;;  %v12110_v31 = vpop.f32.mrb[19].mxu0 }
 0x7b8   : > { %v17363_v21 = vadd.f32 %v12108_v28, %v17306_v30  ;;  %v12111_v9 = vadd.f32 %v12110_v31, %v12109_v44  ;;  %v12025_v49 = vpop.f32.mrb[5].mxu1  ;;  %v19856_v28 = vld [vmem:[#allocation59_spill] sm:$0xff] }
 0x7b9   : > { %v12026_v61 = vadd.f32 %v12025_v49, %v12024_v17  ;;  %v12027_v58 = vpop.f32.mrb[6].mxu1  ;;  %v7663_v44 = vadd.f32 %v7662_v13, %v19856_v28 }
 0x7ba   : > { %v17366_v40 = vadd.f32 %v12111_v9, %v17312_v8  ;;  %v12028_v23 = vpop.f32.mrb[7].mxu1 }
 0x7bb   : > { %v17369_v0 = vadd.f32 %v12026_v61, %v17211_v46  ;;  %v12029_v14 = vadd.f32 %v12028_v23, %v12027_v58  ;;  %v19857_v23 = vld [vmem:[#allocation57_spill] sm:$0xff] }
 0x7bc   : > { %v12112_v20 = vpop.f32.mrb[20].mxu0 }
 0x7bd   : > { %v17374_v41 = vadd.f32 %v12029_v14, %v17213_v6  ;;  %v12113_v30 = vpop.f32.mrb[21].mxu0  ;;  %v7664_v14 = vadd.f32 %v7663_v44, %v19857_v23 }
 0x7be   : > { %v12114_v18 = vadd.f32 %v12113_v30, %v12112_v20  ;;  %v12115_v10 = vpop.f32.mrb[22].mxu0 }
 0x7bf   : > { %v12030_v52 = vpop.f32.mrb[8].mxu1  ;;  %v12116_v8 = vpop.f32.mrb[23].mxu0 }
 0x7c0   : > { %v17378_v24 = vadd.f32 %v12114_v18, %v17321_v4  ;;  %v12117_v46 = vadd.f32 %v12116_v8, %v12115_v10  ;;  %v12031_v11 = vpop.f32.mrb[9].mxu1  ;;  %v7665_v18 = vadd.f32 %v7664_v14, %v19858_v45 }
 0x7c1   : > { %v12032_v53 = vadd.f32 %v12031_v11, %v12030_v52  ;;  %v12033_v43 = vpop.f32.mrb[10].mxu1 }
 0x7c2   : > { %v17382_v48 = vadd.f32 %v12117_v46, %v17324_v39  ;;  %v12034_v6 = vpop.f32.mrb[11].mxu1 }
 0x7c3   : > { %v17385_v47 = vadd.f32 %v12032_v53, %v17227_v60  ;;  %v12035_v62 = vadd.f32 %v12034_v6, %v12033_v43  ;;  %v19859_v53 = vld [vmem:[#allocation116_spill] sm:$0xff] }
 0x7c4   : > { %v12118_v17 = vpop.f32.mrb[24].mxu0  ;;  %v7666_v43 = vadd.f32 %v7665_v18, %v19859_v53 }
 0x7c5   : > { %v17389_v4 = vadd.f32 %v12035_v62, %v17229_v57  ;;  %v12119_v31 = vpop.f32.mrb[25].mxu0 }
 0x7c6   : > { %v12120_v9 = vadd.f32 %v12119_v31, %v12118_v17  ;;  %v12121_v49 = vpop.f32.mrb[26].mxu0  ;;  %v19860_v17 = vld [vmem:[#allocation64_spill] sm:$0xff] }
 0x7c7   : > { %v12036_v61 = vpop.f32.mrb[12].mxu1  ;;  %v12122_v58 = vpop.f32.mrb[27].mxu0  ;;  %v7667_v31 = vadd.f32 %v7666_v43, %v19860_v17 }
 0x7c8   : > { %v17393_v39 = vadd.f32 %v12120_v9, %v17333_v54  ;;  %v12123_v27 = vadd.f32 %v12122_v58, %v12121_v49  ;;  %v12037_v60 = vpop.f32.mrb[13].mxu1 }
 0x7c9   : > { %v12038_v20 = vadd.f32 %v12037_v60, %v12036_v61  ;;  %v12039_v30 = vpop.f32.mrb[14].mxu1  ;;  %v19861_v60 = vld [vmem:[#allocation62_spill] sm:$0xff] }
 0x7ca   : > { %v17397_v10 = vadd.f32 %v12123_v27, %v17336_v32  ;;  %v12040_v57 = vpop.f32.mrb[15].mxu1 }
 0x7cb   : > { %v17400_v52 = vadd.f32 %v12038_v20, %v17237_v37  ;;  %v12041_v8 = vadd.f32 %v12040_v57, %v12039_v30  ;;  %v7668_v20 = vadd.f32 %v7667_v31, %v19861_v60  ;;  %v19862_v57 = vld [vmem:[#allocation63_spill] sm:$0xff] }
 0x7cc   : > { %v12124_v46 = vpop.f32.mrb[28].mxu0 }
 0x7cd   : > { %v17403_v11 = vadd.f32 %v12041_v8, %v17239_v29  ;;  %v12125_v54 = vpop.f32.mrb[29].mxu0  ;;  %v7669_v8 = vadd.f32 %v7668_v20, %v19862_v57 }
 0x7ce   : > { %v12126_v13 = vadd.f32 %v12125_v54, %v12124_v46  ;;  %v12127_v6 = vpop.f32.mrb[30].mxu0 }
 0x7cf   : > { %v12042_v62 = vpop.f32.mrb[16].mxu1  ;;  %v12128_v44 = vpop.f32.mrb[31].mxu0 }
 0x7d0   : > { %v17408_v32 = vadd.f32 %v12126_v13, %v17345_v35  ;;  %v12129_v9 = vadd.f32 %v12128_v44, %v12127_v6  ;;  %v12043_v37 = vpop.f32.mrb[17].mxu1 }
 0x7d1   : > { %v12044_v49 = vadd.f32 %v12043_v37, %v12042_v62  ;;  %v12045_v61 = vpop.f32.mrb[18].mxu1 }
 0x7d2   : > { %v17411_v58 = vadd.f32 %v12129_v9, %v17348_v33  ;;  %v12046_v29 = vpop.f32.mrb[19].mxu1  ;;  %v19863_v9 = vld [vmem:[#allocation61_spill] sm:$0xff] }
 0x7d3   : > { %v17414_v14 = vadd.f32 %v12044_v49, %v17253_v42  ;;  %v12047_v27 = vadd.f32 %v12046_v29, %v12045_v61  ;;  %v7670_v31 = vadd.f32 %v7669_v8, %v19863_v9  ;;  %v19864_v29 = vld [vmem:[#allocation68_spill] sm:$0xff]  ;;  %v19865_v8 = vld [vmem:[#allocation66_spill] sm:$0xff] }
 0x7d4   : > { %v12130_v30 = vpop.f32.mrb[32].mxu0 }
 0x7d5   : > { %v17418_v18 = vadd.f32 %v12047_v27, %v17255_v2  ;;  %v12131_v35 = vpop.f32.mrb[33].mxu0  ;;  %v7671_v27 = vadd.f32 %v7670_v31, %v19864_v29 }
 0x7d6   : > { %v12132_v46 = vadd.f32 %v12131_v35, %v12130_v30  ;;  %v12133_v54 = vpop.f32.mrb[34].mxu0 }
 0x7d7   : > { %v12048_v43 = vpop.f32.mrb[20].mxu1  ;;  %v12134_v13 = vpop.f32.mrb[35].mxu0 }
 0x7d8   : > { %v17422_v33 = vadd.f32 %v12132_v46, %v17357_v50  ;;  %v12135_v6 = vadd.f32 %v12134_v13, %v12133_v54  ;;  %v12049_v42 = vpop.f32.mrb[21].mxu1  ;;  %v7672_v13 = vadd.f32 %v7671_v27, %v19865_v8 }
 0x7d9   : > { %v12050_v62 = vadd.f32 %v12049_v42, %v12048_v43  ;;  %v12051_v44 = vpop.f32.mrb[22].mxu1 }
 0x7da   : > { %v17426_v37 = vadd.f32 %v12135_v6, %v17360_v36  ;;  %v12052_v2 = vpop.f32.mrb[23].mxu1 }
 0x7db   : > { %v17429_v49 = vadd.f32 %v12050_v62, %v17269_v1  ;;  %v12053_v61 = vadd.f32 %v12052_v2, %v12051_v44  ;;  %v19866_v44 = vld [vmem:[#allocation67_spill] sm:$0xff] }
 0x7dc   : > { %v12136_v20 = vpop.f32.mrb[36].mxu0  ;;  %v7673_v31 = vadd.f32 %v7672_v13, %v19866_v44  ;;  %v19868_v13 = vld [vmem:[#allocation72_spill] sm:$0xff] }
 0x7dd   : > { %v17433_v50 = vadd.f32 %v12053_v61, %v17271_v7  ;;  %v12137_v30 = vpop.f32.mrb[37].mxu0 }
 0x7de   : > { %v12138_v35 = vadd.f32 %v12137_v30, %v12136_v20  ;;  %v12139_v46 = vpop.f32.mrb[38].mxu0 }
 0x7df   : > { %v12054_v54 = vpop.f32.mrb[24].mxu1  ;;  %v12140_v43 = vpop.f32.mrb[39].mxu0 }
 0x7e0   : > { %v17437_v36 = vadd.f32 %v12138_v35, %v17369_v0  ;;  %v12141_v6 = vadd.f32 %v12140_v43, %v12139_v46  ;;  %v12055_v1 = vpop.f32.mrb[25].mxu1  ;;  %v19867_v35 = vld [vmem:[#allocation65_spill] sm:$0xff] }
 0x7e1   : > { %v12056_v42 = vadd.f32 %v12055_v1, %v12054_v54  ;;  %v12057_v62 = vpop.f32.mrb[26].mxu1  ;;  %v7674_v46 = vadd.f32 %v7673_v31, %v19867_v35 }
 0x7e2   : > { %v17441_v2 = vadd.f32 %v12141_v6, %v17374_v41  ;;  %v12058_v7 = vpop.f32.mrb[27].mxu1 }
 0x7e3   : > { %v17444_v61 = vadd.f32 %v12056_v42, %v17285_v51  ;;  %v12059_v20 = vadd.f32 %v12058_v7, %v12057_v62  ;;  %v7675_v44 = vadd.f32 %v7674_v46, %v19868_v13 }
 0x7e4   : > { %v12142_v30 = vpop.f32.mrb[40].mxu0 }
 0x7e5   : > { %v17447_v27 = vadd.f32 %v12059_v20, %v17287_v19  ;;  %v12143_v0 = vpop.f32.mrb[41].mxu0 }
 0x7e6   : > { %v12144_v43 = vadd.f32 %v12143_v0, %v12142_v30  ;;  %v12145_v54 = vpop.f32.mrb[42].mxu0  ;;  %v19869_v30 = vld [vmem:[#allocation70_spill] sm:$0xff] }
 0x7e7   : > { %v12060_v1 = vpop.f32.mrb[28].mxu1  ;;  %v12146_v8 = vpop.f32.mrb[43].mxu0  ;;  %v7676_v0 = vadd.f32 %v7675_v44, %v19869_v30 }
 0x7e8   : > { %v17452_v41 = vadd.f32 %v12144_v43, %v17385_v47  ;;  %v12147_v6 = vadd.f32 %v12146_v8, %v12145_v54  ;;  %v12061_v51 = vpop.f32.mrb[29].mxu1  ;;  %v19870_v43 = vld [vmem:[#allocation71_spill] sm:$0xff] }
 0x7e9   : > { %v12062_v42 = vadd.f32 %v12061_v51, %v12060_v1  ;;  %v12063_v62 = vpop.f32.mrb[30].mxu1  ;;  %v7677_v8 = vadd.f32 %v7676_v0, %v19870_v43 }
 0x7ea   : > { %v17455_v7 = vadd.f32 %v12147_v6, %v17389_v4  ;;  %v12064_v19 = vpop.f32.mrb[31].mxu1 }
 0x7eb   : > { %v17458_v20 = vadd.f32 %v12062_v42, %v17301_v12  ;;  %v12065_v31 = vadd.f32 %v12064_v19, %v12063_v62  ;;  %v19871_v19 = vld [vmem:[#allocation69_spill] sm:$0xff] }
 0x7ec   : > { %v12148_v35 = vpop.f32.mrb[44].mxu0  ;;  %v7678_v44 = vadd.f32 %v7677_v8, %v19871_v19  ;;  %v19873_v8 = vld [vmem:[#allocation74_spill] sm:$0xff] }
 0x7ed   : > { %v17462_v46 = vadd.f32 %v12065_v31, %v17303_v26  ;;  %v12149_v47 = vpop.f32.mrb[45].mxu0 }
 0x7ee   : > { %v12150_v54 = vadd.f32 %v12149_v47, %v12148_v35  ;;  %v12151_v1 = vpop.f32.mrb[46].mxu0  ;;  %v19872_v35 = vld [vmem:[#allocation76_spill] sm:$0xff] }
 0x7ef   : > { %v12152_v51 = vpop.f32.mrb[47].mxu0  ;;  %v12194_v13 = vpop.f32.mrb[32].mxu1  ;;  %v7679_v47 = vadd.f32 %v7678_v44, %v19872_v35 }
 0x7f0   : > { %v17466_v4 = vadd.f32 %v12150_v54, %v17400_v52  ;;  %v12153_v6 = vadd.f32 %v12152_v51, %v12151_v1  ;;  %v12195_v12 = vpop.f32.mrb[33].mxu1 }
 0x7f1   : > { %v12196_v42 = vadd.f32 %v12195_v12, %v12194_v13  ;;  %v12197_v62 = vpop.f32.mrb[34].mxu1  ;;  %v7680_v12 = vadd.f32 %v7679_v47, %v19873_v8  ;;  %v19875_v8 = vld [vmem:[#allocation73_spill] sm:$0xff] }
 0x7f2   : > { %v17470_v30 = vadd.f32 %v12153_v6, %v17403_v11  ;;  %v12198_v26 = vpop.f32.mrb[35].mxu1 }
 0x7f3   : > { %v12199_v31 = vadd.f32 %v12198_v26, %v12197_v62  ;;  %v17473_v0 = vadd.f32 %v12196_v42, %v17315_v3  ;;  %v19874_v26 = vld [vmem:[#allocation75_spill] sm:$0xff] }
 0x7f4   : > { %v12154_v43 = vpop.f32.mrb[48].mxu0  ;;  %v7681_v44 = vadd.f32 %v7680_v12, %v19874_v26 }
 0x7f5   : > { %v12155_v29 = vpop.f32.mrb[49].mxu0  ;;  %v17477_v52 = vadd.f32 %v12199_v31, %v17318_v22 }
 0x7f6   : > { %v12156_v54 = vadd.f32 %v12155_v29, %v12154_v43  ;;  %v12157_v13 = vpop.f32.mrb[50].mxu0 }
 0x7f7   : > { %v12158_v1 = vpop.f32.mrb[51].mxu0  ;;  %v12200_v51 = vpop.f32.mrb[36].mxu1 }
 0x7f8   : > { %v17481_v11 = vadd.f32 %v12156_v54, %v17414_v14  ;;  %v12159_v6 = vadd.f32 %v12158_v1, %v12157_v13  ;;  %v12201_v62 = vpop.f32.mrb[37].mxu1  ;;  %v7682_v14 = vadd.f32 %v7681_v44, %v19875_v8 }
 0x7f9   : > { %v12202_v3 = vadd.f32 %v12201_v62, %v12200_v51  ;;  %v12203_v42 = vpop.f32.mrb[38].mxu1  ;;  %v19876_v62 = vld [vmem:[#allocation80_spill] sm:$0xff] }
 0x7fa   : > { %v17485_v35 = vadd.f32 %v12159_v6, %v17418_v18  ;;  %v12204_v22 = vpop.f32.mrb[39].mxu1  ;;  %v7683_v9 = vadd.f32 %v7682_v14, %v19876_v62 }
 0x7fb   : > { %v12205_v31 = vadd.f32 %v12204_v22, %v12203_v42  ;;  %v7379_v29 = vadd.f32 %v12202_v3, %v17327_v25 }
 0x7fc   : > { %v12160_v43 = vpop.f32.mrb[52].mxu0 }
 0x7fd   : > { %v12161_v19 = vpop.f32.mrb[53].mxu0  ;;  %v7382_v47 = vadd.f32 %v12205_v31, %v17330_v38 }
 0x7fe   : > { %v12162_v54 = vadd.f32 %v12161_v19, %v12160_v43  ;;  %v12163_v13 = vpop.f32.mrb[54].mxu0  ;;  %v19877_v19 = vld [vmem:[#allocation78_spill] sm:$0xff] }
 0x7ff   : > { %v12164_v1 = vpop.f32.mrb[55].mxu0  ;;  %v12206_v51 = vpop.f32.mrb[40].mxu1  ;;  %v7684_v31 = vadd.f32 %v7683_v9, %v19877_v19 }
 0x800   : > { %v17492_v12 = vadd.f32 %v12162_v54, %v17429_v49  ;;  %v12165_v18 = vadd.f32 %v12164_v1, %v12163_v13  ;;  %v12207_v6 = vpop.f32.mrb[41].mxu1  ;;  %v19878_v49 = vld [vmem:[#allocation79_spill] sm:$0xff] }
 0x801   : > { %v12208_v42 = vadd.f32 %v12207_v6, %v12206_v51  ;;  %v12209_v22 = vpop.f32.mrb[42].mxu1  ;;  %v7685_v54 = vadd.f32 %v7684_v31, %v19878_v49 }
 0x802   : > { %v17495_v25 = vadd.f32 %v12165_v18, %v17433_v50  ;;  %v12210_v3 = vpop.f32.mrb[43].mxu1 }
 0x803   : > { %v12211_v38 = vadd.f32 %v12210_v3, %v12209_v22  ;;  %v17498_v44 = vadd.f32 %v12208_v42, %v17339_v63  ;;  %v19879_v3 = vld [vmem:[#allocation77_spill] sm:$0xff] }
 0x804   : > { %v12166_v43 = vpop.f32.mrb[56].mxu0  ;;  %v7686_v9 = vadd.f32 %v7685_v54, %v19879_v3 }
 0x805   : > { %v12167_v8 = vpop.f32.mrb[57].mxu0  ;;  %v17502_v14 = vadd.f32 %v12211_v38, %v17342_v56 }
 0x806   : > { %v12168_v13 = vadd.f32 %v12167_v8, %v12166_v43  ;;  %v12169_v1 = vpop.f32.mrb[58].mxu0  ;;  %v19880_v8 = vld [vmem:[#allocation84_spill] sm:$0xff] }
 0x807   : > { %v12170_v51 = vpop.f32.mrb[59].mxu0  ;;  %v12212_v6 = vpop.f32.mrb[44].mxu1  ;;  %v7687_v43 = vadd.f32 %v7686_v9, %v19880_v8  ;;  %v19882_v9 = vld [vmem:[#allocation83_spill] sm:$0xff] }
 0x808   : > { %v17506_v50 = vadd.f32 %v12168_v13, %v17444_v61  ;;  %v12171_v18 = vadd.f32 %v12170_v51, %v12169_v1  ;;  %v12213_v22 = vpop.f32.mrb[45].mxu1 }
 0x809   : > { %v12214_v63 = vadd.f32 %v12213_v22, %v12212_v6  ;;  %v12215_v42 = vpop.f32.mrb[46].mxu1 }
 0x80a   : > { %v17510_v19 = vadd.f32 %v12171_v18, %v17447_v27  ;;  %v12216_v56 = vpop.f32.mrb[47].mxu1  ;;  %v19881_v18 = vld [vmem:[#allocation82_spill] sm:$0xff] }
 0x80b   : > { %v12217_v38 = vadd.f32 %v12216_v56, %v12215_v42  ;;  %v7395_v31 = vadd.f32 %v12214_v63, %v17351_v16  ;;  %v7688_v3 = vadd.f32 %v7687_v43, %v19881_v18  ;;  %v19883_v43 = vld [vmem:[#allocation81_spill] sm:$0xff] }
 0x80c   : > { %v12172_v49 = vpop.f32.mrb[60].mxu0 }
 0x80d   : > { %v12173_v62 = vpop.f32.mrb[61].mxu0  ;;  %v7398_v61 = vadd.f32 %v12217_v38, %v17354_v59  ;;  %v7689_v8 = vadd.f32 %v7688_v3, %v19882_v9 }
 0x80e   : > { %v12174_v13 = vadd.f32 %v12173_v62, %v12172_v49  ;;  %v12175_v1 = vpop.f32.mrb[62].mxu0 }
 0x80f   : > { %v12176_v51 = vpop.f32.mrb[63].mxu0  ;;  %v12218_v6 = vpop.f32.mrb[48].mxu1 }
 0x810   : > { %v17516_v22 = vadd.f32 %v12174_v13, %v17458_v20  ;;  %v12177_v54 = vadd.f32 %v12176_v51, %v12175_v1  ;;  %v12219_v27 = vpop.f32.mrb[49].mxu1  ;;  %v7690_v51 = vadd.f32 %v7689_v8, %v19883_v43 }
 0x811   : > { %v12220_v42 = vadd.f32 %v12219_v27, %v12218_v6  ;;  %v12221_v56 = vpop.f32.mrb[50].mxu1 }
 0x812   : > { %v17520_v16 = vadd.f32 %v12177_v54, %v17462_v46  ;;  %v12222_v63 = vpop.f32.mrb[51].mxu1 }
 0x813   : > { %v12223_v59 = vadd.f32 %v12222_v63, %v12221_v56  ;;  %v7403_v62 = vadd.f32 %v12220_v42, %v17363_v21 }
 0x814   : > { %v12380_v49 = vpop.f32.mrb[64].mxu0 }
 0x815   : > { %v17524_v38 = vadd.f32 %v12380_v49, %v7379_v29  ;;  %v7531_v20 = vpop.f32.mrb[65].mxu0  ;;  %v7406_v13 = vadd.f32 %v12223_v59, %v17366_v40 }
 0x816   : > { %v17528_v1 = vadd.f32 %v7531_v20, %v17473_v0  ;;  %v12381_v6 = vpop.f32.mrb[66].mxu0 }
 0x817   : > { %v17531_v46 = vadd.f32 %v12381_v6, %v7382_v47  ;;  %v12224_v54 = vpop.f32.mrb[52].mxu1  ;;  %v7534_v27 = vpop.f32.mrb[67].mxu0 }
 0x818   : > { %v7691_v3 = vadd.f32 %v7690_v51, %v17528_v1  ;;  %v17535_v21 = vadd.f32 %v7534_v27, %v17477_v52  ;;  %v12225_v29 = vpop.f32.mrb[53].mxu1 }
 0x819   : > { %v12226_v42 = vadd.f32 %v12225_v29, %v12224_v54  ;;  %v12227_v56 = vpop.f32.mrb[54].mxu1 }
 0x81a   : > { %v7692_v40 = vadd.f32 %v7691_v3, %v17535_v21  ;;  %v12228_v63 = vpop.f32.mrb[55].mxu1 }
 0x81b   : > { %v12229_v0 = vadd.f32 %v12228_v63, %v12227_v56  ;;  %v7411_v59 = vadd.f32 %v12226_v42, %v17378_v24 }
 0x81c   : > { %v7693_v8 = vadd.f32 %v7692_v40, %v17524_v38  ;;  %v12384_v47 = vpop.f32.mrb[68].mxu0 }
 0x81d   : > { %v17540_v49 = vadd.f32 %v12384_v47, %v7395_v31  ;;  %v7547_v20 = vpop.f32.mrb[69].mxu0  ;;  %v7414_v51 = vadd.f32 %v12229_v0, %v17382_v48 }
 0x81e   : > { %v17544_v52 = vadd.f32 %v7547_v20, %v17498_v44  ;;  %v7694_v6 = vadd.f32 %v7693_v8, %v17531_v46  ;;  %v12385_v54 = vpop.f32.mrb[70].mxu0 }
 0x81f   : > { %v17547_v27 = vadd.f32 %v12385_v54, %v7398_v61  ;;  %v12230_v3 = vpop.f32.mrb[56].mxu1  ;;  %v7550_v29 = vpop.f32.mrb[71].mxu0 }
 0x820   : > { %v7695_v24 = vadd.f32 %v7694_v6, %v17544_v52  ;;  %v17551_v42 = vadd.f32 %v7550_v29, %v17502_v14  ;;  %v12231_v31 = vpop.f32.mrb[57].mxu1 }
 0x821   : > { %v12232_v56 = vadd.f32 %v12231_v31, %v12230_v3  ;;  %v12233_v40 = vpop.f32.mrb[58].mxu1 }
 0x822   : > { %v7696_v48 = vadd.f32 %v7695_v24, %v17551_v42  ;;  %v12234_v63 = vpop.f32.mrb[59].mxu1 }
 0x823   : > { %v12235_v44 = vadd.f32 %v12234_v63, %v12233_v40  ;;  %v7419_v0 = vadd.f32 %v12232_v56, %v17393_v39 }
 0x824   : > { %v7697_v8 = vadd.f32 %v7696_v48, %v17540_v49  ;;  %v12388_v61 = vpop.f32.mrb[72].mxu0 }
 0x825   : > { %v17556_v47 = vadd.f32 %v12388_v61, %v7411_v59  ;;  %v7563_v20 = vpop.f32.mrb[73].mxu0  ;;  %v7422_v6 = vadd.f32 %v12235_v44, %v17397_v10 }
 0x826   : > { %v17559_v54 = vadd.f32 %v7563_v20, %v7403_v62  ;;  %v7698_v14 = vadd.f32 %v7697_v8, %v17547_v27  ;;  %v12389_v3 = vpop.f32.mrb[74].mxu0 }
 0x827   : > { %19884 = vst [vmem:[#allocation102_spill] sm:$0xff] %v17556_v47  ;;  %v17562_v29 = vadd.f32 %v12389_v3, %v7414_v51  ;;  %v12236_v24 = vpop.f32.mrb[60].mxu1  ;;  %v7566_v31 = vpop.f32.mrb[75].mxu0 }
 0x828   : > { %v7699_v40 = vadd.f32 %v7698_v14, %v17559_v54  ;;  %v17565_v39 = vadd.f32 %v7566_v31, %v7406_v13  ;;  %v12237_v56 = vpop.f32.mrb[61].mxu1 }
 0x829   : > { %19885 = vst [vmem:[#allocation37_spill] sm:$0xff] %v17562_v29  ;;  %v12238_v48 = vadd.f32 %v12237_v56, %v12236_v24  ;;  %v12239_v59 = vpop.f32.mrb[62].mxu1 }
 0x82a   : > { %v7700_v63 = vadd.f32 %v7699_v40, %v17565_v39  ;;  %v12240_v61 = vpop.f32.mrb[63].mxu1 }
 0x82b   : > { %v12241_v10 = vadd.f32 %v12240_v61, %v12239_v59  ;;  %v7427_v62 = vadd.f32 %v12238_v48, %v17408_v32 }
 0x82c   : > { %v7701_v44 = vadd.f32 %v7700_v63, %v17556_v47  ;;  %v12392_v8 = vpop.f32.mrb[76].mxu0 }
 0x82d   : > { %v17570_v51 = vadd.f32 %v12392_v8, %v7427_v62  ;;  %v7579_v20 = vpop.f32.mrb[77].mxu0  ;;  %v7430_v3 = vadd.f32 %v12241_v10, %v17411_v58 }
 0x82e   : > { %v17573_v14 = vadd.f32 %v7579_v20, %v7419_v0  ;;  %v7702_v13 = vadd.f32 %v7701_v44, %v17562_v29  ;;  %v12393_v24 = vpop.f32.mrb[78].mxu0 }
 0x82f   : > { %19886 = vst [vmem:[#allocation94_spill] sm:$0xff] %v17570_v51  ;;  %v17576_v31 = vadd.f32 %v12393_v24, %v7430_v3  ;;  %v12242_v40 = vpop.f32.mrb[64].mxu1  ;;  %v7582_v56 = vpop.f32.mrb[79].mxu0 }
 0x830   : > { %19887 = vst [vmem:[#allocation96_spill] sm:$0xff] %v17573_v14  ;;  %v7703_v59 = vadd.f32 %v7702_v13, %v17573_v14  ;;  %v17579_v32 = vadd.f32 %v7582_v56, %v7422_v6  ;;  %v12243_v48 = vpop.f32.mrb[65].mxu1 }
 0x831   : > { %19888 = vst [vmem:[#allocation140_spill] sm:$0xff] %v17576_v31  ;;  %v12244_v63 = vadd.f32 %v12243_v48, %v12242_v40  ;;  %v12245_v61 = vpop.f32.mrb[66].mxu1 }
 0x832   : > { %19889 = vst [vmem:[#allocation26_spill] sm:$0xff] %v17579_v32  ;;  %v7704_v62 = vadd.f32 %v7703_v59, %v17579_v32  ;;  %v12246_v8 = vpop.f32.mrb[67].mxu1 }
 0x833   : > { %v12247_v58 = vadd.f32 %v12246_v8, %v12245_v61  ;;  %v7435_v0 = vadd.f32 %v12244_v63, %v17422_v33 }
 0x834   : > { %v12396_v10 = vpop.f32.mrb[80].mxu0  ;;  %v7705_v44 = vadd.f32 %v7704_v62, %v17570_v51 }
 0x835   : > { %v7595_v20 = vpop.f32.mrb[81].mxu0  ;;  %v7438_v3 = vadd.f32 %v12247_v58, %v17426_v37 }
 0x836   : > { %v17585_v24 = vadd.f32 %v7595_v20, %v7435_v0  ;;  %v12397_v13 = vpop.f32.mrb[82].mxu0  ;;  %v7706_v59 = vadd.f32 %v7705_v44, %v17576_v31 }
 0x837   : > { %v12248_v6 = vpop.f32.mrb[68].mxu1  ;;  %v7598_v56 = vpop.f32.mrb[83].mxu0 }
 0x838   : > { %19890 = vst [vmem:[#allocation19_spill] sm:$0xff] %v17585_v24  ;;  %v17587_v14 = vadd.f32 %v7598_v56, %v7438_v3  ;;  %v12249_v40 = vpop.f32.mrb[69].mxu1  ;;  %v7707_v51 = vadd.f32 %v7706_v59, %v17585_v24 }
 0x839   : > { %v12250_v48 = vadd.f32 %v12249_v40, %v12248_v6  ;;  %v12251_v61 = vpop.f32.mrb[70].mxu1 }
 0x83a   : > { %19891 = vst [vmem:[#allocation107_spill] sm:$0xff] %v17587_v14  ;;  %v12252_v8 = vpop.f32.mrb[71].mxu1  ;;  %v7708_v6 = vadd.f32 %v7707_v51, %v17587_v14 }
 0x83b   : > { %v7443_v33 = vadd.f32 %v12250_v48, %v17437_v36  ;;  %v12253_v63 = vadd.f32 %v12252_v8, %v12251_v61 }
 0x83c   : > { %v12400_v62 = vpop.f32.mrb[84].mxu0 }
 0x83d   : > { %v17592_v37 = vadd.f32 %v12396_v10, %v7443_v33  ;;  %v7446_v58 = vadd.f32 %v12253_v63, %v17441_v2  ;;  %v7611_v0 = vpop.f32.mrb[85].mxu0 }
 0x83e   : > { %v12401_v20 = vpop.f32.mrb[86].mxu0 }
 0x83f   : > { %19892 = vst [vmem:[#allocation42_spill] sm:$0xff] %v17592_v37  ;;  %v17595_v3 = vadd.f32 %v12397_v13, %v7446_v58  ;;  %v12254_v56 = vpop.f32.mrb[72].mxu1  ;;  %v7614_v32 = vpop.f32.mrb[87].mxu0  ;;  %v7709_v48 = vadd.f32 %v7708_v6, %v17592_v37 }
 0x840   : > { %v12255_v44 = vpop.f32.mrb[73].mxu1 }
 0x841   : > { %19893 = vst [vmem:[#allocation123_spill] sm:$0xff] %v17595_v3  ;;  %v12256_v40 = vadd.f32 %v12255_v44, %v12254_v56  ;;  %v12257_v31 = vpop.f32.mrb[74].mxu1  ;;  %v7710_v63 = vadd.f32 %v7709_v48, %v17595_v3 }
 0x842   : > { %v12258_v36 = vpop.f32.mrb[75].mxu1 }
 0x843   : > { %v7451_v59 = vadd.f32 %v12256_v40, %v17452_v41  ;;  %v12259_v10 = vadd.f32 %v12258_v36, %v12257_v31 }
 0x844   : > { %v12404_v61 = vpop.f32.mrb[88].mxu0 }
 0x845   : > { %v17600_v8 = vadd.f32 %v7611_v0, %v7451_v59  ;;  %v7454_v2 = vadd.f32 %v12259_v10, %v17455_v7  ;;  %v7627_v13 = vpop.f32.mrb[89].mxu0 }
 0x846   : > { %v12405_v33 = vpop.f32.mrb[90].mxu0 }
 0x847   : > { %19894 = vst [vmem:[#allocation115_spill] sm:$0xff] %v17600_v8  ;;  %v17604_v58 = vadd.f32 %v7614_v32, %v7454_v2  ;;  %v12260_v51 = vpop.f32.mrb[76].mxu1  ;;  %v7630_v56 = vpop.f32.mrb[91].mxu0  ;;  %v7711_v14 = vadd.f32 %v7710_v63, %v17600_v8 }
 0x848   : > { %v12261_v44 = vpop.f32.mrb[77].mxu1 }
 0x849   : > { %19895 = vst [vmem:[#allocation144_spill] sm:$0xff] %v17604_v58  ;;  %v12262_v6 = vadd.f32 %v12261_v44, %v12260_v51  ;;  %v12263_v37 = vpop.f32.mrb[78].mxu1  ;;  %v7712_v7 = vadd.f32 %v7711_v14, %v17604_v58 }
 0x84a   : > { %v12264_v41 = vpop.f32.mrb[79].mxu1 }
 0x84b   : > { %v7459_v31 = vadd.f32 %v12262_v6, %v17466_v4  ;;  %v12265_v0 = vadd.f32 %v12264_v41, %v12263_v37 }
 0x84c   : > { %v12408_v40 = vpop.f32.mrb[92].mxu0 }
 0x84d   : > { %v17609_v36 = vadd.f32 %v12400_v62, %v7459_v31  ;;  %v7462_v48 = vadd.f32 %v12265_v0, %v17470_v30  ;;  %v7643_v32 = vpop.f32.mrb[93].mxu0 }
 0x84e   : > { %v12409_v59 = vpop.f32.mrb[94].mxu0 }
 0x84f   : > { %v7713_v10 = vadd.f32 %v7712_v7, %v17609_v36  ;;  %v7623_v2 = vadd.f32 %v12401_v20, %v7462_v48  ;;  %v12266_v3 = vpop.f32.mrb[80].mxu1  ;;  %v7646_v63 = vpop.f32.mrb[95].mxu0 }
 0x850   : > { %v12267_v51 = vpop.f32.mrb[81].mxu1 }
 0x851   : > { %v7714_v44 = vadd.f32 %v7713_v10, %v7623_v2  ;;  %v12268_v8 = vadd.f32 %v12267_v51, %v12266_v3  ;;  %v12269_v24 = vpop.f32.mrb[82].mxu1 }
 0x852   : > { %v12270_v4 = vpop.f32.mrb[83].mxu1 }
 0x853   : > { %v7467_v37 = vadd.f32 %v12268_v8, %v17481_v11  ;;  %v12271_v6 = vadd.f32 %v12270_v4, %v12269_v24 }
 0x855   : > { %v7628_v14 = vadd.f32 %v7627_v13, %v7467_v37  ;;  %v7470_v62 = vadd.f32 %v12271_v6, %v17485_v35 }
 0x857   : > { %v7715_v41 = vadd.f32 %v7714_v44, %v7628_v14  ;;  %v7631_v30 = vadd.f32 %v7630_v56, %v7470_v62  ;;  %v12272_v31 = vpop.f32.mrb[84].mxu1 }
 0x858   : > { %v12273_v0 = vpop.f32.mrb[85].mxu1 }
 0x859   : > { %v7716_v58 = vadd.f32 %v7715_v41, %v7631_v30  ;;  %v12274_v7 = vadd.f32 %v12273_v0, %v12272_v31  ;;  %v12275_v20 = vpop.f32.mrb[86].mxu1 }
 0x85a   : > { %v12276_v48 = vpop.f32.mrb[87].mxu1 }
 0x85b   : > { %v7475_v29 = vadd.f32 %v12274_v7, %v17492_v12  ;;  %v12277_v10 = vadd.f32 %v12276_v48, %v12275_v20 }
 0x85d   : > { %v7636_v3 = vadd.f32 %v12404_v61, %v7475_v29  ;;  %v7478_v51 = vadd.f32 %v12277_v10, %v17495_v25 }
 0x85f   : > { %v7717_v47 = vadd.f32 %v7716_v58, %v7636_v3  ;;  %v7639_v11 = vadd.f32 %v12405_v33, %v7478_v51  ;;  %v12278_v24 = vpop.f32.mrb[88].mxu1 }
 0x860   : > { %v12279_v8 = vpop.f32.mrb[89].mxu1 }
 0x861   : > { %v7718_v13 = vadd.f32 %v7717_v47, %v7639_v11  ;;  %v12280_v35 = vadd.f32 %v12279_v8, %v12278_v24  ;;  %v12281_v44 = vpop.f32.mrb[90].mxu1 }
 0x862   : > { %v12282_v56 = vpop.f32.mrb[91].mxu1 }
 0x863   : > { %v7483_v4 = vadd.f32 %v12280_v35, %v17506_v50  ;;  %v12283_v37 = vadd.f32 %v12282_v56, %v12281_v44 }
 0x865   : > { %v7644_v6 = vadd.f32 %v7643_v32, %v7483_v4  ;;  %v7486_v62 = vadd.f32 %v12283_v37, %v17510_v19 }
 0x867   : > { %v7719_v41 = vadd.f32 %v7718_v13, %v7644_v6  ;;  %v7647_v12 = vadd.f32 %v7646_v63, %v7486_v62  ;;  %v12284_v31 = vpop.f32.mrb[92].mxu1 }
 0x868   : > { %v12285_v29 = vpop.f32.mrb[93].mxu1 }
 0x869   : > { %v7720_v61 = vadd.f32 %v7719_v41, %v7647_v12  ;;  %v12286_v25 = vadd.f32 %v12285_v29, %v12284_v31  ;;  %v12287_v58 = vpop.f32.mrb[94].mxu1 }
 0x86a   : > { %v12288_v33 = vpop.f32.mrb[95].mxu1 }
 0x86b   : > { %v7491_v0 = vadd.f32 %v12286_v25, %v17516_v22  ;;  %v12289_v47 = vadd.f32 %v12288_v33, %v12287_v58 }
 0x86d   : > { %v7652_v7 = vadd.f32 %v12408_v40, %v7491_v0  ;;  %v7494_v20 = vadd.f32 %v12289_v47, %v17520_v16 }
 0x86f   : > { %v7721_v48 = vadd.f32 %v7720_v61, %v7652_v7  ;;  %v7655_v50 = vadd.f32 %v12409_v59, %v7494_v20  ;;  %v19904_v20 = vld [vmem:[#allocation61_spill] sm:$0xff] }
 0x871   : > { %v7722_v10 = vadd.f32 %v7721_v48, %v7655_v50 }
 0x873   : > { %v7723_v32 = vrot.slane %v7722_v10, 4 }
 0x875   : > { %v7724_v51 = vadd.f32 %v7723_v32, %v7722_v10  ;;  %v19905_v10 = vld [vmem:[#allocation68_spill] sm:$0xff] }
 0x877   : > { %v7725_v19 = vrot.slane %v7724_v51, 2 }
 0x879   : > { %v7726_v24 = vadd.f32 %v7725_v19, %v7724_v51  ;;  %v19906_v19 = vld [vmem:[#allocation66_spill] sm:$0xff] }
 0x87b   : > { %v7727_v63 = vrot.slane %v7726_v24, 1 }
 0x87d   : > { %v7728_v8 = vadd.f32 %v7727_v63, %v7726_v24 }
 0x87f   : > { %v17621_v13 = vmul.f32 0.001953125, %v7728_v8 }
 0x881   : > { %v17625_v35 = vsub.f32 %v17609_v36, %v17621_v13  ;;  %v17628_v22 = vsub.f32 %v7623_v2, %v17621_v13  ;;  %v17631_v16 = vsub.f32 %v7628_v14, %v17621_v13  ;;  %v17634_v40 = vsub.f32 %v7631_v30, %v17621_v13 }
 0x882   : > { %v17637_v59 = vsub.f32 %v7636_v3, %v17621_v13  ;;  %v17640_v44 = vsub.f32 %v7639_v11, %v17621_v13  ;;  %v17643_v56 = vsub.f32 %v7644_v6, %v17621_v13  ;;  %v17646_v36 = vsub.f32 %v7647_v12, %v17621_v13 }
 0x883   : > { %19896 = vst [vmem:[#allocation143_spill] sm:$0xff] %v17625_v35  ;;  %19897 = vst [vmem:[#allocation30_spill] sm:$0xff] %v17628_v22  ;;  %v17649_v2 = vsub.f32 %v7652_v7, %v17621_v13  ;;  %v17652_v14 = vsub.f32 %v7655_v50, %v17621_v13  ;;  %v17656_v30 = vsub.f32 %v19852_v34, %v17621_v13 }
 0x884   : > { %19898 = vst [vmem:[#allocation23_spill] sm:$0xff] %v17631_v16  ;;  %19899 = vst [vmem:[#allocation48_spill] sm:$0xff] %v17634_v40  ;;  %v17660_v3 = vsub.f32 %v19853_v55, %v17621_v13  ;;  %v17664_v11 = vsub.f32 %v19854_v5, %v17621_v13  ;;  %v17672_v6 = vsub.f32 %v19855_v15, %v17621_v13 }
 0x885   : > { %19900 = vst [vmem:[#allocation50_spill] sm:$0xff] %v17637_v59  ;;  %19901 = vst [vmem:[#allocation127_spill] sm:$0xff] %v17640_v44  ;;  %v7795_v4 = vmul.f32 %v17656_v30, %v17656_v30  ;;  %v17676_v34 = vsub.f32 %v19856_v28, %v17621_v13  ;;  %v17682_v5 = vsub.f32 %v19857_v23, %v17621_v13 }
 0x886   : > { %19902 = vst [vmem:[#allocation126_spill] sm:$0xff] %v17643_v56  ;;  %19903 = vst [vmem:[#allocation148_spill] sm:$0xff] %v17646_v36  ;;  %v7796_v37 = vmul.f32 %v17660_v3, %v17660_v3  ;;  %v7797_v55 = vmul.f32 %v17664_v11, %v17664_v11  ;;  %v7798_v41 = vmul.f32 %v17672_v6, %v17672_v6 }
 0x887   : > { %v17688_v15 = vsub.f32 %v19858_v45, %v17621_v13  ;;  %v7799_v28 = vmul.f32 %v17676_v34, %v17676_v34  ;;  %v17694_v29 = vsub.f32 %v19859_v53, %v17621_v13  ;;  %v7800_v23 = vmul.f32 %v17682_v5, %v17682_v5 }
 0x888   : > { %v7859_v62 = vadd.f32 %v7796_v37, %v7795_v4  ;;  %v17700_v25 = vsub.f32 %v19860_v17, %v17621_v13  ;;  %v17706_v33 = vsub.f32 %v19861_v60, %v17621_v13  ;;  %v17712_v47 = vsub.f32 %v19862_v57, %v17621_v13  ;;  %v19907_v4 = vld [vmem:[#allocation67_spill] sm:$0xff] }
 0x889   : > { %v7801_v45 = vmul.f32 %v17688_v15, %v17688_v15  ;;  %v7802_v53 = vmul.f32 %v17694_v29, %v17694_v29  ;;  %v17718_v48 = vsub.f32 %v19904_v20, %v17621_v13  ;;  %v17724_v32 = vsub.f32 %v19905_v10, %v17621_v13  ;;  %v19911_v20 = vld [vmem:[#allocation71_spill] sm:$0xff] }
 0x88a   : > { %v7860_v12 = vadd.f32 %v7859_v62, %v7797_v55  ;;  %v7803_v17 = vmul.f32 %v17700_v25, %v17700_v25  ;;  %v7804_v60 = vmul.f32 %v17706_v33, %v17706_v33  ;;  %v7805_v57 = vmul.f32 %v17712_v47, %v17712_v47 }
 0x88b   : > { %v17730_v24 = vsub.f32 %v19906_v19, %v17621_v13  ;;  %v7806_v63 = vmul.f32 %v17718_v48, %v17718_v48  ;;  %v17736_v37 = vsub.f32 %v19907_v4, %v17621_v13  ;;  %v7807_v55 = vmul.f32 %v17724_v32, %v17724_v32 }
 0x88c   : > { %v7861_v31 = vadd.f32 %v7860_v12, %v7798_v41  ;;  %v19908_v41 = vld [vmem:[#allocation65_spill] sm:$0xff] }
 0x88d   : > { %v17742_v12 = vsub.f32 %v19908_v41, %v17621_v13  ;;  %v19914_v41 = vld [vmem:[#allocation74_spill] sm:$0xff] }
 0x88e   : > { %v7862_v61 = vadd.f32 %v7861_v31, %v7799_v28  ;;  %v7808_v28 = vmul.f32 %v17730_v24, %v17730_v24 }
 0x890   : > { %v7863_v58 = vadd.f32 %v7862_v61, %v7800_v23  ;;  %v19909_v23 = vld [vmem:[#allocation72_spill] sm:$0xff] }
 0x891   : > { %v17748_v61 = vsub.f32 %v19909_v23, %v17621_v13 }
 0x892   : > { %v7864_v0 = vadd.f32 %v7863_v58, %v7801_v45  ;;  %v7809_v45 = vmul.f32 %v17736_v37, %v17736_v37 }
 0x894   : > { %v7865_v7 = vadd.f32 %v7864_v0, %v7802_v53  ;;  %v19910_v53 = vld [vmem:[#allocation70_spill] sm:$0xff] }
 0x895   : > { %v17754_v0 = vsub.f32 %v19910_v53, %v17621_v13 }
 0x896   : > { %v7866_v50 = vadd.f32 %v7865_v7, %v7803_v17  ;;  %v7810_v17 = vmul.f32 %v17742_v12, %v17742_v12 }
 0x897   : > { %v7812_v19 = vmul.f32 %v17754_v0, %v17754_v0 }
 0x898   : > { %v7867_v51 = vadd.f32 %v7866_v50, %v7804_v60  ;;  %v17760_v60 = vsub.f32 %v19911_v20, %v17621_v13  ;;  %v7811_v50 = vmul.f32 %v17748_v61, %v17748_v61 }
 0x89a   : > { %v7868_v8 = vadd.f32 %v7867_v51, %v7805_v57  ;;  %v19912_v57 = vld [vmem:[#allocation69_spill] sm:$0xff] }
 0x89b   : > { %v17766_v51 = vsub.f32 %v19912_v57, %v17621_v13 }
 0x89c   : > { %v7869_v62 = vadd.f32 %v7868_v8, %v7806_v63  ;;  %v19913_v8 = vld [vmem:[#allocation76_spill] sm:$0xff] }
 0x89d   : > { %v17772_v4 = vsub.f32 %v19913_v8, %v17621_v13 }
 0x89e   : > { %v7870_v31 = vadd.f32 %v7869_v62, %v7807_v55  ;;  %v7813_v55 = vmul.f32 %v17760_v60, %v17760_v60 }
 0x8a0   : > { %v7871_v58 = vadd.f32 %v7870_v31, %v7808_v28  ;;  %v17778_v28 = vsub.f32 %v19914_v41, %v17621_v13  ;;  %v7814_v31 = vmul.f32 %v17766_v51, %v17766_v51  ;;  %v19918_v41 = vld [vmem:[#allocation79_spill] sm:$0xff] }
 0x8a2   : > { %v7872_v7 = vadd.f32 %v7871_v58, %v7809_v45  ;;  %v17784_v45 = vsub.f32 %v19874_v26, %v17621_v13  ;;  %v7815_v58 = vmul.f32 %v17772_v4, %v17772_v4  ;;  %v7816_v20 = vmul.f32 %v17778_v28, %v17778_v28 }
 0x8a4   : > { %v7873_v10 = vadd.f32 %v7872_v7, %v7810_v17  ;;  %v19915_v17 = vld [vmem:[#allocation73_spill] sm:$0xff]  ;;  %v7817_v26 = vmul.f32 %v17784_v45, %v17784_v45 }
 0x8a5   : > { %v17790_v7 = vsub.f32 %v19915_v17, %v17621_v13 }
 0x8a6   : > { %v7874_v63 = vadd.f32 %v7873_v10, %v7811_v50  ;;  %v19916_v10 = vld [vmem:[#allocation80_spill] sm:$0xff] }
 0x8a7   : > { %v17796_v57 = vsub.f32 %v19916_v10, %v17621_v13  ;;  %v19920_v10 = vld [vmem:[#allocation84_spill] sm:$0xff] }
 0x8a8   : > { %v7875_v62 = vadd.f32 %v7874_v63, %v7812_v19  ;;  %v19917_v63 = vld [vmem:[#allocation78_spill] sm:$0xff] }
 0x8a9   : > { %v17802_v8 = vsub.f32 %v19917_v63, %v17621_v13  ;;  %v17820_v63 = vsub.f32 %v19920_v10, %v17621_v13  ;;  %v17838_v10 = vsub.f32 %v19883_v43, %v17621_v13 }
 0x8aa   : > { %v7876_v23 = vadd.f32 %v7875_v62, %v7813_v55  ;;  %v7818_v55 = vmul.f32 %v17790_v7, %v17790_v7 }
 0x8ab   : > { %v7826_v43 = vmul.f32 %v17838_v10, %v17838_v10 }
 0x8ac   : > { %v7877_v53 = vadd.f32 %v7876_v23, %v7814_v31  ;;  %v17808_v31 = vsub.f32 %v19918_v41, %v17621_v13  ;;  %v7819_v23 = vmul.f32 %v17796_v57, %v17796_v57  ;;  %v17826_v41 = vsub.f32 %v19881_v18, %v17621_v13 }
 0x8ae   : > { %v7878_v50 = vadd.f32 %v7877_v53, %v7815_v58  ;;  %v19919_v53 = vld [vmem:[#allocation77_spill] sm:$0xff]  ;;  %v7824_v18 = vmul.f32 %v17826_v41, %v17826_v41 }
 0x8af   : > { %v17814_v17 = vsub.f32 %v19919_v53, %v17621_v13  ;;  %v17832_v53 = vsub.f32 %v19882_v9, %v17621_v13 }
 0x8b0   : > { %v7879_v19 = vadd.f32 %v7878_v50, %v7816_v20  ;;  %v7820_v20 = vmul.f32 %v17802_v8, %v17802_v8 }
 0x8b1   : > { %v7825_v9 = vmul.f32 %v17832_v53, %v17832_v53 }
 0x8b2   : > { %v7880_v62 = vadd.f32 %v7879_v19, %v7817_v26  ;;  %v7821_v26 = vmul.f32 %v17808_v31, %v17808_v31 }
 0x8b4   : > { %v7881_v58 = vadd.f32 %v7880_v62, %v7818_v55  ;;  %v7822_v55 = vmul.f32 %v17814_v17, %v17814_v17 }
 0x8b6   : > { %v7882_v50 = vadd.f32 %v7881_v58, %v7819_v23  ;;  %v7823_v23 = vmul.f32 %v17820_v63, %v17820_v63 }
 0x8b8   : > { %v7883_v19 = vadd.f32 %v7882_v50, %v7820_v20  ;;  %v17844_v50 = vsub.f32 %v17528_v1, %v17621_v13 }
 0x8ba   : > { %v7884_v62 = vadd.f32 %v7883_v19, %v7821_v26  ;;  %v17850_v19 = vsub.f32 %v17535_v21, %v17621_v13  ;;  %v7827_v1 = vmul.f32 %v17844_v50, %v17844_v50 }
 0x8bc   : > { %v7885_v58 = vadd.f32 %v7884_v62, %v7822_v55  ;;  %v17856_v62 = vsub.f32 %v17524_v38, %v17621_v13  ;;  %v7828_v21 = vmul.f32 %v17850_v19, %v17850_v19 }
 0x8be   : > { %v7886_v20 = vadd.f32 %v7885_v58, %v7823_v23  ;;  %v17862_v58 = vsub.f32 %v17531_v46, %v17621_v13  ;;  %v7829_v38 = vmul.f32 %v17856_v62, %v17856_v62 }
 0x8c0   : > { %v7887_v26 = vadd.f32 %v7886_v20, %v7824_v18  ;;  %v17868_v20 = vsub.f32 %v17544_v52, %v17621_v13  ;;  %v7830_v46 = vmul.f32 %v17862_v58, %v17862_v58 }
 0x8c2   : > { %v7888_v55 = vadd.f32 %v7887_v26, %v7825_v9  ;;  %v17874_v26 = vsub.f32 %v17551_v42, %v17621_v13  ;;  %v7831_v52 = vmul.f32 %v17868_v20, %v17868_v20 }
 0x8c4   : > { %v7889_v23 = vadd.f32 %v7888_v55, %v7826_v43  ;;  %19921 = vst [vmem:[#allocation147_spill] sm:$0xff] %v17874_v26  ;;  %v17880_v55 = vsub.f32 %v17540_v49, %v17621_v13  ;;  %v7832_v42 = vmul.f32 %v17874_v26, %v17874_v26 }
 0x8c6   : > { %v7890_v18 = vadd.f32 %v7889_v23, %v7827_v1  ;;  %19922 = vst [vmem:[#allocation34_spill] sm:$0xff] %v17880_v55  ;;  %v17886_v23 = vsub.f32 %v17547_v27, %v17621_v13  ;;  %v7833_v49 = vmul.f32 %v17880_v55, %v17880_v55 }
 0x8c8   : > { %v7891_v9 = vadd.f32 %v7890_v18, %v7828_v21  ;;  %19923 = vst [vmem:[#allocation27_spill] sm:$0xff] %v17886_v23  ;;  %v17892_v18 = vsub.f32 %v17559_v54, %v17621_v13  ;;  %v7834_v27 = vmul.f32 %v17886_v23, %v17886_v23 }
 0x8ca   : > { %v7892_v43 = vadd.f32 %v7891_v9, %v7829_v38  ;;  %19924 = vst [vmem:[#allocation112_spill] sm:$0xff] %v17892_v18  ;;  %v17898_v9 = vsub.f32 %v17565_v39, %v17621_v13  ;;  %v7835_v54 = vmul.f32 %v17892_v18, %v17892_v18 }
 0x8cc   : > { %v7893_v1 = vadd.f32 %v7892_v43, %v7830_v46  ;;  %19925 = vst [vmem:[#allocation51_spill] sm:$0xff] %v17898_v9  ;;  %v19926_v43 = vld [vmem:[#allocation102_spill] sm:$0xff]  ;;  %v7836_v39 = vmul.f32 %v17898_v9, %v17898_v9 }
 0x8cd   : > { %v17904_v26 = vsub.f32 %v19926_v43, %v17621_v13  ;;  %v19932_v43 = vld [vmem:[#allocation26_spill] sm:$0xff] }
 0x8ce   : > { %v7894_v21 = vadd.f32 %v7893_v1, %v7831_v52  ;;  %v19928_v1 = vld [vmem:[#allocation37_spill] sm:$0xff]  ;;  %v17922_v18 = vsub.f32 %v19932_v43, %v17621_v13  ;;  %v19938_v43 = vld [vmem:[#allocation19_spill] sm:$0xff] }
 0x8cf   : > { %19927 = vst [vmem:[#allocation131_spill] sm:$0xff] %v17904_v26  ;;  %v17910_v55 = vsub.f32 %v19928_v1, %v17621_v13  ;;  %v19934_v1 = vld [vmem:[#allocation94_spill] sm:$0xff] }
 0x8d0   : > { %v7895_v38 = vadd.f32 %v7894_v21, %v7832_v42  ;;  %v19930_v21 = vld [vmem:[#allocation96_spill] sm:$0xff]  ;;  %19933 = vst [vmem:[#allocation151_spill] sm:$0xff] %v17922_v18  ;;  %v17928_v9 = vsub.f32 %v19934_v1, %v17621_v13  ;;  %v19940_v1 = vld [vmem:[#allocation107_spill] sm:$0xff] }
 0x8d1   : > { %19929 = vst [vmem:[#allocation130_spill] sm:$0xff] %v17910_v55  ;;  %v17916_v23 = vsub.f32 %v19930_v21, %v17621_v13  ;;  %v19936_v21 = vld [vmem:[#allocation140_spill] sm:$0xff] }
 0x8d2   : > { %v7896_v46 = vadd.f32 %v7895_v38, %v7833_v49  ;;  %v7837_v49 = vmul.f32 %v17904_v26, %v17904_v26  ;;  %19935 = vst [vmem:[#allocation38_spill] sm:$0xff] %v17928_v9  ;;  %v17934_v26 = vsub.f32 %v19936_v21, %v17621_v13  ;;  %v19941_v21 = vld [vmem:[#allocation42_spill] sm:$0xff] }
 0x8d3   : > { %19931 = vst [vmem:[#allocation152_spill] sm:$0xff] %v17916_v23 }
 0x8d4   : > { %v7897_v52 = vadd.f32 %v7896_v46, %v7834_v27  ;;  %v7838_v27 = vmul.f32 %v17910_v55, %v17910_v55  ;;  %19937 = vst [vmem:[#allocation31_spill] sm:$0xff] %v17934_v26  ;;  %v17940_v55 = vsub.f32 %v19938_v43, %v17621_v13  ;;  %v19943_v43 = vld [vmem:[#allocation123_spill] sm:$0xff] }
 0x8d6   : > { %v7898_v42 = vadd.f32 %v7897_v52, %v7835_v54  ;;  %v7839_v54 = vmul.f32 %v17916_v23, %v17916_v23  ;;  %19939 = vst [vmem:[#allocation43_spill] sm:$0xff] %v17940_v55  ;;  %v17946_v23 = vsub.f32 %v19940_v1, %v17621_v13  ;;  %v19944_v1 = vld [vmem:[#allocation115_spill] sm:$0xff] }
 0x8d8   : > { %v7899_v38 = vadd.f32 %v7898_v42, %v7836_v39  ;;  %v7840_v39 = vmul.f32 %v17922_v18, %v17922_v18  ;;  %v17952_v18 = vsub.f32 %v19941_v21, %v17621_v13  ;;  %v19945_v21 = vld [vmem:[#allocation144_spill] sm:$0xff] }
 0x8da   : > { %v7900_v46 = vadd.f32 %v7899_v38, %v7837_v49  ;;  %v7841_v49 = vmul.f32 %v17928_v9, %v17928_v9  ;;  %19942 = vst [vmem:[#allocation106_spill] sm:$0xff] %v17952_v18  ;;  %v17958_v9 = vsub.f32 %v19943_v43, %v17621_v13 }
 0x8dc   : > { %v7901_v52 = vadd.f32 %v7900_v46, %v7838_v27  ;;  %v7842_v27 = vmul.f32 %v17934_v26, %v17934_v26  ;;  %v17964_v26 = vsub.f32 %v19944_v1, %v17621_v13 }
 0x8de   : > { %v7902_v42 = vadd.f32 %v7901_v52, %v7839_v54  ;;  %v7843_v54 = vmul.f32 %v17940_v55, %v17940_v55  ;;  %v17970_v55 = vsub.f32 %v19945_v21, %v17621_v13  ;;  %v7847_v43 = vmul.f32 %v17964_v26, %v17964_v26 }
 0x8df   : > { %v7850_v13 = vmul.f32 %v17628_v22, %v17628_v22  ;;  %v7851_v21 = vmul.f32 %v17631_v16, %v17631_v16 }
 0x8e0   : > { %v7903_v38 = vadd.f32 %v7902_v42, %v7840_v39  ;;  %v7844_v39 = vmul.f32 %v17946_v23, %v17946_v23 }
 0x8e2   : > { %v7904_v46 = vadd.f32 %v7903_v38, %v7841_v49  ;;  %v7845_v49 = vmul.f32 %v17952_v18, %v17952_v18  ;;  %v7849_v18 = vmul.f32 %v17625_v35, %v17625_v35  ;;  %v18000_v35 = vld [vmem:[#allocation10] ss:$0 sm:$0xff] }
 0x8e4   : > { %v7905_v52 = vadd.f32 %v7904_v46, %v7842_v27  ;;  %v7846_v27 = vmul.f32 %v17958_v9, %v17958_v9 }
 0x8e6   : > { %v7906_v42 = vadd.f32 %v7905_v52, %v7843_v54  ;;  %v7848_v52 = vmul.f32 %v17970_v55, %v17970_v55 }
 0x8e8   : > { %v7907_v38 = vadd.f32 %v7906_v42, %v7844_v39 }
 0x8ea   : > { %v7908_v46 = vadd.f32 %v7907_v38, %v7845_v49  ;;  %v7852_v38 = vmul.f32 %v17634_v40, %v17634_v40 }
 0x8ec   : > { %v7909_v54 = vadd.f32 %v7908_v46, %v7846_v27  ;;  %v7853_v46 = vmul.f32 %v17637_v59, %v17637_v59 }
 0x8ee   : > { %v7910_v1 = vadd.f32 %v7909_v54, %v7847_v43  ;;  %v7854_v54 = vmul.f32 %v17640_v44, %v17640_v44 }
 0x8f0   : > { %v7911_v39 = vadd.f32 %v7910_v1, %v7848_v52  ;;  %v7855_v1 = vmul.f32 %v17643_v56, %v17643_v56 }
 0x8f2   : > { %v7912_v42 = vadd.f32 %v7911_v39, %v7849_v18  ;;  %v7856_v39 = vmul.f32 %v17646_v36, %v17646_v36  ;;  %v7933_v36 = vlaneseq }
 0x8f4   : > { %v7913_v49 = vadd.f32 %v7912_v42, %v7850_v13  ;;  %v7857_v42 = vmul.f32 %v17649_v2, %v17649_v2 }
 0x8f6   : > { %v7914_v27 = vadd.f32 %v7913_v49, %v7851_v21  ;;  %v7858_v49 = vmul.f32 %v17652_v14, %v17652_v14 }
 0x8f8   : > { %v7915_v43 = vadd.f32 %v7914_v27, %v7852_v38 }
 0x8fa   : > { %v7916_v52 = vadd.f32 %v7915_v43, %v7853_v46 }
 0x8fc   : > { %v7917_v18 = vadd.f32 %v7916_v52, %v7854_v54 }
 0x8fe   : > { %v7918_v13 = vadd.f32 %v7917_v18, %v7855_v1  ;;  %v7934_v1 = vshrl.u32 %v7933_v36, 7  ;;  %v7658_v18 = vld [vmem:[#allocation8] sm:$0x1] }
 0x900   : > { %v7919_v21 = vadd.f32 %v7918_v13, %v7856_v39  ;;  %v7935_v16 = vsub.s32 0, %v7934_v1  ;;  %v19957_v1 = vld [vmem:[#allocation51_spill] sm:$0xff] }
 0x902   : > { %v7920_v38 = vadd.f32 %v7919_v21, %v7857_v42 }
 0x904   : > { %v7921_v27 = vadd.f32 %v7920_v38, %v7858_v49 }
 0x906   : > { %v7922_v59 = vrot.slane %v7921_v27, 4 }
 0x908   : > { %v7923_v44 = vadd.f32 %v7922_v59, %v7921_v27 }
 0x90a   : > { %v7924_v46 = vrot.slane %v7923_v44, 2 }
 0x90c   : > { %v7925_v43 = vadd.f32 %v7924_v46, %v7923_v44  ;;  %v19953_v46 = vld [vmem:[#allocation147_spill] sm:$0xff] }
 0x90e   : > { %v7926_v40 = vrot.slane %v7925_v43, 1 }
 0x910   : > { %v7927_v56 = vadd.f32 %v7926_v40, %v7925_v43  ;;  %v19954_v43 = vld [vmem:[#allocation34_spill] sm:$0xff] }
 0x912   : > { %v7928_v54 = vmul.f32 0.001953125, %v7927_v56 }
 0x914   : > { %v7929_v52 = vadd.f32 1e-05, %v7928_v54  ;;  %v19955_v54 = vld [vmem:[#allocation27_spill] sm:$0xff] }
 0x916   : > { %13039 = vrsqrt.f32 %v7929_v52  ;;  %v19956_v52 = vld [vmem:[#allocation112_spill] sm:$0xff] }
 0x920   : > { %v13040_v22 = vpop.eup %13039 }
 0x921   : > { %v7931_v39 = vmul.f32 %v13040_v22, %v7658_v18  ;;  %v19958_v18 = vld [vmem:[#allocation131_spill] sm:$0xff] }
 0x923   : > { %v17998_v13 = vrot.slane %v7931_v39, %v7935_v16  ;;  %v19959_v39 = vld [vmem:[#allocation130_spill] sm:$0xff] }
 0x925   : > { %v8000_v59 = vmul.f32 %v17998_v13, %v17649_v2  ;;  %v8001_v44 = vmul.f32 %v17998_v13, %v17652_v14  ;;  %v18008_v40 = vmul.f32 %v17998_v13, %v17656_v30  ;;  %v18012_v56 = vmul.f32 %v17998_v13, %v17660_v3 }
 0x926   : > { %v18016_v22 = vmul.f32 %v17998_v13, %v17664_v11  ;;  %v18020_v16 = vmul.f32 %v17998_v13, %v17672_v6  ;;  %v18024_v36 = vmul.f32 %v17998_v13, %v17676_v34  ;;  %v18028_v2 = vmul.f32 %v17998_v13, %v17682_v5 }
 0x927   : > { %v8070_v14 = vadd.f32 %v18000_v35, %v8000_v59  ;;  %v8071_v30 = vadd.f32 %v18000_v35, %v8001_v44  ;;  %v18034_v3 = vmul.f32 %v17998_v13, %v17688_v15  ;;  %v18038_v11 = vmul.f32 %v17998_v13, %v17694_v29  ;;  %v19960_v59 = vld [vmem:[#allocation152_spill] sm:$0xff] }
 0x928   : > { %v18042_v6 = vmul.f32 %v17998_v13, %v17700_v25  ;;  %v18046_v34 = vmul.f32 %v17998_v13, %v17706_v33  ;;  %v18050_v5 = vmul.f32 %v17998_v13, %v17712_v47  ;;  %v18054_v15 = vmul.f32 %v17998_v13, %v17718_v48 }
 0x929   : > { %v8134_v42 = vmax.f32 %v8070_v14, 0.0  ;;  %v8135_v29 = vmax.f32 %v8071_v30, 0.0  ;;  %v18058_v21 = vmul.f32 %v17998_v13, %v17724_v32  ;;  %v18062_v25 = vmul.f32 %v17998_v13, %v17730_v24  ;;  %v19961_v14 = vld [vmem:[#allocation151_spill] sm:$0xff] }
 0x92a   : > { %v18066_v33 = vmul.f32 %v17998_v13, %v17736_v37  ;;  %v18070_v47 = vmul.f32 %v17998_v13, %v17742_v12  ;;  %v18074_v48 = vmul.f32 %v17998_v13, %v17748_v61  ;;  %v18078_v32 = vmul.f32 %v17998_v13, %v17754_v0 }
 0x92b   : > { %v9321_v49 = vpack.c.bf16 %v8135_v29, %v8134_v42  ;;  %v18082_v24 = vmul.f32 %v17998_v13, %v17760_v60  ;;  %v18086_v37 = vmul.f32 %v17998_v13, %v17766_v51  ;;  %v18090_v12 = vmul.f32 %v17998_v13, %v17772_v4  ;;  %v19962_v42 = vld [vmem:[#allocation38_spill] sm:$0xff] }
 0x92c   : > { %v18094_v61 = vmul.f32 %v17998_v13, %v17778_v28  ;;  %v18098_v0 = vmul.f32 %v17998_v13, %v17784_v45  ;;  %v18102_v60 = vmul.f32 %v17998_v13, %v17790_v7  ;;  %v18106_v51 = vmul.f32 %v17998_v13, %v17796_v57 }
 0x92d   : > { %19946 = vst [vmem:[#allocation135_spill] sm:$0xff] %v18082_v24  ;;  %19947 = vst [vmem:[#allocation134_spill] sm:$0xff] %v18086_v37  ;;  %v7963_v4 = vmul.f32 %v17998_v13, %v17802_v8  ;;  %v7964_v28 = vmul.f32 %v17998_v13, %v17808_v31  ;;  %v7965_v45 = vmul.f32 %v17998_v13, %v17814_v17  ;;  %v19972_v37 = vld [vmem:[#allocation126_spill] sm:$0xff]  ;;  %v19973_v24 = vld [vmem:[#allocation148_spill] sm:$0xff] }
 0x92e   : > { %19948 = vst [vmem:[#allocation39_spill] sm:$0xff] %v18090_v12  ;;  %19949 = vst [vmem:[#allocation35_spill] sm:$0xff] %v18094_v61  ;;  %v7966_v7 = vmul.f32 %v17998_v13, %v17820_v63  ;;  %v7967_v57 = vmul.f32 %v17998_v13, %v17826_v41  ;;  %v7968_v38 = vmul.f32 %v17998_v13, %v17832_v53  ;;  %v19970_v61 = vld [vmem:[#allocation50_spill] sm:$0xff]  ;;  %v19971_v12 = vld [vmem:[#allocation127_spill] sm:$0xff] }
 0x92f   : > { %19950 = vst [vmem:[#allocation47_spill] sm:$0xff] %v18098_v0  ;;  %19951 = vst [vmem:[#allocation109_spill] sm:$0xff] %v18102_v60  ;;  %v7969_v27 = vmul.f32 %v17998_v13, %v17838_v10  ;;  %v7970_v8 = vmul.f32 %v17998_v13, %v17844_v50  ;;  %v7971_v31 = vmul.f32 %v17998_v13, %v17850_v19  ;;  %v19968_v60 = vld [vmem:[#allocation23_spill] sm:$0xff]  ;;  %v19969_v0 = vld [vmem:[#allocation48_spill] sm:$0xff] }
 0x930   : > { %19952 = vst [vmem:[#allocation139_spill] sm:$0xff] %v18106_v51  ;;  %9353 = vst [vmem:[%s18110_s24 + $0xf8] sm:$0xff] %v9321_v49   ;;  %v7972_v17 = vmul.f32 %v17998_v13, %v17856_v62  ;;  %v7973_v63 = vmul.f32 %v17998_v13, %v17862_v58  ;;  %v7974_v41 = vmul.f32 %v17998_v13, %v17868_v20  ;;  %v19963_v49 = vld [vmem:[#allocation31_spill] sm:$0xff]  ;;  %v19967_v51 = vld [vmem:[#allocation30_spill] sm:$0xff] }
 0x931   : > { %v7975_v53 = vmul.f32 %v17998_v13, %v19953_v46  ;;  %v7976_v10 = vmul.f32 %v17998_v13, %v19954_v43  ;;  %v7977_v50 = vmul.f32 %v17998_v13, %v19955_v54  ;;  %v7978_v19 = vmul.f32 %v17998_v13, %v19956_v52  ;;  %v19964_v43 = vld [vmem:[#allocation43_spill] sm:$0xff] }
 0x932   : > { %v7979_v62 = vmul.f32 %v17998_v13, %v19957_v1  ;;  %v7980_v58 = vmul.f32 %v17998_v13, %v19958_v18  ;;  %v7981_v20 = vmul.f32 %v17998_v13, %v19959_v39  ;;  %v7982_v44 = vmul.f32 %v17998_v13, %v19960_v59  ;;  %v19965_v1 = vld [vmem:[#allocation106_spill] sm:$0xff] }
 0x933   : > { %v7983_v30 = vmul.f32 %v17998_v13, %v19961_v14  ;;  %v7984_v29 = vmul.f32 %v17998_v13, %v19962_v42  ;;  %v7985_v46 = vmul.f32 %v17998_v13, %v19963_v49  ;;  %v7986_v54 = vmul.f32 %v17998_v13, %v19964_v43  ;;  %v19966_v42 = vld [vmem:[#allocation143_spill] sm:$0xff] }
 0x934   : > { %v7987_v52 = vmul.f32 %v17998_v13, %v17946_v23  ;;  %v7988_v18 = vmul.f32 %v17998_v13, %v19965_v1  ;;  %v7989_v39 = vmul.f32 %v17998_v13, %v17958_v9  ;;  %v7990_v59 = vmul.f32 %v17998_v13, %v17964_v26 }
 0x935   : > { %v7991_v14 = vmul.f32 %v17998_v13, %v17970_v55  ;;  %v7992_v49 = vmul.f32 %v17998_v13, %v19966_v42  ;;  %v7993_v43 = vmul.f32 %v17998_v13, %v19967_v51  ;;  %v7994_v23 = vmul.f32 %v17998_v13, %v19968_v60 }
 0x936   : > { %v7995_v1 = vmul.f32 %v17998_v13, %v19969_v0  ;;  %v7996_v9 = vmul.f32 %v17998_v13, %v19970_v61  ;;  %v7997_v26 = vmul.f32 %v17998_v13, %v19971_v12  ;;  %v7998_v55 = vmul.f32 %v17998_v13, %v19972_v37  ;;  %v19981_v0 = vld [vmem:[#allocation39_spill] sm:$0xff] }
 0x937   : > { %v7999_v42 = vmul.f32 %v17998_v13, %v19973_v24  ;;  %v18189_v51 = vadd.f32 %v18000_v35, %v18008_v40  ;;  %v18193_v60 = vadd.f32 %v18000_v35, %v18012_v56  ;;  %v18197_v61 = vadd.f32 %v18000_v35, %v18016_v22  ;;  %v19979_v24 = vld [vmem:[#allocation134_spill] sm:$0xff] }
 0x938   : > { %v18201_v12 = vadd.f32 %v18000_v35, %v18020_v16  ;;  %v18205_v37 = vadd.f32 %v18000_v35, %v18024_v36  ;;  %v18209_v13 = vadd.f32 %v18000_v35, %v18028_v2  ;;  %v18213_v40 = vadd.f32 %v18000_v35, %v18034_v3 }
 0x939   : > { %v18217_v56 = vadd.f32 %v18000_v35, %v18038_v11  ;;  %v18221_v22 = vadd.f32 %v18000_v35, %v18042_v6  ;;  %v18225_v16 = vadd.f32 %v18000_v35, %v18046_v34  ;;  %v18229_v36 = vadd.f32 %v18000_v35, %v18050_v5 }
 0x93a   : > { %v18233_v2 = vadd.f32 %v18000_v35, %v18054_v15  ;;  %v18237_v3 = vadd.f32 %v18000_v35, %v18058_v21  ;;  %v18241_v11 = vadd.f32 %v18000_v35, %v18062_v25  ;;  %v18245_v6 = vadd.f32 %v18000_v35, %v18066_v33  ;;  %v19977_v21 = vld [vmem:[#allocation135_spill] sm:$0xff] }
 0x93b   : > { %v18249_v34 = vadd.f32 %v18000_v35, %v18070_v47  ;;  %v18253_v5 = vadd.f32 %v18000_v35, %v18074_v48  ;;  %v18257_v15 = vadd.f32 %v18000_v35, %v18078_v32  ;;  %v18261_v25 = vadd.f32 %v18000_v35, %v19977_v21 }
 0x93c   : > { %v18265_v33 = vadd.f32 %v18000_v35, %v19979_v24  ;;  %v18269_v47 = vadd.f32 %v18000_v35, %v19981_v0  ;;  %v18291_v0 = vadd.f32 %v18000_v35, %v7964_v28  ;;  %v18312_v28 = vadd.f32 %v18000_v35, %v7971_v31 }
 0x93d   : > { %19974 = vst [vmem:[#allocation138_spill] sm:$0xff] %v18249_v34  ;;  %19975 = vst [vmem:[#allocation101_spill] sm:$0xff] %v18253_v5  ;;  %v19982_v34 = vld [vmem:[#allocation35_spill] sm:$0xff]  ;;  %v18333_v31 = vadd.f32 %v18000_v35, %v7978_v19  ;;  %v18354_v19 = vadd.f32 %v18000_v35, %v7985_v46  ;;  %v18375_v46 = vadd.f32 %v18000_v35, %v7992_v49 }
 0x93e   : > { %19976 = vst [vmem:[#allocation103_spill] sm:$0xff] %v18257_v15  ;;  %19978 = vst [vmem:[#allocation52_spill] sm:$0xff] %v18261_v25  ;;  %v18273_v48 = vadd.f32 %v18000_v35, %v19982_v34  ;;  %v19983_v5 = vld [vmem:[#allocation47_spill] sm:$0xff]  ;;  %v19985_v15 = vld [vmem:[#allocation109_spill] sm:$0xff]  ;;  %v18294_v34 = vadd.f32 %v18000_v35, %v7965_v45  ;;  %v18315_v45 = vadd.f32 %v18000_v35, %v7972_v17 }
 0x93f   : > { %19980 = vst [vmem:[#allocation108_spill] sm:$0xff] %v18265_v33  ;;  %v18277_v32 = vadd.f32 %v18000_v35, %v19983_v5  ;;  %v18281_v21 = vadd.f32 %v18000_v35, %v19985_v15  ;;  %v19986_v25 = vld [vmem:[#allocation139_spill] sm:$0xff]  ;;  %v18288_v33 = vadd.f32 %v18000_v35, %v7963_v4  ;;  %v18297_v5 = vadd.f32 %v18000_v35, %v7966_v7 }
 0x940   : > { %v18285_v24 = vadd.f32 %v18000_v35, %v19986_v25  ;;  %v18303_v15 = vadd.f32 %v18000_v35, %v7968_v38  ;;  %v18306_v25 = vadd.f32 %v18000_v35, %v7969_v27  ;;  %v18309_v4 = vadd.f32 %v18000_v35, %v7970_v8  ;;  %19987 = vst [vmem:[#allocation141_spill] sm:$0xff] %v18375_v46 }
 0x941   : > { %19984 = vst [vmem:[#allocation142_spill] sm:$0xff] %v18277_v32  ;;  %v18300_v32 = vadd.f32 %v18000_v35, %v7967_v57  ;;  %v18318_v7 = vadd.f32 %v18000_v35, %v7973_v63  ;;  %v18321_v57 = vadd.f32 %v18000_v35, %v7974_v41  ;;  %v18324_v38 = vadd.f32 %v18000_v35, %v7975_v53 }
 0x942   : > { %v18327_v27 = vadd.f32 %v18000_v35, %v7976_v10  ;;  %v18330_v8 = vadd.f32 %v18000_v35, %v7977_v50  ;;  %v18336_v17 = vadd.f32 %v18000_v35, %v7979_v62  ;;  %v18339_v63 = vadd.f32 %v18000_v35, %v7980_v58 }
 0x943   : > { %v18342_v41 = vadd.f32 %v18000_v35, %v7981_v20  ;;  %v18345_v53 = vadd.f32 %v18000_v35, %v7982_v44  ;;  %v18348_v10 = vadd.f32 %v18000_v35, %v7983_v30  ;;  %v18351_v50 = vadd.f32 %v18000_v35, %v7984_v29 }
 0x944   : > { %v18357_v62 = vadd.f32 %v18000_v35, %v7986_v54  ;;  %v18360_v58 = vadd.f32 %v18000_v35, %v7987_v52  ;;  %v18363_v20 = vadd.f32 %v18000_v35, %v7988_v18  ;;  %v18366_v44 = vadd.f32 %v18000_v35, %v7989_v39 }
 0x945   : > { %v18369_v30 = vadd.f32 %v18000_v35, %v7990_v59  ;;  %v18372_v29 = vadd.f32 %v18000_v35, %v7991_v14  ;;  %v18378_v54 = vadd.f32 %v18000_v35, %v7993_v43  ;;  %v18381_v52 = vadd.f32 %v18000_v35, %v7994_v23 }
 0x946   : > { %v18384_v18 = vadd.f32 %v18000_v35, %v7995_v1  ;;  %v18387_v39 = vadd.f32 %v18000_v35, %v7996_v9  ;;  %v18390_v59 = vadd.f32 %v18000_v35, %v7997_v26  ;;  %v18393_v14 = vadd.f32 %v18000_v35, %v7998_v55 }
 0x947   : > { %19988 = vst [vmem:[#allocation105_spill] sm:$0xff] %v18378_v54  ;;  %19989 = vst [vmem:[#allocation44_spill] sm:$0xff] %v18381_v52  ;;  %v18396_v49 = vadd.f32 %v18000_v35, %v7999_v42  ;;  %v8072_v43 = vmax.f32 %v18189_v51, 0.0  ;;  %v8073_v23 = vmax.f32 %v18193_v60, 0.0  ;;  %v8074_v52 = vmax.f32 %v18197_v61, 0.0  ;;  %v19999_v54 = vld [vmem:[#allocation108_spill] sm:$0xff] }
 0x948   : > { %19990 = vst [vmem:[#allocation53_spill] sm:$0xff] %v18384_v18  ;;  %19991 = vst [vmem:[#allocation55_spill] sm:$0xff] %v18387_v39  ;;  %v8075_v1 = vmax.f32 %v18201_v12, 0.0  ;;  %v8076_v9 = vmax.f32 %v18205_v37, 0.0  ;;  %v8077_v39 = vmax.f32 %v18209_v13, 0.0  ;;  %v8078_v26 = vmax.f32 %v18213_v40, 0.0 }
 0x949   : > { %19992 = vst [vmem:[#allocation146_spill] sm:$0xff] %v18390_v59  ;;  %19993 = vst [vmem:[#allocation145_spill] sm:$0xff] %v18393_v14  ;;  %v8079_v55 = vmax.f32 %v18217_v56, 0.0  ;;  %v8080_v14 = vmax.f32 %v18221_v22, 0.0  ;;  %v8081_v35 = vmax.f32 %v18225_v16, 0.0  ;;  %v8082_v42 = vmax.f32 %v18229_v36, 0.0 }
 0x94a   : > { %19994 = vst [vmem:[#allocation41_spill] sm:$0xff] %v18396_v49  ;;  %v8083_v51 = vmax.f32 %v18233_v2, 0.0  ;;  %v8084_v60 = vmax.f32 %v18237_v3, 0.0  ;;  %v8085_v61 = vmax.f32 %v18241_v11, 0.0  ;;  %v8086_v12 = vmax.f32 %v18245_v6, 0.0  ;;  %v19995_v37 = vld [vmem:[#allocation138_spill] sm:$0xff] }
 0x94b   : > { %v8087_v13 = vmax.f32 %v19995_v37, 0.0  ;;  %v19996_v49 = vld [vmem:[#allocation101_spill] sm:$0xff]  ;;  %v19997_v59 = vld [vmem:[#allocation103_spill] sm:$0xff]  ;;  %v19998_v18 = vld [vmem:[#allocation52_spill] sm:$0xff]  ;;  %v8091_v16 = vmax.f32 %v19999_v54, 0.0  ;;  %v8092_v36 = vmax.f32 %v18269_v47, 0.0 }
 0x94c   : > { %v8088_v40 = vmax.f32 %v19996_v49, 0.0  ;;  %v8089_v56 = vmax.f32 %v19997_v59, 0.0  ;;  %v8090_v22 = vmax.f32 %v19998_v18, 0.0  ;;  %v8093_v2 = vmax.f32 %v18273_v48, 0.0  ;;  %v20000_v46 = vld [vmem:[#allocation142_spill] sm:$0xff] }
 0x94d   : > { %v8094_v3 = vmax.f32 %v20000_v46, 0.0  ;;  %v8095_v11 = vmax.f32 %v18281_v21, 0.0  ;;  %v8096_v6 = vmax.f32 %v18285_v24, 0.0  ;;  %v8097_v37 = vmax.f32 %v18288_v33, 0.0 }
 0x94e   : > { %v8098_v49 = vmax.f32 %v18291_v0, 0.0  ;;  %v8099_v59 = vmax.f32 %v18294_v34, 0.0  ;;  %v8100_v18 = vmax.f32 %v18297_v5, 0.0  ;;  %v8101_v54 = vmax.f32 %v18300_v32, 0.0 }
 0x94f   : > { %v8102_v47 = vmax.f32 %v18303_v15, 0.0  ;;  %v8103_v48 = vmax.f32 %v18306_v25, 0.0  ;;  %v8104_v46 = vmax.f32 %v18309_v4, 0.0  ;;  %v8105_v21 = vmax.f32 %v18312_v28, 0.0 }
 0x950   : > { %v8106_v24 = vmax.f32 %v18315_v45, 0.0  ;;  %v8107_v33 = vmax.f32 %v18318_v7, 0.0  ;;  %v8108_v0 = vmax.f32 %v18321_v57, 0.0  ;;  %v8109_v34 = vmax.f32 %v18324_v38, 0.0 }
 0x951   : > { %v8110_v5 = vmax.f32 %v18327_v27, 0.0  ;;  %v8111_v32 = vmax.f32 %v18330_v8, 0.0  ;;  %v8112_v15 = vmax.f32 %v18333_v31, 0.0  ;;  %v8113_v25 = vmax.f32 %v18336_v17, 0.0 }
 0x952   : > { %v8114_v4 = vmax.f32 %v18339_v63, 0.0  ;;  %v8115_v28 = vmax.f32 %v18342_v41, 0.0  ;;  %v8116_v45 = vmax.f32 %v18345_v53, 0.0  ;;  %v8117_v7 = vmax.f32 %v18348_v10, 0.0  ;;  %v20001_v53 = vld [vmem:[#allocation141_spill] sm:$0xff] }
 0x953   : > { %v8118_v57 = vmax.f32 %v18351_v50, 0.0  ;;  %v8119_v38 = vmax.f32 %v18354_v19, 0.0  ;;  %v8120_v27 = vmax.f32 %v18357_v62, 0.0  ;;  %v8121_v8 = vmax.f32 %v18360_v58, 0.0  ;;  %v20002_v50 = vld [vmem:[#allocation105_spill] sm:$0xff]  ;;  %v20003_v62 = vld [vmem:[#allocation44_spill] sm:$0xff] }
 0x954   : > { %v8122_v31 = vmax.f32 %v18363_v20, 0.0  ;;  %v8123_v17 = vmax.f32 %v18366_v44, 0.0  ;;  %v8124_v63 = vmax.f32 %v18369_v30, 0.0  ;;  %v8125_v41 = vmax.f32 %v18372_v29, 0.0  ;;  %v20004_v20 = vld [vmem:[#allocation53_spill] sm:$0xff]  ;;  %v20005_v30 = vld [vmem:[#allocation55_spill] sm:$0xff] }
 0x955   : > { %v8126_v10 = vmax.f32 %v20001_v53, 0.0  ;;  %v8127_v19 = vmax.f32 %v20002_v50, 0.0  ;;  %v8128_v58 = vmax.f32 %v20003_v62, 0.0  ;;  %v8129_v44 = vmax.f32 %v20004_v20, 0.0  ;;  %v20006_v53 = vld [vmem:[#allocation146_spill] sm:$0xff]  ;;  %v20007_v62 = vld [vmem:[#allocation145_spill] sm:$0xff] }
 0x956   : > { %v8130_v29 = vmax.f32 %v20005_v30, 0.0  ;;  %v8131_v50 = vmax.f32 %v20006_v53, 0.0  ;;  %v8132_v20 = vmax.f32 %v20007_v62, 0.0  ;;  %v20008_v30 = vld [vmem:[#allocation41_spill] sm:$0xff]  ;;  %v9166_v62 = vpack.c.bf16 %v8073_v23, %v8072_v43 }
 0x957   : > { %v8133_v53 = vmax.f32 %v20008_v30, 0.0  ;;  %v9171_v30 = vpack.c.bf16 %v8075_v1, %v8074_v52  ;;  %v9176_v23 = vpack.c.bf16 %v8077_v39, %v8076_v9  ;;  %v9181_v43 = vpack.c.bf16 %v8079_v55, %v8078_v26 }
 0x958   : > { %v9186_v1 = vpack.c.bf16 %v8081_v35, %v8080_v14  ;;  %v9191_v52 = vpack.c.bf16 %v8083_v51, %v8082_v42  ;;  %v9196_v9 = vpack.c.bf16 %v8085_v61, %v8084_v60  ;;  %9167 = vst [vmem:[%s18110_s24] sm:$0xff] %v9166_v62   ;;  %v9201_v39 = vpack.c.bf16 %v8087_v13, %v8086_v12 }
 0x959   : > { %9323 = vst [vmem:[%s18110_s24 + $0x8] sm:$0xff] %v9171_v30   ;;  %9324 = vst [vmem:[%s18110_s24 + $0x10] sm:$0xff] %v9176_v23   ;;  %v9206_v26 = vpack.c.bf16 %v8089_v56, %v8088_v40  ;;  %v9211_v55 = vpack.c.bf16 %v8091_v16, %v8090_v22  ;;  %v9216_v14 = vpack.c.bf16 %v8093_v2, %v8092_v36 }
 0x95a   : > { %9325 = vst [vmem:[%s18110_s24 + $0x18] sm:$0xff] %v9181_v43   ;;  %9326 = vst [vmem:[%s18110_s24 + $0x20] sm:$0xff] %v9186_v1   ;;  %v9221_v35 = vpack.c.bf16 %v8095_v11, %v8094_v3  ;;  %v9226_v42 = vpack.c.bf16 %v8097_v37, %v8096_v6  ;;  %v9231_v51 = vpack.c.bf16 %v8099_v59, %v8098_v49 }
 0x95b   : > { %9327 = vst [vmem:[%s18110_s24 + $0x28] sm:$0xff] %v9191_v52   ;;  %9328 = vst [vmem:[%s18110_s24 + $0x30] sm:$0xff] %v9196_v9   ;;  %v9236_v60 = vpack.c.bf16 %v8101_v54, %v8100_v18  ;;  %v9241_v61 = vpack.c.bf16 %v8103_v48, %v8102_v47  ;;  %v9246_v12 = vpack.c.bf16 %v8105_v21, %v8104_v46 }
 0x95c   : > { %9329 = vst [vmem:[%s18110_s24 + $0x38] sm:$0xff] %v9201_v39   ;;  %9330 = vst [vmem:[%s18110_s24 + $0x40] sm:$0xff] %v9206_v26   ;;  %v9251_v13 = vpack.c.bf16 %v8107_v33, %v8106_v24  ;;  %v9256_v40 = vpack.c.bf16 %v8109_v34, %v8108_v0  ;;  %v9261_v56 = vpack.c.bf16 %v8111_v32, %v8110_v5 }
 0x95d   : > { %9331 = vst [vmem:[%s18110_s24 + $0x48] sm:$0xff] %v9211_v55   ;;  %9332 = vst [vmem:[%s18110_s24 + $0x50] sm:$0xff] %v9216_v14   ;;  %v9266_v22 = vpack.c.bf16 %v8113_v25, %v8112_v15  ;;  %v9271_v16 = vpack.c.bf16 %v8115_v28, %v8114_v4  ;;  %v9276_v36 = vpack.c.bf16 %v8117_v7, %v8116_v45 }
 0x95e   : > { %9333 = vst [vmem:[%s18110_s24 + $0x58] sm:$0xff] %v9221_v35   ;;  %9334 = vst [vmem:[%s18110_s24 + $0x60] sm:$0xff] %v9226_v42   ;;  %v9281_v2 = vpack.c.bf16 %v8119_v38, %v8118_v57  ;;  %v9286_v3 = vpack.c.bf16 %v8121_v8, %v8120_v27  ;;  %v9291_v11 = vpack.c.bf16 %v8123_v17, %v8122_v31 }
 0x95f   : > { %9335 = vst [vmem:[%s18110_s24 + $0x68] sm:$0xff] %v9231_v51   ;;  %9336 = vst [vmem:[%s18110_s24 + $0x70] sm:$0xff] %v9236_v60   ;;  %v9296_v6 = vpack.c.bf16 %v8125_v41, %v8124_v63  ;;  %v9301_v37 = vpack.c.bf16 %v8127_v19, %v8126_v10  ;;  %v9306_v49 = vpack.c.bf16 %v8129_v44, %v8128_v58 }
 0x960   : > { %9337 = vst [vmem:[%s18110_s24 + $0x78] sm:$0xff] %v9241_v61   ;;  %9338 = vst [vmem:[%s18110_s24 + $0x80] sm:$0xff] %v9246_v12   ;;  %v9311_v59 = vpack.c.bf16 %v8131_v50, %v8130_v29  ;;  %v9316_v18 = vpack.c.bf16 %v8133_v53, %v8132_v20 }
 0x961   : > { %9339 = vst [vmem:[%s18110_s24 + $0x88] sm:$0xff] %v9251_v13   ;;  %9340 = vst [vmem:[%s18110_s24 + $0x90] sm:$0xff] %v9256_v40  }
 0x962   : > { %9341 = vst [vmem:[%s18110_s24 + $0x98] sm:$0xff] %v9261_v56   ;;  %9342 = vst [vmem:[%s18110_s24 + $0xa0] sm:$0xff] %v9266_v22  }
 0x963   : > { %9343 = vst [vmem:[%s18110_s24 + $0xa8] sm:$0xff] %v9271_v16   ;;  %9344 = vst [vmem:[%s18110_s24 + $0xb0] sm:$0xff] %v9276_v36  }
 0x964   : > { %9345 = vst [vmem:[%s18110_s24 + $0xb8] sm:$0xff] %v9281_v2   ;;  %9346 = vst [vmem:[%s18110_s24 + $0xc0] sm:$0xff] %v9286_v3  }
 0x965   : > { %9347 = vst [vmem:[%s18110_s24 + $0xc8] sm:$0xff] %v9291_v11   ;;  %9348 = vst [vmem:[%s18110_s24 + $0xd0] sm:$0xff] %v9296_v6  }
 0x966   : > { %9349 = vst [vmem:[%s18110_s24 + $0xd8] sm:$0xff] %v9301_v37   ;;  %9350 = vst [vmem:[%s18110_s24 + $0xe0] sm:$0xff] %v9306_v49  }
 0x967   : > { %9351 = vst [vmem:[%s18110_s24 + $0xe8] sm:$0xff] %v9311_v59   ;;  %9352 = vst [vmem:[%s18110_s24 + $0xf0] sm:$0xff] %v9316_v18  }
 0x968   : > { %13619 = shalt.err (!%p13616_p13)
}
 0x969   : > { %s13620_s29 = scalar_lea.hbm %s18484_s13, 4096  ;;  %s13624_s11 = scalar_lea.hbm %s18547_s5, 8192 }
 0x96a   : > { %p13621_p9 = scmp.ne.s32.totalorder %s18484_s13, %s13620_s29  ;;  %p13625_p4 = scmp.lt.u32.totalorder %s18484_s13, %s18547_s5 }
 0x96b   : > { %p13626_p8 = scmp.lt.u32.totalorder %s13624_s11, %s13620_s29  ;;  %p13628_p3 = scmp.lt.u32.totalorder %s13620_s29, %s18484_s13 }
 0x96c   : > { %p13622_p0 = pnand %p13621_p9, %p13887_p10 }
 0x96d   : > { %p13627_p6 = por %p13626_p8, %p13625_p4 }
 0x96e   : > { %p13623_p11 = pneg %p13622_p0 }
 0x96f   : > { %p13629_p5 = por %p13628_p3, %p13627_p6 }
 0x971   : > { %p13630_p7 = pnand %p13629_p5, %p13623_p11 }
 0x973   : > { %13633 = shalt.err (!%p13630_p7)
}
 0x974   : > { %s13692_s26 = smov 64   ;;  %s13693_s22 = smov 4  }
 0x975   : > { %12428 = dma.vmem_to_hbm [thread:$0]  (%p13887_p10), %s18486_s6, 4096, %s18484_s13, %s8457_s15, %s13692_s26, %s13692_s26, %s13693_s22  }
 0x976 PF: > { %s8486_s16 = sand.u32 1, %s13668_s18   ;;  %p20009_p12 = scmp.ne.s32.totalorder %s18920_s25, 0 }
 0x977   : > { %p20010_p2 = scmp.ge.s32.totalorder %s13680_s21, 2  ;;  %s8487_s17 = scalar_lea.sflag [#allocation4], %s8486_s16 }
 0x979   : > { %p12448_p1 = pnand %p20010_p2, %p20009_p12 }
 0x97b   : > { %13663 = dma.done.wait (!%p12448_p1), %s8487_s17, 4096  }
 0x97c   : > { %13665 = vsyncadd (!%p12448_p1), %s8487_s17, 4294963200  ;;  %p20_p13 = scmp.ge.s32.totalorder %s13877_s14, 4   ;;  %s20011_s18 = smov %s13672_s19 }
 0x97d   : > { %s20012_s19 = smov %s13676_s20  ;;  %s20013_s20 = smov %s13893_s7 }
 0x97e   : > { %s20014_s21 = smov %s13877_s14  ;;  %22 = sbr.rel (!%p20_p13) target bundleno = 7 (0x7), region = 102 }
 0x985   :  { %8492 = vsyncpa [#allocation3], 1 }
 0x986   :  { %8494 = vsyncpa [#allocation3 + $0x1], 1 }
 0x987   :  { %8495 = vsyncpa [#allocation6], 1 }
 0x988   :  { %8496 = vsyncpa [#allocation9], 1 }
 0x989   :  { %8497 = vsyncpa [#allocation4], 1 }
 0x98a   :  { %8499 = vsyncpa [#allocation4 + $0x1], 1 }

</bundles_post_ra>
